<compile_context>
chip_gen: v6e
topology: v6e:2x2x1
jax: 0.10.0
libtpu: 0.0.40
codegen_flags: <defaults>
</compile_context>

<pallas_src>
import numpy as np
import jax
import jax.numpy as jnp
from jax import lax
from jax.experimental import pallas as pl
from jax.experimental.pallas import tpu as pltpu

# ----------------------------------------------------------------------------
# Configuration
# ----------------------------------------------------------------------------
SEQ_LEN = 24
SEQ_CH = 4             # seq_encoding_channels
PI_CH = 3              # pi_encoding_channels
CONV_SEQ = (32, 3, 1)  # (out_channels, kernel_size, stride)
CONV_PI = (16, 3, 1)
LSTM_HIDDEN = 32       # bidirectional
SEQ_DENSE = 64
PI_DENSE = 64
OUT_DENSE = (32, 3)
BATCH = 2
GATE_BLOCK = 128       # lane-padded width of one (gate, both-directions) block


def _sigmoid_eup(x):
    # sigmoid(x) == 0.5*(tanh(x/2)+1); tanh lowers to the EUP slot.
    return 0.5 * (jnp.tanh(0.5 * x) + 1.0)


# ----------------------------------------------------------------------------
# Fused Pallas kernel: whole forward pass, everything resident in VMEM
# ----------------------------------------------------------------------------
def _fused_forward_kernel(xn_ref, xp_ref,
                          m_all_ref, b_all_ref, w_x_ref, w_h_ref, b_step_ref,
                          m_pi_ref, b_pi_ref, w_pid_ref, b_pid_ref,
                          w_sd_ref, b_sd_ref,
                          w_o0s_ref, w_o0p_ref, b_o0_ref,
                          w_o1_ref, b_o1_ref,
                          o_ref, gin_ref):
    """CrispAI_pe forward for one batch.

    xn_ref   : (B, L*C_seq)        flattened X_nucl
    xp_ref   : (B, L*C_pi)         flattened X_pi
    m_all_ref: (L*C_seq, T*G)      one lane-dense conv matrix; per-step block s
                                   holds [conv(t=s) | conv(t=T-1-s) | 0 pad]
    w_x_ref  : (G, 4G)  bf16       input->gates, gate-major, [fwd|bwd|pad] lanes
    w_h_ref  : (G, 4G)  bf16       hidden->gates, same layout
    gin_ref  : (B, T*4G) f32       scratch: hoisted per-step input projections
    """
    f32 = jnp.float32
    bf16 = jnp.bfloat16
    B = xn_ref.shape[0]
    G = w_h_ref.shape[0]            # 128: padded [h_fwd | h_bwd | 0] width
    G4 = w_h_ref.shape[1]           # 4*G: four gate blocks
    T = m_all_ref.shape[1] // G     # LSTM time steps

    xn = xn_ref[...].astype(bf16)   # (B, L*C_seq)
    xp = xp_ref[...].astype(bf16)   # (B, L*C_pi)

    # ---------------- pi branch: conv-as-matmul + ReLU, dense + ReLU --------
    pi = jnp.dot(xp, m_pi_ref[...], preferred_element_type=f32) + b_pi_ref[...]
    pi = jnp.maximum(pi, 0.0)                                     # (B, Cpi*Lout)
    pi = (jnp.dot(pi.astype(bf16), w_pid_ref[...], preferred_element_type=f32)
          + b_pid_ref[...])
    pi = jnp.maximum(pi, 0.0)                                     # (B, PI_DENSE)

    # ----- sequence conv: ONE matmul covering all T steps & both directions --
    conv = jnp.dot(xn, m_all_ref[...], preferred_element_type=f32) + b_all_ref[...]
    conv = jnp.maximum(conv, 0.0).astype(bf16)                    # (B, T*G)

    # ----- hoisted LSTM input projections (off the serial recurrence chain) --
    w_x = w_x_ref[...]
    b_step = b_step_ref[...]
    for s in range(T):
        xt = conv[:, s * G:(s + 1) * G]                           # aligned 128 lanes
        gin_ref[:, s * G4:(s + 1) * G4] = (
            jnp.dot(xt, w_x, preferred_element_type=f32) + b_step)

    # ----- BiLSTM recurrence: one tiny matmul per step, fwd+bwd interleaved --
    w_h = w_h_ref[...]
    h = jnp.zeros((B, G), f32)      # [h_fwd | h_bwd | 0 pad]
    c = jnp.zeros((B, G), f32)
    for s in range(T):
        gates = gin_ref[:, s * G4:(s + 1) * G4] + jnp.dot(
            h.astype(bf16), w_h, preferred_element_type=f32)      # (B, 4G)
        i_g = _sigmoid_eup(gates[:, 0 * G:1 * G])                 # aligned vregs
        f_g = _sigmoid_eup(gates[:, 1 * G:2 * G])
        g_g = jnp.tanh(gates[:, 2 * G:3 * G])
        o_g = _sigmoid_eup(gates[:, 3 * G:4 * G])
        c = f_g * c + i_g * g_g
        h = o_g * jnp.tanh(c)
    # h == [h_fwd_final | h_bwd_final | 0] == torch hn.permute(1,0,2).view(B,-1)
    # (pad lanes stay exactly zero: gates there are 0, so c,h remain 0).

    # ---------------- dense heads -------------------------------------------
    hn = (jnp.dot(h.astype(bf16), w_sd_ref[...], preferred_element_type=f32)
          + b_sd_ref[...])
    hn = jnp.maximum(hn, 0.0)                                     # (B, SEQ_DENSE)

    # output_dense[0] on concat([hn, pi]) realised as a split matmul (no concat)
    y = (jnp.dot(hn.astype(bf16), w_o0s_ref[...], preferred_element_type=f32)
         + jnp.dot(pi.astype(bf16), w_o0p_ref[...], preferred_element_type=f32)
         + b_o0_ref[...])
    y = jnp.maximum(y, 0.0)                                       # (B, 32)
    y = (jnp.dot(y.astype(bf16), w_o1_ref[...], preferred_element_type=f32)
         + b_o1_ref[...])                                         # (B, 3)

    # head: exp() on columns 0 (mu) and 1 (theta); column 2 (pi logits) raw.
    col = lax.broadcasted_iota(jnp.int32, y.shape, 1)
    o_ref[...] = jnp.where(col < 2, jnp.exp(y), y)


@jax.jit
def crispai_pe_forward(params, X_nucl, X_pi):
    """params: output of prepare_params (arrays only, no Python scalars).
    Works for any batch size; B >= 8 per call is recommended to fill sublanes."""
    B = X_nucl.shape[0]
    xn = X_nucl.reshape(B, -1).astype(jnp.float32)   # (B, L*C_seq) row-major
    xp = X_pi.reshape(B, -1).astype(jnp.float32)     # (B, L*C_pi)
    G = params["w_h"].shape[0]
    G4 = params["w_h"].shape[1]
    T = params["m_all"].shape[1] // G
    out_dim = params["w_out1"].shape[1]
    return pl.pallas_call(
        _fused_forward_kernel,
        out_shape=jax.ShapeDtypeStruct((B, out_dim), jnp.float32),
        scratch_shapes=[pltpu.VMEM((B, T * G4), jnp.float32)],
    )(xn, xp,
      params["m_all"], params["b_all"], params["w_x"], params["w_h"],
      params["b_step"],
      params["m_pi"], params["b_pi"], params["w_pi_d"], params["b_pi_d"],
      params["w_seq_d"], params["b_seq_d"],
      params["w_out0_seq"], params["w_out0_pi"], params["b_out0"],
      params["w_out1"], params["b_out1"])


# ----------------------------------------------------------------------------
# One-time host-side parameter preparation (outside jit)
# ----------------------------------------------------------------------------
def _conv1d_as_matmul(w, b, length):
    """Dense matrix for Conv1d(stride=1, valid) acting on the flattened
    (length, C_in) input.  Output column j corresponds to flat index
    j = co*L_out + l of the contiguous torch (C_out, L_out) buffer."""
    w = np.asarray(w, np.float32)
    b = np.asarray(b, np.float32)
    c_out, c_in, k = w.shape
    l_out = length - k + 1
    mat = np.zeros((length * c_in, c_out * l_out), np.float32)
    bias = np.zeros((c_out * l_out,), np.float32)
    for co in range(c_out):
        for l in range(l_out):
            j = co * l_out + l
            bias[j] = b[co]
            for kk in range(k):
                for ci in range(c_in):
                    mat[(l + kk) * c_in + ci, j] = w[co, ci, kk]
    return mat, bias


def prepare_params(raw, *, seq_len, gate_block=GATE_BLOCK):
    """Lane-dense conv matmul (torch .view() column order baked in), lane-padded
    gate/direction-blocked LSTM weights, pre-transposed bf16 dense weights and
    fused f32 biases.  Everything returned is a plain jnp array."""
    f32 = jnp.float32
    bf16 = jnp.bfloat16
    H = raw["lstm_whh_f"].shape[1]
    G = gate_block
    assert 2 * H <= G

    # -- sequence conv --> ONE (L*C_in, T*G) matrix; per-step [fwd | bwd | pad]
    csw = np.asarray(raw["conv_seq_w"], np.float32)
    c_out, c_in, k = csw.shape
    assert 2 * c_out <= G
    l_out = seq_len - k + 1
    T = l_out                                  # torch .view(B,-1,C_out) steps
    m_seq, b_seq = _conv1d_as_matmul(csw, raw["conv_seq_b"], seq_len)
    # flat buffer index j reinterpreted by the view as (t, c) = (j//C_out, j%C_out)
    m_view = m_seq.reshape(seq_len * c_in, T, c_out)      # [:, t, c] of the view
    b_view = b_seq.reshape(T, c_out)

    m_all = np.zeros((seq_len * c_in, T * G), np.float32)
    b_all = np.zeros((1, T * G), np.float32)
    for s in range(T):
        # step s feeds the fwd cell with timestep s, the bwd cell with T-1-s
        m_all[:, s * G:s * G + c_out] = m_view[:, s, :]
        m_all[:, s * G + c_out:s * G + 2 * c_out] = m_view[:, T - 1 - s, :]
        b_all[0, s * G:s * G + c_out] = b_view[s]
        b_all[0, s * G + c_out:s * G + 2 * c_out] = b_view[T - 1 - s]

    # -- LSTM weights --> (G, 4G) block matrices, gate-major, [fwd|bwd|pad] lanes
    def blocked_padded(wf, wb):
        wf = np.asarray(wf, np.float32)
        wb = np.asarray(wb, np.float32)
        nin = wf.shape[1]
        out = np.zeros((G, 4 * G), np.float32)
        for g in range(4):                                # torch order i, f, g, o
            out[0:nin, g * G:g * G + H] = wf[g * H:(g + 1) * H, :].T
            out[nin:2 * nin, g * G + H:g * G + 2 * H] = wb[g * H:(g + 1) * H, :].T
        return out

    w_x = blocked_padded(raw["lstm_wih_f"], raw["lstm_wih_b"])    # (G, 4G)
    w_h = blocked_padded(raw["lstm_whh_f"], raw["lstm_whh_b"])    # (G, 4G)
    bf_ = np.asarray(raw["lstm_bih_f"], np.float32) + np.asarray(raw["lstm_bhh_f"], np.float32)
    bb_ = np.asarray(raw["lstm_bih_b"], np.float32) + np.asarray(raw["lstm_bhh_b"], np.float32)
    b_step = np.zeros((1, 4 * G), np.float32)
    for g in range(4):
        b_step[0, g * G:g * G + H] = bf_[g * H:(g + 1) * H]
        b_step[0, g * G + H:g * G + 2 * H] = bb_[g * H:(g + 1) * H]

    # -- pi conv as one matmul (column order == torch .view(B,-1) flatten) ----
    m_pi, b_pi = _conv1d_as_matmul(raw["conv_pi_w"], raw["conv_pi_b"], seq_len)

    # -- dense layers: pre-transpose to (in, out); pad seq_dense rows to G so
    #    the final h (with its pad lanes) feeds it directly; split out0 to
    #    avoid an in-kernel lane concat of [hn | pi].
    w_sd_t = np.asarray(raw["seq_dense_w"], np.float32).T        # (2H, SEQ_DENSE)
    w_sd = np.zeros((G, w_sd_t.shape[1]), np.float32)
    w_sd[:2 * H, :] = w_sd_t
    w_pd = np.asarray(raw["pi_dense_w"], np.float32).T           # (Cpi*Lout, PI_DENSE)
    w_o0 = np.asarray(raw["out0_w"], np.float32)                 # (32, SEQ_DENSE+PI_DENSE)
    seq_f = w_sd_t.shape[1]
    w_o0_seq = w_o0[:, :seq_f].T
    w_o0_pi = w_o0[:, seq_f:].T
    w_o1 = np.asarray(raw["out1_w"], np.float32).T               # (32, 3)

    def row(v):
        return np.asarray(v, np.float32).reshape(1, -1)

    return dict(
        m_all=jnp.asarray(m_all, bf16), b_all=jnp.asarray(b_all, f32),
        w_x=jnp.asarray(w_x, bf16), w_h=jnp.asarray(w_h, bf16),
        b_step=jnp.asarray(b_step, f32),
        m_pi=jnp.asarray(m_pi, bf16), b_pi=jnp.asarray(row(b_pi), f32),
        w_pi_d=jnp.asarray(w_pd, bf16), b_pi_d=jnp.asarray(row(raw["pi_dense_b"]), f32),
        w_seq_d=jnp.asarray(w_sd, bf16), b_seq_d=jnp.asarray(row(raw["seq_dense_b"]), f32),
        w_out0_seq=jnp.asarray(w_o0_seq, bf16), w_out0_pi=jnp.asarray(w_o0_pi, bf16),
        b_out0=jnp.asarray(row(raw["out0_b"]), f32),
        w_out1=jnp.asarray(w_o1, bf16), b_out1=jnp.asarray(row(raw["out1_b"]), f32),
    )


# ----------------------------------------------------------------------------
# Deterministic torch-layout parameters + pure-JAX reference (for checking)
# ----------------------------------------------------------------------------
def make_params(key):
    keys = iter(jax.random.split(key, 32))

    def init(shape, scale=0.1):
        return (scale * jax.random.normal(next(keys), shape)).astype(jnp.float32)

    H = LSTM_HIDDEN
    cs_out, cs_k, _ = CONV_SEQ
    cp_out, cp_k, _ = CONV_PI
    pi_flat = cp_out * (SEQ_LEN - cp_k + 1)
    return {
        "conv_seq_w": init((cs_out, SEQ_CH, cs_k)), "conv_seq_b": init((cs_out,)),
        "conv_pi_w": init((cp_out, PI_CH, cp_k)), "conv_pi_b": init((cp_out,)),
        "lstm_wih_f": init((4 * H, cs_out)), "lstm_whh_f": init((4 * H, H)),
        "lstm_bih_f": init((4 * H,)), "lstm_bhh_f": init((4 * H,)),
        "lstm_wih_b": init((4 * H, cs_out)), "lstm_whh_b": init((4 * H, H)),
        "lstm_bih_b": init((4 * H,)), "lstm_bhh_b": init((4 * H,)),
        "seq_dense_w": init((SEQ_DENSE, 2 * H)), "seq_dense_b": init((SEQ_DENSE,)),
        "pi_dense_w": init((PI_DENSE, pi_flat)), "pi_dense_b": init((PI_DENSE,)),
        "out0_w": init((OUT_DENSE[0], SEQ_DENSE + PI_DENSE)), "out0_b": init((OUT_DENSE[0],)),
        "out1_w": init((OUT_DENSE[1], OUT_DENSE[0])), "out1_b": init((OUT_DENSE[1],)),
    }


def _conv1d_ref(x_blc, w, b):
    # torch Conv1d applied to x.permute(0,2,1); x_blc is (B, L, C_in)
    c_out, c_in, k = w.shape
    l_out = x_blc.shape[1] - k + 1
    patches = jnp.stack([x_blc[:, l:l + k, :] for l in range(l_out)], axis=1)
    return jnp.einsum("blkc,ock->bol", patches, w) + b[None, :, None]


def reference_forward(raw, X_nucl, X_pi):
    """Pure-JAX mirror of the PyTorch forward (eval mode)."""
    B = X_nucl.shape[0]
    H = raw["lstm_whh_f"].shape[1]

    def sig(x):
        return 1.0 / (1.0 + jnp.exp(-x))

    xs = jnp.maximum(_conv1d_ref(X_nucl, raw["conv_seq_w"], raw["conv_seq_b"]), 0.0)
    xs = xs.reshape(B, -1, xs.shape[1])            # torch .view(B, -1, C_out)

    def run_dir(wih, whh, bih, bhh, reverse):
        h = jnp.zeros((B, H), jnp.float32)
        c = jnp.zeros((B, H), jnp.float32)
        steps = range(xs.shape[1] - 1, -1, -1) if reverse else range(xs.shape[1])
        for t in steps:
            g = xs[:, t, :] @ wih.T + h @ whh.T + bih + bhh
            i = sig(g[:, 0:H]); f = sig(g[:, H:2 * H])
            gg = jnp.tanh(g[:, 2 * H:3 * H]); o = sig(g[:, 3 * H:4 * H])
            c = f * c + i * gg
            h = o * jnp.tanh(c)
        return h

    hf = run_dir(raw["lstm_wih_f"], raw["lstm_whh_f"], raw["lstm_bih_f"], raw["lstm_bhh_f"], False)
    hb = run_dir(raw["lstm_wih_b"], raw["lstm_whh_b"], raw["lstm_bih_b"], raw["lstm_bhh_b"], True)
    hn = jnp.concatenate([hf, hb], axis=1)
    hn = jnp.maximum(hn @ raw["seq_dense_w"].T + raw["seq_dense_b"], 0.0)

    xp = jnp.maximum(_conv1d_ref(X_pi, raw["conv_pi_w"], raw["conv_pi_b"]), 0.0)
    xp = xp.reshape(B, -1)
    xp = jnp.maximum(xp @ raw["pi_dense_w"].T + raw["pi_dense_b"], 0.0)

    cat = jnp.concatenate([hn, xp], axis=1)
    cat = jnp.maximum(cat @ raw["out0_w"].T + raw["out0_b"], 0.0)
    y = cat @ raw["out1_w"].T + raw["out1_b"]
    return jnp.concatenate([jnp.exp(y[:, 0:2]), y[:, 2:3]], axis=1)


# TODO(synk): draw_samples (ZINB sampling) is outside the forward pass and is
# not implemented; conv_batchnorm/conv_pool/dropout are disabled in this config.

if __name__ == "__main__":
    key = jax.random.PRNGKey(0)
    k_par, k_nucl, k_pi = jax.random.split(key, 3)

    raw = make_params(k_par)
    params = prepare_params(raw, seq_len=SEQ_LEN)

    X_nucl = jax.random.normal(k_nucl, (BATCH, SEQ_LEN, SEQ_CH), dtype=jnp.float32)
    X_pi = jax.random.normal(k_pi, (BATCH, SEQ_LEN, PI_CH), dtype=jnp.float32)

    out = crispai_pe_forward(params, X_nucl, X_pi)
    jax.block_until_ready(out)

    assert out.shape == (BATCH, OUT_DENSE[-1])
    assert bool(jnp.all(jnp.isfinite(out)))
    assert bool(jnp.all(out[:, 0] > 0)) and bool(jnp.all(out[:, 1] > 0))  # exp() cols

    with jax.default_matmul_precision("highest"):
        ref = reference_forward(raw, X_nucl, X_pi)
    err = float(jnp.max(jnp.abs(out - ref)))
    assert err < 5e-2, f"kernel/reference mismatch: max abs err = {err}"

    print("KERNEL_OK")
</pallas_src>

<mosaic_0001>
module attributes {stable_mosaic.version = 11 : i64} {
  func.func @_fused_forward_kernel(%arg0: memref<2x96xf32, #tpu.memory_space<vmem>>, %arg1: memref<2x72xf32, #tpu.memory_space<vmem>>, %arg2: memref<96x2816xbf16, #tpu.memory_space<vmem>>, %arg3: memref<1x2816xf32, #tpu.memory_space<vmem>>, %arg4: memref<128x512xbf16, #tpu.memory_space<vmem>>, %arg5: memref<128x512xbf16, #tpu.memory_space<vmem>>, %arg6: memref<1x512xf32, #tpu.memory_space<vmem>>, %arg7: memref<72x352xbf16, #tpu.memory_space<vmem>>, %arg8: memref<1x352xf32, #tpu.memory_space<vmem>>, %arg9: memref<352x64xbf16, #tpu.memory_space<vmem>>, %arg10: memref<1x64xf32, #tpu.memory_space<vmem>>, %arg11: memref<128x64xbf16, #tpu.memory_space<vmem>>, %arg12: memref<1x64xf32, #tpu.memory_space<vmem>>, %arg13: memref<64x32xbf16, #tpu.memory_space<vmem>>, %arg14: memref<64x32xbf16, #tpu.memory_space<vmem>>, %arg15: memref<1x32xf32, #tpu.memory_space<vmem>>, %arg16: memref<32x3xbf16, #tpu.memory_space<vmem>>, %arg17: memref<1x3xf32, #tpu.memory_space<vmem>>, %arg18: memref<2x3xf32, #tpu.memory_space<vmem>>, %arg19: memref<2x11264xf32, #tpu.memory_space<vmem>>) attributes {dimension_semantics = [], scalar_prefetch = 0 : i64, scratch_operands = 1 : i64, tpu.core_type = #tpu.core_type<tc>} {
    %c0 = arith.constant 0 : index
    %c0_0 = arith.constant 0 : index
    %0 = vector.load %arg0[%c0, %c0_0] : memref<2x96xf32, #tpu.memory_space<vmem>>, vector<2x96xf32>
    %1 = arith.truncf %0 : vector<2x96xf32> to vector<2x96xbf16>
    %c0_1 = arith.constant 0 : index
    %c0_2 = arith.constant 0 : index
    %2 = vector.load %arg1[%c0_1, %c0_2] : memref<2x72xf32, #tpu.memory_space<vmem>>, vector<2x72xf32>
    %3 = arith.truncf %2 : vector<2x72xf32> to vector<2x72xbf16>
    %c0_3 = arith.constant 0 : index
    %c0_4 = arith.constant 0 : index
    %4 = vector.load %arg7[%c0_3, %c0_4] : memref<72x352xbf16, #tpu.memory_space<vmem>>, vector<72x352xbf16>
    %cst = arith.constant dense<0.000000e+00> : vector<2x352xf32>
    %5 = tpu.matmul %3, %4, %cst {dimension_numbers = #tpu.dot_dimension_numbers<[1], [0], [0], [1], [0, 0, 1, 1], [], []>} : vector<2x72xbf16>, vector<72x352xbf16>, vector<2x352xf32> -> vector<2x352xf32>
    %c0_5 = arith.constant 0 : index
    %c0_6 = arith.constant 0 : index
    %6 = vector.load %arg8[%c0_5, %c0_6] : memref<1x352xf32, #tpu.memory_space<vmem>>, vector<1x352xf32>
    %7 = vector.broadcast %6 : vector<1x352xf32> to vector<2x352xf32>
    %8 = arith.addf %5, %7 : vector<2x352xf32>
    %cst_7 = arith.constant 0.000000e+00 : f32
    %9 = vector.broadcast %cst_7 : f32 to vector<2x352xf32>
    %10 = arith.maximumf %8, %9 : vector<2x352xf32>
    %11 = arith.truncf %10 : vector<2x352xf32> to vector<2x352xbf16>
    %c0_8 = arith.constant 0 : index
    %c0_9 = arith.constant 0 : index
    %12 = vector.load %arg9[%c0_8, %c0_9] : memref<352x64xbf16, #tpu.memory_space<vmem>>, vector<352x64xbf16>
    %cst_10 = arith.constant dense<0.000000e+00> : vector<2x64xf32>
    %13 = tpu.matmul %11, %12, %cst_10 {dimension_numbers = #tpu.dot_dimension_numbers<[1], [0], [0], [1], [0, 0, 1, 1], [], []>} : vector<2x352xbf16>, vector<352x64xbf16>, vector<2x64xf32> -> vector<2x64xf32>
    %c0_11 = arith.constant 0 : index
    %c0_12 = arith.constant 0 : index
    %14 = vector.load %arg10[%c0_11, %c0_12] : memref<1x64xf32, #tpu.memory_space<vmem>>, vector<1x64xf32>
    %15 = vector.broadcast %14 : vector<1x64xf32> to vector<2x64xf32>
    %16 = arith.addf %13, %15 : vector<2x64xf32>
    %cst_13 = arith.constant 0.000000e+00 : f32
    %17 = vector.broadcast %cst_13 : f32 to vector<2x64xf32>
    %18 = arith.maximumf %16, %17 : vector<2x64xf32>
    %c0_14 = arith.constant 0 : index
    %c0_15 = arith.constant 0 : index
    %19 = vector.load %arg2[%c0_14, %c0_15] : memref<96x2816xbf16, #tpu.memory_space<vmem>>, vector<96x2816xbf16>
    %cst_16 = arith.constant dense<0.000000e+00> : vector<2x2816xf32>
    %20 = tpu.matmul %1, %19, %cst_16 {dimension_numbers = #tpu.dot_dimension_numbers<[1], [0], [0], [1], [0, 0, 1, 1], [], []>} : vector<2x96xbf16>, vector<96x2816xbf16>, vector<2x2816xf32> -> vector<2x2816xf32>
    %c0_17 = arith.constant 0 : index
    %c0_18 = arith.constant 0 : index
    %21 = vector.load %arg3[%c0_17, %c0_18] : memref<1x2816xf32, #tpu.memory_space<vmem>>, vector<1x2816xf32>
    %22 = vector.broadcast %21 : vector<1x2816xf32> to vector<2x2816xf32>
    %23 = arith.addf %20, %22 : vector<2x2816xf32>
    %cst_19 = arith.constant 0.000000e+00 : f32
    %24 = vector.broadcast %cst_19 : f32 to vector<2x2816xf32>
    %25 = arith.maximumf %23, %24 : vector<2x2816xf32>
    %26 = arith.truncf %25 : vector<2x2816xf32> to vector<2x2816xbf16>
    %c0_20 = arith.constant 0 : index
    %c0_21 = arith.constant 0 : index
    %27 = vector.load %arg4[%c0_20, %c0_21] : memref<128x512xbf16, #tpu.memory_space<vmem>>, vector<128x512xbf16>
    %c0_22 = arith.constant 0 : index
    %c0_23 = arith.constant 0 : index
    %28 = vector.load %arg6[%c0_22, %c0_23] : memref<1x512xf32, #tpu.memory_space<vmem>>, vector<1x512xf32>
    %29 = vector.extract_strided_slice %26 {offsets = [0, 0], sizes = [2, 128], strides = [1, 1]} : vector<2x2816xbf16> to vector<2x128xbf16>
    %cst_24 = arith.constant dense<0.000000e+00> : vector<2x512xf32>
    %30 = tpu.matmul %29, %27, %cst_24 {dimension_numbers = #tpu.dot_dimension_numbers<[1], [0], [0], [1], [0, 0, 1, 1], [], []>} : vector<2x128xbf16>, vector<128x512xbf16>, vector<2x512xf32> -> vector<2x512xf32>
    %31 = vector.broadcast %28 : vector<1x512xf32> to vector<2x512xf32>
    %32 = arith.addf %30, %31 : vector<2x512xf32>
    %c0_25 = arith.constant 0 : index
    %c0_26 = arith.constant 0 : index
    %33 = vector.load %arg19[%c0_25, %c0_26] : memref<2x11264xf32, #tpu.memory_space<vmem>>, vector<2x512xf32>
    tpu.vector_store %arg19[%c0_25, %c0_26], %32 {strides = array<i32>} : memref<2x11264xf32, #tpu.memory_space<vmem>>, vector<2x512xf32>,
    %34 = vector.extract_strided_slice %26 {offsets = [0, 128], sizes = [2, 128], strides = [1, 1]} : vector<2x2816xbf16> to vector<2x128xbf16>
    %cst_27 = arith.constant dense<0.000000e+00> : vector<2x512xf32>
    %35 = tpu.matmul %34, %27, %cst_27 {dimension_numbers = #tpu.dot_dimension_numbers<[1], [0], [0], [1], [0, 0, 1, 1], [], []>} : vector<2x128xbf16>, vector<128x512xbf16>, vector<2x512xf32> -> vector<2x512xf32>
    %36 = vector.broadcast %28 : vector<1x512xf32> to vector<2x512xf32>
    %37 = arith.addf %35, %36 : vector<2x512xf32>
    %c0_28 = arith.constant 0 : index
    %c512 = arith.constant 512 : index
    %38 = vector.load %arg19[%c0_28, %c512] : memref<2x11264xf32, #tpu.memory_space<vmem>>, vector<2x512xf32>
    tpu.vector_store %arg19[%c0_28, %c512], %37 {strides = array<i32>} : memref<2x11264xf32, #tpu.memory_space<vmem>>, vector<2x512xf32>,
    %39 = vector.extract_strided_slice %26 {offsets = [0, 256], sizes = [2, 128], strides = [1, 1]} : vector<2x2816xbf16> to vector<2x128xbf16>
    %cst_29 = arith.constant dense<0.000000e+00> : vector<2x512xf32>
    %40 = tpu.matmul %39, %27, %cst_29 {dimension_numbers = #tpu.dot_dimension_numbers<[1], [0], [0], [1], [0, 0, 1, 1], [], []>} : vector<2x128xbf16>, vector<128x512xbf16>, vector<2x512xf32> -> vector<2x512xf32>
    %41 = vector.broadcast %28 : vector<1x512xf32> to vector<2x512xf32>
    %42 = arith.addf %40, %41 : vector<2x512xf32>
    %c0_30 = arith.constant 0 : index
    %c1024 = arith.constant 1024 : index
    %43 = vector.load %arg19[%c0_30, %c1024] : memref<2x11264xf32, #tpu.memory_space<vmem>>, vector<2x512xf32>
    tpu.vector_store %arg19[%c0_30, %c1024], %42 {strides = array<i32>} : memref<2x11264xf32, #tpu.memory_space<vmem>>, vector<2x512xf32>,
    %44 = vector.extract_strided_slice %26 {offsets = [0, 384], sizes = [2, 128], strides = [1, 1]} : vector<2x2816xbf16> to vector<2x128xbf16>
    %cst_31 = arith.constant dense<0.000000e+00> : vector<2x512xf32>
    %45 = tpu.matmul %44, %27, %cst_31 {dimension_numbers = #tpu.dot_dimension_numbers<[1], [0], [0], [1], [0, 0, 1, 1], [], []>} : vector<2x128xbf16>, vector<128x512xbf16>, vector<2x512xf32> -> vector<2x512xf32>
    %46 = vector.broadcast %28 : vector<1x512xf32> to vector<2x512xf32>
    %47 = arith.addf %45, %46 : vector<2x512xf32>
    %c0_32 = arith.constant 0 : index
    %c1536 = arith.constant 1536 : index
    %48 = vector.load %arg19[%c0_32, %c1536] : memref<2x11264xf32, #tpu.memory_space<vmem>>, vector<2x512xf32>
    tpu.vector_store %arg19[%c0_32, %c1536], %47 {strides = array<i32>} : memref<2x11264xf32, #tpu.memory_space<vmem>>, vector<2x512xf32>,
    %49 = vector.extract_strided_slice %26 {offsets = [0, 512], sizes = [2, 128], strides = [1, 1]} : vector<2x2816xbf16> to vector<2x128xbf16>
    %cst_33 = arith.constant dense<0.000000e+00> : vector<2x512xf32>
    %50 = tpu.matmul %49, %27, %cst_33 {dimension_numbers = #tpu.dot_dimension_numbers<[1], [0], [0], [1], [0, 0, 1, 1], [], []>} : vector<2x128xbf16>, vector<128x512xbf16>, vector<2x512xf32> -> vector<2x512xf32>
    %51 = vector.broadcast %28 : vector<1x512xf32> to vector<2x512xf32>
    %52 = arith.addf %50, %51 : vector<2x512xf32>
    %c0_34 = arith.constant 0 : index
    %c2048 = arith.constant 2048 : index
    %53 = vector.load %arg19[%c0_34, %c2048] : memref<2x11264xf32, #tpu.memory_space<vmem>>, vector<2x512xf32>
    tpu.vector_store %arg19[%c0_34, %c2048], %52 {strides = array<i32>} : memref<2x11264xf32, #tpu.memory_space<vmem>>, vector<2x512xf32>,
    %54 = vector.extract_strided_slice %26 {offsets = [0, 640], sizes = [2, 128], strides = [1, 1]} : vector<2x2816xbf16> to vector<2x128xbf16>
    %cst_35 = arith.constant dense<0.000000e+00> : vector<2x512xf32>
    %55 = tpu.matmul %54, %27, %cst_35 {dimension_numbers = #tpu.dot_dimension_numbers<[1], [0], [0], [1], [0, 0, 1, 1], [], []>} : vector<2x128xbf16>, vector<128x512xbf16>, vector<2x512xf32> -> vector<2x512xf32>
    %56 = vector.broadcast %28 : vector<1x512xf32> to vector<2x512xf32>
    %57 = arith.addf %55, %56 : vector<2x512xf32>
    %c0_36 = arith.constant 0 : index
    %c2560 = arith.constant 2560 : index
    %58 = vector.load %arg19[%c0_36, %c2560] : memref<2x11264xf32, #tpu.memory_space<vmem>>, vector<2x512xf32>
    tpu.vector_store %arg19[%c0_36, %c2560], %57 {strides = array<i32>} : memref<2x11264xf32, #tpu.memory_space<vmem>>, vector<2x512xf32>,
    %59 = vector.extract_strided_slice %26 {offsets = [0, 768], sizes = [2, 128], strides = [1, 1]} : vector<2x2816xbf16> to vector<2x128xbf16>
    %cst_37 = arith.constant dense<0.000000e+00> : vector<2x512xf32>
    %60 = tpu.matmul %59, %27, %cst_37 {dimension_numbers = #tpu.dot_dimension_numbers<[1], [0], [0], [1], [0, 0, 1, 1], [], []>} : vector<2x128xbf16>, vector<128x512xbf16>, vector<2x512xf32> -> vector<2x512xf32>
    %61 = vector.broadcast %28 : vector<1x512xf32> to vector<2x512xf32>
    %62 = arith.addf %60, %61 : vector<2x512xf32>
    %c0_38 = arith.constant 0 : index
    %c3072 = arith.constant 3072 : index
    %63 = vector.load %arg19[%c0_38, %c3072] : memref<2x11264xf32, #tpu.memory_space<vmem>>, vector<2x512xf32>
    tpu.vector_store %arg19[%c0_38, %c3072], %62 {strides = array<i32>} : memref<2x11264xf32, #tpu.memory_space<vmem>>, vector<2x512xf32>,
    %64 = vector.extract_strided_slice %26 {offsets = [0, 896], sizes = [2, 128], strides = [1, 1]} : vector<2x2816xbf16> to vector<2x128xbf16>
    %cst_39 = arith.constant dense<0.000000e+00> : vector<2x512xf32>
    %65 = tpu.matmul %64, %27, %cst_39 {dimension_numbers = #tpu.dot_dimension_numbers<[1], [0], [0], [1], [0, 0, 1, 1], [], []>} : vector<2x128xbf16>, vector<128x512xbf16>, vector<2x512xf32> -> vector<2x512xf32>
    %66 = vector.broadcast %28 : vector<1x512xf32> to vector<2x512xf32>
    %67 = arith.addf %65, %66 : vector<2x512xf32>
    %c0_40 = arith.constant 0 : index
    %c3584 = arith.constant 3584 : index
    %68 = vector.load %arg19[%c0_40, %c3584] : memref<2x11264xf32, #tpu.memory_space<vmem>>, vector<2x512xf32>
    tpu.vector_store %arg19[%c0_40, %c3584], %67 {strides = array<i32>} : memref<2x11264xf32, #tpu.memory_space<vmem>>, vector<2x512xf32>,
    %69 = vector.extract_strided_slice %26 {offsets = [0, 1024], sizes = [2, 128], strides = [1, 1]} : vector<2x2816xbf16> to vector<2x128xbf16>
    %cst_41 = arith.constant dense<0.000000e+00> : vector<2x512xf32>
    %70 = tpu.matmul %69, %27, %cst_41 {dimension_numbers = #tpu.dot_dimension_numbers<[1], [0], [0], [1], [0, 0, 1, 1], [], []>} : vector<2x128xbf16>, vector<128x512xbf16>, vector<2x512xf32> -> vector<2x512xf32>
    %71 = vector.broadcast %28 : vector<1x512xf32> to vector<2x512xf32>
    %72 = arith.addf %70, %71 : vector<2x512xf32>
    %c0_42 = arith.constant 0 : index
    %c4096 = arith.constant 4096 : index
    %73 = vector.load %arg19[%c0_42, %c4096] : memref<2x11264xf32, #tpu.memory_space<vmem>>, vector<2x512xf32>
    tpu.vector_store %arg19[%c0_42, %c4096], %72 {strides = array<i32>} : memref<2x11264xf32, #tpu.memory_space<vmem>>, vector<2x512xf32>,
    %74 = vector.extract_strided_slice %26 {offsets = [0, 1152], sizes = [2, 128], strides = [1, 1]} : vector<2x2816xbf16> to vector<2x128xbf16>
    %cst_43 = arith.constant dense<0.000000e+00> : vector<2x512xf32>
    %75 = tpu.matmul %74, %27, %cst_43 {dimension_numbers = #tpu.dot_dimension_numbers<[1], [0], [0], [1], [0, 0, 1, 1], [], []>} : vector<2x128xbf16>, vector<128x512xbf16>, vector<2x512xf32> -> vector<2x512xf32>
    %76 = vector.broadcast %28 : vector<1x512xf32> to vector<2x512xf32>
    %77 = arith.addf %75, %76 : vector<2x512xf32>
    %c0_44 = arith.constant 0 : index
    %c4608 = arith.constant 4608 : index
    %78 = vector.load %arg19[%c0_44, %c4608] : memref<2x11264xf32, #tpu.memory_space<vmem>>, vector<2x512xf32>
    tpu.vector_store %arg19[%c0_44, %c4608], %77 {strides = array<i32>} : memref<2x11264xf32, #tpu.memory_space<vmem>>, vector<2x512xf32>,
    %79 = vector.extract_strided_slice %26 {offsets = [0, 1280], sizes = [2, 128], strides = [1, 1]} : vector<2x2816xbf16> to vector<2x128xbf16>
    %cst_45 = arith.constant dense<0.000000e+00> : vector<2x512xf32>
    %80 = tpu.matmul %79, %27, %cst_45 {dimension_numbers = #tpu.dot_dimension_numbers<[1], [0], [0], [1], [0, 0, 1, 1], [], []>} : vector<2x128xbf16>, vector<128x512xbf16>, vector<2x512xf32> -> vector<2x512xf32>
    %81 = vector.broadcast %28 : vector<1x512xf32> to vector<2x512xf32>
    %82 = arith.addf %80, %81 : vector<2x512xf32>
    %c0_46 = arith.constant 0 : index
    %c5120 = arith.constant 5120 : index
    %83 = vector.load %arg19[%c0_46, %c5120] : memref<2x11264xf32, #tpu.memory_space<vmem>>, vector<2x512xf32>
    tpu.vector_store %arg19[%c0_46, %c5120], %82 {strides = array<i32>} : memref<2x11264xf32, #tpu.memory_space<vmem>>, vector<2x512xf32>,
    %84 = vector.extract_strided_slice %26 {offsets = [0, 1408], sizes = [2, 128], strides = [1, 1]} : vector<2x2816xbf16> to vector<2x128xbf16>
    %cst_47 = arith.constant dense<0.000000e+00> : vector<2x512xf32>
    %85 = tpu.matmul %84, %27, %cst_47 {dimension_numbers = #tpu.dot_dimension_numbers<[1], [0], [0], [1], [0, 0, 1, 1], [], []>} : vector<2x128xbf16>, vector<128x512xbf16>, vector<2x512xf32> -> vector<2x512xf32>
    %86 = vector.broadcast %28 : vector<1x512xf32> to vector<2x512xf32>
    %87 = arith.addf %85, %86 : vector<2x512xf32>
    %c0_48 = arith.constant 0 : index
    %c5632 = arith.constant 5632 : index
    %88 = vector.load %arg19[%c0_48, %c5632] : memref<2x11264xf32, #tpu.memory_space<vmem>>, vector<2x512xf32>
    tpu.vector_store %arg19[%c0_48, %c5632], %87 {strides = array<i32>} : memref<2x11264xf32, #tpu.memory_space<vmem>>, vector<2x512xf32>,
    %89 = vector.extract_strided_slice %26 {offsets = [0, 1536], sizes = [2, 128], strides = [1, 1]} : vector<2x2816xbf16> to vector<2x128xbf16>
    %cst_49 = arith.constant dense<0.000000e+00> : vector<2x512xf32>
    %90 = tpu.matmul %89, %27, %cst_49 {dimension_numbers = #tpu.dot_dimension_numbers<[1], [0], [0], [1], [0, 0, 1, 1], [], []>} : vector<2x128xbf16>, vector<128x512xbf16>, vector<2x512xf32> -> vector<2x512xf32>
    %91 = vector.broadcast %28 : vector<1x512xf32> to vector<2x512xf32>
    %92 = arith.addf %90, %91 : vector<2x512xf32>
    %c0_50 = arith.constant 0 : index
    %c6144 = arith.constant 6144 : index
    %93 = vector.load %arg19[%c0_50, %c6144] : memref<2x11264xf32, #tpu.memory_space<vmem>>, vector<2x512xf32>
    tpu.vector_store %arg19[%c0_50, %c6144], %92 {strides = array<i32>} : memref<2x11264xf32, #tpu.memory_space<vmem>>, vector<2x512xf32>,
    %94 = vector.extract_strided_slice %26 {offsets = [0, 1664], sizes = [2, 128], strides = [1, 1]} : vector<2x2816xbf16> to vector<2x128xbf16>
    %cst_51 = arith.constant dense<0.000000e+00> : vector<2x512xf32>
    %95 = tpu.matmul %94, %27, %cst_51 {dimension_numbers = #tpu.dot_dimension_numbers<[1], [0], [0], [1], [0, 0, 1, 1], [], []>} : vector<2x128xbf16>, vector<128x512xbf16>, vector<2x512xf32> -> vector<2x512xf32>
    %96 = vector.broadcast %28 : vector<1x512xf32> to vector<2x512xf32>
    %97 = arith.addf %95, %96 : vector<2x512xf32>
    %c0_52 = arith.constant 0 : index
    %c6656 = arith.constant 6656 : index
    %98 = vector.load %arg19[%c0_52, %c6656] : memref<2x11264xf32, #tpu.memory_space<vmem>>, vector<2x512xf32>
    tpu.vector_store %arg19[%c0_52, %c6656], %97 {strides = array<i32>} : memref<2x11264xf32, #tpu.memory_space<vmem>>, vector<2x512xf32>,
    %99 = vector.extract_strided_slice %26 {offsets = [0, 1792], sizes = [2, 128], strides = [1, 1]} : vector<2x2816xbf16> to vector<2x128xbf16>
    %cst_53 = arith.constant dense<0.000000e+00> : vector<2x512xf32>
    %100 = tpu.matmul %99, %27, %cst_53 {dimension_numbers = #tpu.dot_dimension_numbers<[1], [0], [0], [1], [0, 0, 1, 1], [], []>} : vector<2x128xbf16>, vector<128x512xbf16>, vector<2x512xf32> -> vector<2x512xf32>
    %101 = vector.broadcast %28 : vector<1x512xf32> to vector<2x512xf32>
    %102 = arith.addf %100, %101 : vector<2x512xf32>
    %c0_54 = arith.constant 0 : index
    %c7168 = arith.constant 7168 : index
    %103 = vector.load %arg19[%c0_54, %c7168] : memref<2x11264xf32, #tpu.memory_space<vmem>>, vector<2x512xf32>
    tpu.vector_store %arg19[%c0_54, %c7168], %102 {strides = array<i32>} : memref<2x11264xf32, #tpu.memory_space<vmem>>, vector<2x512xf32>,
    %104 = vector.extract_strided_slice %26 {offsets = [0, 1920], sizes = [2, 128], strides = [1, 1]} : vector<2x2816xbf16> to vector<2x128xbf16>
    %cst_55 = arith.constant dense<0.000000e+00> : vector<2x512xf32>
    %105 = tpu.matmul %104, %27, %cst_55 {dimension_numbers = #tpu.dot_dimension_numbers<[1], [0], [0], [1], [0, 0, 1, 1], [], []>} : vector<2x128xbf16>, vector<128x512xbf16>, vector<2x512xf32> -> vector<2x512xf32>
    %106 = vector.broadcast %28 : vector<1x512xf32> to vector<2x512xf32>
    %107 = arith.addf %105, %106 : vector<2x512xf32>
    %c0_56 = arith.constant 0 : index
    %c7680 = arith.constant 7680 : index
    %108 = vector.load %arg19[%c0_56, %c7680] : memref<2x11264xf32, #tpu.memory_space<vmem>>, vector<2x512xf32>
    tpu.vector_store %arg19[%c0_56, %c7680], %107 {strides = array<i32>} : memref<2x11264xf32, #tpu.memory_space<vmem>>, vector<2x512xf32>,
    %109 = vector.extract_strided_slice %26 {offsets = [0, 2048], sizes = [2, 128], strides = [1, 1]} : vector<2x2816xbf16> to vector<2x128xbf16>
    %cst_57 = arith.constant dense<0.000000e+00> : vector<2x512xf32>
    %110 = tpu.matmul %109, %27, %cst_57 {dimension_numbers = #tpu.dot_dimension_numbers<[1], [0], [0], [1], [0, 0, 1, 1], [], []>} : vector<2x128xbf16>, vector<128x512xbf16>, vector<2x512xf32> -> vector<2x512xf32>
    %111 = vector.broadcast %28 : vector<1x512xf32> to vector<2x512xf32>
    %112 = arith.addf %110, %111 : vector<2x512xf32>
    %c0_58 = arith.constant 0 : index
    %c8192 = arith.constant 8192 : index
    %113 = vector.load %arg19[%c0_58, %c8192] : memref<2x11264xf32, #tpu.memory_space<vmem>>, vector<2x512xf32>
    tpu.vector_store %arg19[%c0_58, %c8192], %112 {strides = array<i32>} : memref<2x11264xf32, #tpu.memory_space<vmem>>, vector<2x512xf32>,
    %114 = vector.extract_strided_slice %26 {offsets = [0, 2176], sizes = [2, 128], strides = [1, 1]} : vector<2x2816xbf16> to vector<2x128xbf16>
    %cst_59 = arith.constant dense<0.000000e+00> : vector<2x512xf32>
    %115 = tpu.matmul %114, %27, %cst_59 {dimension_numbers = #tpu.dot_dimension_numbers<[1], [0], [0], [1], [0, 0, 1, 1], [], []>} : vector<2x128xbf16>, vector<128x512xbf16>, vector<2x512xf32> -> vector<2x512xf32>
    %116 = vector.broadcast %28 : vector<1x512xf32> to vector<2x512xf32>
    %117 = arith.addf %115, %116 : vector<2x512xf32>
    %c0_60 = arith.constant 0 : index
    %c8704 = arith.constant 8704 : index
    %118 = vector.load %arg19[%c0_60, %c8704] : memref<2x11264xf32, #tpu.memory_space<vmem>>, vector<2x512xf32>
    tpu.vector_store %arg19[%c0_60, %c8704], %117 {strides = array<i32>} : memref<2x11264xf32, #tpu.memory_space<vmem>>, vector<2x512xf32>,
    %119 = vector.extract_strided_slice %26 {offsets = [0, 2304], sizes = [2, 128], strides = [1, 1]} : vector<2x2816xbf16> to vector<2x128xbf16>
    %cst_61 = arith.constant dense<0.000000e+00> : vector<2x512xf32>
    %120 = tpu.matmul %119, %27, %cst_61 {dimension_numbers = #tpu.dot_dimension_numbers<[1], [0], [0], [1], [0, 0, 1, 1], [], []>} : vector<2x128xbf16>, vector<128x512xbf16>, vector<2x512xf32> -> vector<2x512xf32>
    %121 = vector.broadcast %28 : vector<1x512xf32> to vector<2x512xf32>
    %122 = arith.addf %120, %121 : vector<2x512xf32>
    %c0_62 = arith.constant 0 : index
    %c9216 = arith.constant 9216 : index
    %123 = vector.load %arg19[%c0_62, %c9216] : memref<2x11264xf32, #tpu.memory_space<vmem>>, vector<2x512xf32>
    tpu.vector_store %arg19[%c0_62, %c9216], %122 {strides = array<i32>} : memref<2x11264xf32, #tpu.memory_space<vmem>>, vector<2x512xf32>,
    %124 = vector.extract_strided_slice %26 {offsets = [0, 2432], sizes = [2, 128], strides = [1, 1]} : vector<2x2816xbf16> to vector<2x128xbf16>
    %cst_63 = arith.constant dense<0.000000e+00> : vector<2x512xf32>
    %125 = tpu.matmul %124, %27, %cst_63 {dimension_numbers = #tpu.dot_dimension_numbers<[1], [0], [0], [1], [0, 0, 1, 1], [], []>} : vector<2x128xbf16>, vector<128x512xbf16>, vector<2x512xf32> -> vector<2x512xf32>
    %126 = vector.broadcast %28 : vector<1x512xf32> to vector<2x512xf32>
    %127 = arith.addf %125, %126 : vector<2x512xf32>
    %c0_64 = arith.constant 0 : index
    %c9728 = arith.constant 9728 : index
    %128 = vector.load %arg19[%c0_64, %c9728] : memref<2x11264xf32, #tpu.memory_space<vmem>>, vector<2x512xf32>
    tpu.vector_store %arg19[%c0_64, %c9728], %127 {strides = array<i32>} : memref<2x11264xf32, #tpu.memory_space<vmem>>, vector<2x512xf32>,
    %129 = vector.extract_strided_slice %26 {offsets = [0, 2560], sizes = [2, 128], strides = [1, 1]} : vector<2x2816xbf16> to vector<2x128xbf16>
    %cst_65 = arith.constant dense<0.000000e+00> : vector<2x512xf32>
    %130 = tpu.matmul %129, %27, %cst_65 {dimension_numbers = #tpu.dot_dimension_numbers<[1], [0], [0], [1], [0, 0, 1, 1], [], []>} : vector<2x128xbf16>, vector<128x512xbf16>, vector<2x512xf32> -> vector<2x512xf32>
    %131 = vector.broadcast %28 : vector<1x512xf32> to vector<2x512xf32>
    %132 = arith.addf %130, %131 : vector<2x512xf32>
    %c0_66 = arith.constant 0 : index
    %c10240 = arith.constant 10240 : index
    %133 = vector.load %arg19[%c0_66, %c10240] : memref<2x11264xf32, #tpu.memory_space<vmem>>, vector<2x512xf32>
    tpu.vector_store %arg19[%c0_66, %c10240], %132 {strides = array<i32>} : memref<2x11264xf32, #tpu.memory_space<vmem>>, vector<2x512xf32>,
    %134 = vector.extract_strided_slice %26 {offsets = [0, 2688], sizes = [2, 128], strides = [1, 1]} : vector<2x2816xbf16> to vector<2x128xbf16>
    %cst_67 = arith.constant dense<0.000000e+00> : vector<2x512xf32>
    %135 = tpu.matmul %134, %27, %cst_67 {dimension_numbers = #tpu.dot_dimension_numbers<[1], [0], [0], [1], [0, 0, 1, 1], [], []>} : vector<2x128xbf16>, vector<128x512xbf16>, vector<2x512xf32> -> vector<2x512xf32>
    %136 = vector.broadcast %28 : vector<1x512xf32> to vector<2x512xf32>
    %137 = arith.addf %135, %136 : vector<2x512xf32>
    %c0_68 = arith.constant 0 : index
    %c10752 = arith.constant 10752 : index
    %138 = vector.load %arg19[%c0_68, %c10752] : memref<2x11264xf32, #tpu.memory_space<vmem>>, vector<2x512xf32>
    tpu.vector_store %arg19[%c0_68, %c10752], %137 {strides = array<i32>} : memref<2x11264xf32, #tpu.memory_space<vmem>>, vector<2x512xf32>,
    %c0_69 = arith.constant 0 : index
    %c0_70 = arith.constant 0 : index
    %139 = vector.load %arg5[%c0_69, %c0_70] : memref<128x512xbf16, #tpu.memory_space<vmem>>, vector<128x512xbf16>
    %cst_71 = arith.constant 0.000000e+00 : f32
    %140 = vector.broadcast %cst_71 : f32 to vector<2x128xf32>
    %cst_72 = arith.constant 0.000000e+00 : f32
    %141 = vector.broadcast %cst_72 : f32 to vector<2x128xf32>
    %c0_73 = arith.constant 0 : index
    %c0_74 = arith.constant 0 : index
    %142 = vector.load %arg19[%c0_73, %c0_74] : memref<2x11264xf32, #tpu.memory_space<vmem>>, vector<2x512xf32>
    %143 = arith.truncf %140 : vector<2x128xf32> to vector<2x128xbf16>
    %cst_75 = arith.constant dense<0.000000e+00> : vector<2x512xf32>
    %144 = tpu.matmul %143, %139, %cst_75 {dimension_numbers = #tpu.dot_dimension_numbers<[1], [0], [0], [1], [0, 0, 1, 1], [], []>} : vector<2x128xbf16>, vector<128x512xbf16>, vector<2x512xf32> -> vector<2x512xf32>
    %145 = arith.addf %142, %144 : vector<2x512xf32>
    %146 = vector.extract_strided_slice %145 {offsets = [0, 0], sizes = [2, 128], strides = [1, 1]} : vector<2x512xf32> to vector<2x128xf32>
    %cst_76 = arith.constant 5.000000e-01 : f32
    %147 = vector.broadcast %cst_76 : f32 to vector<2x128xf32>
    %148 = arith.mulf %147, %146 : vector<2x128xf32>
    %149 = math.tanh %148 : vector<2x128xf32>
    %cst_77 = arith.constant 1.000000e+00 : f32
    %150 = vector.broadcast %cst_77 : f32 to vector<2x128xf32>
    %151 = arith.addf %149, %150 : vector<2x128xf32>
    %cst_78 = arith.constant 5.000000e-01 : f32
    %152 = vector.broadcast %cst_78 : f32 to vector<2x128xf32>
    %153 = arith.mulf %152, %151 : vector<2x128xf32>
    %154 = vector.extract_strided_slice %145 {offsets = [0, 128], sizes = [2, 128], strides = [1, 1]} : vector<2x512xf32> to vector<2x128xf32>
    %cst_79 = arith.constant 5.000000e-01 : f32
    %155 = vector.broadcast %cst_79 : f32 to vector<2x128xf32>
    %156 = arith.mulf %155, %154 : vector<2x128xf32>
    %157 = math.tanh %156 : vector<2x128xf32>
    %cst_80 = arith.constant 1.000000e+00 : f32
    %158 = vector.broadcast %cst_80 : f32 to vector<2x128xf32>
    %159 = arith.addf %157, %158 : vector<2x128xf32>
    %cst_81 = arith.constant 5.000000e-01 : f32
    %160 = vector.broadcast %cst_81 : f32 to vector<2x128xf32>
    %161 = arith.mulf %160, %159 : vector<2x128xf32>
    %162 = vector.extract_strided_slice %145 {offsets = [0, 256], sizes = [2, 128], strides = [1, 1]} : vector<2x512xf32> to vector<2x128xf32>
    %163 = math.tanh %162 : vector<2x128xf32>
    %164 = vector.extract_strided_slice %145 {offsets = [0, 384], sizes = [2, 128], strides = [1, 1]} : vector<2x512xf32> to vector<2x128xf32>
    %cst_82 = arith.constant 5.000000e-01 : f32
    %165 = vector.broadcast %cst_82 : f32 to vector<2x128xf32>
    %166 = arith.mulf %165, %164 : vector<2x128xf32>
    %167 = math.tanh %166 : vector<2x128xf32>
    %cst_83 = arith.constant 1.000000e+00 : f32
    %168 = vector.broadcast %cst_83 : f32 to vector<2x128xf32>
    %169 = arith.addf %167, %168 : vector<2x128xf32>
    %cst_84 = arith.constant 5.000000e-01 : f32
    %170 = vector.broadcast %cst_84 : f32 to vector<2x128xf32>
    %171 = arith.mulf %170, %169 : vector<2x128xf32>
    %172 = arith.mulf %161, %141 : vector<2x128xf32>
    %173 = arith.mulf %153, %163 : vector<2x128xf32>
    %174 = arith.addf %172, %173 : vector<2x128xf32>
    %175 = math.tanh %174 : vector<2x128xf32>
    %176 = arith.mulf %171, %175 : vector<2x128xf32>
    %c0_85 = arith.constant 0 : index
    %c512_86 = arith.constant 512 : index
    %177 = vector.load %arg19[%c0_85, %c512_86] : memref<2x11264xf32, #tpu.memory_space<vmem>>, vector<2x512xf32>
    %178 = arith.truncf %176 : vector<2x128xf32> to vector<2x128xbf16>
    %cst_87 = arith.constant dense<0.000000e+00> : vector<2x512xf32>
    %179 = tpu.matmul %178, %139, %cst_87 {dimension_numbers = #tpu.dot_dimension_numbers<[1], [0], [0], [1], [0, 0, 1, 1], [], []>} : vector<2x128xbf16>, vector<128x512xbf16>, vector<2x512xf32> -> vector<2x512xf32>
    %180 = arith.addf %177, %179 : vector<2x512xf32>
    %181 = vector.extract_strided_slice %180 {offsets = [0, 0], sizes = [2, 128], strides = [1, 1]} : vector<2x512xf32> to vector<2x128xf32>
    %cst_88 = arith.constant 5.000000e-01 : f32
    %182 = vector.broadcast %cst_88 : f32 to vector<2x128xf32>
    %183 = arith.mulf %182, %181 : vector<2x128xf32>
    %184 = math.tanh %183 : vector<2x128xf32>
    %cst_89 = arith.constant 1.000000e+00 : f32
    %185 = vector.broadcast %cst_89 : f32 to vector<2x128xf32>
    %186 = arith.addf %184, %185 : vector<2x128xf32>
    %cst_90 = arith.constant 5.000000e-01 : f32
    %187 = vector.broadcast %cst_90 : f32 to vector<2x128xf32>
    %188 = arith.mulf %187, %186 : vector<2x128xf32>
    %189 = vector.extract_strided_slice %180 {offsets = [0, 128], sizes = [2, 128], strides = [1, 1]} : vector<2x512xf32> to vector<2x128xf32>
    %cst_91 = arith.constant 5.000000e-01 : f32
    %190 = vector.broadcast %cst_91 : f32 to vector<2x128xf32>
    %191 = arith.mulf %190, %189 : vector<2x128xf32>
    %192 = math.tanh %191 : vector<2x128xf32>
    %cst_92 = arith.constant 1.000000e+00 : f32
    %193 = vector.broadcast %cst_92 : f32 to vector<2x128xf32>
    %194 = arith.addf %192, %193 : vector<2x128xf32>
    %cst_93 = arith.constant 5.000000e-01 : f32
    %195 = vector.broadcast %cst_93 : f32 to vector<2x128xf32>
    %196 = arith.mulf %195, %194 : vector<2x128xf32>
    %197 = vector.extract_strided_slice %180 {offsets = [0, 256], sizes = [2, 128], strides = [1, 1]} : vector<2x512xf32> to vector<2x128xf32>
    %198 = math.tanh %197 : vector<2x128xf32>
    %199 = vector.extract_strided_slice %180 {offsets = [0, 384], sizes = [2, 128], strides = [1, 1]} : vector<2x512xf32> to vector<2x128xf32>
    %cst_94 = arith.constant 5.000000e-01 : f32
    %200 = vector.broadcast %cst_94 : f32 to vector<2x128xf32>
    %201 = arith.mulf %200, %199 : vector<2x128xf32>
    %202 = math.tanh %201 : vector<2x128xf32>
    %cst_95 = arith.constant 1.000000e+00 : f32
    %203 = vector.broadcast %cst_95 : f32 to vector<2x128xf32>
    %204 = arith.addf %202, %203 : vector<2x128xf32>
    %cst_96 = arith.constant 5.000000e-01 : f32
    %205 = vector.broadcast %cst_96 : f32 to vector<2x128xf32>
    %206 = arith.mulf %205, %204 : vector<2x128xf32>
    %207 = arith.mulf %196, %174 : vector<2x128xf32>
    %208 = arith.mulf %188, %198 : vector<2x128xf32>
    %209 = arith.addf %207, %208 : vector<2x128xf32>
    %210 = math.tanh %209 : vector<2x128xf32>
    %211 = arith.mulf %206, %210 : vector<2x128xf32>
    %c0_97 = arith.constant 0 : index
    %c1024_98 = arith.constant 1024 : index
    %212 = vector.load %arg19[%c0_97, %c1024_98] : memref<2x11264xf32, #tpu.memory_space<vmem>>, vector<2x512xf32>
    %213 = arith.truncf %211 : vector<2x128xf32> to vector<2x128xbf16>
    %cst_99 = arith.constant dense<0.000000e+00> : vector<2x512xf32>
    %214 = tpu.matmul %213, %139, %cst_99 {dimension_numbers = #tpu.dot_dimension_numbers<[1], [0], [0], [1], [0, 0, 1, 1], [], []>} : vector<2x128xbf16>, vector<128x512xbf16>, vector<2x512xf32> -> vector<2x512xf32>
    %215 = arith.addf %212, %214 : vector<2x512xf32>
    %216 = vector.extract_strided_slice %215 {offsets = [0, 0], sizes = [2, 128], strides = [1, 1]} : vector<2x512xf32> to vector<2x128xf32>
    %cst_100 = arith.constant 5.000000e-01 : f32
    %217 = vector.broadcast %cst_100 : f32 to vector<2x128xf32>
    %218 = arith.mulf %217, %216 : vector<2x128xf32>
    %219 = math.tanh %218 : vector<2x128xf32>
    %cst_101 = arith.constant 1.000000e+00 : f32
    %220 = vector.broadcast %cst_101 : f32 to vector<2x128xf32>
    %221 = arith.addf %219, %220 : vector<2x128xf32>
    %cst_102 = arith.constant 5.000000e-01 : f32
    %222 = vector.broadcast %cst_102 : f32 to vector<2x128xf32>
    %223 = arith.mulf %222, %221 : vector<2x128xf32>
    %224 = vector.extract_strided_slice %215 {offsets = [0, 128], sizes = [2, 128], strides = [1, 1]} : vector<2x512xf32> to vector<2x128xf32>
    %cst_103 = arith.constant 5.000000e-01 : f32
    %225 = vector.broadcast %cst_103 : f32 to vector<2x128xf32>
    %226 = arith.mulf %225, %224 : vector<2x128xf32>
    %227 = math.tanh %226 : vector<2x128xf32>
    %cst_104 = arith.constant 1.000000e+00 : f32
    %228 = vector.broadcast %cst_104 : f32 to vector<2x128xf32>
    %229 = arith.addf %227, %228 : vector<2x128xf32>
    %cst_105 = arith.constant 5.000000e-01 : f32
    %230 = vector.broadcast %cst_105 : f32 to vector<2x128xf32>
    %231 = arith.mulf %230, %229 : vector<2x128xf32>
    %232 = vector.extract_strided_slice %215 {offsets = [0, 256], sizes = [2, 128], strides = [1, 1]} : vector<2x512xf32> to vector<2x128xf32>
    %233 = math.tanh %232 : vector<2x128xf32>
    %234 = vector.extract_strided_slice %215 {offsets = [0, 384], sizes = [2, 128], strides = [1, 1]} : vector<2x512xf32> to vector<2x128xf32>
    %cst_106 = arith.constant 5.000000e-01 : f32
    %235 = vector.broadcast %cst_106 : f32 to vector<2x128xf32>
    %236 = arith.mulf %235, %234 : vector<2x128xf32>
    %237 = math.tanh %236 : vector<2x128xf32>
    %cst_107 = arith.constant 1.000000e+00 : f32
    %238 = vector.broadcast %cst_107 : f32 to vector<2x128xf32>
    %239 = arith.addf %237, %238 : vector<2x128xf32>
    %cst_108 = arith.constant 5.000000e-01 : f32
    %240 = vector.broadcast %cst_108 : f32 to vector<2x128xf32>
    %241 = arith.mulf %240, %239 : vector<2x128xf32>
    %242 = arith.mulf %231, %209 : vector<2x128xf32>
    %243 = arith.mulf %223, %233 : vector<2x128xf32>
    %244 = arith.addf %242, %243 : vector<2x128xf32>
    %245 = math.tanh %244 : vector<2x128xf32>
    %246 = arith.mulf %241, %245 : vector<2x128xf32>
    %c0_109 = arith.constant 0 : index
    %c1536_110 = arith.constant 1536 : index
    %247 = vector.load %arg19[%c0_109, %c1536_110] : memref<2x11264xf32, #tpu.memory_space<vmem>>, vector<2x512xf32>
    %248 = arith.truncf %246 : vector<2x128xf32> to vector<2x128xbf16>
    %cst_111 = arith.constant dense<0.000000e+00> : vector<2x512xf32>
    %249 = tpu.matmul %248, %139, %cst_111 {dimension_numbers = #tpu.dot_dimension_numbers<[1], [0], [0], [1], [0, 0, 1, 1], [], []>} : vector<2x128xbf16>, vector<128x512xbf16>, vector<2x512xf32> -> vector<2x512xf32>
    %250 = arith.addf %247, %249 : vector<2x512xf32>
    %251 = vector.extract_strided_slice %250 {offsets = [0, 0], sizes = [2, 128], strides = [1, 1]} : vector<2x512xf32> to vector<2x128xf32>
    %cst_112 = arith.constant 5.000000e-01 : f32
    %252 = vector.broadcast %cst_112 : f32 to vector<2x128xf32>
    %253 = arith.mulf %252, %251 : vector<2x128xf32>
    %254 = math.tanh %253 : vector<2x128xf32>
    %cst_113 = arith.constant 1.000000e+00 : f32
    %255 = vector.broadcast %cst_113 : f32 to vector<2x128xf32>
    %256 = arith.addf %254, %255 : vector<2x128xf32>
    %cst_114 = arith.constant 5.000000e-01 : f32
    %257 = vector.broadcast %cst_114 : f32 to vector<2x128xf32>
    %258 = arith.mulf %257, %256 : vector<2x128xf32>
    %259 = vector.extract_strided_slice %250 {offsets = [0, 128], sizes = [2, 128], strides = [1, 1]} : vector<2x512xf32> to vector<2x128xf32>
    %cst_115 = arith.constant 5.000000e-01 : f32
    %260 = vector.broadcast %cst_115 : f32 to vector<2x128xf32>
    %261 = arith.mulf %260, %259 : vector<2x128xf32>
    %262 = math.tanh %261 : vector<2x128xf32>
    %cst_116 = arith.constant 1.000000e+00 : f32
    %263 = vector.broadcast %cst_116 : f32 to vector<2x128xf32>
    %264 = arith.addf %262, %263 : vector<2x128xf32>
    %cst_117 = arith.constant 5.000000e-01 : f32
    %265 = vector.broadcast %cst_117 : f32 to vector<2x128xf32>
    %266 = arith.mulf %265, %264 : vector<2x128xf32>
    %267 = vector.extract_strided_slice %250 {offsets = [0, 256], sizes = [2, 128], strides = [1, 1]} : vector<2x512xf32> to vector<2x128xf32>
    %268 = math.tanh %267 : vector<2x128xf32>
    %269 = vector.extract_strided_slice %250 {offsets = [0, 384], sizes = [2, 128], strides = [1, 1]} : vector<2x512xf32> to vector<2x128xf32>
    %cst_118 = arith.constant 5.000000e-01 : f32
    %270 = vector.broadcast %cst_118 : f32 to vector<2x128xf32>
    %271 = arith.mulf %270, %269 : vector<2x128xf32>
    %272 = math.tanh %271 : vector<2x128xf32>
    %cst_119 = arith.constant 1.000000e+00 : f32
    %273 = vector.broadcast %cst_119 : f32 to vector<2x128xf32>
    %274 = arith.addf %272, %273 : vector<2x128xf32>
    %cst_120 = arith.constant 5.000000e-01 : f32
    %275 = vector.broadcast %cst_120 : f32 to vector<2x128xf32>
    %276 = arith.mulf %275, %274 : vector<2x128xf32>
    %277 = arith.mulf %266, %244 : vector<2x128xf32>
    %278 = arith.mulf %258, %268 : vector<2x128xf32>
    %279 = arith.addf %277, %278 : vector<2x128xf32>
    %280 = math.tanh %279 : vector<2x128xf32>
    %281 = arith.mulf %276, %280 : vector<2x128xf32>
    %c0_121 = arith.constant 0 : index
    %c2048_122 = arith.constant 2048 : index
    %282 = vector.load %arg19[%c0_121, %c2048_122] : memref<2x11264xf32, #tpu.memory_space<vmem>>, vector<2x512xf32>
    %283 = arith.truncf %281 : vector<2x128xf32> to vector<2x128xbf16>
    %cst_123 = arith.constant dense<0.000000e+00> : vector<2x512xf32>
    %284 = tpu.matmul %283, %139, %cst_123 {dimension_numbers = #tpu.dot_dimension_numbers<[1], [0], [0], [1], [0, 0, 1, 1], [], []>} : vector<2x128xbf16>, vector<128x512xbf16>, vector<2x512xf32> -> vector<2x512xf32>
    %285 = arith.addf %282, %284 : vector<2x512xf32>
    %286 = vector.extract_strided_slice %285 {offsets = [0, 0], sizes = [2, 128], strides = [1, 1]} : vector<2x512xf32> to vector<2x128xf32>
    %cst_124 = arith.constant 5.000000e-01 : f32
    %287 = vector.broadcast %cst_124 : f32 to vector<2x128xf32>
    %288 = arith.mulf %287, %286 : vector<2x128xf32>
    %289 = math.tanh %288 : vector<2x128xf32>
    %cst_125 = arith.constant 1.000000e+00 : f32
    %290 = vector.broadcast %cst_125 : f32 to vector<2x128xf32>
    %291 = arith.addf %289, %290 : vector<2x128xf32>
    %cst_126 = arith.constant 5.000000e-01 : f32
    %292 = vector.broadcast %cst_126 : f32 to vector<2x128xf32>
    %293 = arith.mulf %292, %291 : vector<2x128xf32>
    %294 = vector.extract_strided_slice %285 {offsets = [0, 128], sizes = [2, 128], strides = [1, 1]} : vector<2x512xf32> to vector<2x128xf32>
    %cst_127 = arith.constant 5.000000e-01 : f32
    %295 = vector.broadcast %cst_127 : f32 to vector<2x128xf32>
    %296 = arith.mulf %295, %294 : vector<2x128xf32>
    %297 = math.tanh %296 : vector<2x128xf32>
    %cst_128 = arith.constant 1.000000e+00 : f32
    %298 = vector.broadcast %cst_128 : f32 to vector<2x128xf32>
    %299 = arith.addf %297, %298 : vector<2x128xf32>
    %cst_129 = arith.constant 5.000000e-01 : f32
    %300 = vector.broadcast %cst_129 : f32 to vector<2x128xf32>
    %301 = arith.mulf %300, %299 : vector<2x128xf32>
    %302 = vector.extract_strided_slice %285 {offsets = [0, 256], sizes = [2, 128], strides = [1, 1]} : vector<2x512xf32> to vector<2x128xf32>
    %303 = math.tanh %302 : vector<2x128xf32>
    %304 = vector.extract_strided_slice %285 {offsets = [0, 384], sizes = [2, 128], strides = [1, 1]} : vector<2x512xf32> to vector<2x128xf32>
    %cst_130 = arith.constant 5.000000e-01 : f32
    %305 = vector.broadcast %cst_130 : f32 to vector<2x128xf32>
    %306 = arith.mulf %305, %304 : vector<2x128xf32>
    %307 = math.tanh %306 : vector<2x128xf32>
    %cst_131 = arith.constant 1.000000e+00 : f32
    %308 = vector.broadcast %cst_131 : f32 to vector<2x128xf32>
    %309 = arith.addf %307, %308 : vector<2x128xf32>
    %cst_132 = arith.constant 5.000000e-01 : f32
    %310 = vector.broadcast %cst_132 : f32 to vector<2x128xf32>
    %311 = arith.mulf %310, %309 : vector<2x128xf32>
    %312 = arith.mulf %301, %279 : vector<2x128xf32>
    %313 = arith.mulf %293, %303 : vector<2x128xf32>
    %314 = arith.addf %312, %313 : vector<2x128xf32>
    %315 = math.tanh %314 : vector<2x128xf32>
    %316 = arith.mulf %311, %315 : vector<2x128xf32>
    %c0_133 = arith.constant 0 : index
    %c2560_134 = arith.constant 2560 : index
    %317 = vector.load %arg19[%c0_133, %c2560_134] : memref<2x11264xf32, #tpu.memory_space<vmem>>, vector<2x512xf32>
    %318 = arith.truncf %316 : vector<2x128xf32> to vector<2x128xbf16>
    %cst_135 = arith.constant dense<0.000000e+00> : vector<2x512xf32>
    %319 = tpu.matmul %318, %139, %cst_135 {dimension_numbers = #tpu.dot_dimension_numbers<[1], [0], [0], [1], [0, 0, 1, 1], [], []>} : vector<2x128xbf16>, vector<128x512xbf16>, vector<2x512xf32> -> vector<2x512xf32>
    %320 = arith.addf %317, %319 : vector<2x512xf32>
    %321 = vector.extract_strided_slice %320 {offsets = [0, 0], sizes = [2, 128], strides = [1, 1]} : vector<2x512xf32> to vector<2x128xf32>
    %cst_136 = arith.constant 5.000000e-01 : f32
    %322 = vector.broadcast %cst_136 : f32 to vector<2x128xf32>
    %323 = arith.mulf %322, %321 : vector<2x128xf32>
    %324 = math.tanh %323 : vector<2x128xf32>
    %cst_137 = arith.constant 1.000000e+00 : f32
    %325 = vector.broadcast %cst_137 : f32 to vector<2x128xf32>
    %326 = arith.addf %324, %325 : vector<2x128xf32>
    %cst_138 = arith.constant 5.000000e-01 : f32
    %327 = vector.broadcast %cst_138 : f32 to vector<2x128xf32>
    %328 = arith.mulf %327, %326 : vector<2x128xf32>
    %329 = vector.extract_strided_slice %320 {offsets = [0, 128], sizes = [2, 128], strides = [1, 1]} : vector<2x512xf32> to vector<2x128xf32>
    %cst_139 = arith.constant 5.000000e-01 : f32
    %330 = vector.broadcast %cst_139 : f32 to vector<2x128xf32>
    %331 = arith.mulf %330, %329 : vector<2x128xf32>
    %332 = math.tanh %331 : vector<2x128xf32>
    %cst_140 = arith.constant 1.000000e+00 : f32
    %333 = vector.broadcast %cst_140 : f32 to vector<2x128xf32>
    %334 = arith.addf %332, %333 : vector<2x128xf32>
    %cst_141 = arith.constant 5.000000e-01 : f32
    %335 = vector.broadcast %cst_141 : f32 to vector<2x128xf32>
    %336 = arith.mulf %335, %334 : vector<2x128xf32>
    %337 = vector.extract_strided_slice %320 {offsets = [0, 256], sizes = [2, 128], strides = [1, 1]} : vector<2x512xf32> to vector<2x128xf32>
    %338 = math.tanh %337 : vector<2x128xf32>
    %339 = vector.extract_strided_slice %320 {offsets = [0, 384], sizes = [2, 128], strides = [1, 1]} : vector<2x512xf32> to vector<2x128xf32>
    %cst_142 = arith.constant 5.000000e-01 : f32
    %340 = vector.broadcast %cst_142 : f32 to vector<2x128xf32>
    %341 = arith.mulf %340, %339 : vector<2x128xf32>
    %342 = math.tanh %341 : vector<2x128xf32>
    %cst_143 = arith.constant 1.000000e+00 : f32
    %343 = vector.broadcast %cst_143 : f32 to vector<2x128xf32>
    %344 = arith.addf %342, %343 : vector<2x128xf32>
    %cst_144 = arith.constant 5.000000e-01 : f32
    %345 = vector.broadcast %cst_144 : f32 to vector<2x128xf32>
    %346 = arith.mulf %345, %344 : vector<2x128xf32>
    %347 = arith.mulf %336, %314 : vector<2x128xf32>
    %348 = arith.mulf %328, %338 : vector<2x128xf32>
    %349 = arith.addf %347, %348 : vector<2x128xf32>
    %350 = math.tanh %349 : vector<2x128xf32>
    %351 = arith.mulf %346, %350 : vector<2x128xf32>
    %c0_145 = arith.constant 0 : index
    %c3072_146 = arith.constant 3072 : index
    %352 = vector.load %arg19[%c0_145, %c3072_146] : memref<2x11264xf32, #tpu.memory_space<vmem>>, vector<2x512xf32>
    %353 = arith.truncf %351 : vector<2x128xf32> to vector<2x128xbf16>
    %cst_147 = arith.constant dense<0.000000e+00> : vector<2x512xf32>
    %354 = tpu.matmul %353, %139, %cst_147 {dimension_numbers = #tpu.dot_dimension_numbers<[1], [0], [0], [1], [0, 0, 1, 1], [], []>} : vector<2x128xbf16>, vector<128x512xbf16>, vector<2x512xf32> -> vector<2x512xf32>
    %355 = arith.addf %352, %354 : vector<2x512xf32>
    %356 = vector.extract_strided_slice %355 {offsets = [0, 0], sizes = [2, 128], strides = [1, 1]} : vector<2x512xf32> to vector<2x128xf32>
    %cst_148 = arith.constant 5.000000e-01 : f32
    %357 = vector.broadcast %cst_148 : f32 to vector<2x128xf32>
    %358 = arith.mulf %357, %356 : vector<2x128xf32>
    %359 = math.tanh %358 : vector<2x128xf32>
    %cst_149 = arith.constant 1.000000e+00 : f32
    %360 = vector.broadcast %cst_149 : f32 to vector<2x128xf32>
    %361 = arith.addf %359, %360 : vector<2x128xf32>
    %cst_150 = arith.constant 5.000000e-01 : f32
    %362 = vector.broadcast %cst_150 : f32 to vector<2x128xf32>
    %363 = arith.mulf %362, %361 : vector<2x128xf32>
    %364 = vector.extract_strided_slice %355 {offsets = [0, 128], sizes = [2, 128], strides = [1, 1]} : vector<2x512xf32> to vector<2x128xf32>
    %cst_151 = arith.constant 5.000000e-01 : f32
    %365 = vector.broadcast %cst_151 : f32 to vector<2x128xf32>
    %366 = arith.mulf %365, %364 : vector<2x128xf32>
    %367 = math.tanh %366 : vector<2x128xf32>
    %cst_152 = arith.constant 1.000000e+00 : f32
    %368 = vector.broadcast %cst_152 : f32 to vector<2x128xf32>
    %369 = arith.addf %367, %368 : vector<2x128xf32>
    %cst_153 = arith.constant 5.000000e-01 : f32
    %370 = vector.broadcast %cst_153 : f32 to vector<2x128xf32>
    %371 = arith.mulf %370, %369 : vector<2x128xf32>
    %372 = vector.extract_strided_slice %355 {offsets = [0, 256], sizes = [2, 128], strides = [1, 1]} : vector<2x512xf32> to vector<2x128xf32>
    %373 = math.tanh %372 : vector<2x128xf32>
    %374 = vector.extract_strided_slice %355 {offsets = [0, 384], sizes = [2, 128], strides = [1, 1]} : vector<2x512xf32> to vector<2x128xf32>
    %cst_154 = arith.constant 5.000000e-01 : f32
    %375 = vector.broadcast %cst_154 : f32 to vector<2x128xf32>
    %376 = arith.mulf %375, %374 : vector<2x128xf32>
    %377 = math.tanh %376 : vector<2x128xf32>
    %cst_155 = arith.constant 1.000000e+00 : f32
    %378 = vector.broadcast %cst_155 : f32 to vector<2x128xf32>
    %379 = arith.addf %377, %378 : vector<2x128xf32>
    %cst_156 = arith.constant 5.000000e-01 : f32
    %380 = vector.broadcast %cst_156 : f32 to vector<2x128xf32>
    %381 = arith.mulf %380, %379 : vector<2x128xf32>
    %382 = arith.mulf %371, %349 : vector<2x128xf32>
    %383 = arith.mulf %363, %373 : vector<2x128xf32>
    %384 = arith.addf %382, %383 : vector<2x128xf32>
    %385 = math.tanh %384 : vector<2x128xf32>
    %386 = arith.mulf %381, %385 : vector<2x128xf32>
    %c0_157 = arith.constant 0 : index
    %c3584_158 = arith.constant 3584 : index
    %387 = vector.load %arg19[%c0_157, %c3584_158] : memref<2x11264xf32, #tpu.memory_space<vmem>>, vector<2x512xf32>
    %388 = arith.truncf %386 : vector<2x128xf32> to vector<2x128xbf16>
    %cst_159 = arith.constant dense<0.000000e+00> : vector<2x512xf32>
    %389 = tpu.matmul %388, %139, %cst_159 {dimension_numbers = #tpu.dot_dimension_numbers<[1], [0], [0], [1], [0, 0, 1, 1], [], []>} : vector<2x128xbf16>, vector<128x512xbf16>, vector<2x512xf32> -> vector<2x512xf32>
    %390 = arith.addf %387, %389 : vector<2x512xf32>
    %391 = vector.extract_strided_slice %390 {offsets = [0, 0], sizes = [2, 128], strides = [1, 1]} : vector<2x512xf32> to vector<2x128xf32>
    %cst_160 = arith.constant 5.000000e-01 : f32
    %392 = vector.broadcast %cst_160 : f32 to vector<2x128xf32>
    %393 = arith.mulf %392, %391 : vector<2x128xf32>
    %394 = math.tanh %393 : vector<2x128xf32>
    %cst_161 = arith.constant 1.000000e+00 : f32
    %395 = vector.broadcast %cst_161 : f32 to vector<2x128xf32>
    %396 = arith.addf %394, %395 : vector<2x128xf32>
    %cst_162 = arith.constant 5.000000e-01 : f32
    %397 = vector.broadcast %cst_162 : f32 to vector<2x128xf32>
    %398 = arith.mulf %397, %396 : vector<2x128xf32>
    %399 = vector.extract_strided_slice %390 {offsets = [0, 128], sizes = [2, 128], strides = [1, 1]} : vector<2x512xf32> to vector<2x128xf32>
    %cst_163 = arith.constant 5.000000e-01 : f32
    %400 = vector.broadcast %cst_163 : f32 to vector<2x128xf32>
    %401 = arith.mulf %400, %399 : vector<2x128xf32>
    %402 = math.tanh %401 : vector<2x128xf32>
    %cst_164 = arith.constant 1.000000e+00 : f32
    %403 = vector.broadcast %cst_164 : f32 to vector<2x128xf32>
    %404 = arith.addf %402, %403 : vector<2x128xf32>
    %cst_165 = arith.constant 5.000000e-01 : f32
    %405 = vector.broadcast %cst_165 : f32 to vector<2x128xf32>
    %406 = arith.mulf %405, %404 : vector<2x128xf32>
    %407 = vector.extract_strided_slice %390 {offsets = [0, 256], sizes = [2, 128], strides = [1, 1]} : vector<2x512xf32> to vector<2x128xf32>
    %408 = math.tanh %407 : vector<2x128xf32>
    %409 = vector.extract_strided_slice %390 {offsets = [0, 384], sizes = [2, 128], strides = [1, 1]} : vector<2x512xf32> to vector<2x128xf32>
    %cst_166 = arith.constant 5.000000e-01 : f32
    %410 = vector.broadcast %cst_166 : f32 to vector<2x128xf32>
    %411 = arith.mulf %410, %409 : vector<2x128xf32>
    %412 = math.tanh %411 : vector<2x128xf32>
    %cst_167 = arith.constant 1.000000e+00 : f32
    %413 = vector.broadcast %cst_167 : f32 to vector<2x128xf32>
    %414 = arith.addf %412, %413 : vector<2x128xf32>
    %cst_168 = arith.constant 5.000000e-01 : f32
    %415 = vector.broadcast %cst_168 : f32 to vector<2x128xf32>
    %416 = arith.mulf %415, %414 : vector<2x128xf32>
    %417 = arith.mulf %406, %384 : vector<2x128xf32>
    %418 = arith.mulf %398, %408 : vector<2x128xf32>
    %419 = arith.addf %417, %418 : vector<2x128xf32>
    %420 = math.tanh %419 : vector<2x128xf32>
    %421 = arith.mulf %416, %420 : vector<2x128xf32>
    %c0_169 = arith.constant 0 : index
    %c4096_170 = arith.constant 4096 : index
    %422 = vector.load %arg19[%c0_169, %c4096_170] : memref<2x11264xf32, #tpu.memory_space<vmem>>, vector<2x512xf32>
    %423 = arith.truncf %421 : vector<2x128xf32> to vector<2x128xbf16>
    %cst_171 = arith.constant dense<0.000000e+00> : vector<2x512xf32>
    %424 = tpu.matmul %423, %139, %cst_171 {dimension_numbers = #tpu.dot_dimension_numbers<[1], [0], [0], [1], [0, 0, 1, 1], [], []>} : vector<2x128xbf16>, vector<128x512xbf16>, vector<2x512xf32> -> vector<2x512xf32>
    %425 = arith.addf %422, %424 : vector<2x512xf32>
    %426 = vector.extract_strided_slice %425 {offsets = [0, 0], sizes = [2, 128], strides = [1, 1]} : vector<2x512xf32> to vector<2x128xf32>
    %cst_172 = arith.constant 5.000000e-01 : f32
    %427 = vector.broadcast %cst_172 : f32 to vector<2x128xf32>
    %428 = arith.mulf %427, %426 : vector<2x128xf32>
    %429 = math.tanh %428 : vector<2x128xf32>
    %cst_173 = arith.constant 1.000000e+00 : f32
    %430 = vector.broadcast %cst_173 : f32 to vector<2x128xf32>
    %431 = arith.addf %429, %430 : vector<2x128xf32>
    %cst_174 = arith.constant 5.000000e-01 : f32
    %432 = vector.broadcast %cst_174 : f32 to vector<2x128xf32>
    %433 = arith.mulf %432, %431 : vector<2x128xf32>
    %434 = vector.extract_strided_slice %425 {offsets = [0, 128], sizes = [2, 128], strides = [1, 1]} : vector<2x512xf32> to vector<2x128xf32>
    %cst_175 = arith.constant 5.000000e-01 : f32
    %435 = vector.broadcast %cst_175 : f32 to vector<2x128xf32>
    %436 = arith.mulf %435, %434 : vector<2x128xf32>
    %437 = math.tanh %436 : vector<2x128xf32>
    %cst_176 = arith.constant 1.000000e+00 : f32
    %438 = vector.broadcast %cst_176 : f32 to vector<2x128xf32>
    %439 = arith.addf %437, %438 : vector<2x128xf32>
    %cst_177 = arith.constant 5.000000e-01 : f32
    %440 = vector.broadcast %cst_177 : f32 to vector<2x128xf32>
    %441 = arith.mulf %440, %439 : vector<2x128xf32>
    %442 = vector.extract_strided_slice %425 {offsets = [0, 256], sizes = [2, 128], strides = [1, 1]} : vector<2x512xf32> to vector<2x128xf32>
    %443 = math.tanh %442 : vector<2x128xf32>
    %444 = vector.extract_strided_slice %425 {offsets = [0, 384], sizes = [2, 128], strides = [1, 1]} : vector<2x512xf32> to vector<2x128xf32>
    %cst_178 = arith.constant 5.000000e-01 : f32
    %445 = vector.broadcast %cst_178 : f32 to vector<2x128xf32>
    %446 = arith.mulf %445, %444 : vector<2x128xf32>
    %447 = math.tanh %446 : vector<2x128xf32>
    %cst_179 = arith.constant 1.000000e+00 : f32
    %448 = vector.broadcast %cst_179 : f32 to vector<2x128xf32>
    %449 = arith.addf %447, %448 : vector<2x128xf32>
    %cst_180 = arith.constant 5.000000e-01 : f32
    %450 = vector.broadcast %cst_180 : f32 to vector<2x128xf32>
    %451 = arith.mulf %450, %449 : vector<2x128xf32>
    %452 = arith.mulf %441, %419 : vector<2x128xf32>
    %453 = arith.mulf %433, %443 : vector<2x128xf32>
    %454 = arith.addf %452, %453 : vector<2x128xf32>
    %455 = math.tanh %454 : vector<2x128xf32>
    %456 = arith.mulf %451, %455 : vector<2x128xf32>
    %c0_181 = arith.constant 0 : index
    %c4608_182 = arith.constant 4608 : index
    %457 = vector.load %arg19[%c0_181, %c4608_182] : memref<2x11264xf32, #tpu.memory_space<vmem>>, vector<2x512xf32>
    %458 = arith.truncf %456 : vector<2x128xf32> to vector<2x128xbf16>
    %cst_183 = arith.constant dense<0.000000e+00> : vector<2x512xf32>
    %459 = tpu.matmul %458, %139, %cst_183 {dimension_numbers = #tpu.dot_dimension_numbers<[1], [0], [0], [1], [0, 0, 1, 1], [], []>} : vector<2x128xbf16>, vector<128x512xbf16>, vector<2x512xf32> -> vector<2x512xf32>
    %460 = arith.addf %457, %459 : vector<2x512xf32>
    %461 = vector.extract_strided_slice %460 {offsets = [0, 0], sizes = [2, 128], strides = [1, 1]} : vector<2x512xf32> to vector<2x128xf32>
    %cst_184 = arith.constant 5.000000e-01 : f32
    %462 = vector.broadcast %cst_184 : f32 to vector<2x128xf32>
    %463 = arith.mulf %462, %461 : vector<2x128xf32>
    %464 = math.tanh %463 : vector<2x128xf32>
    %cst_185 = arith.constant 1.000000e+00 : f32
    %465 = vector.broadcast %cst_185 : f32 to vector<2x128xf32>
    %466 = arith.addf %464, %465 : vector<2x128xf32>
    %cst_186 = arith.constant 5.000000e-01 : f32
    %467 = vector.broadcast %cst_186 : f32 to vector<2x128xf32>
    %468 = arith.mulf %467, %466 : vector<2x128xf32>
    %469 = vector.extract_strided_slice %460 {offsets = [0, 128], sizes = [2, 128], strides = [1, 1]} : vector<2x512xf32> to vector<2x128xf32>
    %cst_187 = arith.constant 5.000000e-01 : f32
    %470 = vector.broadcast %cst_187 : f32 to vector<2x128xf32>
    %471 = arith.mulf %470, %469 : vector<2x128xf32>
    %472 = math.tanh %471 : vector<2x128xf32>
    %cst_188 = arith.constant 1.000000e+00 : f32
    %473 = vector.broadcast %cst_188 : f32 to vector<2x128xf32>
    %474 = arith.addf %472, %473 : vector<2x128xf32>
    %cst_189 = arith.constant 5.000000e-01 : f32
    %475 = vector.broadcast %cst_189 : f32 to vector<2x128xf32>
    %476 = arith.mulf %475, %474 : vector<2x128xf32>
    %477 = vector.extract_strided_slice %460 {offsets = [0, 256], sizes = [2, 128], strides = [1, 1]} : vector<2x512xf32> to vector<2x128xf32>
    %478 = math.tanh %477 : vector<2x128xf32>
    %479 = vector.extract_strided_slice %460 {offsets = [0, 384], sizes = [2, 128], strides = [1, 1]} : vector<2x512xf32> to vector<2x128xf32>
    %cst_190 = arith.constant 5.000000e-01 : f32
    %480 = vector.broadcast %cst_190 : f32 to vector<2x128xf32>
    %481 = arith.mulf %480, %479 : vector<2x128xf32>
    %482 = math.tanh %481 : vector<2x128xf32>
    %cst_191 = arith.constant 1.000000e+00 : f32
    %483 = vector.broadcast %cst_191 : f32 to vector<2x128xf32>
    %484 = arith.addf %482, %483 : vector<2x128xf32>
    %cst_192 = arith.constant 5.000000e-01 : f32
    %485 = vector.broadcast %cst_192 : f32 to vector<2x128xf32>
    %486 = arith.mulf %485, %484 : vector<2x128xf32>
    %487 = arith.mulf %476, %454 : vector<2x128xf32>
    %488 = arith.mulf %468, %478 : vector<2x128xf32>
    %489 = arith.addf %487, %488 : vector<2x128xf32>
    %490 = math.tanh %489 : vector<2x128xf32>
    %491 = arith.mulf %486, %490 : vector<2x128xf32>
    %c0_193 = arith.constant 0 : index
    %c5120_194 = arith.constant 5120 : index
    %492 = vector.load %arg19[%c0_193, %c5120_194] : memref<2x11264xf32, #tpu.memory_space<vmem>>, vector<2x512xf32>
    %493 = arith.truncf %491 : vector<2x128xf32> to vector<2x128xbf16>
    %cst_195 = arith.constant dense<0.000000e+00> : vector<2x512xf32>
    %494 = tpu.matmul %493, %139, %cst_195 {dimension_numbers = #tpu.dot_dimension_numbers<[1], [0], [0], [1], [0, 0, 1, 1], [], []>} : vector<2x128xbf16>, vector<128x512xbf16>, vector<2x512xf32> -> vector<2x512xf32>
    %495 = arith.addf %492, %494 : vector<2x512xf32>
    %496 = vector.extract_strided_slice %495 {offsets = [0, 0], sizes = [2, 128], strides = [1, 1]} : vector<2x512xf32> to vector<2x128xf32>
    %cst_196 = arith.constant 5.000000e-01 : f32
    %497 = vector.broadcast %cst_196 : f32 to vector<2x128xf32>
    %498 = arith.mulf %497, %496 : vector<2x128xf32>
    %499 = math.tanh %498 : vector<2x128xf32>
    %cst_197 = arith.constant 1.000000e+00 : f32
    %500 = vector.broadcast %cst_197 : f32 to vector<2x128xf32>
    %501 = arith.addf %499, %500 : vector<2x128xf32>
    %cst_198 = arith.constant 5.000000e-01 : f32
    %502 = vector.broadcast %cst_198 : f32 to vector<2x128xf32>
    %503 = arith.mulf %502, %501 : vector<2x128xf32>
    %504 = vector.extract_strided_slice %495 {offsets = [0, 128], sizes = [2, 128], strides = [1, 1]} : vector<2x512xf32> to vector<2x128xf32>
    %cst_199 = arith.constant 5.000000e-01 : f32
    %505 = vector.broadcast %cst_199 : f32 to vector<2x128xf32>
    %506 = arith.mulf %505, %504 : vector<2x128xf32>
    %507 = math.tanh %506 : vector<2x128xf32>
    %cst_200 = arith.constant 1.000000e+00 : f32
    %508 = vector.broadcast %cst_200 : f32 to vector<2x128xf32>
    %509 = arith.addf %507, %508 : vector<2x128xf32>
    %cst_201 = arith.constant 5.000000e-01 : f32
    %510 = vector.broadcast %cst_201 : f32 to vector<2x128xf32>
    %511 = arith.mulf %510, %509 : vector<2x128xf32>
    %512 = vector.extract_strided_slice %495 {offsets = [0, 256], sizes = [2, 128], strides = [1, 1]} : vector<2x512xf32> to vector<2x128xf32>
    %513 = math.tanh %512 : vector<2x128xf32>
    %514 = vector.extract_strided_slice %495 {offsets = [0, 384], sizes = [2, 128], strides = [1, 1]} : vector<2x512xf32> to vector<2x128xf32>
    %cst_202 = arith.constant 5.000000e-01 : f32
    %515 = vector.broadcast %cst_202 : f32 to vector<2x128xf32>
    %516 = arith.mulf %515, %514 : vector<2x128xf32>
    %517 = math.tanh %516 : vector<2x128xf32>
    %cst_203 = arith.constant 1.000000e+00 : f32
    %518 = vector.broadcast %cst_203 : f32 to vector<2x128xf32>
    %519 = arith.addf %517, %518 : vector<2x128xf32>
    %cst_204 = arith.constant 5.000000e-01 : f32
    %520 = vector.broadcast %cst_204 : f32 to vector<2x128xf32>
    %521 = arith.mulf %520, %519 : vector<2x128xf32>
    %522 = arith.mulf %511, %489 : vector<2x128xf32>
    %523 = arith.mulf %503, %513 : vector<2x128xf32>
    %524 = arith.addf %522, %523 : vector<2x128xf32>
    %525 = math.tanh %524 : vector<2x128xf32>
    %526 = arith.mulf %521, %525 : vector<2x128xf32>
    %c0_205 = arith.constant 0 : index
    %c5632_206 = arith.constant 5632 : index
    %527 = vector.load %arg19[%c0_205, %c5632_206] : memref<2x11264xf32, #tpu.memory_space<vmem>>, vector<2x512xf32>
    %528 = arith.truncf %526 : vector<2x128xf32> to vector<2x128xbf16>
    %cst_207 = arith.constant dense<0.000000e+00> : vector<2x512xf32>
    %529 = tpu.matmul %528, %139, %cst_207 {dimension_numbers = #tpu.dot_dimension_numbers<[1], [0], [0], [1], [0, 0, 1, 1], [], []>} : vector<2x128xbf16>, vector<128x512xbf16>, vector<2x512xf32> -> vector<2x512xf32>
    %530 = arith.addf %527, %529 : vector<2x512xf32>
    %531 = vector.extract_strided_slice %530 {offsets = [0, 0], sizes = [2, 128], strides = [1, 1]} : vector<2x512xf32> to vector<2x128xf32>
    %cst_208 = arith.constant 5.000000e-01 : f32
    %532 = vector.broadcast %cst_208 : f32 to vector<2x128xf32>
    %533 = arith.mulf %532, %531 : vector<2x128xf32>
    %534 = math.tanh %533 : vector<2x128xf32>
    %cst_209 = arith.constant 1.000000e+00 : f32
    %535 = vector.broadcast %cst_209 : f32 to vector<2x128xf32>
    %536 = arith.addf %534, %535 : vector<2x128xf32>
    %cst_210 = arith.constant 5.000000e-01 : f32
    %537 = vector.broadcast %cst_210 : f32 to vector<2x128xf32>
    %538 = arith.mulf %537, %536 : vector<2x128xf32>
    %539 = vector.extract_strided_slice %530 {offsets = [0, 128], sizes = [2, 128], strides = [1, 1]} : vector<2x512xf32> to vector<2x128xf32>
    %cst_211 = arith.constant 5.000000e-01 : f32
    %540 = vector.broadcast %cst_211 : f32 to vector<2x128xf32>
    %541 = arith.mulf %540, %539 : vector<2x128xf32>
    %542 = math.tanh %541 : vector<2x128xf32>
    %cst_212 = arith.constant 1.000000e+00 : f32
    %543 = vector.broadcast %cst_212 : f32 to vector<2x128xf32>
    %544 = arith.addf %542, %543 : vector<2x128xf32>
    %cst_213 = arith.constant 5.000000e-01 : f32
    %545 = vector.broadcast %cst_213 : f32 to vector<2x128xf32>
    %546 = arith.mulf %545, %544 : vector<2x128xf32>
    %547 = vector.extract_strided_slice %530 {offsets = [0, 256], sizes = [2, 128], strides = [1, 1]} : vector<2x512xf32> to vector<2x128xf32>
    %548 = math.tanh %547 : vector<2x128xf32>
    %549 = vector.extract_strided_slice %530 {offsets = [0, 384], sizes = [2, 128], strides = [1, 1]} : vector<2x512xf32> to vector<2x128xf32>
    %cst_214 = arith.constant 5.000000e-01 : f32
    %550 = vector.broadcast %cst_214 : f32 to vector<2x128xf32>
    %551 = arith.mulf %550, %549 : vector<2x128xf32>
    %552 = math.tanh %551 : vector<2x128xf32>
    %cst_215 = arith.constant 1.000000e+00 : f32
    %553 = vector.broadcast %cst_215 : f32 to vector<2x128xf32>
    %554 = arith.addf %552, %553 : vector<2x128xf32>
    %cst_216 = arith.constant 5.000000e-01 : f32
    %555 = vector.broadcast %cst_216 : f32 to vector<2x128xf32>
    %556 = arith.mulf %555, %554 : vector<2x128xf32>
    %557 = arith.mulf %546, %524 : vector<2x128xf32>
    %558 = arith.mulf %538, %548 : vector<2x128xf32>
    %559 = arith.addf %557, %558 : vector<2x128xf32>
    %560 = math.tanh %559 : vector<2x128xf32>
    %561 = arith.mulf %556, %560 : vector<2x128xf32>
    %c0_217 = arith.constant 0 : index
    %c6144_218 = arith.constant 6144 : index
    %562 = vector.load %arg19[%c0_217, %c6144_218] : memref<2x11264xf32, #tpu.memory_space<vmem>>, vector<2x512xf32>
    %563 = arith.truncf %561 : vector<2x128xf32> to vector<2x128xbf16>
    %cst_219 = arith.constant dense<0.000000e+00> : vector<2x512xf32>
    %564 = tpu.matmul %563, %139, %cst_219 {dimension_numbers = #tpu.dot_dimension_numbers<[1], [0], [0], [1], [0, 0, 1, 1], [], []>} : vector<2x128xbf16>, vector<128x512xbf16>, vector<2x512xf32> -> vector<2x512xf32>
    %565 = arith.addf %562, %564 : vector<2x512xf32>
    %566 = vector.extract_strided_slice %565 {offsets = [0, 0], sizes = [2, 128], strides = [1, 1]} : vector<2x512xf32> to vector<2x128xf32>
    %cst_220 = arith.constant 5.000000e-01 : f32
    %567 = vector.broadcast %cst_220 : f32 to vector<2x128xf32>
    %568 = arith.mulf %567, %566 : vector<2x128xf32>
    %569 = math.tanh %568 : vector<2x128xf32>
    %cst_221 = arith.constant 1.000000e+00 : f32
    %570 = vector.broadcast %cst_221 : f32 to vector<2x128xf32>
    %571 = arith.addf %569, %570 : vector<2x128xf32>
    %cst_222 = arith.constant 5.000000e-01 : f32
    %572 = vector.broadcast %cst_222 : f32 to vector<2x128xf32>
    %573 = arith.mulf %572, %571 : vector<2x128xf32>
    %574 = vector.extract_strided_slice %565 {offsets = [0, 128], sizes = [2, 128], strides = [1, 1]} : vector<2x512xf32> to vector<2x128xf32>
    %cst_223 = arith.constant 5.000000e-01 : f32
    %575 = vector.broadcast %cst_223 : f32 to vector<2x128xf32>
    %576 = arith.mulf %575, %574 : vector<2x128xf32>
    %577 = math.tanh %576 : vector<2x128xf32>
    %cst_224 = arith.constant 1.000000e+00 : f32
    %578 = vector.broadcast %cst_224 : f32 to vector<2x128xf32>
    %579 = arith.addf %577, %578 : vector<2x128xf32>
    %cst_225 = arith.constant 5.000000e-01 : f32
    %580 = vector.broadcast %cst_225 : f32 to vector<2x128xf32>
    %581 = arith.mulf %580, %579 : vector<2x128xf32>
    %582 = vector.extract_strided_slice %565 {offsets = [0, 256], sizes = [2, 128], strides = [1, 1]} : vector<2x512xf32> to vector<2x128xf32>
    %583 = math.tanh %582 : vector<2x128xf32>
    %584 = vector.extract_strided_slice %565 {offsets = [0, 384], sizes = [2, 128], strides = [1, 1]} : vector<2x512xf32> to vector<2x128xf32>
    %cst_226 = arith.constant 5.000000e-01 : f32
    %585 = vector.broadcast %cst_226 : f32 to vector<2x128xf32>
    %586 = arith.mulf %585, %584 : vector<2x128xf32>
    %587 = math.tanh %586 : vector<2x128xf32>
    %cst_227 = arith.constant 1.000000e+00 : f32
    %588 = vector.broadcast %cst_227 : f32 to vector<2x128xf32>
    %589 = arith.addf %587, %588 : vector<2x128xf32>
    %cst_228 = arith.constant 5.000000e-01 : f32
    %590 = vector.broadcast %cst_228 : f32 to vector<2x128xf32>
    %591 = arith.mulf %590, %589 : vector<2x128xf32>
    %592 = arith.mulf %581, %559 : vector<2x128xf32>
    %593 = arith.mulf %573, %583 : vector<2x128xf32>
    %594 = arith.addf %592, %593 : vector<2x128xf32>
    %595 = math.tanh %594 : vector<2x128xf32>
    %596 = arith.mulf %591, %595 : vector<2x128xf32>
    %c0_229 = arith.constant 0 : index
    %c6656_230 = arith.constant 6656 : index
    %597 = vector.load %arg19[%c0_229, %c6656_230] : memref<2x11264xf32, #tpu.memory_space<vmem>>, vector<2x512xf32>
    %598 = arith.truncf %596 : vector<2x128xf32> to vector<2x128xbf16>
    %cst_231 = arith.constant dense<0.000000e+00> : vector<2x512xf32>
    %599 = tpu.matmul %598, %139, %cst_231 {dimension_numbers = #tpu.dot_dimension_numbers<[1], [0], [0], [1], [0, 0, 1, 1], [], []>} : vector<2x128xbf16>, vector<128x512xbf16>, vector<2x512xf32> -> vector<2x512xf32>
    %600 = arith.addf %597, %599 : vector<2x512xf32>
    %601 = vector.extract_strided_slice %600 {offsets = [0, 0], sizes = [2, 128], strides = [1, 1]} : vector<2x512xf32> to vector<2x128xf32>
    %cst_232 = arith.constant 5.000000e-01 : f32
    %602 = vector.broadcast %cst_232 : f32 to vector<2x128xf32>
    %603 = arith.mulf %602, %601 : vector<2x128xf32>
    %604 = math.tanh %603 : vector<2x128xf32>
    %cst_233 = arith.constant 1.000000e+00 : f32
    %605 = vector.broadcast %cst_233 : f32 to vector<2x128xf32>
    %606 = arith.addf %604, %605 : vector<2x128xf32>
    %cst_234 = arith.constant 5.000000e-01 : f32
    %607 = vector.broadcast %cst_234 : f32 to vector<2x128xf32>
    %608 = arith.mulf %607, %606 : vector<2x128xf32>
    %609 = vector.extract_strided_slice %600 {offsets = [0, 128], sizes = [2, 128], strides = [1, 1]} : vector<2x512xf32> to vector<2x128xf32>
    %cst_235 = arith.constant 5.000000e-01 : f32
    %610 = vector.broadcast %cst_235 : f32 to vector<2x128xf32>
    %611 = arith.mulf %610, %609 : vector<2x128xf32>
    %612 = math.tanh %611 : vector<2x128xf32>
    %cst_236 = arith.constant 1.000000e+00 : f32
    %613 = vector.broadcast %cst_236 : f32 to vector<2x128xf32>
    %614 = arith.addf %612, %613 : vector<2x128xf32>
    %cst_237 = arith.constant 5.000000e-01 : f32
    %615 = vector.broadcast %cst_237 : f32 to vector<2x128xf32>
    %616 = arith.mulf %615, %614 : vector<2x128xf32>
    %617 = vector.extract_strided_slice %600 {offsets = [0, 256], sizes = [2, 128], strides = [1, 1]} : vector<2x512xf32> to vector<2x128xf32>
    %618 = math.tanh %617 : vector<2x128xf32>
    %619 = vector.extract_strided_slice %600 {offsets = [0, 384], sizes = [2, 128], strides = [1, 1]} : vector<2x512xf32> to vector<2x128xf32>
    %cst_238 = arith.constant 5.000000e-01 : f32
    %620 = vector.broadcast %cst_238 : f32 to vector<2x128xf32>
    %621 = arith.mulf %620, %619 : vector<2x128xf32>
    %622 = math.tanh %621 : vector<2x128xf32>
    %cst_239 = arith.constant 1.000000e+00 : f32
    %623 = vector.broadcast %cst_239 : f32 to vector<2x128xf32>
    %624 = arith.addf %622, %623 : vector<2x128xf32>
    %cst_240 = arith.constant 5.000000e-01 : f32
    %625 = vector.broadcast %cst_240 : f32 to vector<2x128xf32>
    %626 = arith.mulf %625, %624 : vector<2x128xf32>
    %627 = arith.mulf %616, %594 : vector<2x128xf32>
    %628 = arith.mulf %608, %618 : vector<2x128xf32>
    %629 = arith.addf %627, %628 : vector<2x128xf32>
    %630 = math.tanh %629 : vector<2x128xf32>
    %631 = arith.mulf %626, %630 : vector<2x128xf32>
    %c0_241 = arith.constant 0 : index
    %c7168_242 = arith.constant 7168 : index
    %632 = vector.load %arg19[%c0_241, %c7168_242] : memref<2x11264xf32, #tpu.memory_space<vmem>>, vector<2x512xf32>
    %633 = arith.truncf %631 : vector<2x128xf32> to vector<2x128xbf16>
    %cst_243 = arith.constant dense<0.000000e+00> : vector<2x512xf32>
    %634 = tpu.matmul %633, %139, %cst_243 {dimension_numbers = #tpu.dot_dimension_numbers<[1], [0], [0], [1], [0, 0, 1, 1], [], []>} : vector<2x128xbf16>, vector<128x512xbf16>, vector<2x512xf32> -> vector<2x512xf32>
    %635 = arith.addf %632, %634 : vector<2x512xf32>
    %636 = vector.extract_strided_slice %635 {offsets = [0, 0], sizes = [2, 128], strides = [1, 1]} : vector<2x512xf32> to vector<2x128xf32>
    %cst_244 = arith.constant 5.000000e-01 : f32
    %637 = vector.broadcast %cst_244 : f32 to vector<2x128xf32>
    %638 = arith.mulf %637, %636 : vector<2x128xf32>
    %639 = math.tanh %638 : vector<2x128xf32>
    %cst_245 = arith.constant 1.000000e+00 : f32
    %640 = vector.broadcast %cst_245 : f32 to vector<2x128xf32>
    %641 = arith.addf %639, %640 : vector<2x128xf32>
    %cst_246 = arith.constant 5.000000e-01 : f32
    %642 = vector.broadcast %cst_246 : f32 to vector<2x128xf32>
    %643 = arith.mulf %642, %641 : vector<2x128xf32>
    %644 = vector.extract_strided_slice %635 {offsets = [0, 128], sizes = [2, 128], strides = [1, 1]} : vector<2x512xf32> to vector<2x128xf32>
    %cst_247 = arith.constant 5.000000e-01 : f32
    %645 = vector.broadcast %cst_247 : f32 to vector<2x128xf32>
    %646 = arith.mulf %645, %644 : vector<2x128xf32>
    %647 = math.tanh %646 : vector<2x128xf32>
    %cst_248 = arith.constant 1.000000e+00 : f32
    %648 = vector.broadcast %cst_248 : f32 to vector<2x128xf32>
    %649 = arith.addf %647, %648 : vector<2x128xf32>
    %cst_249 = arith.constant 5.000000e-01 : f32
    %650 = vector.broadcast %cst_249 : f32 to vector<2x128xf32>
    %651 = arith.mulf %650, %649 : vector<2x128xf32>
    %652 = vector.extract_strided_slice %635 {offsets = [0, 256], sizes = [2, 128], strides = [1, 1]} : vector<2x512xf32> to vector<2x128xf32>
    %653 = math.tanh %652 : vector<2x128xf32>
    %654 = vector.extract_strided_slice %635 {offsets = [0, 384], sizes = [2, 128], strides = [1, 1]} : vector<2x512xf32> to vector<2x128xf32>
    %cst_250 = arith.constant 5.000000e-01 : f32
    %655 = vector.broadcast %cst_250 : f32 to vector<2x128xf32>
    %656 = arith.mulf %655, %654 : vector<2x128xf32>
    %657 = math.tanh %656 : vector<2x128xf32>
    %cst_251 = arith.constant 1.000000e+00 : f32
    %658 = vector.broadcast %cst_251 : f32 to vector<2x128xf32>
    %659 = arith.addf %657, %658 : vector<2x128xf32>
    %cst_252 = arith.constant 5.000000e-01 : f32
    %660 = vector.broadcast %cst_252 : f32 to vector<2x128xf32>
    %661 = arith.mulf %660, %659 : vector<2x128xf32>
    %662 = arith.mulf %651, %629 : vector<2x128xf32>
    %663 = arith.mulf %643, %653 : vector<2x128xf32>
    %664 = arith.addf %662, %663 : vector<2x128xf32>
    %665 = math.tanh %664 : vector<2x128xf32>
    %666 = arith.mulf %661, %665 : vector<2x128xf32>
    %c0_253 = arith.constant 0 : index
    %c7680_254 = arith.constant 7680 : index
    %667 = vector.load %arg19[%c0_253, %c7680_254] : memref<2x11264xf32, #tpu.memory_space<vmem>>, vector<2x512xf32>
    %668 = arith.truncf %666 : vector<2x128xf32> to vector<2x128xbf16>
    %cst_255 = arith.constant dense<0.000000e+00> : vector<2x512xf32>
    %669 = tpu.matmul %668, %139, %cst_255 {dimension_numbers = #tpu.dot_dimension_numbers<[1], [0], [0], [1], [0, 0, 1, 1], [], []>} : vector<2x128xbf16>, vector<128x512xbf16>, vector<2x512xf32> -> vector<2x512xf32>
    %670 = arith.addf %667, %669 : vector<2x512xf32>
    %671 = vector.extract_strided_slice %670 {offsets = [0, 0], sizes = [2, 128], strides = [1, 1]} : vector<2x512xf32> to vector<2x128xf32>
    %cst_256 = arith.constant 5.000000e-01 : f32
    %672 = vector.broadcast %cst_256 : f32 to vector<2x128xf32>
    %673 = arith.mulf %672, %671 : vector<2x128xf32>
    %674 = math.tanh %673 : vector<2x128xf32>
    %cst_257 = arith.constant 1.000000e+00 : f32
    %675 = vector.broadcast %cst_257 : f32 to vector<2x128xf32>
    %676 = arith.addf %674, %675 : vector<2x128xf32>
    %cst_258 = arith.constant 5.000000e-01 : f32
    %677 = vector.broadcast %cst_258 : f32 to vector<2x128xf32>
    %678 = arith.mulf %677, %676 : vector<2x128xf32>
    %679 = vector.extract_strided_slice %670 {offsets = [0, 128], sizes = [2, 128], strides = [1, 1]} : vector<2x512xf32> to vector<2x128xf32>
    %cst_259 = arith.constant 5.000000e-01 : f32
    %680 = vector.broadcast %cst_259 : f32 to vector<2x128xf32>
    %681 = arith.mulf %680, %679 : vector<2x128xf32>
    %682 = math.tanh %681 : vector<2x128xf32>
    %cst_260 = arith.constant 1.000000e+00 : f32
    %683 = vector.broadcast %cst_260 : f32 to vector<2x128xf32>
    %684 = arith.addf %682, %683 : vector<2x128xf32>
    %cst_261 = arith.constant 5.000000e-01 : f32
    %685 = vector.broadcast %cst_261 : f32 to vector<2x128xf32>
    %686 = arith.mulf %685, %684 : vector<2x128xf32>
    %687 = vector.extract_strided_slice %670 {offsets = [0, 256], sizes = [2, 128], strides = [1, 1]} : vector<2x512xf32> to vector<2x128xf32>
    %688 = math.tanh %687 : vector<2x128xf32>
    %689 = vector.extract_strided_slice %670 {offsets = [0, 384], sizes = [2, 128], strides = [1, 1]} : vector<2x512xf32> to vector<2x128xf32>
    %cst_262 = arith.constant 5.000000e-01 : f32
    %690 = vector.broadcast %cst_262 : f32 to vector<2x128xf32>
    %691 = arith.mulf %690, %689 : vector<2x128xf32>
    %692 = math.tanh %691 : vector<2x128xf32>
    %cst_263 = arith.constant 1.000000e+00 : f32
    %693 = vector.broadcast %cst_263 : f32 to vector<2x128xf32>
    %694 = arith.addf %692, %693 : vector<2x128xf32>
    %cst_264 = arith.constant 5.000000e-01 : f32
    %695 = vector.broadcast %cst_264 : f32 to vector<2x128xf32>
    %696 = arith.mulf %695, %694 : vector<2x128xf32>
    %697 = arith.mulf %686, %664 : vector<2x128xf32>
    %698 = arith.mulf %678, %688 : vector<2x128xf32>
    %699 = arith.addf %697, %698 : vector<2x128xf32>
    %700 = math.tanh %699 : vector<2x128xf32>
    %701 = arith.mulf %696, %700 : vector<2x128xf32>
    %c0_265 = arith.constant 0 : index
    %c8192_266 = arith.constant 8192 : index
    %702 = vector.load %arg19[%c0_265, %c8192_266] : memref<2x11264xf32, #tpu.memory_space<vmem>>, vector<2x512xf32>
    %703 = arith.truncf %701 : vector<2x128xf32> to vector<2x128xbf16>
    %cst_267 = arith.constant dense<0.000000e+00> : vector<2x512xf32>
    %704 = tpu.matmul %703, %139, %cst_267 {dimension_numbers = #tpu.dot_dimension_numbers<[1], [0], [0], [1], [0, 0, 1, 1], [], []>} : vector<2x128xbf16>, vector<128x512xbf16>, vector<2x512xf32> -> vector<2x512xf32>
    %705 = arith.addf %702, %704 : vector<2x512xf32>
    %706 = vector.extract_strided_slice %705 {offsets = [0, 0], sizes = [2, 128], strides = [1, 1]} : vector<2x512xf32> to vector<2x128xf32>
    %cst_268 = arith.constant 5.000000e-01 : f32
    %707 = vector.broadcast %cst_268 : f32 to vector<2x128xf32>
    %708 = arith.mulf %707, %706 : vector<2x128xf32>
    %709 = math.tanh %708 : vector<2x128xf32>
    %cst_269 = arith.constant 1.000000e+00 : f32
    %710 = vector.broadcast %cst_269 : f32 to vector<2x128xf32>
    %711 = arith.addf %709, %710 : vector<2x128xf32>
    %cst_270 = arith.constant 5.000000e-01 : f32
    %712 = vector.broadcast %cst_270 : f32 to vector<2x128xf32>
    %713 = arith.mulf %712, %711 : vector<2x128xf32>
    %714 = vector.extract_strided_slice %705 {offsets = [0, 128], sizes = [2, 128], strides = [1, 1]} : vector<2x512xf32> to vector<2x128xf32>
    %cst_271 = arith.constant 5.000000e-01 : f32
    %715 = vector.broadcast %cst_271 : f32 to vector<2x128xf32>
    %716 = arith.mulf %715, %714 : vector<2x128xf32>
    %717 = math.tanh %716 : vector<2x128xf32>
    %cst_272 = arith.constant 1.000000e+00 : f32
    %718 = vector.broadcast %cst_272 : f32 to vector<2x128xf32>
    %719 = arith.addf %717, %718 : vector<2x128xf32>
    %cst_273 = arith.constant 5.000000e-01 : f32
    %720 = vector.broadcast %cst_273 : f32 to vector<2x128xf32>
    %721 = arith.mulf %720, %719 : vector<2x128xf32>
    %722 = vector.extract_strided_slice %705 {offsets = [0, 256], sizes = [2, 128], strides = [1, 1]} : vector<2x512xf32> to vector<2x128xf32>
    %723 = math.tanh %722 : vector<2x128xf32>
    %724 = vector.extract_strided_slice %705 {offsets = [0, 384], sizes = [2, 128], strides = [1, 1]} : vector<2x512xf32> to vector<2x128xf32>
    %cst_274 = arith.constant 5.000000e-01 : f32
    %725 = vector.broadcast %cst_274 : f32 to vector<2x128xf32>
    %726 = arith.mulf %725, %724 : vector<2x128xf32>
    %727 = math.tanh %726 : vector<2x128xf32>
    %cst_275 = arith.constant 1.000000e+00 : f32
    %728 = vector.broadcast %cst_275 : f32 to vector<2x128xf32>
    %729 = arith.addf %727, %728 : vector<2x128xf32>
    %cst_276 = arith.constant 5.000000e-01 : f32
    %730 = vector.broadcast %cst_276 : f32 to vector<2x128xf32>
    %731 = arith.mulf %730, %729 : vector<2x128xf32>
    %732 = arith.mulf %721, %699 : vector<2x128xf32>
    %733 = arith.mulf %713, %723 : vector<2x128xf32>
    %734 = arith.addf %732, %733 : vector<2x128xf32>
    %735 = math.tanh %734 : vector<2x128xf32>
    %736 = arith.mulf %731, %735 : vector<2x128xf32>
    %c0_277 = arith.constant 0 : index
    %c8704_278 = arith.constant 8704 : index
    %737 = vector.load %arg19[%c0_277, %c8704_278] : memref<2x11264xf32, #tpu.memory_space<vmem>>, vector<2x512xf32>
    %738 = arith.truncf %736 : vector<2x128xf32> to vector<2x128xbf16>
    %cst_279 = arith.constant dense<0.000000e+00> : vector<2x512xf32>
    %739 = tpu.matmul %738, %139, %cst_279 {dimension_numbers = #tpu.dot_dimension_numbers<[1], [0], [0], [1], [0, 0, 1, 1], [], []>} : vector<2x128xbf16>, vector<128x512xbf16>, vector<2x512xf32> -> vector<2x512xf32>
    %740 = arith.addf %737, %739 : vector<2x512xf32>
    %741 = vector.extract_strided_slice %740 {offsets = [0, 0], sizes = [2, 128], strides = [1, 1]} : vector<2x512xf32> to vector<2x128xf32>
    %cst_280 = arith.constant 5.000000e-01 : f32
    %742 = vector.broadcast %cst_280 : f32 to vector<2x128xf32>
    %743 = arith.mulf %742, %741 : vector<2x128xf32>
    %744 = math.tanh %743 : vector<2x128xf32>
    %cst_281 = arith.constant 1.000000e+00 : f32
    %745 = vector.broadcast %cst_281 : f32 to vector<2x128xf32>
    %746 = arith.addf %744, %745 : vector<2x128xf32>
    %cst_282 = arith.constant 5.000000e-01 : f32
    %747 = vector.broadcast %cst_282 : f32 to vector<2x128xf32>
    %748 = arith.mulf %747, %746 : vector<2x128xf32>
    %749 = vector.extract_strided_slice %740 {offsets = [0, 128], sizes = [2, 128], strides = [1, 1]} : vector<2x512xf32> to vector<2x128xf32>
    %cst_283 = arith.constant 5.000000e-01 : f32
    %750 = vector.broadcast %cst_283 : f32 to vector<2x128xf32>
    %751 = arith.mulf %750, %749 : vector<2x128xf32>
    %752 = math.tanh %751 : vector<2x128xf32>
    %cst_284 = arith.constant 1.000000e+00 : f32
    %753 = vector.broadcast %cst_284 : f32 to vector<2x128xf32>
    %754 = arith.addf %752, %753 : vector<2x128xf32>
    %cst_285 = arith.constant 5.000000e-01 : f32
    %755 = vector.broadcast %cst_285 : f32 to vector<2x128xf32>
    %756 = arith.mulf %755, %754 : vector<2x128xf32>
    %757 = vector.extract_strided_slice %740 {offsets = [0, 256], sizes = [2, 128], strides = [1, 1]} : vector<2x512xf32> to vector<2x128xf32>
    %758 = math.tanh %757 : vector<2x128xf32>
    %759 = vector.extract_strided_slice %740 {offsets = [0, 384], sizes = [2, 128], strides = [1, 1]} : vector<2x512xf32> to vector<2x128xf32>
    %cst_286 = arith.constant 5.000000e-01 : f32
    %760 = vector.broadcast %cst_286 : f32 to vector<2x128xf32>
    %761 = arith.mulf %760, %759 : vector<2x128xf32>
    %762 = math.tanh %761 : vector<2x128xf32>
    %cst_287 = arith.constant 1.000000e+00 : f32
    %763 = vector.broadcast %cst_287 : f32 to vector<2x128xf32>
    %764 = arith.addf %762, %763 : vector<2x128xf32>
    %cst_288 = arith.constant 5.000000e-01 : f32
    %765 = vector.broadcast %cst_288 : f32 to vector<2x128xf32>
    %766 = arith.mulf %765, %764 : vector<2x128xf32>
    %767 = arith.mulf %756, %734 : vector<2x128xf32>
    %768 = arith.mulf %748, %758 : vector<2x128xf32>
    %769 = arith.addf %767, %768 : vector<2x128xf32>
    %770 = math.tanh %769 : vector<2x128xf32>
    %771 = arith.mulf %766, %770 : vector<2x128xf32>
    %c0_289 = arith.constant 0 : index
    %c9216_290 = arith.constant 9216 : index
    %772 = vector.load %arg19[%c0_289, %c9216_290] : memref<2x11264xf32, #tpu.memory_space<vmem>>, vector<2x512xf32>
    %773 = arith.truncf %771 : vector<2x128xf32> to vector<2x128xbf16>
    %cst_291 = arith.constant dense<0.000000e+00> : vector<2x512xf32>
    %774 = tpu.matmul %773, %139, %cst_291 {dimension_numbers = #tpu.dot_dimension_numbers<[1], [0], [0], [1], [0, 0, 1, 1], [], []>} : vector<2x128xbf16>, vector<128x512xbf16>, vector<2x512xf32> -> vector<2x512xf32>
    %775 = arith.addf %772, %774 : vector<2x512xf32>
    %776 = vector.extract_strided_slice %775 {offsets = [0, 0], sizes = [2, 128], strides = [1, 1]} : vector<2x512xf32> to vector<2x128xf32>
    %cst_292 = arith.constant 5.000000e-01 : f32
    %777 = vector.broadcast %cst_292 : f32 to vector<2x128xf32>
    %778 = arith.mulf %777, %776 : vector<2x128xf32>
    %779 = math.tanh %778 : vector<2x128xf32>
    %cst_293 = arith.constant 1.000000e+00 : f32
    %780 = vector.broadcast %cst_293 : f32 to vector<2x128xf32>
    %781 = arith.addf %779, %780 : vector<2x128xf32>
    %cst_294 = arith.constant 5.000000e-01 : f32
    %782 = vector.broadcast %cst_294 : f32 to vector<2x128xf32>
    %783 = arith.mulf %782, %781 : vector<2x128xf32>
    %784 = vector.extract_strided_slice %775 {offsets = [0, 128], sizes = [2, 128], strides = [1, 1]} : vector<2x512xf32> to vector<2x128xf32>
    %cst_295 = arith.constant 5.000000e-01 : f32
    %785 = vector.broadcast %cst_295 : f32 to vector<2x128xf32>
    %786 = arith.mulf %785, %784 : vector<2x128xf32>
    %787 = math.tanh %786 : vector<2x128xf32>
    %cst_296 = arith.constant 1.000000e+00 : f32
    %788 = vector.broadcast %cst_296 : f32 to vector<2x128xf32>
    %789 = arith.addf %787, %788 : vector<2x128xf32>
    %cst_297 = arith.constant 5.000000e-01 : f32
    %790 = vector.broadcast %cst_297 : f32 to vector<2x128xf32>
    %791 = arith.mulf %790, %789 : vector<2x128xf32>
    %792 = vector.extract_strided_slice %775 {offsets = [0, 256], sizes = [2, 128], strides = [1, 1]} : vector<2x512xf32> to vector<2x128xf32>
    %793 = math.tanh %792 : vector<2x128xf32>
    %794 = vector.extract_strided_slice %775 {offsets = [0, 384], sizes = [2, 128], strides = [1, 1]} : vector<2x512xf32> to vector<2x128xf32>
    %cst_298 = arith.constant 5.000000e-01 : f32
    %795 = vector.broadcast %cst_298 : f32 to vector<2x128xf32>
    %796 = arith.mulf %795, %794 : vector<2x128xf32>
    %797 = math.tanh %796 : vector<2x128xf32>
    %cst_299 = arith.constant 1.000000e+00 : f32
    %798 = vector.broadcast %cst_299 : f32 to vector<2x128xf32>
    %799 = arith.addf %797, %798 : vector<2x128xf32>
    %cst_300 = arith.constant 5.000000e-01 : f32
    %800 = vector.broadcast %cst_300 : f32 to vector<2x128xf32>
    %801 = arith.mulf %800, %799 : vector<2x128xf32>
    %802 = arith.mulf %791, %769 : vector<2x128xf32>
    %803 = arith.mulf %783, %793 : vector<2x128xf32>
    %804 = arith.addf %802, %803 : vector<2x128xf32>
    %805 = math.tanh %804 : vector<2x128xf32>
    %806 = arith.mulf %801, %805 : vector<2x128xf32>
    %c0_301 = arith.constant 0 : index
    %c9728_302 = arith.constant 9728 : index
    %807 = vector.load %arg19[%c0_301, %c9728_302] : memref<2x11264xf32, #tpu.memory_space<vmem>>, vector<2x512xf32>
    %808 = arith.truncf %806 : vector<2x128xf32> to vector<2x128xbf16>
    %cst_303 = arith.constant dense<0.000000e+00> : vector<2x512xf32>
    %809 = tpu.matmul %808, %139, %cst_303 {dimension_numbers = #tpu.dot_dimension_numbers<[1], [0], [0], [1], [0, 0, 1, 1], [], []>} : vector<2x128xbf16>, vector<128x512xbf16>, vector<2x512xf32> -> vector<2x512xf32>
    %810 = arith.addf %807, %809 : vector<2x512xf32>
    %811 = vector.extract_strided_slice %810 {offsets = [0, 0], sizes = [2, 128], strides = [1, 1]} : vector<2x512xf32> to vector<2x128xf32>
    %cst_304 = arith.constant 5.000000e-01 : f32
    %812 = vector.broadcast %cst_304 : f32 to vector<2x128xf32>
    %813 = arith.mulf %812, %811 : vector<2x128xf32>
    %814 = math.tanh %813 : vector<2x128xf32>
    %cst_305 = arith.constant 1.000000e+00 : f32
    %815 = vector.broadcast %cst_305 : f32 to vector<2x128xf32>
    %816 = arith.addf %814, %815 : vector<2x128xf32>
    %cst_306 = arith.constant 5.000000e-01 : f32
    %817 = vector.broadcast %cst_306 : f32 to vector<2x128xf32>
    %818 = arith.mulf %817, %816 : vector<2x128xf32>
    %819 = vector.extract_strided_slice %810 {offsets = [0, 128], sizes = [2, 128], strides = [1, 1]} : vector<2x512xf32> to vector<2x128xf32>
    %cst_307 = arith.constant 5.000000e-01 : f32
    %820 = vector.broadcast %cst_307 : f32 to vector<2x128xf32>
    %821 = arith.mulf %820, %819 : vector<2x128xf32>
    %822 = math.tanh %821 : vector<2x128xf32>
    %cst_308 = arith.constant 1.000000e+00 : f32
    %823 = vector.broadcast %cst_308 : f32 to vector<2x128xf32>
    %824 = arith.addf %822, %823 : vector<2x128xf32>
    %cst_309 = arith.constant 5.000000e-01 : f32
    %825 = vector.broadcast %cst_309 : f32 to vector<2x128xf32>
    %826 = arith.mulf %825, %824 : vector<2x128xf32>
    %827 = vector.extract_strided_slice %810 {offsets = [0, 256], sizes = [2, 128], strides = [1, 1]} : vector<2x512xf32> to vector<2x128xf32>
    %828 = math.tanh %827 : vector<2x128xf32>
    %829 = vector.extract_strided_slice %810 {offsets = [0, 384], sizes = [2, 128], strides = [1, 1]} : vector<2x512xf32> to vector<2x128xf32>
    %cst_310 = arith.constant 5.000000e-01 : f32
    %830 = vector.broadcast %cst_310 : f32 to vector<2x128xf32>
    %831 = arith.mulf %830, %829 : vector<2x128xf32>
    %832 = math.tanh %831 : vector<2x128xf32>
    %cst_311 = arith.constant 1.000000e+00 : f32
    %833 = vector.broadcast %cst_311 : f32 to vector<2x128xf32>
    %834 = arith.addf %832, %833 : vector<2x128xf32>
    %cst_312 = arith.constant 5.000000e-01 : f32
    %835 = vector.broadcast %cst_312 : f32 to vector<2x128xf32>
    %836 = arith.mulf %835, %834 : vector<2x128xf32>
    %837 = arith.mulf %826, %804 : vector<2x128xf32>
    %838 = arith.mulf %818, %828 : vector<2x128xf32>
    %839 = arith.addf %837, %838 : vector<2x128xf32>
    %840 = math.tanh %839 : vector<2x128xf32>
    %841 = arith.mulf %836, %840 : vector<2x128xf32>
    %c0_313 = arith.constant 0 : index
    %c10240_314 = arith.constant 10240 : index
    %842 = vector.load %arg19[%c0_313, %c10240_314] : memref<2x11264xf32, #tpu.memory_space<vmem>>, vector<2x512xf32>
    %843 = arith.truncf %841 : vector<2x128xf32> to vector<2x128xbf16>
    %cst_315 = arith.constant dense<0.000000e+00> : vector<2x512xf32>
    %844 = tpu.matmul %843, %139, %cst_315 {dimension_numbers = #tpu.dot_dimension_numbers<[1], [0], [0], [1], [0, 0, 1, 1], [], []>} : vector<2x128xbf16>, vector<128x512xbf16>, vector<2x512xf32> -> vector<2x512xf32>
    %845 = arith.addf %842, %844 : vector<2x512xf32>
    %846 = vector.extract_strided_slice %845 {offsets = [0, 0], sizes = [2, 128], strides = [1, 1]} : vector<2x512xf32> to vector<2x128xf32>
    %cst_316 = arith.constant 5.000000e-01 : f32
    %847 = vector.broadcast %cst_316 : f32 to vector<2x128xf32>
    %848 = arith.mulf %847, %846 : vector<2x128xf32>
    %849 = math.tanh %848 : vector<2x128xf32>
    %cst_317 = arith.constant 1.000000e+00 : f32
    %850 = vector.broadcast %cst_317 : f32 to vector<2x128xf32>
    %851 = arith.addf %849, %850 : vector<2x128xf32>
    %cst_318 = arith.constant 5.000000e-01 : f32
    %852 = vector.broadcast %cst_318 : f32 to vector<2x128xf32>
    %853 = arith.mulf %852, %851 : vector<2x128xf32>
    %854 = vector.extract_strided_slice %845 {offsets = [0, 128], sizes = [2, 128], strides = [1, 1]} : vector<2x512xf32> to vector<2x128xf32>
    %cst_319 = arith.constant 5.000000e-01 : f32
    %855 = vector.broadcast %cst_319 : f32 to vector<2x128xf32>
    %856 = arith.mulf %855, %854 : vector<2x128xf32>
    %857 = math.tanh %856 : vector<2x128xf32>
    %cst_320 = arith.constant 1.000000e+00 : f32
    %858 = vector.broadcast %cst_320 : f32 to vector<2x128xf32>
    %859 = arith.addf %857, %858 : vector<2x128xf32>
    %cst_321 = arith.constant 5.000000e-01 : f32
    %860 = vector.broadcast %cst_321 : f32 to vector<2x128xf32>
    %861 = arith.mulf %860, %859 : vector<2x128xf32>
    %862 = vector.extract_strided_slice %845 {offsets = [0, 256], sizes = [2, 128], strides = [1, 1]} : vector<2x512xf32> to vector<2x128xf32>
    %863 = math.tanh %862 : vector<2x128xf32>
    %864 = vector.extract_strided_slice %845 {offsets = [0, 384], sizes = [2, 128], strides = [1, 1]} : vector<2x512xf32> to vector<2x128xf32>
    %cst_322 = arith.constant 5.000000e-01 : f32
    %865 = vector.broadcast %cst_322 : f32 to vector<2x128xf32>
    %866 = arith.mulf %865, %864 : vector<2x128xf32>
    %867 = math.tanh %866 : vector<2x128xf32>
    %cst_323 = arith.constant 1.000000e+00 : f32
    %868 = vector.broadcast %cst_323 : f32 to vector<2x128xf32>
    %869 = arith.addf %867, %868 : vector<2x128xf32>
    %cst_324 = arith.constant 5.000000e-01 : f32
    %870 = vector.broadcast %cst_324 : f32 to vector<2x128xf32>
    %871 = arith.mulf %870, %869 : vector<2x128xf32>
    %872 = arith.mulf %861, %839 : vector<2x128xf32>
    %873 = arith.mulf %853, %863 : vector<2x128xf32>
    %874 = arith.addf %872, %873 : vector<2x128xf32>
    %875 = math.tanh %874 : vector<2x128xf32>
    %876 = arith.mulf %871, %875 : vector<2x128xf32>
    %c0_325 = arith.constant 0 : index
    %c10752_326 = arith.constant 10752 : index
    %877 = vector.load %arg19[%c0_325, %c10752_326] : memref<2x11264xf32, #tpu.memory_space<vmem>>, vector<2x512xf32>
    %878 = arith.truncf %876 : vector<2x128xf32> to vector<2x128xbf16>
    %cst_327 = arith.constant dense<0.000000e+00> : vector<2x512xf32>
    %879 = tpu.matmul %878, %139, %cst_327 {dimension_numbers = #tpu.dot_dimension_numbers<[1], [0], [0], [1], [0, 0, 1, 1], [], []>} : vector<2x128xbf16>, vector<128x512xbf16>, vector<2x512xf32> -> vector<2x512xf32>
    %880 = arith.addf %877, %879 : vector<2x512xf32>
    %881 = vector.extract_strided_slice %880 {offsets = [0, 0], sizes = [2, 128], strides = [1, 1]} : vector<2x512xf32> to vector<2x128xf32>
    %cst_328 = arith.constant 5.000000e-01 : f32
    %882 = vector.broadcast %cst_328 : f32 to vector<2x128xf32>
    %883 = arith.mulf %882, %881 : vector<2x128xf32>
    %884 = math.tanh %883 : vector<2x128xf32>
    %cst_329 = arith.constant 1.000000e+00 : f32
    %885 = vector.broadcast %cst_329 : f32 to vector<2x128xf32>
    %886 = arith.addf %884, %885 : vector<2x128xf32>
    %cst_330 = arith.constant 5.000000e-01 : f32
    %887 = vector.broadcast %cst_330 : f32 to vector<2x128xf32>
    %888 = arith.mulf %887, %886 : vector<2x128xf32>
    %889 = vector.extract_strided_slice %880 {offsets = [0, 128], sizes = [2, 128], strides = [1, 1]} : vector<2x512xf32> to vector<2x128xf32>
    %cst_331 = arith.constant 5.000000e-01 : f32
    %890 = vector.broadcast %cst_331 : f32 to vector<2x128xf32>
    %891 = arith.mulf %890, %889 : vector<2x128xf32>
    %892 = math.tanh %891 : vector<2x128xf32>
    %cst_332 = arith.constant 1.000000e+00 : f32
    %893 = vector.broadcast %cst_332 : f32 to vector<2x128xf32>
    %894 = arith.addf %892, %893 : vector<2x128xf32>
    %cst_333 = arith.constant 5.000000e-01 : f32
    %895 = vector.broadcast %cst_333 : f32 to vector<2x128xf32>
    %896 = arith.mulf %895, %894 : vector<2x128xf32>
    %897 = vector.extract_strided_slice %880 {offsets = [0, 256], sizes = [2, 128], strides = [1, 1]} : vector<2x512xf32> to vector<2x128xf32>
    %898 = math.tanh %897 : vector<2x128xf32>
    %899 = vector.extract_strided_slice %880 {offsets = [0, 384], sizes = [2, 128], strides = [1, 1]} : vector<2x512xf32> to vector<2x128xf32>
    %cst_334 = arith.constant 5.000000e-01 : f32
    %900 = vector.broadcast %cst_334 : f32 to vector<2x128xf32>
    %901 = arith.mulf %900, %899 : vector<2x128xf32>
    %902 = math.tanh %901 : vector<2x128xf32>
    %cst_335 = arith.constant 1.000000e+00 : f32
    %903 = vector.broadcast %cst_335 : f32 to vector<2x128xf32>
    %904 = arith.addf %902, %903 : vector<2x128xf32>
    %cst_336 = arith.constant 5.000000e-01 : f32
    %905 = vector.broadcast %cst_336 : f32 to vector<2x128xf32>
    %906 = arith.mulf %905, %904 : vector<2x128xf32>
    %907 = arith.mulf %896, %874 : vector<2x128xf32>
    %908 = arith.mulf %888, %898 : vector<2x128xf32>
    %909 = arith.addf %907, %908 : vector<2x128xf32>
    %910 = math.tanh %909 : vector<2x128xf32>
    %911 = arith.mulf %906, %910 : vector<2x128xf32>
    %912 = arith.truncf %911 : vector<2x128xf32> to vector<2x128xbf16>
    %c0_337 = arith.constant 0 : index
    %c0_338 = arith.constant 0 : index
    %913 = vector.load %arg11[%c0_337, %c0_338] : memref<128x64xbf16, #tpu.memory_space<vmem>>, vector<128x64xbf16>
    %cst_339 = arith.constant dense<0.000000e+00> : vector<2x64xf32>
    %914 = tpu.matmul %912, %913, %cst_339 {dimension_numbers = #tpu.dot_dimension_numbers<[1], [0], [0], [1], [0, 0, 1, 1], [], []>} : vector<2x128xbf16>, vector<128x64xbf16>, vector<2x64xf32> -> vector<2x64xf32>
    %c0_340 = arith.constant 0 : index
    %c0_341 = arith.constant 0 : index
    %915 = vector.load %arg12[%c0_340, %c0_341] : memref<1x64xf32, #tpu.memory_space<vmem>>, vector<1x64xf32>
    %916 = vector.broadcast %915 : vector<1x64xf32> to vector<2x64xf32>
    %917 = arith.addf %914, %916 : vector<2x64xf32>
    %cst_342 = arith.constant 0.000000e+00 : f32
    %918 = vector.broadcast %cst_342 : f32 to vector<2x64xf32>
    %919 = arith.maximumf %917, %918 : vector<2x64xf32>
    %920 = arith.truncf %919 : vector<2x64xf32> to vector<2x64xbf16>
    %c0_343 = arith.constant 0 : index
    %c0_344 = arith.constant 0 : index
    %921 = vector.load %arg13[%c0_343, %c0_344] : memref<64x32xbf16, #tpu.memory_space<vmem>>, vector<64x32xbf16>
    %cst_345 = arith.constant dense<0.000000e+00> : vector<2x32xf32>
    %922 = tpu.matmul %920, %921, %cst_345 {dimension_numbers = #tpu.dot_dimension_numbers<[1], [0], [0], [1], [0, 0, 1, 1], [], []>} : vector<2x64xbf16>, vector<64x32xbf16>, vector<2x32xf32> -> vector<2x32xf32>
    %923 = arith.truncf %18 : vector<2x64xf32> to vector<2x64xbf16>
    %c0_346 = arith.constant 0 : index
    %c0_347 = arith.constant 0 : index
    %924 = vector.load %arg14[%c0_346, %c0_347] : memref<64x32xbf16, #tpu.memory_space<vmem>>, vector<64x32xbf16>
    %cst_348 = arith.constant dense<0.000000e+00> : vector<2x32xf32>
    %925 = tpu.matmul %923, %924, %cst_348 {dimension_numbers = #tpu.dot_dimension_numbers<[1], [0], [0], [1], [0, 0, 1, 1], [], []>} : vector<2x64xbf16>, vector<64x32xbf16>, vector<2x32xf32> -> vector<2x32xf32>
    %926 = arith.addf %922, %925 : vector<2x32xf32>
    %c0_349 = arith.constant 0 : index
    %c0_350 = arith.constant 0 : index
    %927 = vector.load %arg15[%c0_349, %c0_350] : memref<1x32xf32, #tpu.memory_space<vmem>>, vector<1x32xf32>
    %928 = vector.broadcast %927 : vector<1x32xf32> to vector<2x32xf32>
    %929 = arith.addf %926, %928 : vector<2x32xf32>
    %cst_351 = arith.constant 0.000000e+00 : f32
    %930 = vector.broadcast %cst_351 : f32 to vector<2x32xf32>
    %931 = arith.maximumf %929, %930 : vector<2x32xf32>
    %932 = arith.truncf %931 : vector<2x32xf32> to vector<2x32xbf16>
    %c0_352 = arith.constant 0 : index
    %c0_353 = arith.constant 0 : index
    %933 = vector.load %arg16[%c0_352, %c0_353] : memref<32x3xbf16, #tpu.memory_space<vmem>>, vector<32x3xbf16>
    %cst_354 = arith.constant dense<0.000000e+00> : vector<2x3xf32>
    %934 = tpu.matmul %932, %933, %cst_354 {dimension_numbers = #tpu.dot_dimension_numbers<[1], [0], [0], [1], [0, 0, 1, 1], [], []>} : vector<2x32xbf16>, vector<32x3xbf16>, vector<2x3xf32> -> vector<2x3xf32>
    %c0_355 = arith.constant 0 : index
    %c0_356 = arith.constant 0 : index
    %935 = vector.load %arg17[%c0_355, %c0_356] : memref<1x3xf32, #tpu.memory_space<vmem>>, vector<1x3xf32>
    %936 = vector.broadcast %935 : vector<1x3xf32> to vector<2x3xf32>
    %937 = arith.addf %934, %936 : vector<2x3xf32>
    %938 = tpu.iota {dimensions = array<i32: 1>} : vector<2x3xi32>
    %c2_i32 = arith.constant 2 : i32
    %939 = vector.broadcast %c2_i32 : i32 to vector<2x3xi32>
    %940 = arith.cmpi slt, %938, %939 : vector<2x3xi32>
    %941 = math.exp %937 : vector<2x3xf32>
    %942 = arith.select %940, %941, %937 : vector<2x3xi1>, vector<2x3xf32>
    %c0_357 = arith.constant 0 : index
    %c0_358 = arith.constant 0 : index
    %943 = vector.load %arg18[%c0_357, %c0_358] : memref<2x3xf32, #tpu.memory_space<vmem>>, vector<2x3xf32>
    tpu.vector_store %arg18[%c0_357, %c0_358], %942 {strides = array<i32>} : memref<2x3xf32, #tpu.memory_space<vmem>>, vector<2x3xf32>,
    return
  }
}

</mosaic_0001>

<bundles_post_ra>
// kernel: crispai_pe_forward.1
= control target key start
LH: loop header
LB: loop body
LE: loop exit
PB: predicated region body
PF: predicated region fallthrough
CT: control target
= control target key end

     0   :  { %s12948_s0 = inlined_call_operand.vmem [shape: f32[2,96], index: 0, kind: input, shape index: {}]   ;;  %s12949_s1 = inlined_call_operand.vmem [shape: f32[2,72], index: 1, kind: input, shape index: {}]   ;;  %s12950_s2 = inlined_call_operand.hbm [shape: bf16[96,2816], index: 2, kind: input, shape index: {}]   ;;  %s12951_s3 = inlined_call_operand.vmem [shape: f32[1,2816], index: 3, kind: input, shape index: {}]   ;;  %s12952_s4 = inlined_call_operand.vmem [shape: bf16[128,512], index: 4, kind: input, shape index: {}]   ;;  %s12953_s5 = inlined_call_operand.vmem [shape: bf16[128,512], index: 5, kind: input, shape index: {}]   ;;  %s12954_s6 = inlined_call_operand.hbm [shape: f32[1,512], index: 6, kind: input, shape index: {}]   ;;  %s12955_s7 = inlined_call_operand.vmem [shape: bf16[72,352], index: 7, kind: input, shape index: {}]   ;;  %s12956_s8 = inlined_call_operand.hbm [shape: f32[1,352], index: 8, kind: input, shape index: {}]   ;;  %s12957_s9 = inlined_call_operand.vmem [shape: bf16[352,64], index: 9, kind: input, shape index: {}]   ;;  %s12958_s10 = inlined_call_operand.hbm [shape: f32[1,64], index: 10, kind: input, shape index: {}]   ;;  %s12959_s11 = inlined_call_operand.vmem [shape: bf16[128,64], index: 11, kind: input, shape index: {}]   ;;  %s12960_s12 = inlined_call_operand.hbm [shape: f32[1,64], index: 12, kind: input, shape index: {}]   ;;  %s12961_s13 = inlined_call_operand.vmem [shape: bf16[64,32], index: 13, kind: input, shape index: {}]   ;;  %s12962_s14 = inlined_call_operand.vmem [shape: bf16[64,32], index: 14, kind: input, shape index: {}]   ;;  %s12963_s15 = inlined_call_operand.hbm [shape: f32[1,32], index: 15, kind: input, shape index: {}]   ;;  %s12964_s16 = inlined_call_operand.vmem [shape: bf16[32,3], index: 16, kind: input, shape index: {}]   ;;  %s12965_s17 = inlined_call_operand.hbm [shape: f32[1,3], index: 17, kind: input, shape index: {}]   ;;  %s12966_s18 = inlined_call_operand.hbm [shape: f32[2,3], index: 18, kind: output, shape index: {}]  }
   0x1   :  { %13006 = sst [smem:[#allocation54_spill]] %s12948_s0 }
   0x2   :  { %13007 = sst [smem:[#allocation55_spill]] %s12949_s1 }
   0x3   :  { %13008 = sst [smem:[#allocation56_spill]] %s12950_s2 }
   0x4   :  { %23 = vsyncpa [#allocation4], 0 }
   0x5   :  { %24 = vsyncpa [#allocation7], 0 }
   0x6   :  { %25 = vsyncpa [#allocation10], 0 }
   0x7   :  { %26 = vsyncpa [#allocation13], 0 }
   0x8   :  { %27 = vsyncpa [#allocation5], 0  ;;  %s9350_s27 = smov [#allocation6]   ;;  %s9351_s29 = smov [#allocation9]  }
   0x9   :  { %s56_s28 = sshll.u32 %s9350_s27, 4  ;;  %s80_s30 = sshll.u32 %s9351_s29, 4  ;;  %s57_s28 = int_to_ptr.vmem [resolvable:$true] %s56_s28  ;;  %s81_s30 = int_to_ptr.vmem [resolvable:$true] %s80_s30 }
   0xa   :  { %s9188_s0 = scalar_lea.vmem %s57_s28, 64  ;;  %p9193_p1 = scmp.lt.s32.totalorder %s57_s28, %s57_s28 }
   0xb   :  { %p9189_p0 = scmp.ne.s32.totalorder %s57_s28, %s9188_s0  ;;  %p9194_p2 = scmp.lt.s32.totalorder %s9188_s0, %s9188_s0 }
   0xd   :  { %p9195_p3 = por %p9194_p2, %p9193_p1 }
   0xf   :  { %p9196_p4 = pnand %p9195_p3, %p9189_p0 }
  0x11   :  { %9199 = shalt.err (!%p9196_p4)
}
  0x12   :  { %59 = dma.hbm_to_vmem [thread:$0]  %s12954_s6, 64, %s57_s28, [#allocation7]  }
  0x13   :  { %s9208_s20 = scalar_lea.vmem %s81_s30, 16  ;;  %s9212_s21 = scalar_lea.vmem %s81_s30, 32 }
  0x14   :  { %p9209_p5 = scmp.ne.s32.totalorder %s81_s30, %s9208_s20  ;;  %p9213_p6 = scmp.lt.s32.totalorder %s81_s30, %s81_s30 }
  0x15   :  { %p9214_p7 = scmp.lt.s32.totalorder %s9212_s21, %s9208_s20 }
  0x17   :  { %p9215_p8 = por %p9214_p7, %p9213_p6 }
  0x19   :  { %p9216_p9 = pnand %p9215_p8, %p9209_p5 }
  0x1b   :  { %9219 = shalt.err (!%p9216_p9)
}
  0x1c   :  { %83 = dma.hbm_to_vmem [thread:$0]  %s12958_s10, 16, %s81_s30, [#allocation10]  }
  0x1d   :  { %s9352_s23 = smov [#allocation12]   ;;  %s9353_s25 = smov [#allocation3]  }
  0x1e   :  { %s106_s24 = sshll.u32 %s9352_s23, 4  ;;  %s37_s26 = sshll.u32 %s9353_s25, 4  ;;  %s107_s24 = int_to_ptr.vmem [resolvable:$true] %s106_s24  ;;  %s38_s26 = int_to_ptr.vmem [resolvable:$true] %s37_s26 }
  0x1f   :  { %s9228_s27 = scalar_lea.vmem %s107_s24, 16  ;;  %s9232_s6 = scalar_lea.vmem %s107_s24, 32 }
  0x20   :  { %p9229_p10 = scmp.ne.s32.totalorder %s107_s24, %s9228_s27  ;;  %p9233_p11 = scmp.lt.s32.totalorder %s107_s24, %s107_s24 }
  0x21   :  { %p9234_p12 = scmp.lt.s32.totalorder %s9232_s6, %s9228_s27 }
  0x23   :  { %p9235_p13 = por %p9234_p12, %p9233_p11 }
  0x25   :  { %p9236_p0 = pnand %p9235_p13, %p9229_p10 }
  0x27   :  { %9239 = shalt.err (!%p9236_p0)
}
  0x28   :  { %109 = dma.hbm_to_vmem [thread:$0]  %s12963_s15, 16, %s107_s24, [#allocation13]  }
  0x29   :  { %s9248_s0 = scalar_lea.vmem %s38_s26, 16896  ;;  %p9253_p2 = scmp.lt.s32.totalorder %s38_s26, %s38_s26 }
  0x2a   :  { %p9249_p1 = scmp.ne.s32.totalorder %s38_s26, %s9248_s0  ;;  %p9254_p3 = scmp.lt.s32.totalorder %s9248_s0, %s9248_s0 }
  0x2c   :  { %p9255_p4 = por %p9254_p3, %p9253_p2 }
  0x2e   :  { %p9256_p5 = pnand %p9255_p4, %p9249_p1 }
  0x30   :  { %9259 = shalt.err (!%p9256_p5)
}
  0x31   :  { %s9354_s10 = smov 1408   ;;  %s9355_s30 = smov 88  }
  0x32   :  { %s13009_s20 = sld [smem:[#allocation56_spill]]  ;;  %s9356_s21 = smov [#allocation8]  }
  0x33   :  { %s68_s22 = sshll.u32 %s9356_s21, 4  ;;  %s9357_s2 = smov [#allocation11]   ;;  %s69_s22 = int_to_ptr.vmem [resolvable:$true] %s68_s22 }
  0x34   :  { %s92_s23 = sshll.u32 %s9357_s2, 4  ;;  %s9268_s15 = scalar_lea.vmem %s69_s22, 48  ;;  %s93_s23 = int_to_ptr.vmem [resolvable:$true] %s92_s23 }
  0x35   :  { %p9269_p6 = scmp.ne.s32.totalorder %s69_s22, %s9268_s15  ;;  %s9272_s24 = scalar_lea.vmem %s69_s22, 64 }
  0x36   :  { %p9273_p7 = scmp.lt.s32.totalorder %s69_s22, %s69_s22  ;;  %p9274_p8 = scmp.lt.s32.totalorder %s9272_s24, %s9268_s15 }
  0x38   :  { %43 = dma.hbm_to_vmem [thread:$0]  %s13009_s20, 16896, %s38_s26, [#allocation4], %s9354_s10, %s9354_s10, %s9355_s30  }
  0x39   :  { %p9275_p9 = por %p9274_p8, %p9273_p7 }
  0x3b   :  { %p9276_p10 = pnand %p9275_p9, %p9269_p6 }
  0x3d   :  { %9279 = shalt.err (!%p9276_p10)
}
  0x3e   :  { %71 = dma.hbm_to_vmem [thread:$0]  %s12956_s8, 48, %s69_s22, [#allocation7]  }
  0x3f   :  { %s9288_s6 = scalar_lea.vmem %s93_s23, 16  ;;  %s9292_s26 = scalar_lea.vmem %s93_s23, 32 }
  0x40   :  { %p9289_p11 = scmp.ne.s32.totalorder %s93_s23, %s9288_s6  ;;  %p9293_p12 = scmp.lt.s32.totalorder %s93_s23, %s93_s23 }
  0x41   :  { %p9294_p13 = scmp.lt.s32.totalorder %s9292_s26, %s9288_s6 }
  0x43   :  { %p9295_p0 = por %p9294_p13, %p9293_p12 }
  0x45   :  { %p9296_p1 = pnand %p9295_p0, %p9289_p11 }
  0x47   :  { %9299 = shalt.err (!%p9296_p1)
}
  0x48   :  { %95 = dma.hbm_to_vmem [thread:$0]  %s12960_s12, 16, %s93_s23, [#allocation10]  }
  0x49   :  { %s9358_s0 = smov [#allocation14]  }
  0x4a   :  { %s118_s10 = sshll.u32 %s9358_s0, 4  ;;  %s119_s10 = int_to_ptr.vmem [resolvable:$true] %s118_s10 }
  0x4b   :  { %s9308_s30 = scalar_lea.vmem %s119_s10, 16  ;;  %s9312_s19 = scalar_lea.vmem %s119_s10, 32 }
  0x4c   :  { %p9309_p2 = scmp.ne.s32.totalorder %s119_s10, %s9308_s30  ;;  %p9313_p3 = scmp.lt.s32.totalorder %s119_s10, %s119_s10 }
  0x4d   :  { %p9314_p4 = scmp.lt.s32.totalorder %s9312_s19, %s9308_s30 }
  0x4f   :  { %p9315_p5 = por %p9314_p4, %p9313_p3 }
  0x51   :  { %p9316_p6 = pnand %p9315_p5, %p9309_p2 }
  0x53   :  { %9319 = shalt.err (!%p9316_p6)
}
  0x54   :  { %121 = dma.hbm_to_vmem [thread:$0]  %s12965_s17, 16, %s119_s10, [#allocation13]  }
  0x55   :  { %9340 = dma.done.wait [#allocation4], 16896  }
  0x56   :  { %9341 = vsyncadd [#allocation4], 4294950400 }
  0x57   :  { %9342 = dma.done.wait [#allocation7], 112  }
  0x58   :  { %9343 = vsyncadd [#allocation7], 4294967184 }
  0x59   :  { %9344 = dma.done.wait [#allocation10], 32  }
  0x5a   :  { %9345 = vsyncadd [#allocation10], 4294967264 }
  0x5b   :  { %9346 = dma.done.wait [#allocation13], 32  }
  0x5c   :  { %9347 = vsyncadd [#allocation13], 4294967264  ;;  %v12968_v0 = vmov 0.0   ;;  %v12972_v1 = vmov 0   ;;  %vm9361_vm0 = vmmov 0   ;;  %vm259_vm1 = vcmask 1043456  }
  0x5d   :  { %8348 = vmatprep.subr.bf16.mxu1 %v12968_v0  ;;  %301 = vmatprep.mubr.bf16.mxu0 %v12972_v1  ;;  %v164_v2 = vld [vmem:[%s12955_s7 + $0x60] sm:$0xff]  ;;  %v8446_v3 = vld [vmem:[%s12955_s7 + $0x68] ss:$0 sps:$4 sm:$0xff]   ;;  %v8447_v6 = vld [vmem:[%s12955_s7 + $0x4c] ss:$12 sps:$4 sm:$0xff]   ;;  %s13010_s15 = sld [smem:[#allocation55_spill]]  ;;  %v12967_v46 = vlaneseq }
  0x5e   :  { %8358 = vmatprep.mubr.msk.bf16.mxu1 %vm9361_vm0, %v12968_v0  ;;  %v8031_v4 = vcombine.high %v164_v2, %v164_v2  ;;  %v8030_v5 = vcombine.low %v164_v2, %v164_v2  ;;  %v267_v7 = vsel %vm259_vm1, %v8446_v3, 0  ;;  %v8450_v9 = vld [vmem:[%s12955_s7 + $0x50] ss:$12 sps:$4 sm:$0xff]   ;;  %v8449_v10 = vld [vmem:[%s12955_s7 + $0x48] ss:$12 sps:$4 sm:$0xff]   ;;  %vm255_vm2 = vcmask 588800  }
  0x5f   :  { %8349 = vmatpush3.bf16.msra.mxu1 %v267_v7  ;;  %v8451_v11 = vld [vmem:[%s12955_s7 + $0x34] ss:$12 sps:$4 sm:$0xff]   ;;  %v8454_v12 = vld [vmem:[%s12955_s7 + $0x38] ss:$12 sps:$4 sm:$0xff]   ;;  %v8453_v13 = vld [vmem:[%s12955_s7 + $0x30] ss:$12 sps:$4 sm:$0xff]  }
  0x60   :  { %8033 = vmatprep.subr.msk.bf16.mxu0 %vm259_vm1, %v8031_v4  ;;  %v261_v8 = vsel %vm259_vm1, %v8030_v5, 0  ;;  %8350 = vmatprep.subr.bf16.mxu1 %v12968_v0  ;;  %v8455_v14 = vld [vmem:[%s12955_s7 + $0x1c] ss:$12 sps:$4 sm:$0xff]   ;;  %v8458_v15 = vld [vmem:[%s12955_s7 + $0x20] ss:$12 sps:$4 sm:$0xff]   ;;  %v8465_v25 = vld [vmem:[%s12957_s9 + $0x70] sm:$0xff]  }
  0x61   :  { %276 = vmatpush1.bf16.msra.mxu0 %v261_v8  ;;  %v8457_v16 = vld [vmem:[%s12955_s7 + $0x18] ss:$12 sps:$4 sm:$0xff]   ;;  %v8462_v18 = vld [vmem:[%s12955_s7 + $0x8] ss:$12 sps:$4 sm:$0xff]   ;;  %v8461_v20 = vld [vmem:[%s12955_s7] ss:$12 sps:$4 sm:$0xff]  }
  0x62   :  { %277 = vmatprep.subr.bf16.mxu0 %v8447_v6  ;;  %v8459_v17 = vld [vmem:[%s12955_s7 + $0x4] ss:$12 sps:$4 sm:$0xff]   ;;  %v8463_v21 = vld [vmem:[%s12957_s9 + $0x78] sm:$0xff]   ;;  %v8467_v23 = vld [vmem:[%s12957_s9 + $0xa8] sm:$0xff]   ;;  %v9608_v47 = vshrl.u32 %v12967_v46, 7  ;;  %vm539_vm3 = vcmask 785408  }
  0x63   :  { %8351 = vmatpush3.bf16.msra.mxu1 %v8450_v9  ;;  %v146_v19 = vld [vmem:[%s13010_s15] sm:$0x3]  ;;  %v8464_v24 = vld [vmem:[%s12957_s9 + $0x38] sm:$0xff]   ;;  %v8466_v27 = vld [vmem:[%s12957_s9 + $0x30] sm:$0xff]   ;;  %s13011_s6 = sld [smem:[#allocation54_spill]]  ;;  %vm7804_vm4 = vcmask 523264  }
  0x64   :  { %8352 = vmatprep.subr.bf16.mxu1 %v12968_v0  ;;  %v147_v22 = vpack.c.bf16 %v146_v19, %v146_v19  ;;  %v8470_v26 = vld [vmem:[%s12957_s9 + $0xa0] sm:$0xff]   ;;  %v8468_v28 = vld [vmem:[%s12957_s9 + $0x68] sm:$0xff]   ;;  %v8473_v31 = vld [vmem:[%s12957_s9 + $0x98] sm:$0xff]   ;;  %v9611_v48 = vsub.s32 2, %v9608_v47  ;;  %v9614_v50 = vsub.s32 0, %v9608_v47  ;;  %v9617_v51 = vsub.s32 1, %v9608_v47 }
  0x65   :  { %278 = vmatpush1.bf16.msra.mxu0 %v8449_v10  ;;  %v8469_v29 = vld [vmem:[%s12957_s9 + $0x28] sm:$0xff]   ;;  %v8471_v30 = vld [vmem:[%s12957_s9 + $0x60] sm:$0xff]   ;;  %v8476_v32 = vld [vmem:[%s12957_s9 + $0x90] sm:$0xff]   ;;  %vm7948_vm5 = vcmask 261120   ;;  %vm7998_vm7 = vcmask 17408  }
  0x66   :  { %279 = vmatprep.subr.bf16.mxu0 %v8451_v11  ;;  %v8472_v33 = vld [vmem:[%s12957_s9 + $0x20] sm:$0xff]   ;;  %v8474_v34 = vld [vmem:[%s12957_s9 + $0x58] sm:$0xff]   ;;  %v8479_v35 = vld [vmem:[%s12957_s9 + $0x88] sm:$0xff]  }
  0x67   :  { %8353 = vmatpush3.bf16.msra.mxu1 %v8454_v12  ;;  %v8475_v36 = vld [vmem:[%s12957_s9 + $0x18] sm:$0xff]   ;;  %v8477_v37 = vld [vmem:[%s12957_s9 + $0x50] sm:$0xff]   ;;  %v8480_v39 = vld [vmem:[%s12957_s9 + $0x48] sm:$0xff]  }
  0x68   :  { %8354 = vmatprep.subr.bf16.mxu1 %v12968_v0  ;;  %v8478_v38 = vld [vmem:[%s12957_s9 + $0x10] sm:$0xff]   ;;  %v8482_v40 = vld [vmem:[%s12957_s9 + $0x80] sm:$0xff]   ;;  %v8481_v41 = vld [vmem:[%s12957_s9 + $0x8] sm:$0xff]  }
  0x69   :  { %280 = vmatpush1.bf16.msra.mxu0 %v8453_v13  ;;  %v8486_v42 = vld [vmem:[#allocation3 + $0x374] ss:$88 sps:$4 sm:$0xff]   ;;  %v8483_v43 = vld [vmem:[%s12957_s9 + $0x40] sm:$0xff]   ;;  %v8484_v3 = vld [vmem:[#allocation3 + $0x370] ss:$88 sps:$4 sm:$0xff]  }
  0x6a   :  { %281 = vmatprep.subr.bf16.mxu0 %v8455_v14  ;;  %v8487_v44 = vld [vmem:[%s12957_s9] sm:$0xff]   ;;  %v8505_v45 = vld [vmem:[#allocation3 + $0x37c] ss:$88 sps:$4 sm:$0xff]   ;;  %v8503_v13 = vld [vmem:[#allocation3 + $0x378] ss:$88 sps:$4 sm:$0xff]  }
  0x6b   :  { %8355 = vmatpush3.bf16.msra.mxu1 %v8458_v15  ;;  %v166_v49 = vld [vmem:[#allocation8] sm:$0x7]  ;;  %v8488_v12 = vld [vmem:[#allocation3 + $0x2c0] ss:$88 sps:$4 sm:$0xff]   ;;  %v8493_v14 = vld [vmem:[#allocation3 + $0x214] ss:$88 sps:$4 sm:$0xff]  }
  0x6c   :  { %8356 = vmatprep.subr.bf16.mxu1 %v12968_v0  ;;  %v179_v52 = vrot.slane %v166_v49, %v9611_v48  ;;  %v171_v53 = vrot.slane %v166_v49, %v9614_v50  ;;  %v175_v55 = vrot.slane %v166_v49, %v9617_v51  ;;  %v8490_v5 = vld [vmem:[#allocation3 + $0x2c4] ss:$88 sps:$4 sm:$0xff]   ;;  %v8527_v49 = vld [vmem:[#allocation3 + $0x170] ss:$88 sps:$4 sm:$0xff]  }
  0x6d   :  { %282 = vmatpush1.bf16.msra.mxu0 %v8457_v16  ;;  %v8508_v15 = vld [vmem:[#allocation3 + $0x2cc] ss:$88 sps:$4 sm:$0xff]   ;;  %v8491_v16 = vld [vmem:[#allocation3 + $0x210] ss:$88 sps:$4 sm:$0xff]   ;;  %v8514_v19 = vld [vmem:[#allocation3 + $0x21c] ss:$88 sps:$4 sm:$0xff]  }
  0x6e   :  { %283 = vmatprep.subr.bf16.mxu0 %v8459_v17  ;;  %v8506_v17 = vld [vmem:[#allocation3 + $0x2c8] ss:$88 sps:$4 sm:$0xff]  }
  0x6f   :  { %8357 = vmatpush3.bf16.msra.mxu1 %v8462_v18  ;;  %v8496_v18 = vld [vmem:[#allocation3 + $0x164] ss:$88 sps:$4 sm:$0xff]  }
  0x70   :  { %8362 = vmatprep.subr.bf16.mxu1 %v12968_v0 }
  0x71   :  { %284 = vmatpush1.bf16.msra.mxu0 %v8461_v20  ;;  %v8494_v20 = vld [vmem:[#allocation3 + $0x160] ss:$88 sps:$4 sm:$0xff]  }
  0x72   :  { %8297 = vmatprep.subr.bf16.mxu0 %v8463_v21  ;;  %8359 = vmatmul.mubr.msk.bf16.vlgmr.msra.gmra.mxu1 %vm255_vm2, %v147_v22  ;;  %v8512_v21 = vld [vmem:[#allocation3 + $0x218] ss:$88 sps:$4 sm:$0xff]  }
  0x73   :  { %8363 = vmatpush3.bf16.msra.mxu1 %v8467_v23  ;;  %8374 = vmatprep.mubr.msk.bf16.mxu1 %vm9361_vm0, %v12968_v0  ;;  %v8520_v23 = vld [vmem:[#allocation3 + $0x16c] ss:$88 sps:$4 sm:$0xff]  }
  0x74   :  { %8034 = vmatmul.mubr.msk.bf16.vlgmr.msra.gmra.mxu0 %vm255_vm2, %v147_v22  ;;  %8364 = vmatprep.subr.bf16.mxu1 %v12968_v0  ;;  %v8499_v22 = vld [vmem:[#allocation3 + $0xb4] ss:$88 sps:$4 sm:$0xff]  }
  0x75   :  { %8298 = vmatpush3.bf16.msra.mxu0 %v8464_v24  ;;  %v8497_v24 = vld [vmem:[#allocation3 + $0xb0] ss:$88 sps:$4 sm:$0xff]  }
  0x76   :  { %8299 = vmatprep.subr.bf16.mxu0 %v8465_v25  ;;  %v8518_v25 = vld [vmem:[#allocation3 + $0x168] ss:$88 sps:$4 sm:$0xff]  }
  0x77   :  { %8365 = vmatpush3.bf16.msra.mxu1 %v8470_v26  ;;  %v8502_v26 = vld [vmem:[#allocation3 + $0x4] ss:$88 sps:$4 sm:$0xff]  }
  0x78   :  { %8366 = vmatprep.subr.bf16.mxu1 %v12968_v0 }
  0x79   :  { %8300 = vmatpush3.bf16.msra.mxu0 %v8466_v27  ;;  %v8526_v27 = vld [vmem:[#allocation3 + $0xbc] ss:$88 sps:$4 sm:$0xff]  }
  0x7a   :  { %8301 = vmatprep.subr.bf16.mxu0 %v8468_v28  ;;  %v8500_v28 = vld [vmem:[#allocation3] ss:$88 sps:$4 sm:$0xff]  }
  0x7b   :  { %8367 = vmatpush3.bf16.msra.mxu1 %v8473_v31  ;;  %v8511_v31 = vld [vmem:[#allocation3 + $0x384] ss:$88 sps:$4 sm:$0xff]  }
  0x7c   :  { %8368 = vmatprep.subr.bf16.mxu1 %v12968_v0 }
  0x7d   :  { %8302 = vmatpush3.bf16.msra.mxu0 %v8469_v29  ;;  %v144_v29 = vld [vmem:[%s13011_s6] sm:$0x3] }
  0x7e   :  { %8303 = vmatprep.subr.bf16.mxu0 %v8471_v30  ;;  %v8524_v30 = vld [vmem:[#allocation3 + $0xb8] ss:$88 sps:$4 sm:$0xff]  }
  0x7f   :  { %8369 = vmatpush3.bf16.msra.mxu1 %v8476_v32  ;;  %v8532_v32 = vld [vmem:[#allocation3 + $0xc] ss:$88 sps:$4 sm:$0xff]  }
  0x80   :  { %8370 = vmatprep.subr.bf16.mxu1 %v12968_v0 }
  0x81   :  { %8304 = vmatpush3.bf16.msra.mxu0 %v8472_v33  ;;  %v9628_v33 = vpack.c.bf16 %v144_v29, %v144_v29  ;;  %v8584_v29 = vld [vmem:[#allocation3 + $0x2f0] ss:$88 sps:$4 sm:$0xff]  }
  0x82   :  { %8305 = vmatprep.subr.bf16.mxu0 %v8474_v34  ;;  %v8509_v34 = vld [vmem:[#allocation3 + $0x380] ss:$88 sps:$4 sm:$0xff]  }
  0x83   :  { %8371 = vmatpush3.bf16.msra.mxu1 %v8479_v35  ;;  %v8530_v35 = vld [vmem:[#allocation3 + $0x8] ss:$88 sps:$4 sm:$0xff]  }
  0x84   :  { %8372 = vmatprep.subr.bf16.mxu1 %v12968_v0 }
  0x85   :  { %8306 = vmatpush3.bf16.msra.mxu0 %v8475_v36  ;;  %v8517_v36 = vld [vmem:[#allocation3 + $0x2d4] ss:$88 sps:$4 sm:$0xff]  }
  0x86   :  { %8307 = vmatprep.subr.bf16.mxu0 %v8477_v37  ;;  %v8541_v37 = vld [vmem:[#allocation3 + $0x38c] ss:$88 sps:$4 sm:$0xff]  }
  0x87   :  { %8373 = vmatpush3.bf16.msra.mxu1 %v8482_v40  ;;  %v8523_v40 = vld [vmem:[#allocation3 + $0x224] ss:$88 sps:$4 sm:$0xff]  }
  0x88   :  { %1539 = vmatprep.subr.bf16.mxu1 %v8486_v42  ;;  %v8521_v42 = vld [vmem:[#allocation3 + $0x220] ss:$88 sps:$4 sm:$0xff]  }
  0x89   :  { %8308 = vmatpush3.bf16.msra.mxu0 %v8478_v38  ;;  %v8515_v38 = vld [vmem:[#allocation3 + $0x2d0] ss:$88 sps:$4 sm:$0xff]  }
  0x8a   :  { %8309 = vmatprep.subr.bf16.mxu0 %v8480_v39  ;;  %v8539_v39 = vld [vmem:[#allocation3 + $0x388] ss:$88 sps:$4 sm:$0xff]  }
  0x8d   :  { %8310 = vmatpush3.bf16.msra.mxu0 %v8481_v41  ;;  %v8547_v41 = vld [vmem:[#allocation3 + $0x2dc] ss:$88 sps:$4 sm:$0xff]  }
  0x8e   :  { %8311 = vmatprep.subr.bf16.mxu0 %v8483_v43  ;;  %v8545_v43 = vld [vmem:[#allocation3 + $0x2d8] ss:$88 sps:$4 sm:$0xff]  }
  0x91   :  { %8312 = vmatpush3.bf16.msra.mxu0 %v8487_v44  ;;  %v8529_v44 = vld [vmem:[#allocation3 + $0x174] ss:$88 sps:$4 sm:$0xff]  }
  0x92   :  { %1580 = vmatprep.subr.bf16.mxu0 %v8505_v45  ;;  %v8553_v45 = vld [vmem:[#allocation3 + $0x22c] ss:$88 sps:$4 sm:$0xff]  }
 0x132   :  { %v344_v54 = vpop.f32.mrf.mxu1 }
 0x133   :  { %v345_v57 = vadd.f32 %v344_v54, %v179_v52  ;;  %v8551_v52 = vld [vmem:[#allocation3 + $0x228] ss:$88 sps:$4 sm:$0xff]   ;;  %v8559_v54 = vld [vmem:[#allocation3 + $0x17c] ss:$88 sps:$4 sm:$0xff]  }
 0x134   :  { %v303_v56 = vpop.f32.mrf.mxu0  ;;  %v8360_v59 = vpop.f32.mrf.mxu1 }
 0x135   :  { %v304_v58 = vadd.f32 %v303_v56, %v171_v53  ;;  %v352_v60 = vmax.f32 %v345_v57, 0.0  ;;  %v8535_v53 = vld [vmem:[#allocation3 + $0xc4] ss:$88 sps:$4 sm:$0xff]   ;;  %v8557_v56 = vld [vmem:[#allocation3 + $0x178] ss:$88 sps:$4 sm:$0xff]  }
 0x136   :  { %v305_v61 = vpop.f32.mrf.mxu0  ;;  %v347_v2 = vpop.f32.mrf.mxu1  ;;  %v8538_v57 = vld [vmem:[#allocation3 + $0x14] ss:$88 sps:$4 sm:$0xff]   ;;  %v8536_v59 = vld [vmem:[#allocation3 + $0x10] ss:$88 sps:$4 sm:$0xff]  }
 0x137   :  { %v350_v62 = vmax.f32 %v304_v58, 0.0  ;;  %v306_v63 = vadd.f32 %v305_v61, %v175_v55  ;;  %v355_v4 = vpack.c.bf16 %v352_v60, %v352_v60  ;;  %v8533_v55 = vld [vmem:[#allocation3 + $0xc0] ss:$88 sps:$4 sm:$0xff]   ;;  %v8565_v58 = vld [vmem:[#allocation3 + $0xcc] ss:$88 sps:$4 sm:$0xff]  }
 0x138   :  { %v307_v6 = vpop.f32.mrf.mxu0  ;;  %v8361_v8 = vpop.f32.mrf.mxu1  ;;  %v8563_v60 = vld [vmem:[#allocation3 + $0xc8] ss:$88 sps:$4 sm:$0xff]   ;;  %v8544_v61 = vld [vmem:[#allocation3 + $0x394] ss:$88 sps:$4 sm:$0xff]   ;;  %v8569_v2 = vld [vmem:[#allocation3 + $0x18] ss:$88 sps:$4 sm:$0xff]  }
 0x139   :  { %v351_v7 = vmax.f32 %v306_v63, 0.0  ;;  %v353_v9 = vpack.c.bf16 %v350_v62, %v350_v62  ;;  %8375 = vmatmul.mubr.msk.bf16.vlgmr.msra.gmra.mxu1 %vm539_vm3, %v355_v4  ;;  %v8571_v62 = vld [vmem:[#allocation3 + $0x1c] ss:$88 sps:$4 sm:$0xff]   ;;  %v8542_v63 = vld [vmem:[#allocation3 + $0x390] ss:$88 sps:$4 sm:$0xff]  }
 0x13a   :  { %v308_v10 = vpop.f32.mrf.mxu0  ;;  %1540 = vmatpush1.bf16.msra.mxu1 %v8484_v3  ;;  %1567 = vmatprep.mubr.bf16.mxu1 %v12972_v1  ;;  %v8550_v3 = vld [vmem:[#allocation3 + $0x2e4] ss:$88 sps:$4 sm:$0xff]   ;;  %v8575_v6 = vld [vmem:[#allocation3 + $0x398] ss:$88 sps:$4 sm:$0xff]  }
 0x13b   :  { %v354_v11 = vpack.c.bf16 %v351_v7, %v351_v7  ;;  %1541 = vmatprep.subr.bf16.mxu1 %v8490_v5  ;;  %v8577_v4 = vld [vmem:[#allocation3 + $0x39c] ss:$88 sps:$4 sm:$0xff]   ;;  %v8548_v5 = vld [vmem:[#allocation3 + $0x2e0] ss:$88 sps:$4 sm:$0xff]   ;;  %v8583_v8 = vld [vmem:[#allocation3 + $0x2ec] ss:$88 sps:$4 sm:$0xff]  }
 0x13c   :  { %v8556_v7 = vld [vmem:[#allocation3 + $0x234] ss:$88 sps:$4 sm:$0xff]   ;;  %v8581_v10 = vld [vmem:[#allocation3 + $0x2e8] ss:$88 sps:$4 sm:$0xff]  }
 0x13d   :  { %575 = vmatprep.mubr.bf16.mxu0 %v354_v11  ;;  %v8562_v11 = vld [vmem:[#allocation3 + $0x184] ss:$88 sps:$4 sm:$0xff]  }
 0x13e   :  { %576 = vmatmul.mubr.bf16.vlgmr.msra.gmra.mxu0 %v353_v9  ;;  %1542 = vmatpush1.bf16.msra.mxu1 %v8488_v12  ;;  %v8554_v9 = vld [vmem:[#allocation3 + $0x230] ss:$88 sps:$4 sm:$0xff]   ;;  %v8589_v12 = vld [vmem:[#allocation3 + $0x23c] ss:$88 sps:$4 sm:$0xff]  }
 0x13f   :  { %1581 = vmatpush1.bf16.msra.mxu0 %v8503_v13  ;;  %1543 = vmatprep.subr.bf16.mxu1 %v8493_v14  ;;  %v8560_v13 = vld [vmem:[#allocation3 + $0x180] ss:$88 sps:$4 sm:$0xff]  }
 0x140   :  { %1582 = vmatprep.subr.bf16.mxu0 %v8508_v15  ;;  %1608 = vmatprep.mubr.bf16.mxu0 %v12972_v1  ;;  %v8587_v14 = vld [vmem:[#allocation3 + $0x238] ss:$88 sps:$4 sm:$0xff]   ;;  %v8568_v15 = vld [vmem:[#allocation3 + $0xd4] ss:$88 sps:$4 sm:$0xff]  }
 0x142   :  { %1544 = vmatpush1.bf16.msra.mxu1 %v8491_v16  ;;  %v8595_v16 = vld [vmem:[#allocation3 + $0x18c] ss:$88 sps:$4 sm:$0xff]  }
 0x143   :  { %1583 = vmatpush1.bf16.msra.mxu0 %v8506_v17  ;;  %1545 = vmatprep.subr.bf16.mxu1 %v8496_v18  ;;  %v8566_v17 = vld [vmem:[#allocation3 + $0xd0] ss:$88 sps:$4 sm:$0xff]  }
 0x144   :  { %1584 = vmatprep.subr.bf16.mxu0 %v8514_v19  ;;  %v8593_v18 = vld [vmem:[#allocation3 + $0x188] ss:$88 sps:$4 sm:$0xff]   ;;  %v8574_v19 = vld [vmem:[#allocation3 + $0x24] ss:$88 sps:$4 sm:$0xff]  }
 0x146   :  { %1546 = vmatpush1.bf16.msra.mxu1 %v8494_v20  ;;  %v8601_v20 = vld [vmem:[#allocation3 + $0xdc] ss:$88 sps:$4 sm:$0xff]  }
 0x147   :  { %1585 = vmatpush1.bf16.msra.mxu0 %v8512_v21  ;;  %1547 = vmatprep.subr.bf16.mxu1 %v8499_v22  ;;  %v8572_v21 = vld [vmem:[#allocation3 + $0x20] ss:$88 sps:$4 sm:$0xff]  }
 0x148   :  { %1586 = vmatprep.subr.bf16.mxu0 %v8520_v23  ;;  %v8599_v22 = vld [vmem:[#allocation3 + $0xd8] ss:$88 sps:$4 sm:$0xff]   ;;  %v8580_v23 = vld [vmem:[#allocation3 + $0x3a4] ss:$88 sps:$4 sm:$0xff]  }
 0x14a   :  { %1548 = vmatpush1.bf16.msra.mxu1 %v8497_v24  ;;  %v8607_v24 = vld [vmem:[#allocation3 + $0x2c] ss:$88 sps:$4 sm:$0xff]  }
 0x14b   :  { %1587 = vmatpush1.bf16.msra.mxu0 %v8518_v25  ;;  %1549 = vmatprep.subr.bf16.mxu1 %v8502_v26  ;;  %v8578_v25 = vld [vmem:[#allocation3 + $0x3a0] ss:$88 sps:$4 sm:$0xff]  }
 0x14c   :  { %1588 = vmatprep.subr.bf16.mxu0 %v8526_v27  ;;  %v8605_v26 = vld [vmem:[#allocation3 + $0x28] ss:$88 sps:$4 sm:$0xff]   ;;  %v8586_v27 = vld [vmem:[#allocation3 + $0x2f4] ss:$88 sps:$4 sm:$0xff]  }
 0x14e   :  { %1550 = vmatpush1.bf16.msra.mxu1 %v8500_v28  ;;  %v8613_v28 = vld [vmem:[#allocation3 + $0x3ac] ss:$88 sps:$4 sm:$0xff]  }
 0x14f   :  { %1589 = vmatpush1.bf16.msra.mxu0 %v8524_v30  ;;  %1621 = vmatprep.subr.bf16.mxu1 %v8511_v31  ;;  %v8611_v30 = vld [vmem:[#allocation3 + $0x3a8] ss:$88 sps:$4 sm:$0xff]   ;;  %v8592_v31 = vld [vmem:[#allocation3 + $0x244] ss:$88 sps:$4 sm:$0xff]  }
 0x150   :  { %1590 = vmatprep.subr.bf16.mxu0 %v8532_v32  ;;  %v8619_v32 = vld [vmem:[#allocation3 + $0x2fc] ss:$88 sps:$4 sm:$0xff]  }
 0x151   :  { %8192 = vmatmul.mubr.msk.bf16.vlgmr.msra.gmra.mxu1 %vm539_vm3, %v9628_v33 }
 0x152   :  { %1622 = vmatpush1.bf16.msra.mxu1 %v8509_v34  ;;  %1649 = vmatprep.mubr.bf16.mxu1 %v12972_v1  ;;  %v8590_v34 = vld [vmem:[#allocation3 + $0x240] ss:$88 sps:$4 sm:$0xff]  }
 0x153   :  { %1591 = vmatpush1.bf16.msra.mxu0 %v8530_v35  ;;  %1623 = vmatprep.subr.bf16.mxu1 %v8517_v36  ;;  %v8617_v35 = vld [vmem:[#allocation3 + $0x2f8] ss:$88 sps:$4 sm:$0xff]   ;;  %v8598_v36 = vld [vmem:[#allocation3 + $0x194] ss:$88 sps:$4 sm:$0xff]  }
 0x154   :  { %1662 = vmatprep.subr.bf16.mxu0 %v8541_v37  ;;  %v8625_v37 = vld [vmem:[#allocation3 + $0x24c] ss:$88 sps:$4 sm:$0xff]  }
 0x156   :  { %8193 = vmatmul.mubr.msk.bf16.vlgmr.msra.gmra.mxu0 %vm539_vm3, %v9628_v33  ;;  %1624 = vmatpush1.bf16.msra.mxu1 %v8515_v38  ;;  %v8596_v38 = vld [vmem:[#allocation3 + $0x190] ss:$88 sps:$4 sm:$0xff]  }
 0x157   :  { %1663 = vmatpush1.bf16.msra.mxu0 %v8539_v39  ;;  %1625 = vmatprep.subr.bf16.mxu1 %v8523_v40  ;;  %v8623_v39 = vld [vmem:[#allocation3 + $0x248] ss:$88 sps:$4 sm:$0xff]   ;;  %v8604_v40 = vld [vmem:[#allocation3 + $0xe4] ss:$88 sps:$4 sm:$0xff]  }
 0x158   :  { %1664 = vmatprep.subr.bf16.mxu0 %v8547_v41  ;;  %1690 = vmatprep.mubr.bf16.mxu0 %v12972_v1  ;;  %v8631_v41 = vld [vmem:[#allocation3 + $0x19c] ss:$88 sps:$4 sm:$0xff]  }
 0x15a   :  { %1626 = vmatpush1.bf16.msra.mxu1 %v8521_v42  ;;  %v8602_v42 = vld [vmem:[#allocation3 + $0xe0] ss:$88 sps:$4 sm:$0xff]  }
 0x15b   :  { %1665 = vmatpush1.bf16.msra.mxu0 %v8545_v43  ;;  %1627 = vmatprep.subr.bf16.mxu1 %v8529_v44  ;;  %v8629_v43 = vld [vmem:[#allocation3 + $0x198] ss:$88 sps:$4 sm:$0xff]   ;;  %v8610_v44 = vld [vmem:[#allocation3 + $0x34] ss:$88 sps:$4 sm:$0xff]  }
 0x15c   :  { %1666 = vmatprep.subr.bf16.mxu0 %v8553_v45  ;;  %v8637_v45 = vld [vmem:[#allocation3 + $0xec] ss:$88 sps:$4 sm:$0xff]  }
 0x15e   :  { %1628 = vmatpush1.bf16.msra.mxu1 %v8527_v49  ;;  %v8608_v49 = vld [vmem:[#allocation3 + $0x30] ss:$88 sps:$4 sm:$0xff]  }
 0x15f   :  { %1667 = vmatpush1.bf16.msra.mxu0 %v8551_v52  ;;  %1629 = vmatprep.subr.bf16.mxu1 %v8535_v53  ;;  %v8635_v52 = vld [vmem:[#allocation3 + $0xe8] ss:$88 sps:$4 sm:$0xff]   ;;  %v8616_v53 = vld [vmem:[#allocation3 + $0x3b4] ss:$88 sps:$4 sm:$0xff]  }
 0x160   :  { %1668 = vmatprep.subr.bf16.mxu0 %v8559_v54  ;;  %v8643_v54 = vld [vmem:[#allocation3 + $0x3c] ss:$88 sps:$4 sm:$0xff]  }
 0x162   :  { %1630 = vmatpush1.bf16.msra.mxu1 %v8533_v55  ;;  %v8614_v55 = vld [vmem:[#allocation3 + $0x3b0] ss:$88 sps:$4 sm:$0xff]  }
 0x163   :  { %1669 = vmatpush1.bf16.msra.mxu0 %v8557_v56  ;;  %1631 = vmatprep.subr.bf16.mxu1 %v8538_v57  ;;  %v8641_v56 = vld [vmem:[#allocation3 + $0x38] ss:$88 sps:$4 sm:$0xff]   ;;  %v8622_v57 = vld [vmem:[#allocation3 + $0x304] ss:$88 sps:$4 sm:$0xff]  }
 0x164   :  { %1670 = vmatprep.subr.bf16.mxu0 %v8565_v58  ;;  %v8649_v58 = vld [vmem:[#allocation3 + $0x3bc] ss:$88 sps:$4 sm:$0xff]  }
 0x166   :  { %1632 = vmatpush1.bf16.msra.mxu1 %v8536_v59  ;;  %v8620_v59 = vld [vmem:[#allocation3 + $0x300] ss:$88 sps:$4 sm:$0xff]  }
 0x167   :  { %1671 = vmatpush1.bf16.msra.mxu0 %v8563_v60  ;;  %1703 = vmatprep.subr.bf16.mxu1 %v8544_v61  ;;  %v8647_v60 = vld [vmem:[#allocation3 + $0x3b8] ss:$88 sps:$4 sm:$0xff]   ;;  %v8628_v61 = vld [vmem:[#allocation3 + $0x254] ss:$88 sps:$4 sm:$0xff]  }
 0x168   :  { %1672 = vmatprep.subr.bf16.mxu0 %v8571_v62  ;;  %v8655_v62 = vld [vmem:[#allocation3 + $0x30c] ss:$88 sps:$4 sm:$0xff]  }
 0x169   :  { %8194 = vmatmul.mubr.msk.bf16.vlgmr.msra.gmra.mxu1 %vm539_vm3, %v9628_v33 }
 0x16a   :  { %1704 = vmatpush1.bf16.msra.mxu1 %v8542_v63  ;;  %1731 = vmatprep.mubr.bf16.mxu1 %v12972_v1  ;;  %v8626_v63 = vld [vmem:[#allocation3 + $0x250] ss:$88 sps:$4 sm:$0xff]  }
 0x16b   :  { %1673 = vmatpush1.bf16.msra.mxu0 %v8569_v2  ;;  %1705 = vmatprep.subr.bf16.mxu1 %v8550_v3  ;;  %v8653_v2 = vld [vmem:[#allocation3 + $0x308] ss:$88 sps:$4 sm:$0xff]   ;;  %v8634_v3 = vld [vmem:[#allocation3 + $0x1a4] ss:$88 sps:$4 sm:$0xff]  }
 0x16c   :  { %1744 = vmatprep.subr.bf16.mxu0 %v8577_v4  ;;  %v8661_v4 = vld [vmem:[#allocation3 + $0x25c] ss:$88 sps:$4 sm:$0xff]  }
 0x16e   :  { %8195 = vmatmul.mubr.msk.bf16.vlgmr.msra.gmra.mxu0 %vm539_vm3, %v9628_v33  ;;  %1706 = vmatpush1.bf16.msra.mxu1 %v8548_v5  ;;  %v8632_v5 = vld [vmem:[#allocation3 + $0x1a0] ss:$88 sps:$4 sm:$0xff]  }
 0x16f   :  { %1745 = vmatpush1.bf16.msra.mxu0 %v8575_v6  ;;  %1707 = vmatprep.subr.bf16.mxu1 %v8556_v7  ;;  %v8659_v6 = vld [vmem:[#allocation3 + $0x258] ss:$88 sps:$4 sm:$0xff]   ;;  %v8640_v7 = vld [vmem:[#allocation3 + $0xf4] ss:$88 sps:$4 sm:$0xff]  }
 0x170   :  { %1746 = vmatprep.subr.bf16.mxu0 %v8583_v8  ;;  %1772 = vmatprep.mubr.bf16.mxu0 %v12972_v1  ;;  %v8667_v8 = vld [vmem:[#allocation3 + $0x1ac] ss:$88 sps:$4 sm:$0xff]  }
 0x172   :  { %1708 = vmatpush1.bf16.msra.mxu1 %v8554_v9  ;;  %v8638_v9 = vld [vmem:[#allocation3 + $0xf0] ss:$88 sps:$4 sm:$0xff]  }
 0x173   :  { %1747 = vmatpush1.bf16.msra.mxu0 %v8581_v10  ;;  %1709 = vmatprep.subr.bf16.mxu1 %v8562_v11  ;;  %v8665_v10 = vld [vmem:[#allocation3 + $0x1a8] ss:$88 sps:$4 sm:$0xff]   ;;  %v8646_v11 = vld [vmem:[#allocation3 + $0x44] ss:$88 sps:$4 sm:$0xff]  }
 0x174   :  { %1748 = vmatprep.subr.bf16.mxu0 %v8589_v12  ;;  %v8673_v12 = vld [vmem:[#allocation3 + $0xfc] ss:$88 sps:$4 sm:$0xff]  }
 0x176   :  { %1710 = vmatpush1.bf16.msra.mxu1 %v8560_v13  ;;  %v8644_v13 = vld [vmem:[#allocation3 + $0x40] ss:$88 sps:$4 sm:$0xff]  }
 0x177   :  { %1749 = vmatpush1.bf16.msra.mxu0 %v8587_v14  ;;  %1711 = vmatprep.subr.bf16.mxu1 %v8568_v15  ;;  %v8671_v14 = vld [vmem:[#allocation3 + $0xf8] ss:$88 sps:$4 sm:$0xff]   ;;  %v8652_v15 = vld [vmem:[#allocation3 + $0x3c4] ss:$88 sps:$4 sm:$0xff]  }
 0x178   :  { %1750 = vmatprep.subr.bf16.mxu0 %v8595_v16  ;;  %v8679_v16 = vld [vmem:[#allocation3 + $0x4c] ss:$88 sps:$4 sm:$0xff]  }
 0x17a   :  { %1712 = vmatpush1.bf16.msra.mxu1 %v8566_v17  ;;  %v8650_v17 = vld [vmem:[#allocation3 + $0x3c0] ss:$88 sps:$4 sm:$0xff]  }
 0x17b   :  { %1751 = vmatpush1.bf16.msra.mxu0 %v8593_v18  ;;  %1713 = vmatprep.subr.bf16.mxu1 %v8574_v19  ;;  %v8677_v18 = vld [vmem:[#allocation3 + $0x48] ss:$88 sps:$4 sm:$0xff]   ;;  %v8658_v19 = vld [vmem:[#allocation3 + $0x314] ss:$88 sps:$4 sm:$0xff]  }
 0x17c   :  { %1752 = vmatprep.subr.bf16.mxu0 %v8601_v20  ;;  %v9657_v20 = vld [vmem:[%s12952_s4 + $0xe4] ss:$16 sps:$4 sm:$0xff]  }
 0x17e   :  { %1714 = vmatpush1.bf16.msra.mxu1 %v8572_v21  ;;  %v8656_v21 = vld [vmem:[#allocation3 + $0x310] ss:$88 sps:$4 sm:$0xff]  }
 0x17f   :  { %1753 = vmatpush1.bf16.msra.mxu0 %v8599_v22  ;;  %1785 = vmatprep.subr.bf16.mxu1 %v8580_v23  ;;  %v9664_v22 = vld [vmem:[%s12952_s4 + $0xe0] ss:$16 sps:$4 sm:$0xff]   ;;  %v8664_v23 = vld [vmem:[#allocation3 + $0x264] ss:$88 sps:$4 sm:$0xff]  }
 0x180   :  { %1754 = vmatprep.subr.bf16.mxu0 %v8607_v24  ;;  %v9670_v24 = vld [vmem:[%s12952_s4 + $0xc4] ss:$16 sps:$4 sm:$0xff]  }
 0x181   :  { %8196 = vmatmul.mubr.msk.bf16.vlgmr.msra.gmra.mxu1 %vm539_vm3, %v9628_v33 }
 0x182   :  { %1786 = vmatpush1.bf16.msra.mxu1 %v8578_v25  ;;  %1813 = vmatprep.mubr.bf16.mxu1 %v12972_v1  ;;  %v8662_v25 = vld [vmem:[#allocation3 + $0x260] ss:$88 sps:$4 sm:$0xff]  }
 0x183   :  { %1755 = vmatpush1.bf16.msra.mxu0 %v8605_v26  ;;  %1787 = vmatprep.subr.bf16.mxu1 %v8586_v27  ;;  %v9679_v26 = vld [vmem:[%s12952_s4 + $0xc0] ss:$16 sps:$4 sm:$0xff]   ;;  %v8670_v27 = vld [vmem:[#allocation3 + $0x1b4] ss:$88 sps:$4 sm:$0xff]  }
 0x184   :  { %1826 = vmatprep.subr.bf16.mxu0 %v8613_v28  ;;  %v9685_v28 = vld [vmem:[%s12952_s4 + $0xa4] ss:$16 sps:$4 sm:$0xff]  }
 0x186   :  { %8197 = vmatmul.mubr.msk.bf16.vlgmr.msra.gmra.mxu0 %vm539_vm3, %v9628_v33  ;;  %1788 = vmatpush1.bf16.msra.mxu1 %v8584_v29  ;;  %v8668_v29 = vld [vmem:[#allocation3 + $0x1b0] ss:$88 sps:$4 sm:$0xff]  }
 0x187   :  { %1827 = vmatpush1.bf16.msra.mxu0 %v8611_v30  ;;  %1789 = vmatprep.subr.bf16.mxu1 %v8592_v31  ;;  %v9692_v30 = vld [vmem:[%s12952_s4 + $0xa0] ss:$16 sps:$4 sm:$0xff]   ;;  %v8676_v31 = vld [vmem:[#allocation3 + $0x104] ss:$88 sps:$4 sm:$0xff]  }
 0x188   :  { %1828 = vmatprep.subr.bf16.mxu0 %v8619_v32  ;;  %1854 = vmatprep.mubr.bf16.mxu0 %v12972_v1  ;;  %v9698_v32 = vld [vmem:[%s12952_s4 + $0x84] ss:$16 sps:$4 sm:$0xff]  }
 0x18a   :  { %1790 = vmatpush1.bf16.msra.mxu1 %v8590_v34  ;;  %v8674_v34 = vld [vmem:[#allocation3 + $0x100] ss:$88 sps:$4 sm:$0xff]  }
 0x18b   :  { %1829 = vmatpush1.bf16.msra.mxu0 %v8617_v35  ;;  %1791 = vmatprep.subr.bf16.mxu1 %v8598_v36  ;;  %v9704_v35 = vld [vmem:[%s12952_s4 + $0x80] ss:$16 sps:$4 sm:$0xff]   ;;  %v8682_v36 = vld [vmem:[#allocation3 + $0x54] ss:$88 sps:$4 sm:$0xff]  }
 0x18c   :  { %1830 = vmatprep.subr.bf16.mxu0 %v8625_v37  ;;  %v9710_v37 = vld [vmem:[%s12952_s4 + $0x64] ss:$16 sps:$4 sm:$0xff]  }
 0x18e   :  { %1792 = vmatpush1.bf16.msra.mxu1 %v8596_v38  ;;  %v8680_v38 = vld [vmem:[#allocation3 + $0x50] ss:$88 sps:$4 sm:$0xff]  }
 0x18f   :  { %1831 = vmatpush1.bf16.msra.mxu0 %v8623_v39  ;;  %1793 = vmatprep.subr.bf16.mxu1 %v8604_v40  ;;  %v9716_v39 = vld [vmem:[%s12952_s4 + $0x60] ss:$16 sps:$4 sm:$0xff]   ;;  %v9721_v40 = vld [vmem:[%s12952_s4 + $0xec] ss:$16 sps:$4 sm:$0xff]  }
 0x190   :  { %1832 = vmatprep.subr.bf16.mxu0 %v8631_v41  ;;  %v9727_v41 = vld [vmem:[%s12952_s4 + $0x44] ss:$16 sps:$4 sm:$0xff]  }
 0x192   :  { %1794 = vmatpush1.bf16.msra.mxu1 %v8602_v42  ;;  %v9732_v42 = vld [vmem:[%s12952_s4 + $0xe8] ss:$16 sps:$4 sm:$0xff]  }
 0x193   :  { %1833 = vmatpush1.bf16.msra.mxu0 %v8629_v43  ;;  %1795 = vmatprep.subr.bf16.mxu1 %v8610_v44  ;;  %v9738_v43 = vld [vmem:[%s12952_s4 + $0x40] ss:$16 sps:$4 sm:$0xff]   ;;  %v9744_v44 = vld [vmem:[%s12952_s4 + $0xcc] ss:$16 sps:$4 sm:$0xff]  }
 0x194   :  { %1834 = vmatprep.subr.bf16.mxu0 %v8637_v45  ;;  %v9750_v45 = vld [vmem:[%s12952_s4 + $0x24] ss:$16 sps:$4 sm:$0xff]  }
 0x196   :  { %1796 = vmatpush1.bf16.msra.mxu1 %v8608_v49  ;;  %v9758_v49 = vld [vmem:[%s12952_s4 + $0xc8] ss:$16 sps:$4 sm:$0xff]  }
 0x197   :  { %1835 = vmatpush1.bf16.msra.mxu0 %v8635_v52  ;;  %1867 = vmatprep.subr.bf16.mxu1 %v8616_v53  ;;  %v9764_v52 = vld [vmem:[%s12952_s4 + $0x20] ss:$16 sps:$4 sm:$0xff]   ;;  %v9776_v53 = vld [vmem:[%s12952_s4 + $0x4] ss:$16 sps:$4 sm:$0xff]  }
 0x198   :  { %1836 = vmatprep.subr.bf16.mxu0 %v8643_v54  ;;  %v9783_v54 = vld [vmem:[%s12952_s4 + $0xa8] ss:$16 sps:$4 sm:$0xff]  }
 0x199   :  { %8198 = vmatmul.mubr.msk.bf16.vlgmr.msra.gmra.mxu1 %vm539_vm3, %v9628_v33 }
 0x19a   :  { %1868 = vmatpush1.bf16.msra.mxu1 %v8614_v55  ;;  %1895 = vmatprep.mubr.bf16.mxu1 %v12972_v1  ;;  %v9789_v55 = vld [vmem:[%s12952_s4] ss:$16 sps:$4 sm:$0xff]  }
 0x19b   :  { %1837 = vmatpush1.bf16.msra.mxu0 %v8641_v56  ;;  %1869 = vmatprep.subr.bf16.mxu1 %v8622_v57  ;;  %v9795_v56 = vld [vmem:[%s12952_s4 + $0x8c] ss:$16 sps:$4 sm:$0xff]   ;;  %v9802_v57 = vld [vmem:[%s12952_s4 + $0x88] ss:$16 sps:$4 sm:$0xff]  }
 0x19c   :  { %1908 = vmatprep.subr.bf16.mxu0 %v8649_v58  ;;  %v9809_v58 = vld [vmem:[%s12952_s4 + $0x6c] ss:$16 sps:$4 sm:$0xff]  }
 0x19e   :  { %8199 = vmatmul.mubr.msk.bf16.vlgmr.msra.gmra.mxu0 %vm539_vm3, %v9628_v33  ;;  %1870 = vmatpush1.bf16.msra.mxu1 %v8620_v59  ;;  %v9816_v59 = vld [vmem:[%s12952_s4 + $0x68] ss:$16 sps:$4 sm:$0xff]  }
 0x19f   :  { %1909 = vmatpush1.bf16.msra.mxu0 %v8647_v60  ;;  %1871 = vmatprep.subr.bf16.mxu1 %v8628_v61  ;;  %v9822_v60 = vld [vmem:[%s12952_s4 + $0x4c] ss:$16 sps:$4 sm:$0xff]   ;;  %v9828_v61 = vld [vmem:[%s12952_s4 + $0x48] ss:$16 sps:$4 sm:$0xff]  }
 0x1a0   :  { %1910 = vmatprep.subr.bf16.mxu0 %v8655_v62  ;;  %1936 = vmatprep.mubr.bf16.mxu0 %v12972_v1  ;;  %v9834_v62 = vld [vmem:[%s12952_s4 + $0x2c] ss:$16 sps:$4 sm:$0xff]  }
 0x1a2   :  { %1872 = vmatpush1.bf16.msra.mxu1 %v8626_v63  ;;  %v9840_v63 = vld [vmem:[%s12952_s4 + $0x28] ss:$16 sps:$4 sm:$0xff]  }
 0x1a3   :  { %1911 = vmatpush1.bf16.msra.mxu0 %v8653_v2  ;;  %1873 = vmatprep.subr.bf16.mxu1 %v8634_v3  ;;  %v9846_v2 = vld [vmem:[%s12952_s4 + $0xc] ss:$16 sps:$4 sm:$0xff]   ;;  %v9852_v3 = vld [vmem:[%s12952_s4 + $0x8] ss:$16 sps:$4 sm:$0xff]  }
 0x1a4   :  { %1912 = vmatprep.subr.bf16.mxu0 %v8661_v4 }
 0x1a6   :  { %1874 = vmatpush1.bf16.msra.mxu1 %v8632_v5 }
 0x1a7   :  { %1913 = vmatpush1.bf16.msra.mxu0 %v8659_v6  ;;  %1875 = vmatprep.subr.bf16.mxu1 %v8640_v7 }
 0x1a8   :  { %1914 = vmatprep.subr.bf16.mxu0 %v8667_v8  ;;  %v8036_v8 = vld [vmem:[#allocation9] ss:$0 sm:$0xff] }
 0x1aa   :  { %1876 = vmatpush1.bf16.msra.mxu1 %v8638_v9 }
 0x1ab   :  { %1915 = vmatpush1.bf16.msra.mxu0 %v8665_v10  ;;  %1877 = vmatprep.subr.bf16.mxu1 %v8646_v11 }
 0x1ac   :  { %1916 = vmatprep.subr.bf16.mxu0 %v8673_v12 }
 0x1ae   :  { %1878 = vmatpush1.bf16.msra.mxu1 %v8644_v13 }
 0x1af   :  { %1917 = vmatpush1.bf16.msra.mxu0 %v8671_v14  ;;  %1949 = vmatprep.subr.bf16.mxu1 %v8652_v15 }
 0x1b0   :  { %1918 = vmatprep.subr.bf16.mxu0 %v8679_v16  ;;  %v9862_v16 = vld [vmem:[%s12951_s3] sm:$0xff] }
 0x1b1   :  { %8200 = vmatmul.mubr.msk.bf16.vlgmr.msra.gmra.mxu1 %vm539_vm3, %v9628_v33 }
 0x1b2   :  { %1950 = vmatpush1.bf16.msra.mxu1 %v8650_v17  ;;  %1977 = vmatprep.mubr.bf16.mxu1 %v12972_v1  ;;  %v765_v17 = vrot.slane %v9862_v16, %v9614_v50 }
 0x1b3   :  { %1919 = vmatpush1.bf16.msra.mxu0 %v8677_v18  ;;  %1951 = vmatprep.subr.bf16.mxu1 %v8658_v19 }
 0x1b4   :  { %2244 = vmatprep.subr.bf16.mxu0 %v9657_v20 }
 0x1b6   :  { %8201 = vmatmul.mubr.msk.bf16.vlgmr.msra.gmra.mxu0 %vm539_vm3, %v9628_v33  ;;  %1952 = vmatpush1.bf16.msra.mxu1 %v8656_v21 }
 0x1b7   :  { %2245 = vmatpush1.bf16.msra.mxu0 %v9664_v22  ;;  %1953 = vmatprep.subr.bf16.mxu1 %v8664_v23 }
 0x1b8   :  { %2246 = vmatprep.subr.bf16.mxu0 %v9670_v24  ;;  %2276 = vmatprep.mubr.bf16.mxu0 %v12972_v1 }
 0x1ba   :  { %1954 = vmatpush1.bf16.msra.mxu1 %v8662_v25 }
 0x1bb   :  { %2247 = vmatpush1.bf16.msra.mxu0 %v9679_v26  ;;  %1955 = vmatprep.subr.bf16.mxu1 %v8670_v27 }
 0x1bc   :  { %2248 = vmatprep.subr.bf16.mxu0 %v9685_v28 }
 0x1be   :  { %1956 = vmatpush1.bf16.msra.mxu1 %v8668_v29 }
 0x1bf   :  { %2249 = vmatpush1.bf16.msra.mxu0 %v9692_v30  ;;  %1957 = vmatprep.subr.bf16.mxu1 %v8676_v31 }
 0x1c0   :  { %2250 = vmatprep.subr.bf16.mxu0 %v9698_v32 }
 0x1c2   :  { %1958 = vmatpush1.bf16.msra.mxu1 %v8674_v34 }
 0x1c3   :  { %2251 = vmatpush1.bf16.msra.mxu0 %v9704_v35  ;;  %1959 = vmatprep.subr.bf16.mxu1 %v8682_v36  ;;  %v12971_v36 = vsub.s32 6, %v9608_v47 }
 0x1c4   :  { %2252 = vmatprep.subr.bf16.mxu0 %v9710_v37 }
 0x1c6   :  { %1960 = vmatpush1.bf16.msra.mxu1 %v8680_v38  ;;  %v9874_v38 = vld [vmem:[%s12951_s3 + $0x8] sm:$0xff] }
 0x1c7   :  { %2253 = vmatpush1.bf16.msra.mxu0 %v9716_v39  ;;  %2285 = vmatprep.subr.bf16.mxu1 %v9721_v40 }
 0x1c8   :  { %2254 = vmatprep.subr.bf16.mxu0 %v9727_v41 }
 0x1c9   :  { %8202 = vmatmul.mubr.msk.bf16.vlgmr.msra.gmra.mxu1 %vm539_vm3, %v9628_v33  ;;  %v9770_v33 = vld [vmem:[%s12952_s4 + $0xac] ss:$16 sps:$4 sm:$0xff]  }
 0x1ca   :  { %2286 = vmatpush1.bf16.msra.mxu1 %v9732_v42  ;;  %2317 = vmatprep.mubr.bf16.mxu1 %v12972_v1 }
 0x1cb   :  { %2255 = vmatpush1.bf16.msra.mxu0 %v9738_v43  ;;  %2287 = vmatprep.subr.bf16.mxu1 %v9744_v44 }
 0x1cc   :  { %2256 = vmatprep.subr.bf16.mxu0 %v9750_v45 }
 0x1ce   :  { %2288 = vmatpush1.bf16.msra.mxu1 %v9758_v49 }
 0x1cf   :  { %2257 = vmatpush1.bf16.msra.mxu0 %v9764_v52  ;;  %2289 = vmatprep.subr.bf16.mxu1 %v9770_v33 }
 0x1d0   :  { %2258 = vmatprep.subr.bf16.mxu0 %v9776_v53 }
 0x1d2   :  { %2290 = vmatpush1.bf16.msra.mxu1 %v9783_v54 }
 0x1d3   :  { %2259 = vmatpush1.bf16.msra.mxu0 %v9789_v55  ;;  %2291 = vmatprep.subr.bf16.mxu1 %v9795_v56 }
 0x1d4   :  { %2349 = vmatprep.subr.bf16.mxu0 %v9657_v20 }
 0x1d6   :  { %2292 = vmatpush1.bf16.msra.mxu1 %v9802_v57 }
 0x1d7   :  { %2293 = vmatprep.subr.bf16.mxu1 %v9809_v58 }
 0x1da   :  { %2294 = vmatpush1.bf16.msra.mxu1 %v9816_v59 }
 0x1db   :  { %2295 = vmatprep.subr.bf16.mxu1 %v9822_v60 }
 0x1de   :  { %2296 = vmatpush1.bf16.msra.mxu1 %v9828_v61 }
 0x1df   :  { %2297 = vmatprep.subr.bf16.mxu1 %v9834_v62 }
 0x1e2   :  { %2298 = vmatpush1.bf16.msra.mxu1 %v9840_v63 }
 0x1e3   :  { %2299 = vmatprep.subr.bf16.mxu1 %v9846_v2 }
 0x1e6   :  { %2300 = vmatpush1.bf16.msra.mxu1 %v9852_v3 }
 0x1e7   :  { %2390 = vmatprep.subr.bf16.mxu1 %v9721_v40 }
 0x1f9   :  { %v617_v4 = vpop.f32.mrf.mxu1 }
 0x1fb   :  { %v8376_v5 = vpop.f32.mrf.mxu1 }
 0x1fd   :  { %v620_v7 = vpop.f32.mrf.mxu1 }
 0x1fe   :  { %v8313_v6 = vpop.f32.mrf.mxu0 }
 0x1ff   :  { %v8377_v10 = vpop.f32.mrf.mxu1 }
 0x200   :  { %v8314_v9 = vpop.f32.mrf.mxu0  ;;  %v769_v10 = vrot.slane %v9862_v16, %v9617_v51 }
 0x201   :  { %v8315_v11 = vadd.f32 %v8314_v9, %v8313_v6  ;;  %v9882_v6 = vrot.slane %v9874_v38, %v12971_v36 }
 0x202   :  { %v8316_v12 = vpop.f32.mrf.mxu0 }
 0x203   :  { %v578_v13 = vadd.f32 %v8315_v11, %v8036_v8 }
 0x204   :  { %v8317_v14 = vpop.f32.mrf.mxu0 }
 0x205   :  { %v9857_v15 = vadd.f32 %v617_v4, %v578_v13  ;;  %v12970_v4 = vsub.s32 7, %v9608_v47 }
 0x207   :  { %13012 = vst [vmem:[#allocation21_spill] sm:$0xff] %v9857_v15  ;;  %v9889_v7 = vrot.slane %v9874_v38, %v12970_v4 }
 0x211   :  { %v1569_v18 = vpop.f32.mrf.mxu1 }
 0x212   :  { %v1570_v19 = vadd.f32 %v1569_v18, %v765_v17 }
 0x213   :  { %v1571_v21 = vpop.f32.mrf.mxu1 }
 0x214   :  { %v1986_v23 = vmax.f32 %v1570_v19, 0.0  ;;  %v1572_v14 = vadd.f32 %v1571_v21, %v769_v10 }
 0x215   :  { %v1573_v25 = vpop.f32.mrf.mxu1 }
 0x216   :  { %v9866_v27 = vpop.f32.mrf.mxu0  ;;  %v2008_v29 = vpack.c.bf16 %v1986_v23, %v1986_v23  ;;  %v1987_v23 = vmax.f32 %v1572_v14, 0.0 }
 0x217   :  { %v1574_v31 = vpop.f32.mrf.mxu1 }
 0x218   :  { %v9868_v34 = vpop.f32.mrf.mxu0  ;;  %2277 = vmatmul.mubr.bf16.vlgmr.msra.gmra.mxu0 %v2008_v29  ;;  %2318 = vmatmul.mubr.bf16.vlgmr.msra.gmra.mxu1 %v2008_v29  ;;  %v2009_v21 = vpack.c.bf16 %v1987_v23, %v1987_v23  ;;  %v9948_v31 = vsub.s32 3, %v9608_v47 }
 0x219   :  { %2350 = vmatpush1.bf16.msra.mxu0 %v9664_v22  ;;  %2391 = vmatpush1.bf16.msra.mxu1 %v9732_v42 }
 0x21a   :  { %v1614_v5 = vpop.f32.mrf.mxu0  ;;  %2351 = vmatprep.subr.bf16.mxu0 %v9670_v24  ;;  %2392 = vmatprep.subr.bf16.mxu1 %v9744_v44  ;;  %v809_v10 = vrot.slane %v9874_v38, %v9948_v31 }
 0x21b   :  { %2381 = vmatprep.mubr.bf16.mxu0 %v12972_v1  ;;  %2422 = vmatprep.mubr.bf16.mxu1 %v12972_v1  ;;  %v805_v5 = vrot.slane %v9874_v38, %v9611_v48 }
 0x21c   :  { %v1615_v8 = vpop.f32.mrf.mxu0 }
 0x21d   :  { %2352 = vmatpush1.bf16.msra.mxu0 %v9679_v26  ;;  %2393 = vmatpush1.bf16.msra.mxu1 %v9758_v49 }
 0x21e   :  { %2353 = vmatprep.subr.bf16.mxu0 %v9685_v28  ;;  %2394 = vmatprep.subr.bf16.mxu1 %v9770_v33 }
 0x221   :  { %2354 = vmatpush1.bf16.msra.mxu0 %v9692_v30  ;;  %2395 = vmatpush1.bf16.msra.mxu1 %v9783_v54 }
 0x222   :  { %2355 = vmatprep.subr.bf16.mxu0 %v9698_v32  ;;  %2396 = vmatprep.subr.bf16.mxu1 %v9795_v56 }
 0x225   :  { %2356 = vmatpush1.bf16.msra.mxu0 %v9704_v35  ;;  %2397 = vmatpush1.bf16.msra.mxu1 %v9802_v57 }
 0x226   :  { %2357 = vmatprep.subr.bf16.mxu0 %v9710_v37  ;;  %2398 = vmatprep.subr.bf16.mxu1 %v9809_v58 }
 0x229   :  { %2358 = vmatpush1.bf16.msra.mxu0 %v9716_v39  ;;  %2399 = vmatpush1.bf16.msra.mxu1 %v9816_v59  ;;  %v9907_v9 = vpop.f32.mrf.mxu1 }
 0x22a   :  { %2359 = vmatprep.subr.bf16.mxu0 %v9727_v41  ;;  %2400 = vmatprep.subr.bf16.mxu1 %v9822_v60 }
 0x22b   :  { %v9913_v11 = vpop.f32.mrf.mxu1 }
 0x22d   :  { %2360 = vmatpush1.bf16.msra.mxu0 %v9738_v43  ;;  %2401 = vmatpush1.bf16.msra.mxu1 %v9828_v61  ;;  %v1655_v12 = vpop.f32.mrf.mxu1 }
 0x22e   :  { %v9917_v13 = vpop.f32.mrf.mxu0  ;;  %2361 = vmatprep.subr.bf16.mxu0 %v9750_v45  ;;  %2402 = vmatprep.subr.bf16.mxu1 %v9834_v62 }
 0x22f   :  { %v1656_v17 = vpop.f32.mrf.mxu1 }
 0x230   :  { %v9921_v18 = vpop.f32.mrf.mxu0 }
 0x231   :  { %2362 = vmatpush1.bf16.msra.mxu0 %v9764_v52  ;;  %2403 = vmatpush1.bf16.msra.mxu1 %v9840_v63 }
 0x232   :  { %v1696_v19 = vpop.f32.mrf.mxu0  ;;  %2363 = vmatprep.subr.bf16.mxu0 %v9776_v53  ;;  %2404 = vmatprep.subr.bf16.mxu1 %v9846_v2 }
 0x234   :  { %v1697_v25 = vpop.f32.mrf.mxu0 }
 0x235   :  { %2364 = vmatpush1.bf16.msra.mxu0 %v9789_v55  ;;  %2405 = vmatpush1.bf16.msra.mxu1 %v9852_v3  ;;  %v773_v25 = vrot.slane %v9862_v16, %v9611_v48 }
 0x236   :  { %2454 = vmatprep.subr.bf16.mxu0 %v9657_v20  ;;  %2495 = vmatprep.subr.bf16.mxu1 %v9721_v40 }
 0x238   :  { %2382 = vmatmul.mubr.bf16.vlgmr.msra.gmra.mxu0 %v2009_v21  ;;  %2423 = vmatmul.mubr.bf16.vlgmr.msra.gmra.mxu1 %v2009_v21 }
 0x239   :  { %2455 = vmatpush1.bf16.msra.mxu0 %v9664_v22  ;;  %2496 = vmatpush1.bf16.msra.mxu1 %v9732_v42 }
 0x23a   :  { %2456 = vmatprep.subr.bf16.mxu0 %v9670_v24  ;;  %2497 = vmatprep.subr.bf16.mxu1 %v9744_v44 }
 0x23b   :  { %2486 = vmatprep.mubr.bf16.mxu0 %v12972_v1  ;;  %2527 = vmatprep.mubr.bf16.mxu1 %v12972_v1 }
 0x23d   :  { %2457 = vmatpush1.bf16.msra.mxu0 %v9679_v26  ;;  %2498 = vmatpush1.bf16.msra.mxu1 %v9758_v49 }
 0x23e   :  { %2458 = vmatprep.subr.bf16.mxu0 %v9685_v28  ;;  %2499 = vmatprep.subr.bf16.mxu1 %v9770_v33 }
 0x241   :  { %2459 = vmatpush1.bf16.msra.mxu0 %v9692_v30  ;;  %2500 = vmatpush1.bf16.msra.mxu1 %v9783_v54  ;;  %v9943_v29 = vpop.f32.mrf.mxu1 }
 0x242   :  { %2460 = vmatprep.subr.bf16.mxu0 %v9698_v32  ;;  %2501 = vmatprep.subr.bf16.mxu1 %v9795_v56 }
 0x243   :  { %v9952_v8 = vpop.f32.mrf.mxu1 }
 0x245   :  { %2461 = vmatpush1.bf16.msra.mxu0 %v9704_v35  ;;  %2502 = vmatpush1.bf16.msra.mxu1 %v9802_v57  ;;  %v1737_v12 = vpop.f32.mrf.mxu1 }
 0x246   :  { %v1774_v14 = vpop.f32.mrf.mxu0  ;;  %2462 = vmatprep.subr.bf16.mxu0 %v9710_v37  ;;  %2503 = vmatprep.subr.bf16.mxu1 %v9809_v58 }
 0x247   :  { %v9960_v17 = vadd.f32 %v1774_v14, %v805_v5  ;;  %v1738_v19 = vpop.f32.mrf.mxu1  ;;  %v1611_v5 = vadd.f32 %v9866_v27, %v773_v25  ;;  %v9980_v27 = vsub.s32 4, %v9608_v47  ;;  %v9985_v14 = vsub.s32 5, %v9608_v47 }
 0x248   :  { %v1776_v23 = vpop.f32.mrf.mxu0 }
 0x249   :  { %v9964_v21 = vadd.f32 %v1776_v23, %v809_v10  ;;  %2463 = vmatpush1.bf16.msra.mxu0 %v9716_v39  ;;  %2504 = vmatpush1.bf16.msra.mxu1 %v9816_v59  ;;  %v1988_v10 = vmax.f32 %v1611_v5, 0.0  ;;  %v813_v19 = vrot.slane %v9874_v38, %v9980_v27  ;;  %v817_v23 = vrot.slane %v9874_v38, %v9985_v14 }
 0x24a   :  { %v1778_v46 = vpop.f32.mrf.mxu0  ;;  %2464 = vmatprep.subr.bf16.mxu0 %v9727_v41  ;;  %2505 = vmatprep.subr.bf16.mxu1 %v9822_v60 }
 0x24b   :  { %v2010_v46 = vpack.c.bf16 %v1988_v10, %v1988_v10 }
 0x24c   :  { %v1779_v12 = vpop.f32.mrf.mxu0 }
 0x24d   :  { %2465 = vmatpush1.bf16.msra.mxu0 %v9738_v43  ;;  %2506 = vmatpush1.bf16.msra.mxu1 %v9828_v61 }
 0x24e   :  { %2466 = vmatprep.subr.bf16.mxu0 %v9750_v45  ;;  %2507 = vmatprep.subr.bf16.mxu1 %v9834_v62 }
 0x251   :  { %2467 = vmatpush1.bf16.msra.mxu0 %v9764_v52  ;;  %2508 = vmatpush1.bf16.msra.mxu1 %v9840_v63 }
 0x252   :  { %2468 = vmatprep.subr.bf16.mxu0 %v9776_v53  ;;  %2509 = vmatprep.subr.bf16.mxu1 %v9846_v2 }
 0x255   :  { %2469 = vmatpush1.bf16.msra.mxu0 %v9789_v55  ;;  %2510 = vmatpush1.bf16.msra.mxu1 %v9852_v3 }
 0x256   :  { %2559 = vmatprep.subr.bf16.mxu0 %v9657_v20  ;;  %2600 = vmatprep.subr.bf16.mxu1 %v9721_v40 }
 0x258   :  { %2487 = vmatmul.mubr.bf16.vlgmr.msra.gmra.mxu0 %v2010_v46  ;;  %2528 = vmatmul.mubr.bf16.vlgmr.msra.gmra.mxu1 %v2010_v46 }
 0x259   :  { %2560 = vmatpush1.bf16.msra.mxu0 %v9664_v22  ;;  %2601 = vmatpush1.bf16.msra.mxu1 %v9732_v42  ;;  %v1815_v25 = vpop.f32.mrf.mxu1 }
 0x25a   :  { %2561 = vmatprep.subr.bf16.mxu0 %v9670_v24  ;;  %2602 = vmatprep.subr.bf16.mxu1 %v9744_v44  ;;  %v9997_v12 = vadd.f32 %v1815_v25, %v813_v19 }
 0x25b   :  { %2591 = vmatprep.mubr.bf16.mxu0 %v12972_v1  ;;  %2632 = vmatprep.mubr.bf16.mxu1 %v12972_v1  ;;  %v1817_v5 = vpop.f32.mrf.mxu1 }
 0x25c   :  { %v10001_v10 = vadd.f32 %v1817_v5, %v817_v23 }
 0x25d   :  { %2562 = vmatpush1.bf16.msra.mxu0 %v9679_v26  ;;  %2603 = vmatpush1.bf16.msra.mxu1 %v9758_v49  ;;  %v1819_v46 = vpop.f32.mrf.mxu1 }
 0x25e   :  { %v1856_v0 = vpop.f32.mrf.mxu0  ;;  %2563 = vmatprep.subr.bf16.mxu0 %v9685_v28  ;;  %2604 = vmatprep.subr.bf16.mxu1 %v9770_v33 }
 0x25f   :  { %v10008_v19 = vadd.f32 %v1856_v0, %v9882_v6  ;;  %v1820_v25 = vpop.f32.mrf.mxu1  ;;  %v777_v0 = vrot.slane %v9862_v16, %v9948_v31  ;;  %v758_v6 = vld [vmem:[%s12951_s3 + $0x10] sm:$0x3f] }
 0x260   :  { %v1858_v4 = vpop.f32.mrf.mxu0 }
 0x261   :  { %v10011_v36 = vadd.f32 %v1858_v4, %v9889_v7  ;;  %2564 = vmatpush1.bf16.msra.mxu0 %v9692_v30  ;;  %2605 = vmatpush1.bf16.msra.mxu1 %v9783_v54  ;;  %v1613_v4 = vadd.f32 %v9868_v34, %v777_v0  ;;  %v837_v34 = vrot.slane %v758_v6, %v9611_v48 }
 0x262   :  { %v1860_v23 = vpop.f32.mrf.mxu0  ;;  %2565 = vmatprep.subr.bf16.mxu0 %v9698_v32  ;;  %2606 = vmatprep.subr.bf16.mxu1 %v9795_v56 }
 0x263   :  { %13013 = vst [vmem:[#allocation22_spill] sm:$0xff] %v10011_v36  ;;  %v1989_v46 = vmax.f32 %v1613_v4, 0.0  ;;  %v841_v23 = vrot.slane %v758_v6, %v9948_v31 }
 0x264   :  { %v1861_v5 = vpop.f32.mrf.mxu0 }
 0x265   :  { %2566 = vmatpush1.bf16.msra.mxu0 %v9704_v35  ;;  %2607 = vmatpush1.bf16.msra.mxu1 %v9802_v57  ;;  %v2011_v1 = vpack.c.bf16 %v1989_v46, %v1989_v46  ;;  %v13018_v46 = vmov 0  }
 0x266   :  { %2567 = vmatprep.subr.bf16.mxu0 %v9710_v37  ;;  %2608 = vmatprep.subr.bf16.mxu1 %v9809_v58 }
 0x269   :  { %2568 = vmatpush1.bf16.msra.mxu0 %v9716_v39  ;;  %2609 = vmatpush1.bf16.msra.mxu1 %v9816_v59 }
 0x26a   :  { %2569 = vmatprep.subr.bf16.mxu0 %v9727_v41  ;;  %2610 = vmatprep.subr.bf16.mxu1 %v9822_v60 }
 0x26d   :  { %2570 = vmatpush1.bf16.msra.mxu0 %v9738_v43  ;;  %2611 = vmatpush1.bf16.msra.mxu1 %v9828_v61 }
 0x26e   :  { %2571 = vmatprep.subr.bf16.mxu0 %v9750_v45  ;;  %2612 = vmatprep.subr.bf16.mxu1 %v9834_v62 }
 0x271   :  { %2572 = vmatpush1.bf16.msra.mxu0 %v9764_v52  ;;  %2613 = vmatpush1.bf16.msra.mxu1 %v9840_v63  ;;  %v10037_v7 = vpop.f32.mrf.mxu1 }
 0x272   :  { %13014 = vst [vmem:[#allocation23_spill] sm:$0xff] %v10037_v7  ;;  %2573 = vmatprep.subr.bf16.mxu0 %v9776_v53  ;;  %2614 = vmatprep.subr.bf16.mxu1 %v9846_v2 }
 0x273   :  { %v10042_v25 = vpop.f32.mrf.mxu1 }
 0x274   :  { %13015 = vst [vmem:[#allocation24_spill] sm:$0xff] %v10042_v25 }
 0x275   :  { %2574 = vmatpush1.bf16.msra.mxu0 %v9789_v55  ;;  %2615 = vmatpush1.bf16.msra.mxu1 %v9852_v3  ;;  %v1901_v5 = vpop.f32.mrf.mxu1 }
 0x276   :  { %v1938_v0 = vpop.f32.mrf.mxu0  ;;  %2664 = vmatprep.subr.bf16.mxu0 %v9657_v20  ;;  %2705 = vmatprep.subr.bf16.mxu1 %v9721_v40 }
 0x277   :  { %v10049_v4 = vadd.f32 %v1938_v0, %v837_v34  ;;  %v1902_v15 = vpop.f32.mrf.mxu1 }
 0x278   :  { %v1940_v7 = vpop.f32.mrf.mxu0  ;;  %2592 = vmatmul.mubr.bf16.vlgmr.msra.gmra.mxu0 %v2011_v1  ;;  %2633 = vmatmul.mubr.bf16.vlgmr.msra.gmra.mxu1 %v2011_v1  ;;  %v845_v1 = vrot.slane %v758_v6, %v9980_v27  ;;  %v849_v15 = vrot.slane %v758_v6, %v9985_v14 }
 0x279   :  { %13016 = vst [vmem:[#allocation25_spill] sm:$0xff] %v10049_v4  ;;  %v10051_v25 = vadd.f32 %v1940_v7, %v841_v23  ;;  %2665 = vmatpush1.bf16.msra.mxu0 %v9664_v22  ;;  %2706 = vmatpush1.bf16.msra.mxu1 %v9732_v42  ;;  %v781_v7 = vrot.slane %v9862_v16, %v9980_v27 }
 0x27a   :  { %v1942_v36 = vpop.f32.mrf.mxu0  ;;  %2666 = vmatprep.subr.bf16.mxu0 %v9670_v24  ;;  %2707 = vmatprep.subr.bf16.mxu1 %v9744_v44 }
 0x27b   :  { %13017 = vst [vmem:[#allocation26_spill] sm:$0xff] %v10051_v25  ;;  %2696 = vmatprep.mubr.bf16.mxu0 %v13018_v46  ;;  %2737 = vmatprep.mubr.bf16.mxu1 %v13018_v46 }
 0x27c   :  { %v1943_v34 = vpop.f32.mrf.mxu0 }
 0x27d   :  { %2667 = vmatpush1.bf16.msra.mxu0 %v9679_v26  ;;  %2708 = vmatpush1.bf16.msra.mxu1 %v9758_v49  ;;  %v1652_v34 = vadd.f32 %v9907_v9, %v781_v7  ;;  %v785_v9 = vrot.slane %v9862_v16, %v9985_v14 }
 0x27e   :  { %2668 = vmatprep.subr.bf16.mxu0 %v9685_v28  ;;  %2709 = vmatprep.subr.bf16.mxu1 %v9770_v33 }
 0x281   :  { %2669 = vmatpush1.bf16.msra.mxu0 %v9692_v30  ;;  %2710 = vmatpush1.bf16.msra.mxu1 %v9783_v54 }
 0x282   :  { %2670 = vmatprep.subr.bf16.mxu0 %v9698_v32  ;;  %2711 = vmatprep.subr.bf16.mxu1 %v9795_v56 }
 0x285   :  { %2671 = vmatpush1.bf16.msra.mxu0 %v9704_v35  ;;  %2712 = vmatpush1.bf16.msra.mxu1 %v9802_v57 }
 0x286   :  { %2672 = vmatprep.subr.bf16.mxu0 %v9710_v37  ;;  %2713 = vmatprep.subr.bf16.mxu1 %v9809_v58 }
 0x289   :  { %2673 = vmatpush1.bf16.msra.mxu0 %v9716_v39  ;;  %2714 = vmatpush1.bf16.msra.mxu1 %v9816_v59  ;;  %v1979_v36 = vpop.f32.mrf.mxu1 }
 0x28a   :  { %2674 = vmatprep.subr.bf16.mxu0 %v9727_v41  ;;  %2715 = vmatprep.subr.bf16.mxu1 %v9822_v60  ;;  %v10079_v23 = vadd.f32 %v1979_v36, %v845_v1  ;;  %v1990_v1 = vmax.f32 %v1652_v34, 0.0  ;;  %v1654_v36 = vadd.f32 %v9913_v11, %v785_v9  ;;  %v13021_v11 = vsub.s32 6, %v9608_v47 }
 0x28b   :  { %v1981_v5 = vpop.f32.mrf.mxu1  ;;  %v9362_v34 = vmov 1983009808  }
 0x28c   :  { %13019 = vst [vmem:[#allocation27_spill] sm:$0xff] %v10079_v23  ;;  %v10081_v0 = vadd.f32 %v1981_v5, %v849_v15  ;;  %v2012_v15 = vpack.c.bf16 %v1990_v1, %v1990_v1  ;;  %v1991_v7 = vmax.f32 %v1654_v36, 0.0  ;;  %v789_v5 = vrot.slane %v9862_v16, %v13021_v11 }
 0x28d   :  { %2675 = vmatpush1.bf16.msra.mxu0 %v9738_v43  ;;  %2716 = vmatpush1.bf16.msra.mxu1 %v9828_v61  ;;  %v1983_v6 = vpop.f32.mrf.mxu1 }
 0x28e   :  { %13020 = vst [vmem:[#allocation28_spill] sm:$0xff] %v10081_v0  ;;  %2676 = vmatprep.subr.bf16.mxu0 %v9750_v45  ;;  %2717 = vmatprep.subr.bf16.mxu1 %v9834_v62  ;;  %v2013_v14 = vpack.c.bf16 %v1991_v7, %v1991_v7  ;;  %v1693_v6 = vadd.f32 %v9917_v13, %v789_v5 }
 0x28f   :  { %v1984_v27 = vpop.f32.mrf.mxu1 }
 0x290   :  { %v2333_v27 = vunpack.c.l.s4 %v9362_v34  ;;  %v1992_v1 = vmax.f32 %v1693_v6, 0.0 }
 0x291   :  { %2677 = vmatpush1.bf16.msra.mxu0 %v9764_v52  ;;  %2718 = vmatpush1.bf16.msra.mxu1 %v9840_v63 }
 0x292   :  { %2678 = vmatprep.subr.bf16.mxu0 %v9776_v53  ;;  %2719 = vmatprep.subr.bf16.mxu1 %v9846_v2  ;;  %v2334_v9 = vunpack.c.0.s8 %v2333_v27  ;;  %v2014_v36 = vpack.c.bf16 %v1992_v1, %v1992_v1 }
 0x294   :  { %v10186_v34 = vsub.s32 %v2334_v9, %v9608_v47 }
 0x295   :  { %2679 = vmatpush1.bf16.msra.mxu0 %v9789_v55  ;;  %2720 = vmatpush1.bf16.msra.mxu1 %v9852_v3 }
 0x296   :  { %2769 = vmatprep.subr.bf16.mxu0 %v9657_v20  ;;  %2810 = vmatprep.subr.bf16.mxu1 %v9721_v40 }
 0x298   :  { %2697 = vmatmul.mubr.bf16.vlgmr.msra.gmra.mxu0 %v2012_v15  ;;  %2738 = vmatmul.mubr.bf16.vlgmr.msra.gmra.mxu1 %v2012_v15  ;;  %v2062_v15 = vld [vmem:[#allocation6] sm:$0xf] }
 0x299   :  { %2770 = vmatpush1.bf16.msra.mxu0 %v9664_v22  ;;  %2811 = vmatpush1.bf16.msra.mxu1 %v9732_v42  ;;  %v10170_v13 = vrot.slane %v2062_v15, %v9614_v50  ;;  %v10175_v7 = vrot.slane %v2062_v15, %v9611_v48  ;;  %v10181_v11 = vrot.slane %v2062_v15, %v9948_v31 }
 0x29a   :  { %2771 = vmatprep.subr.bf16.mxu0 %v9670_v24  ;;  %2812 = vmatprep.subr.bf16.mxu1 %v9744_v44 }
 0x29b   :  { %2801 = vmatprep.mubr.bf16.mxu0 %v13018_v46  ;;  %2842 = vmatprep.mubr.bf16.mxu1 %v13018_v46 }
 0x29d   :  { %2772 = vmatpush1.bf16.msra.mxu0 %v9679_v26  ;;  %2813 = vmatpush1.bf16.msra.mxu1 %v9758_v49 }
 0x29e   :  { %2773 = vmatprep.subr.bf16.mxu0 %v9685_v28  ;;  %2814 = vmatprep.subr.bf16.mxu1 %v9770_v33 }
 0x2a1   :  { %2774 = vmatpush1.bf16.msra.mxu0 %v9692_v30  ;;  %2815 = vmatpush1.bf16.msra.mxu1 %v9783_v54 }
 0x2a2   :  { %2775 = vmatprep.subr.bf16.mxu0 %v9698_v32  ;;  %2816 = vmatprep.subr.bf16.mxu1 %v9795_v56 }
 0x2a5   :  { %2776 = vmatpush1.bf16.msra.mxu0 %v9704_v35  ;;  %2817 = vmatpush1.bf16.msra.mxu1 %v9802_v57 }
 0x2a6   :  { %2777 = vmatprep.subr.bf16.mxu0 %v9710_v37  ;;  %2818 = vmatprep.subr.bf16.mxu1 %v9809_v58 }
 0x2a9   :  { %2778 = vmatpush1.bf16.msra.mxu0 %v9716_v39  ;;  %2819 = vmatpush1.bf16.msra.mxu1 %v9816_v59 }
 0x2aa   :  { %2779 = vmatprep.subr.bf16.mxu0 %v9727_v41  ;;  %2820 = vmatprep.subr.bf16.mxu1 %v9822_v60 }
 0x2ad   :  { %2780 = vmatpush1.bf16.msra.mxu0 %v9738_v43  ;;  %2821 = vmatpush1.bf16.msra.mxu1 %v9828_v61 }
 0x2ae   :  { %2781 = vmatprep.subr.bf16.mxu0 %v9750_v45  ;;  %2822 = vmatprep.subr.bf16.mxu1 %v9834_v62 }
 0x2b1   :  { %2782 = vmatpush1.bf16.msra.mxu0 %v9764_v52  ;;  %2823 = vmatpush1.bf16.msra.mxu1 %v9840_v63 }
 0x2b2   :  { %2783 = vmatprep.subr.bf16.mxu0 %v9776_v53  ;;  %2824 = vmatprep.subr.bf16.mxu1 %v9846_v2 }
 0x2b5   :  { %2784 = vmatpush1.bf16.msra.mxu0 %v9789_v55  ;;  %2825 = vmatpush1.bf16.msra.mxu1 %v9852_v3 }
 0x2b6   :  { %2874 = vmatprep.subr.bf16.mxu0 %v9657_v20  ;;  %2915 = vmatprep.subr.bf16.mxu1 %v9721_v40 }
 0x2b8   :  { %2802 = vmatmul.mubr.bf16.vlgmr.msra.gmra.mxu0 %v2013_v14  ;;  %2843 = vmatmul.mubr.bf16.vlgmr.msra.gmra.mxu1 %v2013_v14  ;;  %v10178_v14 = vrot.slane %v2062_v15, %v9617_v51 }
 0x2b9   :  { %2875 = vmatpush1.bf16.msra.mxu0 %v9664_v22  ;;  %2916 = vmatpush1.bf16.msra.mxu1 %v9732_v42 }
 0x2ba   :  { %2876 = vmatprep.subr.bf16.mxu0 %v9670_v24  ;;  %2917 = vmatprep.subr.bf16.mxu1 %v9744_v44 }
 0x2bb   :  { %2906 = vmatprep.mubr.bf16.mxu0 %v13018_v46  ;;  %2947 = vmatprep.mubr.bf16.mxu1 %v13018_v46 }
 0x2bd   :  { %2877 = vmatpush1.bf16.msra.mxu0 %v9679_v26  ;;  %2918 = vmatpush1.bf16.msra.mxu1 %v9758_v49 }
 0x2be   :  { %2878 = vmatprep.subr.bf16.mxu0 %v9685_v28  ;;  %2919 = vmatprep.subr.bf16.mxu1 %v9770_v33 }
 0x2c1   :  { %2879 = vmatpush1.bf16.msra.mxu0 %v9692_v30  ;;  %2920 = vmatpush1.bf16.msra.mxu1 %v9783_v54 }
 0x2c2   :  { %2880 = vmatprep.subr.bf16.mxu0 %v9698_v32  ;;  %2921 = vmatprep.subr.bf16.mxu1 %v9795_v56 }
 0x2c5   :  { %2881 = vmatpush1.bf16.msra.mxu0 %v9704_v35  ;;  %2922 = vmatpush1.bf16.msra.mxu1 %v9802_v57 }
 0x2c6   :  { %2882 = vmatprep.subr.bf16.mxu0 %v9710_v37  ;;  %2923 = vmatprep.subr.bf16.mxu1 %v9809_v58 }
 0x2c9   :  { %2883 = vmatpush1.bf16.msra.mxu0 %v9716_v39  ;;  %2924 = vmatpush1.bf16.msra.mxu1 %v9816_v59 }
 0x2ca   :  { %2884 = vmatprep.subr.bf16.mxu0 %v9727_v41  ;;  %2925 = vmatprep.subr.bf16.mxu1 %v9822_v60 }
 0x2cd   :  { %2885 = vmatpush1.bf16.msra.mxu0 %v9738_v43  ;;  %2926 = vmatpush1.bf16.msra.mxu1 %v9828_v61 }
 0x2ce   :  { %2886 = vmatprep.subr.bf16.mxu0 %v9750_v45  ;;  %2927 = vmatprep.subr.bf16.mxu1 %v9834_v62 }
 0x2d1   :  { %2887 = vmatpush1.bf16.msra.mxu0 %v9764_v52  ;;  %2928 = vmatpush1.bf16.msra.mxu1 %v9840_v63 }
 0x2d2   :  { %2888 = vmatprep.subr.bf16.mxu0 %v9776_v53  ;;  %2929 = vmatprep.subr.bf16.mxu1 %v9846_v2 }
 0x2d5   :  { %2889 = vmatpush1.bf16.msra.mxu0 %v9789_v55  ;;  %2930 = vmatpush1.bf16.msra.mxu1 %v9852_v3 }
 0x2d6   :  { %2979 = vmatprep.subr.bf16.mxu0 %v9657_v20  ;;  %3020 = vmatprep.subr.bf16.mxu1 %v9721_v40 }
 0x2d8   :  { %2907 = vmatmul.mubr.bf16.vlgmr.msra.gmra.mxu0 %v2014_v36  ;;  %2948 = vmatmul.mubr.bf16.vlgmr.msra.gmra.mxu1 %v2014_v36  ;;  %v2278_v5 = vpop.f32.mrf.mxu0  ;;  %v2319_v6 = vpop.f32.mrf.mxu1 }
 0x2d9   :  { %2980 = vmatpush1.bf16.msra.mxu0 %v9664_v22  ;;  %3021 = vmatpush1.bf16.msra.mxu1 %v9732_v42  ;;  %v2279_v48 = vadd.f32 %v2278_v5, %v10170_v13  ;;  %v2320_v31 = vadd.f32 %v2319_v6, %v10175_v7 }
 0x2da   :  { %v2280_v27 = vpop.f32.mrf.mxu0  ;;  %v2321_v1 = vpop.f32.mrf.mxu1  ;;  %2981 = vmatprep.subr.bf16.mxu0 %v9670_v24  ;;  %3022 = vmatprep.subr.bf16.mxu1 %v9744_v44 }
 0x2db   :  { %v2281_v15 = vadd.f32 %v2280_v27, %v10178_v14  ;;  %v2322_v36 = vadd.f32 %v2321_v1, %v10181_v11  ;;  %3011 = vmatprep.mubr.bf16.mxu0 %v13018_v46  ;;  %3052 = vmatprep.mubr.bf16.mxu1 %v13018_v46 }
 0x2dc   :  { %v2282_v9 = vpop.f32.mrf.mxu0  ;;  %v2323_v0 = vpop.f32.mrf.mxu1 }
 0x2dd   :  { %v2330_v23 = vcombine.low %v2279_v48, %v2281_v15  ;;  %v2331_v5 = vcombine.low %v2320_v31, %v2322_v36  ;;  %2982 = vmatpush1.bf16.msra.mxu0 %v9679_v26  ;;  %3023 = vmatpush1.bf16.msra.mxu1 %v9758_v49 }
 0x2de   :  { %v2283_v25 = vpop.f32.mrf.mxu0  ;;  %v2324_v4 = vpop.f32.mrf.mxu1  ;;  %2983 = vmatprep.subr.bf16.mxu0 %v9685_v28  ;;  %3024 = vmatprep.subr.bf16.mxu1 %v9770_v33 }
 0x2df   :  { %v10201_v6 = vrot.slane %v2330_v23, %v10186_v34  ;;  %v10204_v27 = vrot.slane %v2331_v5, %v10186_v34  ;;  %v13022_v25 = vsub.s32 7, %v9608_v47 }
 0x2e1   :  { %2984 = vmatpush1.bf16.msra.mxu0 %v9692_v30  ;;  %3025 = vmatpush1.bf16.msra.mxu1 %v9783_v54  ;;  %v793_v4 = vrot.slane %v9862_v16, %v13022_v25 }
 0x2e2   :  { %2985 = vmatprep.subr.bf16.mxu0 %v9698_v32  ;;  %3026 = vmatprep.subr.bf16.mxu1 %v9795_v56 }
 0x2e3   :  { %v1695_v23 = vadd.f32 %v9921_v18, %v793_v4 }
 0x2e5   :  { %2986 = vmatpush1.bf16.msra.mxu0 %v9704_v35  ;;  %3027 = vmatpush1.bf16.msra.mxu1 %v9802_v57  ;;  %v1993_v47 = vmax.f32 %v1695_v23, 0.0 }
 0x2e6   :  { %2987 = vmatprep.subr.bf16.mxu0 %v9710_v37  ;;  %3028 = vmatprep.subr.bf16.mxu1 %v9809_v58 }
 0x2e7   :  { %v2015_v16 = vpack.c.bf16 %v1993_v47, %v1993_v47 }
 0x2e9   :  { %2988 = vmatpush1.bf16.msra.mxu0 %v9716_v39  ;;  %3029 = vmatpush1.bf16.msra.mxu1 %v9816_v59 }
 0x2ea   :  { %2989 = vmatprep.subr.bf16.mxu0 %v9727_v41  ;;  %3030 = vmatprep.subr.bf16.mxu1 %v9822_v60 }
 0x2ed   :  { %2990 = vmatpush1.bf16.msra.mxu0 %v9738_v43  ;;  %3031 = vmatpush1.bf16.msra.mxu1 %v9828_v61 }
 0x2ee   :  { %2991 = vmatprep.subr.bf16.mxu0 %v9750_v45  ;;  %3032 = vmatprep.subr.bf16.mxu1 %v9834_v62 }
 0x2f1   :  { %2992 = vmatpush1.bf16.msra.mxu0 %v9764_v52  ;;  %3033 = vmatpush1.bf16.msra.mxu1 %v9840_v63 }
 0x2f2   :  { %2993 = vmatprep.subr.bf16.mxu0 %v9776_v53  ;;  %3034 = vmatprep.subr.bf16.mxu1 %v9846_v2 }
 0x2f5   :  { %2994 = vmatpush1.bf16.msra.mxu0 %v9789_v55  ;;  %3035 = vmatpush1.bf16.msra.mxu1 %v9852_v3 }
 0x2f6   :  { %3084 = vmatprep.subr.bf16.mxu0 %v9657_v20  ;;  %3125 = vmatprep.subr.bf16.mxu1 %v9721_v40 }
 0x2f8   :  { %v2383_v18 = vpop.f32.mrf.mxu0  ;;  %v2424_v48 = vpop.f32.mrf.mxu1  ;;  %3012 = vmatmul.mubr.bf16.vlgmr.msra.gmra.mxu0 %v2015_v16  ;;  %3053 = vmatmul.mubr.bf16.vlgmr.msra.gmra.mxu1 %v2015_v16 }
 0x2f9   :  { %3085 = vmatpush1.bf16.msra.mxu0 %v9664_v22  ;;  %3126 = vmatpush1.bf16.msra.mxu1 %v9732_v42  ;;  %v2384_v1 = vadd.f32 %v2383_v18, %v10170_v13  ;;  %v2425_v20 = vadd.f32 %v2424_v48, %v10175_v7 }
 0x2fa   :  { %v2385_v31 = vpop.f32.mrf.mxu0  ;;  %v2426_v15 = vpop.f32.mrf.mxu1  ;;  %3086 = vmatprep.subr.bf16.mxu0 %v9670_v24  ;;  %3127 = vmatprep.subr.bf16.mxu1 %v9744_v44 }
 0x2fb   :  { %v2386_v36 = vadd.f32 %v2385_v31, %v10178_v14  ;;  %v2427_v9 = vadd.f32 %v2426_v15, %v10181_v11  ;;  %3116 = vmatprep.mubr.bf16.mxu0 %v13018_v46  ;;  %3157 = vmatprep.mubr.bf16.mxu1 %v13018_v46  ;;  %v10313_v15 = vld [vmem:[%s12952_s4 + $0xc0] ss:$16 sps:$4 sm:$0xff]  }
 0x2fc   :  { %v2387_v22 = vpop.f32.mrf.mxu0  ;;  %v2428_v5 = vpop.f32.mrf.mxu1 }
 0x2fd   :  { %v2435_v25 = vcombine.low %v2384_v1, %v2386_v36  ;;  %v2436_v4 = vcombine.low %v2425_v20, %v2427_v9  ;;  %3087 = vmatpush1.bf16.msra.mxu0 %v9679_v26  ;;  %3128 = vmatpush1.bf16.msra.mxu1 %v9758_v49  ;;  %v797_v26 = vrot.slane %v9874_v38, %v9614_v50  ;;  %v10320_v36 = vld [vmem:[%s12952_s4 + $0xa4] ss:$16 sps:$4 sm:$0xff]   ;;  %v10335_v5 = vld [vmem:[%s12952_s4 + $0xa0] ss:$16 sps:$4 sm:$0xff]  }
 0x2fe   :  { %v2388_v24 = vpop.f32.mrf.mxu0  ;;  %v2429_v23 = vpop.f32.mrf.mxu1  ;;  %3088 = vmatprep.subr.bf16.mxu0 %v9685_v28  ;;  %3129 = vmatprep.subr.bf16.mxu1 %v9770_v33 }
 0x2ff   :  { %v10251_v47 = vrot.slane %v2435_v25, %v10186_v34  ;;  %v10254_v16 = vrot.slane %v2436_v4, %v10186_v34  ;;  %v1734_v28 = vadd.f32 %v9943_v29, %v797_v26  ;;  %v10349_v25 = vld [vmem:[%s12952_s4 + $0x80] ss:$16 sps:$4 sm:$0xff]   ;;  %v10372_v4 = vld [vmem:[%s12952_s4 + $0x44] ss:$16 sps:$4 sm:$0xff]   ;;  %v10416_v24 = vld [vmem:[%s12952_s4 + $0xec] ss:$16 sps:$4 sm:$0xff]  }
 0x301   :  { %3089 = vmatpush1.bf16.msra.mxu0 %v9692_v30  ;;  %3130 = vmatpush1.bf16.msra.mxu1 %v9783_v54  ;;  %v1994_v30 = vmax.f32 %v1734_v28, 0.0 }
 0x302   :  { %3090 = vmatprep.subr.bf16.mxu0 %v9698_v32  ;;  %3131 = vmatprep.subr.bf16.mxu1 %v9795_v56 }
 0x303   :  { %v2016_v32 = vpack.c.bf16 %v1994_v30, %v1994_v30 }
 0x305   :  { %3091 = vmatpush1.bf16.msra.mxu0 %v9704_v35  ;;  %3132 = vmatpush1.bf16.msra.mxu1 %v9802_v57  ;;  %v10286_v35 = vld [vmem:[%s12952_s4 + $0xe4] ss:$16 sps:$4 sm:$0xff]  }
 0x306   :  { %3092 = vmatprep.subr.bf16.mxu0 %v9710_v37  ;;  %3133 = vmatprep.subr.bf16.mxu1 %v9809_v58 }
 0x309   :  { %3093 = vmatpush1.bf16.msra.mxu0 %v9716_v39  ;;  %3134 = vmatpush1.bf16.msra.mxu1 %v9816_v59 }
 0x30a   :  { %3094 = vmatprep.subr.bf16.mxu0 %v9727_v41  ;;  %3135 = vmatprep.subr.bf16.mxu1 %v9822_v60 }
 0x30d   :  { %3095 = vmatpush1.bf16.msra.mxu0 %v9738_v43  ;;  %3136 = vmatpush1.bf16.msra.mxu1 %v9828_v61 }
 0x30e   :  { %3096 = vmatprep.subr.bf16.mxu0 %v9750_v45  ;;  %3137 = vmatprep.subr.bf16.mxu1 %v9834_v62  ;;  %v10295_v45 = vld [vmem:[%s12952_s4 + $0xe0] ss:$16 sps:$4 sm:$0xff]  }
 0x311   :  { %3097 = vmatpush1.bf16.msra.mxu0 %v9764_v52  ;;  %3138 = vmatpush1.bf16.msra.mxu1 %v9840_v63 }
 0x312   :  { %3098 = vmatprep.subr.bf16.mxu0 %v9776_v53  ;;  %3139 = vmatprep.subr.bf16.mxu1 %v9846_v2 }
 0x315   :  { %3099 = vmatpush1.bf16.msra.mxu0 %v9789_v55  ;;  %3140 = vmatpush1.bf16.msra.mxu1 %v9852_v3 }
 0x316   :  { %3189 = vmatprep.subr.bf16.mxu0 %v10286_v35  ;;  %3230 = vmatprep.subr.bf16.mxu1 %v9721_v40  ;;  %v10302_v40 = vld [vmem:[%s12952_s4 + $0xc4] ss:$16 sps:$4 sm:$0xff]  }
 0x318   :  { %v2488_v37 = vpop.f32.mrf.mxu0  ;;  %v2529_v39 = vpop.f32.mrf.mxu1  ;;  %3117 = vmatmul.mubr.bf16.vlgmr.msra.gmra.mxu0 %v2016_v32  ;;  %3158 = vmatmul.mubr.bf16.vlgmr.msra.gmra.mxu1 %v2016_v32  ;;  %v10431_v32 = vld [vmem:[%s12952_s4 + $0xcc] ss:$16 sps:$4 sm:$0xff]  }
 0x319   :  { %v2489_v41 = vadd.f32 %v2488_v37, %v10170_v13  ;;  %v2530_v43 = vadd.f32 %v2529_v39, %v10175_v7  ;;  %3190 = vmatpush1.bf16.msra.mxu0 %v10295_v45  ;;  %3231 = vmatpush1.bf16.msra.mxu1 %v9732_v42 }
 0x31a   :  { %v2490_v52 = vpop.f32.mrf.mxu0  ;;  %v2531_v53 = vpop.f32.mrf.mxu1  ;;  %3191 = vmatprep.subr.bf16.mxu0 %v10302_v40  ;;  %3232 = vmatprep.subr.bf16.mxu1 %v9744_v44 }
 0x31b   :  { %v2491_v55 = vadd.f32 %v2490_v52, %v10178_v14  ;;  %v2532_v29 = vadd.f32 %v2531_v53, %v10181_v11  ;;  %3221 = vmatprep.mubr.bf16.mxu0 %v13018_v46  ;;  %3262 = vmatprep.mubr.bf16.mxu1 %v13018_v46 }
 0x31c   :  { %v2492_v42 = vpop.f32.mrf.mxu0  ;;  %v2533_v48 = vpop.f32.mrf.mxu1 }
 0x31d   :  { %v2540_v1 = vcombine.low %v2489_v41, %v2491_v55  ;;  %v2541_v31 = vcombine.low %v2530_v43, %v2532_v29  ;;  %3192 = vmatpush1.bf16.msra.mxu0 %v10313_v15  ;;  %3233 = vmatpush1.bf16.msra.mxu1 %v9758_v49  ;;  %v10443_v29 = vld [vmem:[%s12952_s4 + $0xc8] ss:$16 sps:$4 sm:$0xff]  }
 0x31e   :  { %v2493_v44 = vpop.f32.mrf.mxu0  ;;  %v2534_v20 = vpop.f32.mrf.mxu1  ;;  %3193 = vmatprep.subr.bf16.mxu0 %v10320_v36  ;;  %3234 = vmatprep.subr.bf16.mxu1 %v9770_v33  ;;  %v10342_v33 = vld [vmem:[%s12952_s4 + $0x84] ss:$16 sps:$4 sm:$0xff]  }
 0x31f   :  { %v10325_v9 = vrot.slane %v2540_v1, %v10186_v34  ;;  %v10328_v22 = vrot.slane %v2541_v31, %v10186_v34  ;;  %v10450_v1 = vld [vmem:[%s12952_s4 + $0xac] ss:$16 sps:$4 sm:$0xff]  }
 0x321   :  { %3194 = vmatpush1.bf16.msra.mxu0 %v10335_v5  ;;  %3235 = vmatpush1.bf16.msra.mxu1 %v9783_v54  ;;  %v10356_v54 = vld [vmem:[%s12952_s4 + $0x64] ss:$16 sps:$4 sm:$0xff]  }
 0x322   :  { %3195 = vmatprep.subr.bf16.mxu0 %v10342_v33  ;;  %3236 = vmatprep.subr.bf16.mxu1 %v9795_v56  ;;  %v10363_v56 = vld [vmem:[%s12952_s4 + $0x60] ss:$16 sps:$4 sm:$0xff]  }
 0x325   :  { %3196 = vmatpush1.bf16.msra.mxu0 %v10349_v25  ;;  %3237 = vmatpush1.bf16.msra.mxu1 %v9802_v57  ;;  %v801_v57 = vrot.slane %v9874_v38, %v9617_v51  ;;  %v10387_v38 = vld [vmem:[%s12952_s4 + $0x24] ss:$16 sps:$4 sm:$0xff]  }
 0x326   :  { %3197 = vmatprep.subr.bf16.mxu0 %v10356_v54  ;;  %3238 = vmatprep.subr.bf16.mxu1 %v9809_v58  ;;  %v10379_v58 = vld [vmem:[%s12952_s4 + $0x40] ss:$16 sps:$4 sm:$0xff]  }
 0x329   :  { %3198 = vmatpush1.bf16.msra.mxu0 %v10363_v56  ;;  %3239 = vmatpush1.bf16.msra.mxu1 %v9816_v59  ;;  %v1736_v59 = vadd.f32 %v9952_v8, %v801_v57  ;;  %v10401_v8 = vld [vmem:[%s12952_s4 + $0x4] ss:$16 sps:$4 sm:$0xff]   ;;  %v10465_v57 = vld [vmem:[%s12952_s4 + $0xa8] ss:$16 sps:$4 sm:$0xff]  }
 0x32a   :  { %3199 = vmatprep.subr.bf16.mxu0 %v10372_v4  ;;  %3240 = vmatprep.subr.bf16.mxu1 %v9822_v60  ;;  %v10394_v60 = vld [vmem:[%s12952_s4 + $0x20] ss:$16 sps:$4 sm:$0xff]  }
 0x32d   :  { %3200 = vmatpush1.bf16.msra.mxu0 %v10379_v58  ;;  %3241 = vmatpush1.bf16.msra.mxu1 %v9828_v61  ;;  %v1995_v61 = vmax.f32 %v1736_v59, 0.0  ;;  %v10472_v59 = vld [vmem:[%s12952_s4 + $0x8c] ss:$16 sps:$4 sm:$0xff]  }
 0x32e   :  { %3201 = vmatprep.subr.bf16.mxu0 %v10387_v38  ;;  %3242 = vmatprep.subr.bf16.mxu1 %v9834_v62  ;;  %v10408_v62 = vld [vmem:[%s12952_s4] ss:$16 sps:$4 sm:$0xff]  }
 0x331   :  { %3202 = vmatpush1.bf16.msra.mxu0 %v10394_v60  ;;  %3243 = vmatpush1.bf16.msra.mxu1 %v9840_v63  ;;  %v2017_v63 = vpack.c.bf16 %v1995_v61, %v1995_v61  ;;  %v10479_v61 = vld [vmem:[%s12952_s4 + $0x88] ss:$16 sps:$4 sm:$0xff]  }
 0x332   :  { %3203 = vmatprep.subr.bf16.mxu0 %v10401_v8  ;;  %3244 = vmatprep.subr.bf16.mxu1 %v9846_v2 }
 0x335   :  { %3204 = vmatpush1.bf16.msra.mxu0 %v10408_v62  ;;  %3245 = vmatpush1.bf16.msra.mxu1 %v9852_v3  ;;  %v10423_v3 = vld [vmem:[%s12952_s4 + $0xe8] ss:$16 sps:$4 sm:$0xff]  }
 0x336   :  { %3294 = vmatprep.subr.bf16.mxu0 %v10286_v35  ;;  %3335 = vmatprep.subr.bf16.mxu1 %v10416_v24 }
 0x338   :  { %v2593_v2 = vpop.f32.mrf.mxu0  ;;  %v2634_v23 = vpop.f32.mrf.mxu1  ;;  %3222 = vmatmul.mubr.bf16.vlgmr.msra.gmra.mxu0 %v2017_v63  ;;  %3263 = vmatmul.mubr.bf16.vlgmr.msra.gmra.mxu1 %v2017_v63  ;;  %v10486_v63 = vld [vmem:[%s12952_s4 + $0x6c] ss:$16 sps:$4 sm:$0xff]  }
 0x339   :  { %3295 = vmatpush1.bf16.msra.mxu0 %v10295_v45  ;;  %3336 = vmatpush1.bf16.msra.mxu1 %v10423_v3  ;;  %v2594_v26 = vadd.f32 %v2593_v2, %v10170_v13  ;;  %v2635_v37 = vadd.f32 %v2634_v23, %v10175_v7  ;;  %v10493_v2 = vld [vmem:[%s12952_s4 + $0x68] ss:$16 sps:$4 sm:$0xff]   ;;  %v10500_v23 = vld [vmem:[%s12952_s4 + $0x4c] ss:$16 sps:$4 sm:$0xff]  }
 0x33a   :  { %v2595_v28 = vpop.f32.mrf.mxu0  ;;  %v2636_v30 = vpop.f32.mrf.mxu1  ;;  %3296 = vmatprep.subr.bf16.mxu0 %v10302_v40  ;;  %3337 = vmatprep.subr.bf16.mxu1 %v10431_v32 }
 0x33b   :  { %v2596_v39 = vadd.f32 %v2595_v28, %v10178_v14  ;;  %v2637_v41 = vadd.f32 %v2636_v30, %v10181_v11  ;;  %3326 = vmatprep.mubr.bf16.mxu0 %v13018_v46  ;;  %3367 = vmatprep.mubr.bf16.mxu1 %v13018_v46  ;;  %v10514_v28 = vld [vmem:[%s12952_s4 + $0x2c] ss:$16 sps:$4 sm:$0xff]   ;;  %v10521_v30 = vld [vmem:[%s12952_s4 + $0x28] ss:$16 sps:$4 sm:$0xff]  }
 0x33c   :  { %v2597_v43 = vpop.f32.mrf.mxu0  ;;  %v2638_v52 = vpop.f32.mrf.mxu1 }
 0x33d   :  { %v2645_v53 = vcombine.low %v2594_v26, %v2596_v39  ;;  %v2646_v55 = vcombine.low %v2635_v37, %v2637_v41  ;;  %3297 = vmatpush1.bf16.msra.mxu0 %v10313_v15  ;;  %3338 = vmatpush1.bf16.msra.mxu1 %v10443_v29  ;;  %v10507_v26 = vld [vmem:[%s12952_s4 + $0x48] ss:$16 sps:$4 sm:$0xff]   ;;  %v1996_v37 = vmax.f32 %v9960_v17, 0.0  ;;  %v10529_v39 = vld [vmem:[%s12952_s4 + $0xc] ss:$16 sps:$4 sm:$0xff]  }
 0x33e   :  { %v2598_v42 = vpop.f32.mrf.mxu0  ;;  %v2639_v48 = vpop.f32.mrf.mxu1  ;;  %3298 = vmatprep.subr.bf16.mxu0 %v10320_v36  ;;  %3339 = vmatprep.subr.bf16.mxu1 %v10450_v1  ;;  %v10536_v41 = vld [vmem:[%s12952_s4 + $0x8] ss:$16 sps:$4 sm:$0xff]  }
 0x33f   :  { %v10454_v31 = vrot.slane %v2645_v53, %v10186_v34  ;;  %v10457_v44 = vrot.slane %v2646_v55, %v10186_v34  ;;  %v2018_v43 = vpack.c.bf16 %v1996_v37, %v1996_v37 }
 0x341   :  { %13023 = vst [vmem:[#allocation29_spill] sm:$0xff] %v10457_v44  ;;  %3299 = vmatpush1.bf16.msra.mxu0 %v10335_v5  ;;  %3340 = vmatpush1.bf16.msra.mxu1 %v10465_v57 }
 0x342   :  { %3300 = vmatprep.subr.bf16.mxu0 %v10342_v33  ;;  %3341 = vmatprep.subr.bf16.mxu1 %v10472_v59 }
 0x345   :  { %3301 = vmatpush1.bf16.msra.mxu0 %v10349_v25  ;;  %3342 = vmatpush1.bf16.msra.mxu1 %v10479_v61 }
 0x346   :  { %3302 = vmatprep.subr.bf16.mxu0 %v10356_v54  ;;  %3343 = vmatprep.subr.bf16.mxu1 %v10486_v63 }
 0x349   :  { %3303 = vmatpush1.bf16.msra.mxu0 %v10363_v56  ;;  %3344 = vmatpush1.bf16.msra.mxu1 %v10493_v2 }
 0x34a   :  { %3304 = vmatprep.subr.bf16.mxu0 %v10372_v4  ;;  %3345 = vmatprep.subr.bf16.mxu1 %v10500_v23 }
 0x34d   :  { %3305 = vmatpush1.bf16.msra.mxu0 %v10379_v58  ;;  %3346 = vmatpush1.bf16.msra.mxu1 %v10507_v26 }
 0x34e   :  { %3306 = vmatprep.subr.bf16.mxu0 %v10387_v38  ;;  %3347 = vmatprep.subr.bf16.mxu1 %v10514_v28 }
 0x351   :  { %3307 = vmatpush1.bf16.msra.mxu0 %v10394_v60  ;;  %3348 = vmatpush1.bf16.msra.mxu1 %v10521_v30 }
 0x352   :  { %3308 = vmatprep.subr.bf16.mxu0 %v10401_v8  ;;  %3349 = vmatprep.subr.bf16.mxu1 %v10529_v39 }
 0x355   :  { %3309 = vmatpush1.bf16.msra.mxu0 %v10408_v62  ;;  %3350 = vmatpush1.bf16.msra.mxu1 %v10536_v41 }
 0x356   :  { %3399 = vmatprep.subr.bf16.mxu0 %v10286_v35  ;;  %3440 = vmatprep.subr.bf16.mxu1 %v10416_v24 }
 0x358   :  { %v2698_v17 = vpop.f32.mrf.mxu0  ;;  %v2739_v52 = vpop.f32.mrf.mxu1  ;;  %3327 = vmatmul.mubr.bf16.vlgmr.msra.gmra.mxu0 %v2018_v43  ;;  %3368 = vmatmul.mubr.bf16.vlgmr.msra.gmra.mxu1 %v2018_v43 }
 0x359   :  { %3400 = vmatpush1.bf16.msra.mxu0 %v10295_v45  ;;  %3441 = vmatpush1.bf16.msra.mxu1 %v10423_v3  ;;  %v2699_v53 = vadd.f32 %v2698_v17, %v10170_v13  ;;  %v2740_v48 = vadd.f32 %v2739_v52, %v10175_v7 }
 0x35a   :  { %v2700_v55 = vpop.f32.mrf.mxu0  ;;  %v2741_v42 = vpop.f32.mrf.mxu1  ;;  %3401 = vmatprep.subr.bf16.mxu0 %v10302_v40  ;;  %3442 = vmatprep.subr.bf16.mxu1 %v10431_v32 }
 0x35b   :  { %v2701_v37 = vadd.f32 %v2700_v55, %v10178_v14  ;;  %v2742_v20 = vadd.f32 %v2741_v42, %v10181_v11  ;;  %3431 = vmatprep.mubr.bf16.mxu0 %v13018_v46  ;;  %3472 = vmatprep.mubr.bf16.mxu1 %v13018_v46 }
 0x35c   :  { %v2702_v43 = vpop.f32.mrf.mxu0  ;;  %v2743_v49 = vpop.f32.mrf.mxu1 }
 0x35d   :  { %v2750_v18 = vcombine.low %v2699_v53, %v2701_v37  ;;  %v2751_v17 = vcombine.low %v2740_v48, %v2742_v20  ;;  %3402 = vmatpush1.bf16.msra.mxu0 %v10313_v15  ;;  %3443 = vmatpush1.bf16.msra.mxu1 %v10443_v29 }
 0x35e   :  { %v2703_v0 = vpop.f32.mrf.mxu0  ;;  %v2744_v44 = vpop.f32.mrf.mxu1  ;;  %3403 = vmatprep.subr.bf16.mxu0 %v10320_v36  ;;  %3444 = vmatprep.subr.bf16.mxu1 %v10450_v1 }
 0x35f   :  { %v10556_v52 = vrot.slane %v2750_v18, %v10186_v34  ;;  %v10559_v55 = vrot.slane %v2751_v17, %v10186_v34  ;;  %v1997_v0 = vmax.f32 %v9964_v21, 0.0 }
 0x361   :  { %13024 = vst [vmem:[#allocation30_spill] sm:$0xff] %v10559_v55  ;;  %3404 = vmatpush1.bf16.msra.mxu0 %v10335_v5  ;;  %3445 = vmatpush1.bf16.msra.mxu1 %v10465_v57  ;;  %v2019_v18 = vpack.c.bf16 %v1997_v0, %v1997_v0 }
 0x362   :  { %3405 = vmatprep.subr.bf16.mxu0 %v10342_v33  ;;  %3446 = vmatprep.subr.bf16.mxu1 %v10472_v59 }
 0x365   :  { %3406 = vmatpush1.bf16.msra.mxu0 %v10349_v25  ;;  %3447 = vmatpush1.bf16.msra.mxu1 %v10479_v61 }
 0x366   :  { %3407 = vmatprep.subr.bf16.mxu0 %v10356_v54  ;;  %3448 = vmatprep.subr.bf16.mxu1 %v10486_v63 }
 0x369   :  { %3408 = vmatpush1.bf16.msra.mxu0 %v10363_v56  ;;  %3449 = vmatpush1.bf16.msra.mxu1 %v10493_v2 }
 0x36a   :  { %3409 = vmatprep.subr.bf16.mxu0 %v10372_v4  ;;  %3450 = vmatprep.subr.bf16.mxu1 %v10500_v23 }
 0x36d   :  { %3410 = vmatpush1.bf16.msra.mxu0 %v10379_v58  ;;  %3451 = vmatpush1.bf16.msra.mxu1 %v10507_v26 }
 0x36e   :  { %3411 = vmatprep.subr.bf16.mxu0 %v10387_v38  ;;  %3452 = vmatprep.subr.bf16.mxu1 %v10514_v28 }
 0x371   :  { %3412 = vmatpush1.bf16.msra.mxu0 %v10394_v60  ;;  %3453 = vmatpush1.bf16.msra.mxu1 %v10521_v30 }
 0x372   :  { %3413 = vmatprep.subr.bf16.mxu0 %v10401_v8  ;;  %3454 = vmatprep.subr.bf16.mxu1 %v10529_v39 }
 0x375   :  { %3414 = vmatpush1.bf16.msra.mxu0 %v10408_v62  ;;  %3455 = vmatpush1.bf16.msra.mxu1 %v10536_v41 }
 0x376   :  { %3504 = vmatprep.subr.bf16.mxu0 %v10286_v35  ;;  %3545 = vmatprep.subr.bf16.mxu1 %v10416_v24 }
 0x378   :  { %v2803_v44 = vpop.f32.mrf.mxu0  ;;  %v2844_v20 = vpop.f32.mrf.mxu1  ;;  %3432 = vmatmul.mubr.bf16.vlgmr.msra.gmra.mxu0 %v2019_v18  ;;  %3473 = vmatmul.mubr.bf16.vlgmr.msra.gmra.mxu1 %v2019_v18 }
 0x379   :  { %3505 = vmatpush1.bf16.msra.mxu0 %v10295_v45  ;;  %3546 = vmatpush1.bf16.msra.mxu1 %v10423_v3  ;;  %v2804_v21 = vadd.f32 %v2803_v44, %v10170_v13  ;;  %v2845_v48 = vadd.f32 %v2844_v20, %v10175_v7 }
 0x37a   :  { %v2805_v53 = vpop.f32.mrf.mxu0  ;;  %v2846_v42 = vpop.f32.mrf.mxu1  ;;  %3506 = vmatprep.subr.bf16.mxu0 %v10302_v40  ;;  %3547 = vmatprep.subr.bf16.mxu1 %v10431_v32 }
 0x37b   :  { %v2806_v37 = vadd.f32 %v2805_v53, %v10178_v14  ;;  %v2847_v43 = vadd.f32 %v2846_v42, %v10181_v11  ;;  %3536 = vmatprep.mubr.bf16.mxu0 %v13018_v46  ;;  %3577 = vmatprep.mubr.bf16.mxu1 %v13018_v46 }
 0x37c   :  { %v2807_v17 = vpop.f32.mrf.mxu0  ;;  %v2848_v0 = vpop.f32.mrf.mxu1 }
 0x37d   :  { %v2855_v18 = vcombine.low %v2804_v21, %v2806_v37  ;;  %v2856_v44 = vcombine.low %v2845_v48, %v2847_v43  ;;  %3507 = vmatpush1.bf16.msra.mxu0 %v10313_v15  ;;  %3548 = vmatpush1.bf16.msra.mxu1 %v10443_v29 }
 0x37e   :  { %v2808_v49 = vpop.f32.mrf.mxu0  ;;  %v2849_v55 = vpop.f32.mrf.mxu1  ;;  %3508 = vmatprep.subr.bf16.mxu0 %v10320_v36  ;;  %3549 = vmatprep.subr.bf16.mxu1 %v10450_v1 }
 0x37f   :  { %v10603_v20 = vrot.slane %v2855_v18, %v10186_v34  ;;  %v10606_v53 = vrot.slane %v2856_v44, %v10186_v34  ;;  %v1998_v55 = vmax.f32 %v9997_v12, 0.0 }
 0x381   :  { %13025 = vst [vmem:[#allocation31_spill] sm:$0xff] %v10603_v20  ;;  %13026 = vst [vmem:[#allocation32_spill] sm:$0xff] %v10606_v53  ;;  %3509 = vmatpush1.bf16.msra.mxu0 %v10335_v5  ;;  %3550 = vmatpush1.bf16.msra.mxu1 %v10465_v57  ;;  %v2020_v49 = vpack.c.bf16 %v1998_v55, %v1998_v55 }
 0x382   :  { %3510 = vmatprep.subr.bf16.mxu0 %v10342_v33  ;;  %3551 = vmatprep.subr.bf16.mxu1 %v10472_v59 }
 0x385   :  { %3511 = vmatpush1.bf16.msra.mxu0 %v10349_v25  ;;  %3552 = vmatpush1.bf16.msra.mxu1 %v10479_v61 }
 0x386   :  { %3512 = vmatprep.subr.bf16.mxu0 %v10356_v54  ;;  %3553 = vmatprep.subr.bf16.mxu1 %v10486_v63 }
 0x389   :  { %3513 = vmatpush1.bf16.msra.mxu0 %v10363_v56  ;;  %3554 = vmatpush1.bf16.msra.mxu1 %v10493_v2 }
 0x38a   :  { %3514 = vmatprep.subr.bf16.mxu0 %v10372_v4  ;;  %3555 = vmatprep.subr.bf16.mxu1 %v10500_v23 }
 0x38d   :  { %3515 = vmatpush1.bf16.msra.mxu0 %v10379_v58  ;;  %3556 = vmatpush1.bf16.msra.mxu1 %v10507_v26 }
 0x38e   :  { %3516 = vmatprep.subr.bf16.mxu0 %v10387_v38  ;;  %3557 = vmatprep.subr.bf16.mxu1 %v10514_v28 }
 0x391   :  { %3517 = vmatpush1.bf16.msra.mxu0 %v10394_v60  ;;  %3558 = vmatpush1.bf16.msra.mxu1 %v10521_v30 }
 0x392   :  { %3518 = vmatprep.subr.bf16.mxu0 %v10401_v8  ;;  %3559 = vmatprep.subr.bf16.mxu1 %v10529_v39 }
 0x395   :  { %3519 = vmatpush1.bf16.msra.mxu0 %v10408_v62  ;;  %3560 = vmatpush1.bf16.msra.mxu1 %v10536_v41 }
 0x396   :  { %3609 = vmatprep.subr.bf16.mxu0 %v10286_v35  ;;  %3650 = vmatprep.subr.bf16.mxu1 %v10416_v24 }
 0x398   :  { %v2908_v42 = vpop.f32.mrf.mxu0  ;;  %v2949_v48 = vpop.f32.mrf.mxu1  ;;  %3537 = vmatmul.mubr.bf16.vlgmr.msra.gmra.mxu0 %v2020_v49  ;;  %3578 = vmatmul.mubr.bf16.vlgmr.msra.gmra.mxu1 %v2020_v49 }
 0x399   :  { %3610 = vmatpush1.bf16.msra.mxu0 %v10295_v45  ;;  %3651 = vmatpush1.bf16.msra.mxu1 %v10423_v3  ;;  %v2909_v12 = vadd.f32 %v2908_v42, %v10170_v13  ;;  %v2950_v17 = vadd.f32 %v2949_v48, %v10175_v7 }
 0x39a   :  { %v2910_v37 = vpop.f32.mrf.mxu0  ;;  %v2951_v43 = vpop.f32.mrf.mxu1  ;;  %3611 = vmatprep.subr.bf16.mxu0 %v10302_v40  ;;  %3652 = vmatprep.subr.bf16.mxu1 %v10431_v32 }
 0x39b   :  { %v2911_v0 = vadd.f32 %v2910_v37, %v10178_v14  ;;  %v2952_v18 = vadd.f32 %v2951_v43, %v10181_v11  ;;  %3641 = vmatprep.mubr.bf16.mxu0 %v13018_v46  ;;  %3682 = vmatprep.mubr.bf16.mxu1 %v13018_v46 }
 0x39c   :  { %v2912_v44 = vpop.f32.mrf.mxu0  ;;  %v2953_v55 = vpop.f32.mrf.mxu1 }
 0x39d   :  { %v2960_v49 = vcombine.low %v2909_v12, %v2911_v0  ;;  %v2961_v42 = vcombine.low %v2950_v17, %v2952_v18  ;;  %3612 = vmatpush1.bf16.msra.mxu0 %v10313_v15  ;;  %3653 = vmatpush1.bf16.msra.mxu1 %v10443_v29 }
 0x39e   :  { %v2913_v21 = vpop.f32.mrf.mxu0  ;;  %v2954_v53 = vpop.f32.mrf.mxu1  ;;  %3613 = vmatprep.subr.bf16.mxu0 %v10320_v36  ;;  %3654 = vmatprep.subr.bf16.mxu1 %v10450_v1 }
 0x39f   :  { %v10650_v48 = vrot.slane %v2960_v49, %v10186_v34  ;;  %v10653_v37 = vrot.slane %v2961_v42, %v10186_v34  ;;  %v1999_v53 = vmax.f32 %v10001_v10, 0.0 }
 0x3a1   :  { %13027 = vst [vmem:[#allocation33_spill] sm:$0xff] %v10650_v48  ;;  %13028 = vst [vmem:[#allocation34_spill] sm:$0xff] %v10653_v37  ;;  %3614 = vmatpush1.bf16.msra.mxu0 %v10335_v5  ;;  %3655 = vmatpush1.bf16.msra.mxu1 %v10465_v57  ;;  %v2021_v21 = vpack.c.bf16 %v1999_v53, %v1999_v53 }
 0x3a2   :  { %3615 = vmatprep.subr.bf16.mxu0 %v10342_v33  ;;  %3656 = vmatprep.subr.bf16.mxu1 %v10472_v59 }
 0x3a5   :  { %3616 = vmatpush1.bf16.msra.mxu0 %v10349_v25  ;;  %3657 = vmatpush1.bf16.msra.mxu1 %v10479_v61 }
 0x3a6   :  { %3617 = vmatprep.subr.bf16.mxu0 %v10356_v54  ;;  %3658 = vmatprep.subr.bf16.mxu1 %v10486_v63 }
 0x3a9   :  { %3618 = vmatpush1.bf16.msra.mxu0 %v10363_v56  ;;  %3659 = vmatpush1.bf16.msra.mxu1 %v10493_v2 }
 0x3aa   :  { %3619 = vmatprep.subr.bf16.mxu0 %v10372_v4  ;;  %3660 = vmatprep.subr.bf16.mxu1 %v10500_v23 }
 0x3ad   :  { %3620 = vmatpush1.bf16.msra.mxu0 %v10379_v58  ;;  %3661 = vmatpush1.bf16.msra.mxu1 %v10507_v26 }
 0x3ae   :  { %3621 = vmatprep.subr.bf16.mxu0 %v10387_v38  ;;  %3662 = vmatprep.subr.bf16.mxu1 %v10514_v28 }
 0x3b1   :  { %3622 = vmatpush1.bf16.msra.mxu0 %v10394_v60  ;;  %3663 = vmatpush1.bf16.msra.mxu1 %v10521_v30 }
 0x3b2   :  { %3623 = vmatprep.subr.bf16.mxu0 %v10401_v8  ;;  %3664 = vmatprep.subr.bf16.mxu1 %v10529_v39 }
 0x3b5   :  { %3624 = vmatpush1.bf16.msra.mxu0 %v10408_v62  ;;  %3665 = vmatpush1.bf16.msra.mxu1 %v10536_v41 }
 0x3b6   :  { %3714 = vmatprep.subr.bf16.mxu0 %v10286_v35  ;;  %3755 = vmatprep.subr.bf16.mxu1 %v10416_v24 }
 0x3b8   :  { %v3013_v43 = vpop.f32.mrf.mxu0  ;;  %v3054_v17 = vpop.f32.mrf.mxu1  ;;  %3642 = vmatmul.mubr.bf16.vlgmr.msra.gmra.mxu0 %v2021_v21  ;;  %3683 = vmatmul.mubr.bf16.vlgmr.msra.gmra.mxu1 %v2021_v21 }
 0x3b9   :  { %3715 = vmatpush1.bf16.msra.mxu0 %v10295_v45  ;;  %3756 = vmatpush1.bf16.msra.mxu1 %v10423_v3  ;;  %v3014_v10 = vadd.f32 %v3013_v43, %v10170_v13  ;;  %v3055_v44 = vadd.f32 %v3054_v17, %v10175_v7 }
 0x3ba   :  { %v3015_v0 = vpop.f32.mrf.mxu0  ;;  %v3056_v18 = vpop.f32.mrf.mxu1  ;;  %3716 = vmatprep.subr.bf16.mxu0 %v10302_v40  ;;  %3757 = vmatprep.subr.bf16.mxu1 %v10431_v32 }
 0x3bb   :  { %v3016_v55 = vadd.f32 %v3015_v0, %v10178_v14  ;;  %v3057_v49 = vadd.f32 %v3056_v18, %v10181_v11  ;;  %3746 = vmatprep.mubr.bf16.mxu0 %v13018_v46  ;;  %3787 = vmatprep.mubr.bf16.mxu1 %v13018_v46 }
 0x3bc   :  { %v3017_v42 = vpop.f32.mrf.mxu0  ;;  %v3058_v53 = vpop.f32.mrf.mxu1 }
 0x3bd   :  { %v3065_v21 = vcombine.low %v3014_v10, %v3016_v55  ;;  %v3066_v43 = vcombine.low %v3055_v44, %v3057_v49  ;;  %3717 = vmatpush1.bf16.msra.mxu0 %v10313_v15  ;;  %3758 = vmatpush1.bf16.msra.mxu1 %v10443_v29 }
 0x3be   :  { %v3018_v12 = vpop.f32.mrf.mxu0  ;;  %v3059_v37 = vpop.f32.mrf.mxu1  ;;  %3718 = vmatprep.subr.bf16.mxu0 %v10320_v36  ;;  %3759 = vmatprep.subr.bf16.mxu1 %v10450_v1 }
 0x3bf   :  { %v10697_v17 = vrot.slane %v3065_v21, %v10186_v34  ;;  %v10700_v0 = vrot.slane %v3066_v43, %v10186_v34  ;;  %v2000_v37 = vmax.f32 %v10008_v19, 0.0 }
 0x3c1   :  { %13029 = vst [vmem:[#allocation35_spill] sm:$0xff] %v10697_v17  ;;  %13030 = vst [vmem:[#allocation36_spill] sm:$0xff] %v10700_v0  ;;  %3719 = vmatpush1.bf16.msra.mxu0 %v10335_v5  ;;  %3760 = vmatpush1.bf16.msra.mxu1 %v10465_v57  ;;  %v2022_v12 = vpack.c.bf16 %v2000_v37, %v2000_v37 }
 0x3c2   :  { %3720 = vmatprep.subr.bf16.mxu0 %v10342_v33  ;;  %3761 = vmatprep.subr.bf16.mxu1 %v10472_v59 }
 0x3c5   :  { %3721 = vmatpush1.bf16.msra.mxu0 %v10349_v25  ;;  %3762 = vmatpush1.bf16.msra.mxu1 %v10479_v61 }
 0x3c6   :  { %3722 = vmatprep.subr.bf16.mxu0 %v10356_v54  ;;  %3763 = vmatprep.subr.bf16.mxu1 %v10486_v63 }
 0x3c9   :  { %3723 = vmatpush1.bf16.msra.mxu0 %v10363_v56  ;;  %3764 = vmatpush1.bf16.msra.mxu1 %v10493_v2 }
 0x3ca   :  { %3724 = vmatprep.subr.bf16.mxu0 %v10372_v4  ;;  %3765 = vmatprep.subr.bf16.mxu1 %v10500_v23 }
 0x3cd   :  { %3725 = vmatpush1.bf16.msra.mxu0 %v10379_v58  ;;  %3766 = vmatpush1.bf16.msra.mxu1 %v10507_v26 }
 0x3ce   :  { %3726 = vmatprep.subr.bf16.mxu0 %v10387_v38  ;;  %3767 = vmatprep.subr.bf16.mxu1 %v10514_v28 }
 0x3d1   :  { %3727 = vmatpush1.bf16.msra.mxu0 %v10394_v60  ;;  %3768 = vmatpush1.bf16.msra.mxu1 %v10521_v30 }
 0x3d2   :  { %3728 = vmatprep.subr.bf16.mxu0 %v10401_v8  ;;  %3769 = vmatprep.subr.bf16.mxu1 %v10529_v39 }
 0x3d5   :  { %3729 = vmatpush1.bf16.msra.mxu0 %v10408_v62  ;;  %3770 = vmatpush1.bf16.msra.mxu1 %v10536_v41 }
 0x3d6   :  { %3819 = vmatprep.subr.bf16.mxu0 %v10286_v35  ;;  %3860 = vmatprep.subr.bf16.mxu1 %v10416_v24 }
 0x3d8   :  { %v3118_v18 = vpop.f32.mrf.mxu0  ;;  %v3159_v44 = vpop.f32.mrf.mxu1  ;;  %3747 = vmatmul.mubr.bf16.vlgmr.msra.gmra.mxu0 %v2022_v12  ;;  %3788 = vmatmul.mubr.bf16.vlgmr.msra.gmra.mxu1 %v2022_v12 }
 0x3d9   :  { %3820 = vmatpush1.bf16.msra.mxu0 %v10295_v45  ;;  %3861 = vmatpush1.bf16.msra.mxu1 %v10423_v3  ;;  %v3119_v19 = vadd.f32 %v3118_v18, %v10170_v13  ;;  %v3160_v42 = vadd.f32 %v3159_v44, %v10175_v7 }
 0x3da   :  { %v3120_v55 = vpop.f32.mrf.mxu0  ;;  %v3161_v49 = vpop.f32.mrf.mxu1  ;;  %3821 = vmatprep.subr.bf16.mxu0 %v10302_v40  ;;  %3862 = vmatprep.subr.bf16.mxu1 %v10431_v32 }
 0x3db   :  { %v3121_v53 = vadd.f32 %v3120_v55, %v10178_v14  ;;  %v3162_v21 = vadd.f32 %v3161_v49, %v10181_v11  ;;  %3851 = vmatprep.mubr.bf16.mxu0 %v13018_v46  ;;  %3892 = vmatprep.mubr.bf16.mxu1 %v13018_v46 }
 0x3dc   :  { %v3122_v43 = vpop.f32.mrf.mxu0  ;;  %v3163_v37 = vpop.f32.mrf.mxu1 }
 0x3dd   :  { %v3170_v12 = vcombine.low %v3119_v19, %v3121_v53  ;;  %v3171_v18 = vcombine.low %v3160_v42, %v3162_v21  ;;  %3822 = vmatpush1.bf16.msra.mxu0 %v10313_v15  ;;  %3863 = vmatpush1.bf16.msra.mxu1 %v10443_v29 }
 0x3de   :  { %v3123_v10 = vpop.f32.mrf.mxu0  ;;  %v3164_v0 = vpop.f32.mrf.mxu1  ;;  %3823 = vmatprep.subr.bf16.mxu0 %v10320_v36  ;;  %3864 = vmatprep.subr.bf16.mxu1 %v10450_v1 }
 0x3df   :  { %v10744_v44 = vrot.slane %v3170_v12, %v10186_v34  ;;  %v10747_v55 = vrot.slane %v3171_v18, %v10186_v34  ;;  %v13033_v0 = vld [vmem:[#allocation22_spill] sm:$0xff] }
 0x3e0   :  { %v2001_v10 = vmax.f32 %v13033_v0, 0.0 }
 0x3e1   :  { %13031 = vst [vmem:[#allocation37_spill] sm:$0xff] %v10744_v44  ;;  %13032 = vst [vmem:[#allocation38_spill] sm:$0xff] %v10747_v55  ;;  %3824 = vmatpush1.bf16.msra.mxu0 %v10335_v5  ;;  %3865 = vmatpush1.bf16.msra.mxu1 %v10465_v57 }
 0x3e2   :  { %3825 = vmatprep.subr.bf16.mxu0 %v10342_v33  ;;  %3866 = vmatprep.subr.bf16.mxu1 %v10472_v59  ;;  %v2023_v49 = vpack.c.bf16 %v2001_v10, %v2001_v10 }
 0x3e5   :  { %3826 = vmatpush1.bf16.msra.mxu0 %v10349_v25  ;;  %3867 = vmatpush1.bf16.msra.mxu1 %v10479_v61 }
 0x3e6   :  { %3827 = vmatprep.subr.bf16.mxu0 %v10356_v54  ;;  %3868 = vmatprep.subr.bf16.mxu1 %v10486_v63 }
 0x3e9   :  { %3828 = vmatpush1.bf16.msra.mxu0 %v10363_v56  ;;  %3869 = vmatpush1.bf16.msra.mxu1 %v10493_v2 }
 0x3ea   :  { %3829 = vmatprep.subr.bf16.mxu0 %v10372_v4  ;;  %3870 = vmatprep.subr.bf16.mxu1 %v10500_v23 }
 0x3ed   :  { %3830 = vmatpush1.bf16.msra.mxu0 %v10379_v58  ;;  %3871 = vmatpush1.bf16.msra.mxu1 %v10507_v26 }
 0x3ee   :  { %3831 = vmatprep.subr.bf16.mxu0 %v10387_v38  ;;  %3872 = vmatprep.subr.bf16.mxu1 %v10514_v28 }
 0x3f1   :  { %3832 = vmatpush1.bf16.msra.mxu0 %v10394_v60  ;;  %3873 = vmatpush1.bf16.msra.mxu1 %v10521_v30 }
 0x3f2   :  { %3833 = vmatprep.subr.bf16.mxu0 %v10401_v8  ;;  %3874 = vmatprep.subr.bf16.mxu1 %v10529_v39 }
 0x3f5   :  { %3834 = vmatpush1.bf16.msra.mxu0 %v10408_v62  ;;  %3875 = vmatpush1.bf16.msra.mxu1 %v10536_v41 }
 0x3f6   :  { %3924 = vmatprep.subr.bf16.mxu0 %v10286_v35  ;;  %3965 = vmatprep.subr.bf16.mxu1 %v10416_v24 }
 0x3f8   :  { %v3223_v42 = vpop.f32.mrf.mxu0  ;;  %v3264_v53 = vpop.f32.mrf.mxu1  ;;  %3852 = vmatmul.mubr.bf16.vlgmr.msra.gmra.mxu0 %v2023_v49  ;;  %3893 = vmatmul.mubr.bf16.vlgmr.msra.gmra.mxu1 %v2023_v49 }
 0x3f9   :  { %3925 = vmatpush1.bf16.msra.mxu0 %v10295_v45  ;;  %3966 = vmatpush1.bf16.msra.mxu1 %v10423_v3  ;;  %v3224_v21 = vadd.f32 %v3223_v42, %v10170_v13  ;;  %v3265_v12 = vadd.f32 %v3264_v53, %v10175_v7 }
 0x3fa   :  { %v3225_v43 = vpop.f32.mrf.mxu0  ;;  %v3266_v37 = vpop.f32.mrf.mxu1  ;;  %3926 = vmatprep.subr.bf16.mxu0 %v10302_v40  ;;  %3967 = vmatprep.subr.bf16.mxu1 %v10431_v32 }
 0x3fb   :  { %v3226_v18 = vadd.f32 %v3225_v43, %v10178_v14  ;;  %v3267_v0 = vadd.f32 %v3266_v37, %v10181_v11  ;;  %3956 = vmatprep.mubr.bf16.mxu0 %v13018_v46  ;;  %3997 = vmatprep.mubr.bf16.mxu1 %v13018_v46 }
 0x3fc   :  { %v3227_v10 = vpop.f32.mrf.mxu0  ;;  %v3268_v49 = vpop.f32.mrf.mxu1 }
 0x3fd   :  { %v3275_v19 = vcombine.low %v3224_v21, %v3226_v18  ;;  %v3276_v42 = vcombine.low %v3265_v12, %v3267_v0  ;;  %3927 = vmatpush1.bf16.msra.mxu0 %v10313_v15  ;;  %3968 = vmatpush1.bf16.msra.mxu1 %v10443_v29 }
 0x3fe   :  { %v3228_v55 = vpop.f32.mrf.mxu0  ;;  %v3269_v44 = vpop.f32.mrf.mxu1  ;;  %3928 = vmatprep.subr.bf16.mxu0 %v10320_v36  ;;  %3969 = vmatprep.subr.bf16.mxu1 %v10450_v1 }
 0x3ff   :  { %v10791_v53 = vrot.slane %v3275_v19, %v10186_v34  ;;  %v10794_v43 = vrot.slane %v3276_v42, %v10186_v34  ;;  %v10811_v44 = vld [vmem:[%s12951_s3 + $0x10] sm:$0x3f]  ;;  %v13036_v19 = vld [vmem:[#allocation23_spill] sm:$0xff] }
 0x400   :  { %v829_v55 = vrot.slane %v10811_v44, %v9614_v50 }
 0x401   :  { %13034 = vst [vmem:[#allocation22_spill] sm:$0xff] %v10791_v53  ;;  %13035 = vst [vmem:[#allocation39_spill] sm:$0xff] %v10794_v43  ;;  %3929 = vmatpush1.bf16.msra.mxu0 %v10335_v5  ;;  %3970 = vmatpush1.bf16.msra.mxu1 %v10465_v57 }
 0x402   :  { %3930 = vmatprep.subr.bf16.mxu0 %v10342_v33  ;;  %3971 = vmatprep.subr.bf16.mxu1 %v10472_v59  ;;  %v1898_v37 = vadd.f32 %v13036_v19, %v829_v55 }
 0x404   :  { %v2002_v12 = vmax.f32 %v1898_v37, 0.0 }
 0x405   :  { %3931 = vmatpush1.bf16.msra.mxu0 %v10349_v25  ;;  %3972 = vmatpush1.bf16.msra.mxu1 %v10479_v61 }
 0x406   :  { %3932 = vmatprep.subr.bf16.mxu0 %v10356_v54  ;;  %3973 = vmatprep.subr.bf16.mxu1 %v10486_v63  ;;  %v2024_v50 = vpack.c.bf16 %v2002_v12, %v2002_v12 }
 0x409   :  { %3933 = vmatpush1.bf16.msra.mxu0 %v10363_v56  ;;  %3974 = vmatpush1.bf16.msra.mxu1 %v10493_v2 }
 0x40a   :  { %3934 = vmatprep.subr.bf16.mxu0 %v10372_v4  ;;  %3975 = vmatprep.subr.bf16.mxu1 %v10500_v23 }
 0x40d   :  { %3935 = vmatpush1.bf16.msra.mxu0 %v10379_v58  ;;  %3976 = vmatpush1.bf16.msra.mxu1 %v10507_v26 }
 0x40e   :  { %3936 = vmatprep.subr.bf16.mxu0 %v10387_v38  ;;  %3977 = vmatprep.subr.bf16.mxu1 %v10514_v28 }
 0x411   :  { %3937 = vmatpush1.bf16.msra.mxu0 %v10394_v60  ;;  %3978 = vmatpush1.bf16.msra.mxu1 %v10521_v30 }
 0x412   :  { %3938 = vmatprep.subr.bf16.mxu0 %v10401_v8  ;;  %3979 = vmatprep.subr.bf16.mxu1 %v10529_v39 }
 0x415   :  { %3939 = vmatpush1.bf16.msra.mxu0 %v10408_v62  ;;  %3980 = vmatpush1.bf16.msra.mxu1 %v10536_v41 }
 0x416   :  { %4029 = vmatprep.subr.bf16.mxu0 %v10286_v35  ;;  %4070 = vmatprep.subr.bf16.mxu1 %v10416_v24 }
 0x418   :  { %v3328_v18 = vpop.f32.mrf.mxu0  ;;  %v3369_v0 = vpop.f32.mrf.mxu1  ;;  %3957 = vmatmul.mubr.bf16.vlgmr.msra.gmra.mxu0 %v2024_v50  ;;  %3998 = vmatmul.mubr.bf16.vlgmr.msra.gmra.mxu1 %v2024_v50 }
 0x419   :  { %4030 = vmatpush1.bf16.msra.mxu0 %v10295_v45  ;;  %4071 = vmatpush1.bf16.msra.mxu1 %v10423_v3  ;;  %v3329_v10 = vadd.f32 %v3328_v18, %v10170_v13  ;;  %v3370_v55 = vadd.f32 %v3369_v0, %v10175_v7 }
 0x41a   :  { %v3330_v49 = vpop.f32.mrf.mxu0  ;;  %v3371_v42 = vpop.f32.mrf.mxu1  ;;  %4031 = vmatprep.subr.bf16.mxu0 %v10302_v40  ;;  %4072 = vmatprep.subr.bf16.mxu1 %v10431_v32 }
 0x41b   :  { %v3331_v19 = vadd.f32 %v3330_v49, %v10178_v14  ;;  %v3372_v37 = vadd.f32 %v3371_v42, %v10181_v11  ;;  %4061 = vmatprep.mubr.bf16.mxu0 %v13018_v46  ;;  %4102 = vmatprep.mubr.bf16.mxu1 %v13018_v46 }
 0x41c   :  { %v3332_v12 = vpop.f32.mrf.mxu0  ;;  %v3373_v50 = vpop.f32.mrf.mxu1 }
 0x41d   :  { %v3380_v21 = vcombine.low %v3329_v10, %v3331_v19  ;;  %v3381_v18 = vcombine.low %v3370_v55, %v3372_v37  ;;  %4032 = vmatpush1.bf16.msra.mxu0 %v10313_v15  ;;  %4073 = vmatpush1.bf16.msra.mxu1 %v10443_v29 }
 0x41e   :  { %v3333_v43 = vpop.f32.mrf.mxu0  ;;  %v3374_v53 = vpop.f32.mrf.mxu1  ;;  %4033 = vmatprep.subr.bf16.mxu0 %v10320_v36  ;;  %4074 = vmatprep.subr.bf16.mxu1 %v10450_v1 }
 0x41f   :  { %v10845_v0 = vrot.slane %v3380_v21, %v10186_v34  ;;  %v10848_v49 = vrot.slane %v3381_v18, %v10186_v34  ;;  %v833_v53 = vrot.slane %v10811_v44, %v9617_v51  ;;  %v13039_v43 = vld [vmem:[#allocation24_spill] sm:$0xff] }
 0x421   :  { %13037 = vst [vmem:[#allocation23_spill] sm:$0xff] %v10845_v0  ;;  %13038 = vst [vmem:[#allocation40_spill] sm:$0xff] %v10848_v49  ;;  %4034 = vmatpush1.bf16.msra.mxu0 %v10335_v5  ;;  %4075 = vmatpush1.bf16.msra.mxu1 %v10465_v57  ;;  %v1900_v21 = vadd.f32 %v13039_v43, %v833_v53 }
 0x422   :  { %4035 = vmatprep.subr.bf16.mxu0 %v10342_v33  ;;  %4076 = vmatprep.subr.bf16.mxu1 %v10472_v59 }
 0x423   :  { %v2003_v42 = vmax.f32 %v1900_v21, 0.0 }
 0x425   :  { %4036 = vmatpush1.bf16.msra.mxu0 %v10349_v25  ;;  %4077 = vmatpush1.bf16.msra.mxu1 %v10479_v61  ;;  %v2025_v51 = vpack.c.bf16 %v2003_v42, %v2003_v42 }
 0x426   :  { %4037 = vmatprep.subr.bf16.mxu0 %v10356_v54  ;;  %4078 = vmatprep.subr.bf16.mxu1 %v10486_v63 }
 0x429   :  { %4038 = vmatpush1.bf16.msra.mxu0 %v10363_v56  ;;  %4079 = vmatpush1.bf16.msra.mxu1 %v10493_v2 }
 0x42a   :  { %4039 = vmatprep.subr.bf16.mxu0 %v10372_v4  ;;  %4080 = vmatprep.subr.bf16.mxu1 %v10500_v23 }
 0x42d   :  { %4040 = vmatpush1.bf16.msra.mxu0 %v10379_v58  ;;  %4081 = vmatpush1.bf16.msra.mxu1 %v10507_v26 }
 0x42e   :  { %4041 = vmatprep.subr.bf16.mxu0 %v10387_v38  ;;  %4082 = vmatprep.subr.bf16.mxu1 %v10514_v28 }
 0x431   :  { %4042 = vmatpush1.bf16.msra.mxu0 %v10394_v60  ;;  %4083 = vmatpush1.bf16.msra.mxu1 %v10521_v30 }
 0x432   :  { %4043 = vmatprep.subr.bf16.mxu0 %v10401_v8  ;;  %4084 = vmatprep.subr.bf16.mxu1 %v10529_v39 }
 0x435   :  { %4044 = vmatpush1.bf16.msra.mxu0 %v10408_v62  ;;  %4085 = vmatpush1.bf16.msra.mxu1 %v10536_v41 }
 0x436   :  { %4134 = vmatprep.subr.bf16.mxu0 %v10286_v35  ;;  %4175 = vmatprep.subr.bf16.mxu1 %v10416_v24 }
 0x438   :  { %v3433_v44 = vpop.f32.mrf.mxu0  ;;  %v3474_v55 = vpop.f32.mrf.mxu1  ;;  %4062 = vmatmul.mubr.bf16.vlgmr.msra.gmra.mxu0 %v2025_v51  ;;  %4103 = vmatmul.mubr.bf16.vlgmr.msra.gmra.mxu1 %v2025_v51 }
 0x439   :  { %4135 = vmatpush1.bf16.msra.mxu0 %v10295_v45  ;;  %4176 = vmatpush1.bf16.msra.mxu1 %v10423_v3  ;;  %v3434_v19 = vadd.f32 %v3433_v44, %v10170_v13  ;;  %v3475_v35 = vadd.f32 %v3474_v55, %v10175_v7 }
 0x43a   :  { %v3435_v37 = vpop.f32.mrf.mxu0  ;;  %v3476_v12 = vpop.f32.mrf.mxu1  ;;  %4136 = vmatprep.subr.bf16.mxu0 %v10302_v40  ;;  %4177 = vmatprep.subr.bf16.mxu1 %v10431_v32 }
 0x43b   :  { %v3436_v50 = vadd.f32 %v3435_v37, %v10178_v14  ;;  %v3477_v18 = vadd.f32 %v3476_v12, %v10181_v11  ;;  %4166 = vmatprep.mubr.bf16.mxu0 %v13018_v46  ;;  %4207 = vmatprep.mubr.bf16.mxu1 %v13018_v46 }
 0x43c   :  { %v3437_v45 = vpop.f32.mrf.mxu0  ;;  %v3478_v53 = vpop.f32.mrf.mxu1 }
 0x43d   :  { %v3485_v43 = vcombine.low %v3434_v19, %v3436_v50  ;;  %v3486_v21 = vcombine.low %v3475_v35, %v3477_v18  ;;  %4137 = vmatpush1.bf16.msra.mxu0 %v10313_v15  ;;  %4178 = vmatpush1.bf16.msra.mxu1 %v10443_v29  ;;  %v13042_v15 = vld [vmem:[#allocation25_spill] sm:$0xff] }
 0x43e   :  { %v3438_v40 = vpop.f32.mrf.mxu0  ;;  %v3479_v42 = vpop.f32.mrf.mxu1  ;;  %4138 = vmatprep.subr.bf16.mxu0 %v10320_v36  ;;  %4179 = vmatprep.subr.bf16.mxu1 %v10450_v1  ;;  %v2004_v36 = vmax.f32 %v13042_v15, 0.0  ;;  %v10954_v35 = vld [vmem:[%s12952_s4 + $0xc0] ss:$16 sps:$4 sm:$0xff]   ;;  %v10961_v18 = vld [vmem:[%s12952_s4 + $0xa4] ss:$16 sps:$4 sm:$0xff]  }
 0x43f   :  { %v10894_v51 = vrot.slane %v3485_v43, %v10186_v34  ;;  %v10897_v44 = vrot.slane %v3486_v21, %v10186_v34  ;;  %v10976_v43 = vld [vmem:[%s12952_s4 + $0xa0] ss:$16 sps:$4 sm:$0xff]   ;;  %v11040_v42 = vld [vmem:[%s12952_s4 + $0x4] ss:$16 sps:$4 sm:$0xff]   ;;  %v11055_v15 = vld [vmem:[%s12952_s4 + $0xec] ss:$16 sps:$4 sm:$0xff]  }
 0x440   :  { %v10990_v21 = vld [vmem:[%s12952_s4 + $0x80] ss:$16 sps:$4 sm:$0xff]  }
 0x441   :  { %13040 = vst [vmem:[#allocation24_spill] sm:$0xff] %v10894_v51  ;;  %13041 = vst [vmem:[#allocation41_spill] sm:$0xff] %v10897_v44  ;;  %4139 = vmatpush1.bf16.msra.mxu0 %v10335_v5  ;;  %4180 = vmatpush1.bf16.msra.mxu1 %v10465_v57  ;;  %v2026_v5 = vpack.c.bf16 %v2004_v36, %v2004_v36  ;;  %v13045_v40 = vld [vmem:[#allocation26_spill] sm:$0xff] }
 0x442   :  { %4140 = vmatprep.subr.bf16.mxu0 %v10342_v33  ;;  %4181 = vmatprep.subr.bf16.mxu1 %v10472_v59  ;;  %v10927_v33 = vld [vmem:[%s12952_s4 + $0xe4] ss:$16 sps:$4 sm:$0xff]  }
 0x445   :  { %4141 = vmatpush1.bf16.msra.mxu0 %v10349_v25  ;;  %4182 = vmatpush1.bf16.msra.mxu1 %v10479_v61 }
 0x446   :  { %4142 = vmatprep.subr.bf16.mxu0 %v10356_v54  ;;  %4183 = vmatprep.subr.bf16.mxu1 %v10486_v63 }
 0x449   :  { %4143 = vmatpush1.bf16.msra.mxu0 %v10363_v56  ;;  %4184 = vmatpush1.bf16.msra.mxu1 %v10493_v2  ;;  %v10934_v56 = vld [vmem:[%s12952_s4 + $0xe0] ss:$16 sps:$4 sm:$0xff]  }
 0x44a   :  { %4144 = vmatprep.subr.bf16.mxu0 %v10372_v4  ;;  %4185 = vmatprep.subr.bf16.mxu1 %v10500_v23 }
 0x44d   :  { %4145 = vmatpush1.bf16.msra.mxu0 %v10379_v58  ;;  %4186 = vmatpush1.bf16.msra.mxu1 %v10507_v26 }
 0x44e   :  { %4146 = vmatprep.subr.bf16.mxu0 %v10387_v38  ;;  %4187 = vmatprep.subr.bf16.mxu1 %v10514_v28 }
 0x451   :  { %4147 = vmatpush1.bf16.msra.mxu0 %v10394_v60  ;;  %4188 = vmatpush1.bf16.msra.mxu1 %v10521_v30  ;;  %v10942_v60 = vld [vmem:[%s12952_s4 + $0xc4] ss:$16 sps:$4 sm:$0xff]  }
 0x452   :  { %4148 = vmatprep.subr.bf16.mxu0 %v10401_v8  ;;  %4189 = vmatprep.subr.bf16.mxu1 %v10529_v39 }
 0x455   :  { %4149 = vmatpush1.bf16.msra.mxu0 %v10408_v62  ;;  %4190 = vmatpush1.bf16.msra.mxu1 %v10536_v41 }
 0x456   :  { %4239 = vmatprep.subr.bf16.mxu0 %v10927_v33  ;;  %4280 = vmatprep.subr.bf16.mxu1 %v10416_v24 }
 0x458   :  { %v3538_v25 = vpop.f32.mrf.mxu0  ;;  %v3579_v54 = vpop.f32.mrf.mxu1  ;;  %4167 = vmatmul.mubr.bf16.vlgmr.msra.gmra.mxu0 %v2026_v5  ;;  %4208 = vmatmul.mubr.bf16.vlgmr.msra.gmra.mxu1 %v2026_v5 }
 0x459   :  { %4240 = vmatpush1.bf16.msra.mxu0 %v10934_v56  ;;  %4281 = vmatpush1.bf16.msra.mxu1 %v10423_v3  ;;  %v3539_v4 = vadd.f32 %v3538_v25, %v10170_v13  ;;  %v3580_v8 = vadd.f32 %v3579_v54, %v10175_v7 }
 0x45a   :  { %v3540_v58 = vpop.f32.mrf.mxu0  ;;  %v3581_v38 = vpop.f32.mrf.mxu1  ;;  %4241 = vmatprep.subr.bf16.mxu0 %v10942_v60  ;;  %4282 = vmatprep.subr.bf16.mxu1 %v10431_v32 }
 0x45b   :  { %v3541_v62 = vadd.f32 %v3540_v58, %v10178_v14  ;;  %v3582_v24 = vadd.f32 %v3581_v38, %v10181_v11  ;;  %4271 = vmatprep.mubr.bf16.mxu0 %v13018_v46  ;;  %4312 = vmatprep.mubr.bf16.mxu1 %v13018_v46 }
 0x45c   :  { %v3542_v3 = vpop.f32.mrf.mxu0  ;;  %v3583_v19 = vpop.f32.mrf.mxu1 }
 0x45d   :  { %v3590_v37 = vcombine.low %v3539_v4, %v3541_v62  ;;  %v3591_v12 = vcombine.low %v3580_v8, %v3582_v24  ;;  %4242 = vmatpush1.bf16.msra.mxu0 %v10954_v35  ;;  %4283 = vmatpush1.bf16.msra.mxu1 %v10443_v29  ;;  %v11070_v4 = vld [vmem:[%s12952_s4 + $0xcc] ss:$16 sps:$4 sm:$0xff]  }
 0x45e   :  { %v3543_v32 = vpop.f32.mrf.mxu0  ;;  %v3584_v50 = vpop.f32.mrf.mxu1  ;;  %4243 = vmatprep.subr.bf16.mxu0 %v10961_v18  ;;  %4284 = vmatprep.subr.bf16.mxu1 %v10450_v1  ;;  %v10983_v1 = vld [vmem:[%s12952_s4 + $0x84] ss:$16 sps:$4 sm:$0xff]  }
 0x45f   :  { %v10966_v45 = vrot.slane %v3590_v37, %v10186_v34  ;;  %v10969_v53 = vrot.slane %v3591_v12, %v10186_v34  ;;  %v11082_v37 = vld [vmem:[%s12952_s4 + $0xc8] ss:$16 sps:$4 sm:$0xff]   ;;  %v11089_v50 = vld [vmem:[%s12952_s4 + $0xac] ss:$16 sps:$4 sm:$0xff]  }
 0x461   :  { %13043 = vst [vmem:[#allocation25_spill] sm:$0xff] %v10966_v45  ;;  %13044 = vst [vmem:[#allocation42_spill] sm:$0xff] %v10969_v53  ;;  %4244 = vmatpush1.bf16.msra.mxu0 %v10976_v43  ;;  %4285 = vmatpush1.bf16.msra.mxu1 %v10465_v57  ;;  %v10997_v57 = vld [vmem:[%s12952_s4 + $0x64] ss:$16 sps:$4 sm:$0xff]  }
 0x462   :  { %4245 = vmatprep.subr.bf16.mxu0 %v10983_v1  ;;  %4286 = vmatprep.subr.bf16.mxu1 %v10472_v59  ;;  %v11004_v59 = vld [vmem:[%s12952_s4 + $0x60] ss:$16 sps:$4 sm:$0xff]  }
 0x465   :  { %4246 = vmatpush1.bf16.msra.mxu0 %v10990_v21  ;;  %4287 = vmatpush1.bf16.msra.mxu1 %v10479_v61  ;;  %v11011_v61 = vld [vmem:[%s12952_s4 + $0x44] ss:$16 sps:$4 sm:$0xff]  }
 0x466   :  { %4247 = vmatprep.subr.bf16.mxu0 %v10997_v57  ;;  %4288 = vmatprep.subr.bf16.mxu1 %v10486_v63  ;;  %v11018_v63 = vld [vmem:[%s12952_s4 + $0x40] ss:$16 sps:$4 sm:$0xff]  }
 0x469   :  { %4248 = vmatpush1.bf16.msra.mxu0 %v11004_v59  ;;  %4289 = vmatpush1.bf16.msra.mxu1 %v10493_v2  ;;  %v11025_v2 = vld [vmem:[%s12952_s4 + $0x24] ss:$16 sps:$4 sm:$0xff]  }
 0x46a   :  { %4249 = vmatprep.subr.bf16.mxu0 %v11011_v61  ;;  %4290 = vmatprep.subr.bf16.mxu1 %v10500_v23  ;;  %v11032_v23 = vld [vmem:[%s12952_s4 + $0x20] ss:$16 sps:$4 sm:$0xff]  }
 0x46d   :  { %4250 = vmatpush1.bf16.msra.mxu0 %v11018_v63  ;;  %4291 = vmatpush1.bf16.msra.mxu1 %v10507_v26  ;;  %v2005_v26 = vmax.f32 %v13045_v40, 0.0 }
 0x46e   :  { %4251 = vmatprep.subr.bf16.mxu0 %v11025_v2  ;;  %4292 = vmatprep.subr.bf16.mxu1 %v10514_v28  ;;  %v11047_v28 = vld [vmem:[%s12952_s4] ss:$16 sps:$4 sm:$0xff]  }
 0x471   :  { %4252 = vmatpush1.bf16.msra.mxu0 %v11032_v23  ;;  %4293 = vmatpush1.bf16.msra.mxu1 %v10521_v30  ;;  %v2027_v30 = vpack.c.bf16 %v2005_v26, %v2005_v26 }
 0x472   :  { %4253 = vmatprep.subr.bf16.mxu0 %v11040_v42  ;;  %4294 = vmatprep.subr.bf16.mxu1 %v10529_v39 }
 0x475   :  { %4254 = vmatpush1.bf16.msra.mxu0 %v11047_v28  ;;  %4295 = vmatpush1.bf16.msra.mxu1 %v10536_v41  ;;  %v11062_v41 = vld [vmem:[%s12952_s4 + $0xe8] ss:$16 sps:$4 sm:$0xff]  }
 0x476   :  { %4344 = vmatprep.subr.bf16.mxu0 %v10927_v33  ;;  %4385 = vmatprep.subr.bf16.mxu1 %v11055_v15 }
 0x478   :  { %v3643_v39 = vpop.f32.mrf.mxu0  ;;  %v3684_v36 = vpop.f32.mrf.mxu1  ;;  %4272 = vmatmul.mubr.bf16.vlgmr.msra.gmra.mxu0 %v2027_v30  ;;  %4313 = vmatmul.mubr.bf16.vlgmr.msra.gmra.mxu1 %v2027_v30 }
 0x479   :  { %4345 = vmatpush1.bf16.msra.mxu0 %v10934_v56  ;;  %4386 = vmatpush1.bf16.msra.mxu1 %v11062_v41  ;;  %v3644_v5 = vadd.f32 %v3643_v39, %v10170_v13  ;;  %v3685_v58 = vadd.f32 %v3684_v36, %v10175_v7  ;;  %v11104_v39 = vld [vmem:[%s12952_s4 + $0xa8] ss:$16 sps:$4 sm:$0xff]   ;;  %v11111_v36 = vld [vmem:[%s12952_s4 + $0x8c] ss:$16 sps:$4 sm:$0xff]  }
 0x47a   :  { %v3645_v25 = vpop.f32.mrf.mxu0  ;;  %v3686_v54 = vpop.f32.mrf.mxu1  ;;  %4346 = vmatprep.subr.bf16.mxu0 %v10942_v60  ;;  %4387 = vmatprep.subr.bf16.mxu1 %v11070_v4 }
 0x47b   :  { %v3646_v38 = vadd.f32 %v3645_v25, %v10178_v14  ;;  %v3687_v8 = vadd.f32 %v3686_v54, %v10181_v11  ;;  %4376 = vmatprep.mubr.bf16.mxu0 %v13018_v46  ;;  %4417 = vmatprep.mubr.bf16.mxu1 %v13018_v46  ;;  %v9076_v25 = vld [vmem:[%s12952_s4 + $0x6c] ss:$16 sps:$4 sm:$0xff]   ;;  %v9077_v54 = vld [vmem:[%s12952_s4 + $0x68] ss:$16 sps:$4 sm:$0xff]  }
 0x47c   :  { %v3647_v62 = vpop.f32.mrf.mxu0  ;;  %v3688_v24 = vpop.f32.mrf.mxu1 }
 0x47d   :  { %v3695_v3 = vcombine.low %v3644_v5, %v3646_v38  ;;  %v3696_v19 = vcombine.low %v3685_v58, %v3687_v8  ;;  %4347 = vmatpush1.bf16.msra.mxu0 %v10954_v35  ;;  %4388 = vmatpush1.bf16.msra.mxu1 %v11082_v37  ;;  %v11118_v5 = vld [vmem:[%s12952_s4 + $0x88] ss:$16 sps:$4 sm:$0xff]   ;;  %v9078_v58 = vld [vmem:[%s12952_s4 + $0x4c] ss:$16 sps:$4 sm:$0xff]  }
 0x47e   :  { %v3648_v12 = vpop.f32.mrf.mxu0  ;;  %v3689_v32 = vpop.f32.mrf.mxu1  ;;  %4348 = vmatprep.subr.bf16.mxu0 %v10961_v18  ;;  %4389 = vmatprep.subr.bf16.mxu1 %v11089_v50  ;;  %v9079_v38 = vld [vmem:[%s12952_s4 + $0x48] ss:$16 sps:$4 sm:$0xff]   ;;  %v9080_v8 = vld [vmem:[%s12952_s4 + $0x2c] ss:$16 sps:$4 sm:$0xff]  }
 0x47f   :  { %v11093_v40 = vrot.slane %v3695_v3, %v10186_v34  ;;  %v11096_v26 = vrot.slane %v3696_v19, %v10186_v34  ;;  %v9081_v62 = vld [vmem:[%s12952_s4 + $0x28] ss:$16 sps:$4 sm:$0xff]   ;;  %v9082_v19 = vld [vmem:[%s12952_s4 + $0xc] ss:$16 sps:$4 sm:$0xff]  }
 0x480   :  { %v13048_v24 = vld [vmem:[#allocation27_spill] sm:$0xff] }
 0x481   :  { %13046 = vst [vmem:[#allocation26_spill] sm:$0xff] %v11093_v40  ;;  %13047 = vst [vmem:[#allocation43_spill] sm:$0xff] %v11096_v26  ;;  %4349 = vmatpush1.bf16.msra.mxu0 %v10976_v43  ;;  %4390 = vmatpush1.bf16.msra.mxu1 %v11104_v39  ;;  %v2006_v3 = vmax.f32 %v13048_v24, 0.0  ;;  %v9083_v12 = vld [vmem:[%s12952_s4 + $0x8] ss:$16 sps:$4 sm:$0xff]  }
 0x482   :  { %4350 = vmatprep.subr.bf16.mxu0 %v10983_v1  ;;  %4391 = vmatprep.subr.bf16.mxu1 %v11111_v36 }
 0x483   :  { %v2028_v32 = vpack.c.bf16 %v2006_v3, %v2006_v3 }
 0x485   :  { %4351 = vmatpush1.bf16.msra.mxu0 %v10990_v21  ;;  %4392 = vmatpush1.bf16.msra.mxu1 %v11118_v5 }
 0x486   :  { %4352 = vmatprep.subr.bf16.mxu0 %v10997_v57  ;;  %4393 = vmatprep.subr.bf16.mxu1 %v9076_v25 }
 0x489   :  { %4353 = vmatpush1.bf16.msra.mxu0 %v11004_v59  ;;  %4394 = vmatpush1.bf16.msra.mxu1 %v9077_v54 }
 0x48a   :  { %4354 = vmatprep.subr.bf16.mxu0 %v11011_v61  ;;  %4395 = vmatprep.subr.bf16.mxu1 %v9078_v58 }
 0x48d   :  { %4355 = vmatpush1.bf16.msra.mxu0 %v11018_v63  ;;  %4396 = vmatpush1.bf16.msra.mxu1 %v9079_v38 }
 0x48e   :  { %4356 = vmatprep.subr.bf16.mxu0 %v11025_v2  ;;  %4397 = vmatprep.subr.bf16.mxu1 %v9080_v8 }
 0x491   :  { %4357 = vmatpush1.bf16.msra.mxu0 %v11032_v23  ;;  %4398 = vmatpush1.bf16.msra.mxu1 %v9081_v62 }
 0x492   :  { %4358 = vmatprep.subr.bf16.mxu0 %v11040_v42  ;;  %4399 = vmatprep.subr.bf16.mxu1 %v9082_v19 }
 0x495   :  { %4359 = vmatpush1.bf16.msra.mxu0 %v11047_v28  ;;  %4400 = vmatpush1.bf16.msra.mxu1 %v9083_v12 }
 0x496   :  { %4449 = vmatprep.subr.bf16.mxu0 %v10927_v33  ;;  %4490 = vmatprep.subr.bf16.mxu1 %v11055_v15 }
 0x498   :  { %v3748_v24 = vpop.f32.mrf.mxu0  ;;  %v3789_v30 = vpop.f32.mrf.mxu1  ;;  %4377 = vmatmul.mubr.bf16.vlgmr.msra.gmra.mxu0 %v2028_v32  ;;  %4418 = vmatmul.mubr.bf16.vlgmr.msra.gmra.mxu1 %v2028_v32 }
 0x499   :  { %4450 = vmatpush1.bf16.msra.mxu0 %v10934_v56  ;;  %4491 = vmatpush1.bf16.msra.mxu1 %v11062_v41  ;;  %v3749_v29 = vadd.f32 %v3748_v24, %v10170_v13  ;;  %v3790_v33 = vadd.f32 %v3789_v30, %v10175_v7 }
 0x49a   :  { %v3750_v55 = vpop.f32.mrf.mxu0  ;;  %v3791_v10 = vpop.f32.mrf.mxu1  ;;  %4451 = vmatprep.subr.bf16.mxu0 %v10942_v60  ;;  %4492 = vmatprep.subr.bf16.mxu1 %v11070_v4 }
 0x49b   :  { %v3751_v15 = vadd.f32 %v3750_v55, %v10178_v14  ;;  %v3792_v3 = vadd.f32 %v3791_v10, %v10181_v11  ;;  %4481 = vmatprep.mubr.bf16.mxu0 %v13018_v46  ;;  %4522 = vmatprep.mubr.bf16.mxu1 %v13018_v46 }
 0x49c   :  { %v3752_v56 = vpop.f32.mrf.mxu0  ;;  %v3793_v41 = vpop.f32.mrf.mxu1 }
 0x49d   :  { %v3800_v32 = vcombine.low %v3749_v29, %v3751_v15  ;;  %v3801_v24 = vcombine.low %v3790_v33, %v3792_v3  ;;  %4452 = vmatpush1.bf16.msra.mxu0 %v10954_v35  ;;  %4493 = vmatpush1.bf16.msra.mxu1 %v11082_v37  ;;  %v13051_v35 = vld [vmem:[#allocation28_spill] sm:$0xff]  ;;  %v11272_v3 = vld [vmem:[%s12953_s5 + $0x84] ss:$16 sps:$4 sm:$0xff]  }
 0x49e   :  { %v3753_v60 = vpop.f32.mrf.mxu0  ;;  %v3794_v4 = vpop.f32.mrf.mxu1  ;;  %4453 = vmatprep.subr.bf16.mxu0 %v10961_v18  ;;  %4494 = vmatprep.subr.bf16.mxu1 %v11089_v50  ;;  %v2007_v18 = vmax.f32 %v13051_v35, 0.0  ;;  %v11277_v56 = vld [vmem:[%s12953_s5 + $0x8c] ss:$16 sps:$4 sm:$0xff]   ;;  %v11304_v35 = vld [vmem:[%s12953_s5 + $0x64] ss:$16 sps:$4 sm:$0xff]  }
 0x49f   :  { %v11171_v10 = vrot.slane %v3800_v32, %v10186_v34  ;;  %v11174_v55 = vrot.slane %v3801_v24, %v10186_v34  ;;  %v11292_v60 = vld [vmem:[%s12953_s5 + $0x80] ss:$16 sps:$4 sm:$0xff]   ;;  %v11297_v4 = vld [vmem:[%s12953_s5 + $0x88] ss:$16 sps:$4 sm:$0xff]  }
 0x4a1   :  { %13049 = vst [vmem:[#allocation27_spill] sm:$0xff] %v11171_v10  ;;  %13050 = vst [vmem:[#allocation44_spill] sm:$0xff] %v11174_v55  ;;  %4454 = vmatpush1.bf16.msra.mxu0 %v10976_v43  ;;  %4495 = vmatpush1.bf16.msra.mxu1 %v11104_v39  ;;  %v11195_v43 = vld [vmem:[%s12953_s5 + $0xe4] ss:$16 sps:$4 sm:$0xff]  }
 0x4a2   :  { %4455 = vmatprep.subr.bf16.mxu0 %v10983_v1  ;;  %4496 = vmatprep.subr.bf16.mxu1 %v11111_v36  ;;  %v11200_v1 = vld [vmem:[%s12953_s5 + $0xec] ss:$16 sps:$4 sm:$0xff]   ;;  %v11243_v39 = vld [vmem:[%s12953_s5 + $0xa4] ss:$16 sps:$4 sm:$0xff]  }
 0x4a3   :  { %v11248_v36 = vld [vmem:[%s12953_s5 + $0xac] ss:$16 sps:$4 sm:$0xff]  }
 0x4a5   :  { %4456 = vmatpush1.bf16.msra.mxu0 %v10990_v21  ;;  %4497 = vmatpush1.bf16.msra.mxu1 %v11118_v5  ;;  %v11206_v21 = vld [vmem:[%s12953_s5 + $0xe0] ss:$16 sps:$4 sm:$0xff]  }
 0x4a6   :  { %4457 = vmatprep.subr.bf16.mxu0 %v10997_v57  ;;  %4498 = vmatprep.subr.bf16.mxu1 %v9076_v25  ;;  %v11211_v57 = vld [vmem:[%s12953_s5 + $0xe8] ss:$16 sps:$4 sm:$0xff]  }
 0x4a9   :  { %4458 = vmatpush1.bf16.msra.mxu0 %v11004_v59  ;;  %4499 = vmatpush1.bf16.msra.mxu1 %v9077_v54  ;;  %v2029_v59 = vpack.c.bf16 %v2007_v18, %v2007_v18  ;;  %v11309_v18 = vld [vmem:[%s12953_s5 + $0x6c] ss:$16 sps:$4 sm:$0xff]  }
 0x4aa   :  { %4459 = vmatprep.subr.bf16.mxu0 %v11011_v61  ;;  %4500 = vmatprep.subr.bf16.mxu1 %v9078_v58  ;;  %v11218_v61 = vld [vmem:[%s12953_s5 + $0xc4] ss:$16 sps:$4 sm:$0xff]  }
 0x4ad   :  { %4460 = vmatpush1.bf16.msra.mxu0 %v11018_v63  ;;  %4501 = vmatpush1.bf16.msra.mxu1 %v9079_v38  ;;  %v11223_v63 = vld [vmem:[%s12953_s5 + $0xcc] ss:$16 sps:$4 sm:$0xff]  }
 0x4ae   :  { %4461 = vmatprep.subr.bf16.mxu0 %v11025_v2  ;;  %4502 = vmatprep.subr.bf16.mxu1 %v9080_v8 }
 0x4b1   :  { %4462 = vmatpush1.bf16.msra.mxu0 %v11032_v23  ;;  %4503 = vmatpush1.bf16.msra.mxu1 %v9081_v62 }
 0x4b2   :  { %4463 = vmatprep.subr.bf16.mxu0 %v11040_v42  ;;  %4504 = vmatprep.subr.bf16.mxu1 %v9082_v19  ;;  %v11230_v42 = vld [vmem:[%s12953_s5 + $0xc0] ss:$16 sps:$4 sm:$0xff]  }
 0x4b3   :  { %v11260_v19 = vld [vmem:[%s12953_s5 + $0xa0] ss:$16 sps:$4 sm:$0xff]  }
 0x4b5   :  { %4464 = vmatpush1.bf16.msra.mxu0 %v11047_v28  ;;  %4505 = vmatpush1.bf16.msra.mxu1 %v9083_v12  ;;  %v11235_v28 = vld [vmem:[%s12953_s5 + $0xc8] ss:$16 sps:$4 sm:$0xff]  }
 0x4b6   :  { %4747 = vmatprep.subr.bf16.mxu0 %v11195_v43  ;;  %4788 = vmatprep.subr.bf16.mxu1 %v11200_v1  ;;  %v11265_v12 = vld [vmem:[%s12953_s5 + $0xa8] ss:$16 sps:$4 sm:$0xff]  }
 0x4b8   :  { %v3853_v2 = vpop.f32.mrf.mxu0  ;;  %v3894_v23 = vpop.f32.mrf.mxu1  ;;  %4482 = vmatmul.mubr.bf16.vlgmr.msra.gmra.mxu0 %v2029_v59  ;;  %4523 = vmatmul.mubr.bf16.vlgmr.msra.gmra.mxu1 %v2029_v59  ;;  %v11316_v59 = vld [vmem:[%s12953_s5 + $0x60] ss:$16 sps:$4 sm:$0xff]  }
 0x4b9   :  { %4748 = vmatpush1.bf16.msra.mxu0 %v11206_v21  ;;  %4789 = vmatpush1.bf16.msra.mxu1 %v11211_v57  ;;  %v3854_v37 = vadd.f32 %v3853_v2, %v10170_v13  ;;  %v3895_v5 = vadd.f32 %v3894_v23, %v10175_v7  ;;  %v11321_v2 = vld [vmem:[%s12953_s5 + $0x68] ss:$16 sps:$4 sm:$0xff]   ;;  %v11328_v23 = vld [vmem:[%s12953_s5 + $0x44] ss:$16 sps:$4 sm:$0xff]  }
 0x4ba   :  { %v3855_v50 = vpop.f32.mrf.mxu0  ;;  %v3896_v30 = vpop.f32.mrf.mxu1  ;;  %4749 = vmatprep.subr.bf16.mxu0 %v11218_v61  ;;  %4790 = vmatprep.subr.bf16.mxu1 %v11223_v63 }
 0x4bb   :  { %v3856_v25 = vadd.f32 %v3855_v50, %v10178_v14  ;;  %v3897_v54 = vadd.f32 %v3896_v30, %v10181_v11  ;;  %4779 = vmatprep.mubr.bf16.mxu0 %v13018_v46  ;;  %4820 = vmatprep.mubr.bf16.mxu1 %v13018_v46  ;;  %v11340_v50 = vld [vmem:[%s12953_s5 + $0x40] ss:$16 sps:$4 sm:$0xff]   ;;  %v11345_v30 = vld [vmem:[%s12953_s5 + $0x48] ss:$16 sps:$4 sm:$0xff]  }
 0x4bc   :  { %v3857_v58 = vpop.f32.mrf.mxu0  ;;  %v3898_v38 = vpop.f32.mrf.mxu1 }
 0x4bd   :  { %v3905_v8 = vcombine.low %v3854_v37, %v3856_v25  ;;  %v3906_v62 = vcombine.low %v3895_v5, %v3897_v54  ;;  %4750 = vmatpush1.bf16.msra.mxu0 %v11230_v42  ;;  %4791 = vmatpush1.bf16.msra.mxu1 %v11235_v28  ;;  %v11333_v37 = vld [vmem:[%s12953_s5 + $0x4c] ss:$16 sps:$4 sm:$0xff]   ;;  %v11352_v5 = vld [vmem:[%s12953_s5 + $0x24] ss:$16 sps:$4 sm:$0xff]   ;;  %v11364_v54 = vld [vmem:[%s12953_s5 + $0x20] ss:$16 sps:$4 sm:$0xff]  }
 0x4be   :  { %v3858_v33 = vpop.f32.mrf.mxu0  ;;  %v3899_v15 = vpop.f32.mrf.mxu1  ;;  %4751 = vmatprep.subr.bf16.mxu0 %v11243_v39  ;;  %4792 = vmatprep.subr.bf16.mxu1 %v11248_v36  ;;  %v11357_v25 = vld [vmem:[%s12953_s5 + $0x2c] ss:$16 sps:$4 sm:$0xff]   ;;  %v11369_v58 = vld [vmem:[%s12953_s5 + $0x28] ss:$16 sps:$4 sm:$0xff]   ;;  %v11376_v38 = vld [vmem:[%s12953_s5 + $0x4] ss:$16 sps:$4 sm:$0xff]  }
 0x4bf   :  { %v11280_v41 = vrot.slane %v3905_v8, %v10186_v34  ;;  %v11283_v32 = vrot.slane %v3906_v62, %v10186_v34  ;;  %v11381_v8 = vld [vmem:[%s12953_s5 + $0xc] ss:$16 sps:$4 sm:$0xff]   ;;  %v11388_v62 = vld [vmem:[%s12953_s5] ss:$16 sps:$4 sm:$0xff]   ;;  %v11393_v33 = vld [vmem:[%s12953_s5 + $0x8] ss:$16 sps:$4 sm:$0xff]  }
 0x4c1   :  { %13052 = vst [vmem:[#allocation28_spill] sm:$0xff] %v11280_v41  ;;  %13053 = vst [vmem:[#allocation45_spill] sm:$0xff] %v11283_v32  ;;  %4752 = vmatpush1.bf16.msra.mxu0 %v11260_v19  ;;  %4793 = vmatpush1.bf16.msra.mxu1 %v11265_v12 }
 0x4c2   :  { %4753 = vmatprep.subr.bf16.mxu0 %v11272_v3  ;;  %4794 = vmatprep.subr.bf16.mxu1 %v11277_v56 }
 0x4c5   :  { %4754 = vmatpush1.bf16.msra.mxu0 %v11292_v60  ;;  %4795 = vmatpush1.bf16.msra.mxu1 %v11297_v4 }
 0x4c6   :  { %4755 = vmatprep.subr.bf16.mxu0 %v11304_v35  ;;  %4796 = vmatprep.subr.bf16.mxu1 %v11309_v18 }
 0x4c9   :  { %4756 = vmatpush1.bf16.msra.mxu0 %v11316_v59  ;;  %4797 = vmatpush1.bf16.msra.mxu1 %v11321_v2 }
 0x4ca   :  { %4757 = vmatprep.subr.bf16.mxu0 %v11328_v23  ;;  %4798 = vmatprep.subr.bf16.mxu1 %v11333_v37 }
 0x4cd   :  { %4758 = vmatpush1.bf16.msra.mxu0 %v11340_v50  ;;  %4799 = vmatpush1.bf16.msra.mxu1 %v11345_v30 }
 0x4ce   :  { %4759 = vmatprep.subr.bf16.mxu0 %v11352_v5  ;;  %4800 = vmatprep.subr.bf16.mxu1 %v11357_v25 }
 0x4d1   :  { %4760 = vmatpush1.bf16.msra.mxu0 %v11364_v54  ;;  %4801 = vmatpush1.bf16.msra.mxu1 %v11369_v58 }
 0x4d2   :  { %4761 = vmatprep.subr.bf16.mxu0 %v11376_v38  ;;  %4802 = vmatprep.subr.bf16.mxu1 %v11381_v8 }
 0x4d5   :  { %4762 = vmatpush1.bf16.msra.mxu0 %v11388_v62  ;;  %4803 = vmatpush1.bf16.msra.mxu1 %v11393_v33 }
 0x4d6   :  { %4879 = vmatprep.subr.bf16.mxu0 %v11195_v43  ;;  %4920 = vmatprep.subr.bf16.mxu1 %v11200_v1 }
 0x4d8   :  { %v3958_v15 = vpop.f32.mrf.mxu0  ;;  %v3999_v24 = vpop.f32.mrf.mxu1  ;;  %4780 = vmatmul.mubr.bf16.vlgmr.msra.gmra.mxu0 %v13018_v46  ;;  %4821 = vmatmul.mubr.bf16.vlgmr.msra.gmra.mxu1 %v13018_v46 }
 0x4d9   :  { %4880 = vmatpush1.bf16.msra.mxu0 %v11206_v21  ;;  %4921 = vmatpush1.bf16.msra.mxu1 %v11211_v57  ;;  %v3959_v29 = vadd.f32 %v3958_v15, %v10170_v13  ;;  %v4000_v55 = vadd.f32 %v3999_v24, %v10175_v7 }
 0x4da   :  { %v3960_v32 = vpop.f32.mrf.mxu0  ;;  %v4001_v41 = vpop.f32.mrf.mxu1  ;;  %4881 = vmatprep.subr.bf16.mxu0 %v11218_v61  ;;  %4922 = vmatprep.subr.bf16.mxu1 %v11223_v63 }
 0x4db   :  { %v3961_v10 = vadd.f32 %v3960_v32, %v10178_v14  ;;  %v4002_v26 = vadd.f32 %v4001_v41, %v10181_v11  ;;  %4911 = vmatprep.mubr.bf16.mxu0 %v13018_v46  ;;  %4952 = vmatprep.mubr.bf16.mxu1 %v13018_v46 }
 0x4dc   :  { %v3962_v40 = vpop.f32.mrf.mxu0  ;;  %v4003_v53 = vpop.f32.mrf.mxu1 }
 0x4dd   :  { %v4010_v45 = vcombine.low %v3959_v29, %v3961_v10  ;;  %v4011_v15 = vcombine.low %v4000_v55, %v4002_v26  ;;  %4882 = vmatpush1.bf16.msra.mxu0 %v11230_v42  ;;  %4923 = vmatpush1.bf16.msra.mxu1 %v11235_v28 }
 0x4de   :  { %v3963_v44 = vpop.f32.mrf.mxu0  ;;  %v4004_v51 = vpop.f32.mrf.mxu1  ;;  %4883 = vmatprep.subr.bf16.mxu0 %v11243_v39  ;;  %4924 = vmatprep.subr.bf16.mxu1 %v11248_v36 }
 0x4df   :  { %v11418_v41 = vrot.slane %v4010_v45, %v10186_v34  ;;  %v11421_v32 = vrot.slane %v4011_v15, %v10186_v34 }
 0x4e1   :  { %13054 = vst [vmem:[#allocation46_spill] sm:$0xff] %v11418_v41  ;;  %13055 = vst [vmem:[#allocation47_spill] sm:$0xff] %v11421_v32  ;;  %4884 = vmatpush1.bf16.msra.mxu0 %v11260_v19  ;;  %4925 = vmatpush1.bf16.msra.mxu1 %v11265_v12 }
 0x4e2   :  { %4885 = vmatprep.subr.bf16.mxu0 %v11272_v3  ;;  %4926 = vmatprep.subr.bf16.mxu1 %v11277_v56 }
 0x4e5   :  { %4886 = vmatpush1.bf16.msra.mxu0 %v11292_v60  ;;  %4927 = vmatpush1.bf16.msra.mxu1 %v11297_v4 }
 0x4e6   :  { %4887 = vmatprep.subr.bf16.mxu0 %v11304_v35  ;;  %4928 = vmatprep.subr.bf16.mxu1 %v11309_v18 }
 0x4e9   :  { %4888 = vmatpush1.bf16.msra.mxu0 %v11316_v59  ;;  %4929 = vmatpush1.bf16.msra.mxu1 %v11321_v2 }
 0x4ea   :  { %4889 = vmatprep.subr.bf16.mxu0 %v11328_v23  ;;  %4930 = vmatprep.subr.bf16.mxu1 %v11333_v37 }
 0x4ed   :  { %4890 = vmatpush1.bf16.msra.mxu0 %v11340_v50  ;;  %4931 = vmatpush1.bf16.msra.mxu1 %v11345_v30 }
 0x4ee   :  { %4891 = vmatprep.subr.bf16.mxu0 %v11352_v5  ;;  %4932 = vmatprep.subr.bf16.mxu1 %v11357_v25 }
 0x4f1   :  { %4892 = vmatpush1.bf16.msra.mxu0 %v11364_v54  ;;  %4933 = vmatpush1.bf16.msra.mxu1 %v11369_v58 }
 0x4f2   :  { %4893 = vmatprep.subr.bf16.mxu0 %v11376_v38  ;;  %4934 = vmatprep.subr.bf16.mxu1 %v11381_v8 }
 0x4f5   :  { %4894 = vmatpush1.bf16.msra.mxu0 %v11388_v62  ;;  %4935 = vmatpush1.bf16.msra.mxu1 %v11393_v33 }
 0x4f6   :  { %5011 = vmatprep.subr.bf16.mxu0 %v11195_v43  ;;  %5052 = vmatprep.subr.bf16.mxu1 %v11200_v1 }
 0x4f8   :  { %v4063_v51 = vpop.f32.mrf.mxu0  ;;  %v4104_v44 = vpop.f32.mrf.mxu1 }
 0x4f9   :  { %v4064_v26 = vadd.f32 %v4063_v51, %v10170_v13  ;;  %v4105_v10 = vadd.f32 %v4104_v44, %v10175_v7 }
 0x4fa   :  { %v4065_v45 = vpop.f32.mrf.mxu0  ;;  %v4106_v40 = vpop.f32.mrf.mxu1 }
 0x4fb   :  { %v4066_v55 = vadd.f32 %v4065_v45, %v10178_v14  ;;  %v4107_v29 = vadd.f32 %v4106_v40, %v10181_v11 }
 0x4fc   :  { %v4067_v24 = vpop.f32.mrf.mxu0  ;;  %v4108_v15 = vpop.f32.mrf.mxu1 }
 0x4fd   :  { %v4115_v53 = vcombine.low %v4064_v26, %v4066_v55  ;;  %v4116_v32 = vcombine.low %v4105_v10, %v4107_v29 }
 0x4fe   :  { %v4068_v41 = vpop.f32.mrf.mxu0  ;;  %v4109_v49 = vpop.f32.mrf.mxu1 }
 0x4ff   :  { %v11454_v0 = vrot.slane %v4115_v53, %v10186_v34  ;;  %v11457_v17 = vrot.slane %v4116_v32, %v10186_v34 }
 0x501   :  { %13056 = vst [vmem:[#allocation48_spill] sm:$0xff] %v11454_v0  ;;  %13057 = vst [vmem:[#allocation49_spill] sm:$0xff] %v11457_v17 }
 0x518   :  { %v4168_v44 = vpop.f32.mrf.mxu0  ;;  %v4209_v48 = vpop.f32.mrf.mxu1 }
 0x519   :  { %v4169_v40 = vadd.f32 %v4168_v44, %v10170_v13  ;;  %v4210_v26 = vadd.f32 %v4209_v48, %v10175_v7 }
 0x51a   :  { %v4170_v45 = vpop.f32.mrf.mxu0  ;;  %v4211_v20 = vpop.f32.mrf.mxu1 }
 0x51b   :  { %v4171_v41 = vadd.f32 %v4170_v45, %v10178_v14  ;;  %v4212_v49 = vadd.f32 %v4211_v20, %v10181_v11 }
 0x51c   :  { %v4172_v53 = vpop.f32.mrf.mxu0  ;;  %v4213_v10 = vpop.f32.mrf.mxu1 }
 0x51d   :  { %v4220_v55 = vcombine.low %v4169_v40, %v4171_v41  ;;  %v4221_v32 = vcombine.low %v4210_v26, %v4212_v49 }
 0x51e   :  { %v4173_v29 = vpop.f32.mrf.mxu0  ;;  %v4214_v24 = vpop.f32.mrf.mxu1 }
 0x51f   :  { %v11466_v15 = vrot.slane %v4220_v55, %v10186_v34  ;;  %v11469_v51 = vrot.slane %v4221_v32, %v10186_v34 }
 0x521   :  { %13058 = vst [vmem:[#allocation50_spill] sm:$0xff] %v11466_v15  ;;  %13059 = vst [vmem:[#allocation51_spill] sm:$0xff] %v11469_v51 }
 0x538   :  { %v4273_v48 = vpop.f32.mrf.mxu0  ;;  %v4314_v17 = vpop.f32.mrf.mxu1 }
 0x539   :  { %v4274_v20 = vadd.f32 %v4273_v48, %v10170_v13  ;;  %v4315_v40 = vadd.f32 %v4314_v17, %v10175_v7 }
 0x53a   :  { %v4275_v45 = vpop.f32.mrf.mxu0  ;;  %v4316_v0 = vpop.f32.mrf.mxu1 }
 0x53b   :  { %v4276_v26 = vadd.f32 %v4275_v45, %v10178_v14  ;;  %v4317_v41 = vadd.f32 %v4316_v0, %v10181_v11 }
 0x53c   :  { %v4277_v49 = vpop.f32.mrf.mxu0  ;;  %v4318_v53 = vpop.f32.mrf.mxu1 }
 0x53d   :  { %v4325_v10 = vcombine.low %v4274_v20, %v4276_v26  ;;  %v4326_v55 = vcombine.low %v4315_v40, %v4317_v41 }
 0x53e   :  { %v4278_v32 = vpop.f32.mrf.mxu0  ;;  %v4319_v29 = vpop.f32.mrf.mxu1 }
 0x53f   :  { %v11478_v24 = vrot.slane %v4325_v10, %v10186_v34  ;;  %v11481_v44 = vrot.slane %v4326_v55, %v10186_v34 }
 0x541   :  { %13060 = vst [vmem:[#allocation52_spill] sm:$0xff] %v11478_v24  ;;  %13061 = vst [vmem:[#allocation53_spill] sm:$0xff] %v11481_v44 }
 0x558   :  { %v4378_v17 = vpop.f32.mrf.mxu0  ;;  %v4419_v51 = vpop.f32.mrf.mxu1 }
 0x559   :  { %v4379_v0 = vadd.f32 %v4378_v17, %v10170_v13  ;;  %v4420_v20 = vadd.f32 %v4419_v51, %v10175_v7 }
 0x55a   :  { %v4380_v45 = vpop.f32.mrf.mxu0  ;;  %v4421_v15 = vpop.f32.mrf.mxu1 }
 0x55b   :  { %v4381_v40 = vadd.f32 %v4380_v45, %v10178_v14  ;;  %v4422_v26 = vadd.f32 %v4421_v15, %v10181_v11 }
 0x55c   :  { %v4382_v41 = vpop.f32.mrf.mxu0  ;;  %v4423_v49 = vpop.f32.mrf.mxu1 }
 0x55d   :  { %v4430_v53 = vcombine.low %v4379_v0, %v4381_v40  ;;  %v4431_v10 = vcombine.low %v4420_v20, %v4422_v26 }
 0x55e   :  { %v4383_v55 = vpop.f32.mrf.mxu0  ;;  %v4424_v32 = vpop.f32.mrf.mxu1 }
 0x55f   :  { %v11490_v29 = vrot.slane %v4430_v53, %v10186_v34  ;;  %v11493_v48 = vrot.slane %v4431_v10, %v10186_v34 }
 0x578   :  { %v4483_v51 = vpop.f32.mrf.mxu0  ;;  %v4524_v44 = vpop.f32.mrf.mxu1 }
 0x579   :  { %v4484_v15 = vadd.f32 %v4483_v51, %v10170_v13  ;;  %v4525_v0 = vadd.f32 %v4524_v44, %v10175_v7 }
 0x57a   :  { %v4485_v45 = vpop.f32.mrf.mxu0  ;;  %v4526_v24 = vpop.f32.mrf.mxu1 }
 0x57b   :  { %v4486_v20 = vadd.f32 %v4485_v45, %v10178_v14  ;;  %v4527_v40 = vadd.f32 %v4526_v24, %v10181_v11 }
 0x57c   :  { %v4487_v26 = vpop.f32.mrf.mxu0  ;;  %v4528_v41 = vpop.f32.mrf.mxu1 }
 0x57d   :  { %v4535_v49 = vcombine.low %v4484_v15, %v4486_v20  ;;  %v4536_v53 = vcombine.low %v4525_v0, %v4527_v40 }
 0x57e   :  { %v4488_v10 = vpop.f32.mrf.mxu0  ;;  %v4529_v55 = vpop.f32.mrf.mxu1 }
 0x57f   :  { %v11502_v32 = vrot.slane %v4535_v49, %v10186_v34  ;;  %v11505_v17 = vrot.slane %v4536_v53, %v10186_v34  ;;  %v13062_v49 = vcombine.low %v10201_v6, %v10204_v27 }
 0x598   :  { %v4781_v7 = vpop.f32.mrf.mxu0  ;;  %v4822_v44 = vpop.f32.mrf.mxu1 }
 0x59a   :  { %v4783_v14 = vpop.f32.mrf.mxu0  ;;  %v4824_v51 = vpop.f32.mrf.mxu1 }
 0x59b   :  { %v4833_v11 = vcombine.low %v4781_v7, %v4783_v14  ;;  %v4834_v24 = vcombine.low %v4822_v44, %v4824_v51 }
 0x59c   :  { %v4785_v45 = vpop.f32.mrf.mxu0  ;;  %v4826_v15 = vpop.f32.mrf.mxu1 }
 0x59d   :  { %v4841_v0 = vrot.slane %v4833_v11, %v10186_v34  ;;  %v4848_v20 = vrot.slane %v4834_v24, %v10186_v34 }
 0x59e   :  { %v4786_v40 = vpop.f32.mrf.mxu0  ;;  %v4827_v26 = vpop.f32.mrf.mxu1 }
 0x59f   :  { %v4849_v41 = vcombine.low %v4841_v0, %v4848_v20 }
 0x5a1   :  { %v4851_v53 = vadd.f32 %v4849_v41, %v13062_v49 }
 0x5a3   :  { %v4852_v10 = vmul.f32 0.5, %v4851_v53  ;;  %v4857_v55 = vrot.slane %v4851_v53, 2  ;;  %v4863_v7 = vrot.slane %v4851_v53, 4  ;;  %v4866_v44 = vrot.slane %v4851_v53, 6 }
 0x5a5   :  { %8797 = vtanh.f32 %v4852_v10  ;;  %v4859_v13 = vmul.f32 0.5, %v4857_v55  ;;  %v4868_v14 = vmul.f32 0.5, %v4866_v44 }
 0x5a7   :  { %8799 = vtanh.f32 %v4859_v13 }
 0x5a8   :  { %8801 = vtanh.f32 %v4863_v7 }
 0x5a9   :  { %8803 = vtanh.f32 %v4868_v14 }
 0x5b2   :  { %v8798_v51 = vpop.eup %8797 }
 0x5b3   :  { %v4854_v11 = vadd.f32 1.0, %v8798_v51 }
 0x5b4   :  { %v8800_v45 = vpop.eup %8799 }
 0x5b5   :  { %v4855_v24 = vmul.f32 0.5, %v4854_v11  ;;  %v4861_v15 = vadd.f32 1.0, %v8800_v45  ;;  %v8802_v20 = vpop.eup %8801 }
 0x5b6   :  { %v8804_v26 = vpop.eup %8803 }
 0x5b7   :  { %v4862_v0 = vmul.f32 0.5, %v4861_v15  ;;  %v4873_v6 = vmul.f32 %v8802_v20, %v4855_v24  ;;  %v4870_v13 = vadd.f32 1.0, %v8804_v26  ;;  %v13063_v26 = vcombine.low %v10251_v47, %v10254_v16 }
 0x5b9   :  { %v4872_v40 = vmul.f32 0.0, %v4862_v0  ;;  %v4871_v41 = vmul.f32 0.5, %v4870_v13 }
 0x5bb   :  { %v11514_v27 = vadd.f32 %v4873_v6, %v4872_v40 }
 0x5bd   :  { %8805 = vtanh.f32 %v11514_v27 }
 0x5ca   :  { %v8806_v49 = vpop.eup %8805 }
 0x5cb   :  { %v4876_v53 = vmul.f32 %v8806_v49, %v4871_v41 }
 0x5cd   :  { %v4878_v10 = vpack.c.bf16 %v4876_v53, %v4876_v53 }
 0x5cf   :  { %4912 = vmatmul.mubr.bf16.vlgmr.msra.gmra.mxu0 %v4878_v10  ;;  %4953 = vmatmul.mubr.bf16.vlgmr.msra.gmra.mxu1 %v4878_v10 }
 0x5d0   :  { %5012 = vmatpush1.bf16.msra.mxu0 %v11206_v21  ;;  %5053 = vmatpush1.bf16.msra.mxu1 %v11211_v57 }
 0x5d1   :  { %5013 = vmatprep.subr.bf16.mxu0 %v11218_v61  ;;  %5054 = vmatprep.subr.bf16.mxu1 %v11223_v63 }
 0x5d2   :  { %5043 = vmatprep.mubr.bf16.mxu0 %v13018_v46  ;;  %5084 = vmatprep.mubr.bf16.mxu1 %v13018_v46 }
 0x5d4   :  { %5014 = vmatpush1.bf16.msra.mxu0 %v11230_v42  ;;  %5055 = vmatpush1.bf16.msra.mxu1 %v11235_v28 }
 0x5d5   :  { %5015 = vmatprep.subr.bf16.mxu0 %v11243_v39  ;;  %5056 = vmatprep.subr.bf16.mxu1 %v11248_v36 }
 0x5d8   :  { %5016 = vmatpush1.bf16.msra.mxu0 %v11260_v19  ;;  %5057 = vmatpush1.bf16.msra.mxu1 %v11265_v12 }
 0x5d9   :  { %5017 = vmatprep.subr.bf16.mxu0 %v11272_v3  ;;  %5058 = vmatprep.subr.bf16.mxu1 %v11277_v56 }
 0x5dc   :  { %5018 = vmatpush1.bf16.msra.mxu0 %v11292_v60  ;;  %5059 = vmatpush1.bf16.msra.mxu1 %v11297_v4 }
 0x5dd   :  { %5019 = vmatprep.subr.bf16.mxu0 %v11304_v35  ;;  %5060 = vmatprep.subr.bf16.mxu1 %v11309_v18 }
 0x5e0   :  { %5020 = vmatpush1.bf16.msra.mxu0 %v11316_v59  ;;  %5061 = vmatpush1.bf16.msra.mxu1 %v11321_v2 }
 0x5e1   :  { %5021 = vmatprep.subr.bf16.mxu0 %v11328_v23  ;;  %5062 = vmatprep.subr.bf16.mxu1 %v11333_v37 }
 0x5e4   :  { %5022 = vmatpush1.bf16.msra.mxu0 %v11340_v50  ;;  %5063 = vmatpush1.bf16.msra.mxu1 %v11345_v30 }
 0x5e5   :  { %5023 = vmatprep.subr.bf16.mxu0 %v11352_v5  ;;  %5064 = vmatprep.subr.bf16.mxu1 %v11357_v25 }
 0x5e8   :  { %5024 = vmatpush1.bf16.msra.mxu0 %v11364_v54  ;;  %5065 = vmatpush1.bf16.msra.mxu1 %v11369_v58 }
 0x5e9   :  { %5025 = vmatprep.subr.bf16.mxu0 %v11376_v38  ;;  %5066 = vmatprep.subr.bf16.mxu1 %v11381_v8 }
 0x5ec   :  { %5026 = vmatpush1.bf16.msra.mxu0 %v11388_v62  ;;  %5067 = vmatpush1.bf16.msra.mxu1 %v11393_v33 }
 0x5ed   :  { %5143 = vmatprep.subr.bf16.mxu0 %v11195_v43  ;;  %5184 = vmatprep.subr.bf16.mxu1 %v11200_v1 }
 0x68f   :  { %v4913_v55 = vpop.f32.mrf.mxu0  ;;  %v4954_v7 = vpop.f32.mrf.mxu1 }
 0x691   :  { %v4915_v44 = vpop.f32.mrf.mxu0  ;;  %v4956_v14 = vpop.f32.mrf.mxu1 }
 0x692   :  { %v4965_v51 = vcombine.low %v4913_v55, %v4915_v44  ;;  %v4966_v11 = vcombine.low %v4954_v7, %v4956_v14 }
 0x693   :  { %v4917_v45 = vpop.f32.mrf.mxu0  ;;  %v4958_v24 = vpop.f32.mrf.mxu1 }
 0x694   :  { %v4973_v15 = vrot.slane %v4965_v51, %v10186_v34  ;;  %v4980_v0 = vrot.slane %v4966_v11, %v10186_v34 }
 0x695   :  { %v4918_v20 = vpop.f32.mrf.mxu0  ;;  %v4959_v40 = vpop.f32.mrf.mxu1 }
 0x696   :  { %v4981_v6 = vcombine.low %v4973_v15, %v4980_v0 }
 0x698   :  { %v4983_v13 = vadd.f32 %v4981_v6, %v13063_v26 }
 0x69a   :  { %v4984_v41 = vmul.f32 0.5, %v4983_v13  ;;  %v4989_v49 = vrot.slane %v4983_v13, 2  ;;  %v4995_v10 = vrot.slane %v4983_v13, 4  ;;  %v4998_v55 = vrot.slane %v4983_v13, 6 }
 0x69c   :  { %8807 = vtanh.f32 %v4984_v41  ;;  %v4991_v53 = vmul.f32 0.5, %v4989_v49  ;;  %v5000_v7 = vmul.f32 0.5, %v4998_v55 }
 0x69e   :  { %8809 = vtanh.f32 %v4991_v53 }
 0x69f   :  { %8811 = vtanh.f32 %v4995_v10 }
 0x6a0   :  { %8813 = vtanh.f32 %v5000_v7 }
 0x6a9   :  { %v8808_v44 = vpop.eup %8807 }
 0x6aa   :  { %v4986_v14 = vadd.f32 1.0, %v8808_v44 }
 0x6ab   :  { %v8810_v51 = vpop.eup %8809 }
 0x6ac   :  { %v4987_v11 = vmul.f32 0.5, %v4986_v14  ;;  %v4993_v45 = vadd.f32 1.0, %v8810_v51  ;;  %v8812_v15 = vpop.eup %8811 }
 0x6ad   :  { %v8814_v20 = vpop.eup %8813 }
 0x6ae   :  { %v4994_v24 = vmul.f32 0.5, %v4993_v45  ;;  %v5005_v16 = vmul.f32 %v8812_v15, %v4987_v11  ;;  %v5002_v40 = vadd.f32 1.0, %v8814_v20 }
 0x6b0   :  { %v5004_v47 = vmul.f32 %v4994_v24, %v11514_v27  ;;  %v5003_v6 = vmul.f32 0.5, %v5002_v40 }
 0x6b2   :  { %v11557_v0 = vadd.f32 %v5005_v16, %v5004_v47  ;;  %v13064_v47 = vcombine.low %v10325_v9, %v10328_v22 }
 0x6b4   :  { %8815 = vtanh.f32 %v11557_v0 }
 0x6c1   :  { %v8816_v26 = vpop.eup %8815 }
 0x6c2   :  { %v5008_v13 = vmul.f32 %v8816_v26, %v5003_v6 }
 0x6c4   :  { %v5010_v41 = vpack.c.bf16 %v5008_v13, %v5008_v13 }
 0x6c6   :  { %5044 = vmatmul.mubr.bf16.vlgmr.msra.gmra.mxu0 %v5010_v41  ;;  %5085 = vmatmul.mubr.bf16.vlgmr.msra.gmra.mxu1 %v5010_v41 }
 0x6c7   :  { %5144 = vmatpush1.bf16.msra.mxu0 %v11206_v21  ;;  %5185 = vmatpush1.bf16.msra.mxu1 %v11211_v57 }
 0x6c8   :  { %5145 = vmatprep.subr.bf16.mxu0 %v11218_v61  ;;  %5186 = vmatprep.subr.bf16.mxu1 %v11223_v63 }
 0x6c9   :  { %5175 = vmatprep.mubr.bf16.mxu0 %v13018_v46  ;;  %5216 = vmatprep.mubr.bf16.mxu1 %v13018_v46 }
 0x6cb   :  { %5146 = vmatpush1.bf16.msra.mxu0 %v11230_v42  ;;  %5187 = vmatpush1.bf16.msra.mxu1 %v11235_v28 }
 0x6cc   :  { %5147 = vmatprep.subr.bf16.mxu0 %v11243_v39  ;;  %5188 = vmatprep.subr.bf16.mxu1 %v11248_v36 }
 0x6cf   :  { %5148 = vmatpush1.bf16.msra.mxu0 %v11260_v19  ;;  %5189 = vmatpush1.bf16.msra.mxu1 %v11265_v12 }
 0x6d0   :  { %5149 = vmatprep.subr.bf16.mxu0 %v11272_v3  ;;  %5190 = vmatprep.subr.bf16.mxu1 %v11277_v56 }
 0x6d3   :  { %5150 = vmatpush1.bf16.msra.mxu0 %v11292_v60  ;;  %5191 = vmatpush1.bf16.msra.mxu1 %v11297_v4 }
 0x6d4   :  { %5151 = vmatprep.subr.bf16.mxu0 %v11304_v35  ;;  %5192 = vmatprep.subr.bf16.mxu1 %v11309_v18 }
 0x6d7   :  { %5152 = vmatpush1.bf16.msra.mxu0 %v11316_v59  ;;  %5193 = vmatpush1.bf16.msra.mxu1 %v11321_v2 }
 0x6d8   :  { %5153 = vmatprep.subr.bf16.mxu0 %v11328_v23  ;;  %5194 = vmatprep.subr.bf16.mxu1 %v11333_v37 }
 0x6db   :  { %5154 = vmatpush1.bf16.msra.mxu0 %v11340_v50  ;;  %5195 = vmatpush1.bf16.msra.mxu1 %v11345_v30 }
 0x6dc   :  { %5155 = vmatprep.subr.bf16.mxu0 %v11352_v5  ;;  %5196 = vmatprep.subr.bf16.mxu1 %v11357_v25 }
 0x6df   :  { %5156 = vmatpush1.bf16.msra.mxu0 %v11364_v54  ;;  %5197 = vmatpush1.bf16.msra.mxu1 %v11369_v58 }
 0x6e0   :  { %5157 = vmatprep.subr.bf16.mxu0 %v11376_v38  ;;  %5198 = vmatprep.subr.bf16.mxu1 %v11381_v8 }
 0x6e3   :  { %5158 = vmatpush1.bf16.msra.mxu0 %v11388_v62  ;;  %5199 = vmatpush1.bf16.msra.mxu1 %v11393_v33 }
 0x6e4   :  { %5275 = vmatprep.subr.bf16.mxu0 %v11195_v43  ;;  %5316 = vmatprep.subr.bf16.mxu1 %v11200_v1 }
 0x786   :  { %v5045_v27 = vpop.f32.mrf.mxu0  ;;  %v5086_v49 = vpop.f32.mrf.mxu1 }
 0x788   :  { %v5047_v53 = vpop.f32.mrf.mxu0  ;;  %v5088_v10 = vpop.f32.mrf.mxu1 }
 0x789   :  { %v5097_v55 = vcombine.low %v5045_v27, %v5047_v53  ;;  %v5098_v7 = vcombine.low %v5086_v49, %v5088_v10 }
 0x78a   :  { %v5049_v44 = vpop.f32.mrf.mxu0  ;;  %v5090_v14 = vpop.f32.mrf.mxu1 }
 0x78b   :  { %v5105_v51 = vrot.slane %v5097_v55, %v10186_v34  ;;  %v5112_v11 = vrot.slane %v5098_v7, %v10186_v34 }
 0x78c   :  { %v5050_v45 = vpop.f32.mrf.mxu0  ;;  %v5091_v24 = vpop.f32.mrf.mxu1 }
 0x78d   :  { %v5113_v15 = vcombine.low %v5105_v51, %v5112_v11 }
 0x78f   :  { %v5115_v16 = vadd.f32 %v5113_v15, %v13064_v47 }
 0x791   :  { %v5116_v20 = vmul.f32 0.5, %v5115_v16  ;;  %v5121_v40 = vrot.slane %v5115_v16, 2  ;;  %v5127_v26 = vrot.slane %v5115_v16, 4  ;;  %v5130_v13 = vrot.slane %v5115_v16, 6 }
 0x793   :  { %8817 = vtanh.f32 %v5116_v20  ;;  %v5123_v6 = vmul.f32 0.5, %v5121_v40  ;;  %v5132_v41 = vmul.f32 0.5, %v5130_v13 }
 0x795   :  { %8819 = vtanh.f32 %v5123_v6 }
 0x796   :  { %8821 = vtanh.f32 %v5127_v26 }
 0x797   :  { %8823 = vtanh.f32 %v5132_v41 }
 0x7a0   :  { %v8818_v27 = vpop.eup %8817 }
 0x7a1   :  { %v5118_v49 = vadd.f32 1.0, %v8818_v27 }
 0x7a2   :  { %v8820_v53 = vpop.eup %8819 }
 0x7a3   :  { %v5119_v10 = vmul.f32 0.5, %v5118_v49  ;;  %v5125_v55 = vadd.f32 1.0, %v8820_v53  ;;  %v8822_v44 = vpop.eup %8821 }
 0x7a4   :  { %v8824_v51 = vpop.eup %8823 }
 0x7a5   :  { %v5126_v7 = vmul.f32 0.5, %v5125_v55  ;;  %v5137_v22 = vmul.f32 %v8822_v44, %v5119_v10  ;;  %v5134_v11 = vadd.f32 1.0, %v8824_v51 }
 0x7a7   :  { %v5136_v9 = vmul.f32 %v5126_v7, %v11557_v0  ;;  %v5135_v45 = vmul.f32 0.5, %v5134_v11  ;;  %v13065_v7 = vld [vmem:[#allocation29_spill] sm:$0xff] }
 0x7a9   :  { %v11600_v14 = vadd.f32 %v5137_v22, %v5136_v9 }
 0x7ab   :  { %8825 = vtanh.f32 %v11600_v14 }
 0x7b8   :  { %v8826_v24 = vpop.eup %8825 }
 0x7b9   :  { %v5140_v15 = vmul.f32 %v8826_v24, %v5135_v45 }
 0x7bb   :  { %v5142_v47 = vpack.c.bf16 %v5140_v15, %v5140_v15 }
 0x7bd   :  { %5176 = vmatmul.mubr.bf16.vlgmr.msra.gmra.mxu0 %v5142_v47  ;;  %5217 = vmatmul.mubr.bf16.vlgmr.msra.gmra.mxu1 %v5142_v47 }
 0x7be   :  { %5276 = vmatpush1.bf16.msra.mxu0 %v11206_v21  ;;  %5317 = vmatpush1.bf16.msra.mxu1 %v11211_v57 }
 0x7bf   :  { %5277 = vmatprep.subr.bf16.mxu0 %v11218_v61  ;;  %5318 = vmatprep.subr.bf16.mxu1 %v11223_v63 }
 0x7c0   :  { %5307 = vmatprep.mubr.bf16.mxu0 %v13018_v46  ;;  %5348 = vmatprep.mubr.bf16.mxu1 %v13018_v46 }
 0x7c2   :  { %5278 = vmatpush1.bf16.msra.mxu0 %v11230_v42  ;;  %5319 = vmatpush1.bf16.msra.mxu1 %v11235_v28 }
 0x7c3   :  { %5279 = vmatprep.subr.bf16.mxu0 %v11243_v39  ;;  %5320 = vmatprep.subr.bf16.mxu1 %v11248_v36 }
 0x7c6   :  { %5280 = vmatpush1.bf16.msra.mxu0 %v11260_v19  ;;  %5321 = vmatpush1.bf16.msra.mxu1 %v11265_v12 }
 0x7c7   :  { %5281 = vmatprep.subr.bf16.mxu0 %v11272_v3  ;;  %5322 = vmatprep.subr.bf16.mxu1 %v11277_v56 }
 0x7ca   :  { %5282 = vmatpush1.bf16.msra.mxu0 %v11292_v60  ;;  %5323 = vmatpush1.bf16.msra.mxu1 %v11297_v4 }
 0x7cb   :  { %5283 = vmatprep.subr.bf16.mxu0 %v11304_v35  ;;  %5324 = vmatprep.subr.bf16.mxu1 %v11309_v18 }
 0x7ce   :  { %5284 = vmatpush1.bf16.msra.mxu0 %v11316_v59  ;;  %5325 = vmatpush1.bf16.msra.mxu1 %v11321_v2 }
 0x7cf   :  { %5285 = vmatprep.subr.bf16.mxu0 %v11328_v23  ;;  %5326 = vmatprep.subr.bf16.mxu1 %v11333_v37 }
 0x7d2   :  { %5286 = vmatpush1.bf16.msra.mxu0 %v11340_v50  ;;  %5327 = vmatpush1.bf16.msra.mxu1 %v11345_v30 }
 0x7d3   :  { %5287 = vmatprep.subr.bf16.mxu0 %v11352_v5  ;;  %5328 = vmatprep.subr.bf16.mxu1 %v11357_v25 }
 0x7d6   :  { %5288 = vmatpush1.bf16.msra.mxu0 %v11364_v54  ;;  %5329 = vmatpush1.bf16.msra.mxu1 %v11369_v58 }
 0x7d7   :  { %5289 = vmatprep.subr.bf16.mxu0 %v11376_v38  ;;  %5330 = vmatprep.subr.bf16.mxu1 %v11381_v8 }
 0x7da   :  { %5290 = vmatpush1.bf16.msra.mxu0 %v11388_v62  ;;  %5331 = vmatpush1.bf16.msra.mxu1 %v11393_v33 }
 0x7db   :  { %5407 = vmatprep.subr.bf16.mxu0 %v11195_v43  ;;  %5448 = vmatprep.subr.bf16.mxu1 %v11200_v1  ;;  %v13066_v43 = vcombine.low %v10454_v31, %v13065_v7 }
 0x87d   :  { %v5177_v0 = vpop.f32.mrf.mxu0  ;;  %v5218_v16 = vpop.f32.mrf.mxu1 }
 0x87f   :  { %v5179_v20 = vpop.f32.mrf.mxu0  ;;  %v5220_v40 = vpop.f32.mrf.mxu1 }
 0x880   :  { %v5229_v6 = vcombine.low %v5177_v0, %v5179_v20  ;;  %v5230_v26 = vcombine.low %v5218_v16, %v5220_v40 }
 0x881   :  { %v5181_v13 = vpop.f32.mrf.mxu0  ;;  %v5222_v41 = vpop.f32.mrf.mxu1 }
 0x882   :  { %v5237_v27 = vrot.slane %v5229_v6, %v10186_v34  ;;  %v5244_v49 = vrot.slane %v5230_v26, %v10186_v34 }
 0x883   :  { %v5182_v53 = vpop.f32.mrf.mxu0  ;;  %v5223_v10 = vpop.f32.mrf.mxu1 }
 0x884   :  { %v5245_v55 = vcombine.low %v5237_v27, %v5244_v49 }
 0x886   :  { %v5247_v44 = vadd.f32 %v5245_v55, %v13066_v43 }
 0x888   :  { %v5248_v1 = vmul.f32 0.5, %v5247_v44  ;;  %v5253_v9 = vrot.slane %v5247_v44, 2  ;;  %v5259_v51 = vrot.slane %v5247_v44, 4  ;;  %v5262_v11 = vrot.slane %v5247_v44, 6 }
 0x88a   :  { %8827 = vtanh.f32 %v5248_v1  ;;  %v5255_v22 = vmul.f32 0.5, %v5253_v9  ;;  %v5264_v45 = vmul.f32 0.5, %v5262_v11  ;;  %v11702_v11 = vld [vmem:[%s12953_s5 + $0xe0] ss:$16 sps:$4 sm:$0xff]  }
 0x88c   :  { %8829 = vtanh.f32 %v5255_v22 }
 0x88d   :  { %8831 = vtanh.f32 %v5259_v51 }
 0x88e   :  { %8833 = vtanh.f32 %v5264_v45  ;;  %v11708_v45 = vld [vmem:[%s12953_s5 + $0xe8] ss:$16 sps:$4 sm:$0xff]  }
 0x897   :  { %v8828_v24 = vpop.eup %8827 }
 0x898   :  { %v5250_v15 = vadd.f32 1.0, %v8828_v24  ;;  %v11714_v24 = vld [vmem:[%s12953_s5 + $0xc4] ss:$16 sps:$4 sm:$0xff]  }
 0x899   :  { %v8830_v47 = vpop.eup %8829 }
 0x89a   :  { %v5251_v0 = vmul.f32 0.5, %v5250_v15  ;;  %v5257_v16 = vadd.f32 1.0, %v8830_v47  ;;  %v8832_v40 = vpop.eup %8831  ;;  %v11720_v15 = vld [vmem:[%s12953_s5 + $0xcc] ss:$16 sps:$4 sm:$0xff]   ;;  %v11728_v47 = vld [vmem:[%s12953_s5 + $0xc0] ss:$16 sps:$4 sm:$0xff]  }
 0x89b   :  { %v8834_v13 = vpop.eup %8833 }
 0x89c   :  { %v5258_v20 = vmul.f32 0.5, %v5257_v16  ;;  %v5269_v6 = vmul.f32 %v8832_v40, %v5251_v0  ;;  %v5266_v41 = vadd.f32 1.0, %v8834_v13  ;;  %v11734_v0 = vld [vmem:[%s12953_s5 + $0xc8] ss:$16 sps:$4 sm:$0xff]   ;;  %v11740_v16 = vld [vmem:[%s12953_s5 + $0xa4] ss:$16 sps:$4 sm:$0xff]  }
 0x89d   :  { %v11752_v40 = vld [vmem:[%s12953_s5 + $0xa0] ss:$16 sps:$4 sm:$0xff]  }
 0x89e   :  { %v5268_v31 = vmul.f32 %v5258_v20, %v11600_v14  ;;  %v5267_v27 = vmul.f32 0.5, %v5266_v41  ;;  %v11746_v20 = vld [vmem:[%s12953_s5 + $0xac] ss:$16 sps:$4 sm:$0xff]   ;;  %v11776_v13 = vld [vmem:[%s12953_s5 + $0x80] ss:$16 sps:$4 sm:$0xff]  }
 0x89f   :  { %v11782_v41 = vld [vmem:[%s12953_s5 + $0x88] ss:$16 sps:$4 sm:$0xff]  }
 0x8a0   :  { %v11643_v26 = vadd.f32 %v5269_v6, %v5268_v31  ;;  %v11758_v31 = vld [vmem:[%s12953_s5 + $0xa8] ss:$16 sps:$4 sm:$0xff]   ;;  %v11764_v6 = vld [vmem:[%s12953_s5 + $0x84] ss:$16 sps:$4 sm:$0xff]  }
 0x8a2   :  { %8835 = vtanh.f32 %v11643_v26 }
 0x8af   :  { %v8836_v49 = vpop.eup %8835 }
 0x8b0   :  { %v5272_v53 = vmul.f32 %v8836_v49, %v5267_v27  ;;  %v11788_v27 = vld [vmem:[%s12953_s5 + $0x64] ss:$16 sps:$4 sm:$0xff]   ;;  %v11794_v49 = vld [vmem:[%s12953_s5 + $0x6c] ss:$16 sps:$4 sm:$0xff]  }
 0x8b2   :  { %v5274_v10 = vpack.c.bf16 %v5272_v53, %v5272_v53  ;;  %v11800_v53 = vld [vmem:[%s12953_s5 + $0x60] ss:$16 sps:$4 sm:$0xff]  }
 0x8b4   :  { %5308 = vmatmul.mubr.bf16.vlgmr.msra.gmra.mxu0 %v5274_v10  ;;  %5349 = vmatmul.mubr.bf16.vlgmr.msra.gmra.mxu1 %v5274_v10  ;;  %v11806_v10 = vld [vmem:[%s12953_s5 + $0x68] ss:$16 sps:$4 sm:$0xff]  }
 0x8b5   :  { %5408 = vmatpush1.bf16.msra.mxu0 %v11206_v21  ;;  %5449 = vmatpush1.bf16.msra.mxu1 %v11211_v57  ;;  %v11681_v21 = vld [vmem:[%s12953_s5 + $0xe4] ss:$16 sps:$4 sm:$0xff]   ;;  %v11687_v57 = vld [vmem:[%s12953_s5 + $0xec] ss:$16 sps:$4 sm:$0xff]  }
 0x8b6   :  { %5409 = vmatprep.subr.bf16.mxu0 %v11218_v61  ;;  %5450 = vmatprep.subr.bf16.mxu1 %v11223_v63 }
 0x8b7   :  { %5439 = vmatprep.mubr.bf16.mxu0 %v13018_v46  ;;  %5480 = vmatprep.mubr.bf16.mxu1 %v13018_v46 }
 0x8b9   :  { %5410 = vmatpush1.bf16.msra.mxu0 %v11230_v42  ;;  %5451 = vmatpush1.bf16.msra.mxu1 %v11235_v28 }
 0x8ba   :  { %5411 = vmatprep.subr.bf16.mxu0 %v11243_v39  ;;  %5452 = vmatprep.subr.bf16.mxu1 %v11248_v36 }
 0x8bd   :  { %5412 = vmatpush1.bf16.msra.mxu0 %v11260_v19  ;;  %5453 = vmatpush1.bf16.msra.mxu1 %v11265_v12 }
 0x8be   :  { %5413 = vmatprep.subr.bf16.mxu0 %v11272_v3  ;;  %5454 = vmatprep.subr.bf16.mxu1 %v11277_v56 }
 0x8c1   :  { %5414 = vmatpush1.bf16.msra.mxu0 %v11292_v60  ;;  %5455 = vmatpush1.bf16.msra.mxu1 %v11297_v4 }
 0x8c2   :  { %5415 = vmatprep.subr.bf16.mxu0 %v11304_v35  ;;  %5456 = vmatprep.subr.bf16.mxu1 %v11309_v18  ;;  %v13067_v18 = vld [vmem:[#allocation30_spill] sm:$0xff] }
 0x8c5   :  { %5416 = vmatpush1.bf16.msra.mxu0 %v11316_v59  ;;  %5457 = vmatpush1.bf16.msra.mxu1 %v11321_v2  ;;  %v13068_v59 = vcombine.low %v10556_v52, %v13067_v18 }
 0x8c6   :  { %5417 = vmatprep.subr.bf16.mxu0 %v11328_v23  ;;  %5458 = vmatprep.subr.bf16.mxu1 %v11333_v37 }
 0x8c9   :  { %5418 = vmatpush1.bf16.msra.mxu0 %v11340_v50  ;;  %5459 = vmatpush1.bf16.msra.mxu1 %v11345_v30 }
 0x8ca   :  { %5419 = vmatprep.subr.bf16.mxu0 %v11352_v5  ;;  %5460 = vmatprep.subr.bf16.mxu1 %v11357_v25 }
 0x8cd   :  { %5420 = vmatpush1.bf16.msra.mxu0 %v11364_v54  ;;  %5461 = vmatpush1.bf16.msra.mxu1 %v11369_v58 }
 0x8ce   :  { %5421 = vmatprep.subr.bf16.mxu0 %v11376_v38  ;;  %5462 = vmatprep.subr.bf16.mxu1 %v11381_v8 }
 0x8d1   :  { %5422 = vmatpush1.bf16.msra.mxu0 %v11388_v62  ;;  %5463 = vmatpush1.bf16.msra.mxu1 %v11393_v33 }
 0x8d2   :  { %5539 = vmatprep.subr.bf16.mxu0 %v11681_v21  ;;  %5580 = vmatprep.subr.bf16.mxu1 %v11687_v57 }
 0x974   :  { %v5309_v61 = vpop.f32.mrf.mxu0  ;;  %v5350_v63 = vpop.f32.mrf.mxu1 }
 0x976   :  { %v5311_v42 = vpop.f32.mrf.mxu0  ;;  %v5352_v28 = vpop.f32.mrf.mxu1 }
 0x977   :  { %v5361_v39 = vcombine.low %v5309_v61, %v5311_v42  ;;  %v5362_v36 = vcombine.low %v5350_v63, %v5352_v28  ;;  %v11812_v61 = vld [vmem:[%s12953_s5 + $0x44] ss:$16 sps:$4 sm:$0xff]   ;;  %v11818_v63 = vld [vmem:[%s12953_s5 + $0x4c] ss:$16 sps:$4 sm:$0xff]   ;;  %v11824_v42 = vld [vmem:[%s12953_s5 + $0x40] ss:$16 sps:$4 sm:$0xff]  }
 0x978   :  { %v5313_v19 = vpop.f32.mrf.mxu0  ;;  %v5354_v12 = vpop.f32.mrf.mxu1  ;;  %v11830_v28 = vld [vmem:[%s12953_s5 + $0x48] ss:$16 sps:$4 sm:$0xff]  }
 0x979   :  { %v5369_v3 = vrot.slane %v5361_v39, %v10186_v34  ;;  %v5376_v56 = vrot.slane %v5362_v36, %v10186_v34  ;;  %v11836_v39 = vld [vmem:[%s12953_s5 + $0x24] ss:$16 sps:$4 sm:$0xff]   ;;  %v11842_v36 = vld [vmem:[%s12953_s5 + $0x2c] ss:$16 sps:$4 sm:$0xff]   ;;  %v11848_v19 = vld [vmem:[%s12953_s5 + $0x20] ss:$16 sps:$4 sm:$0xff]  }
 0x97a   :  { %v5314_v60 = vpop.f32.mrf.mxu0  ;;  %v5355_v4 = vpop.f32.mrf.mxu1  ;;  %v11854_v12 = vld [vmem:[%s12953_s5 + $0x28] ss:$16 sps:$4 sm:$0xff]  }
 0x97b   :  { %v5377_v35 = vcombine.low %v5369_v3, %v5376_v56  ;;  %v11860_v3 = vld [vmem:[%s12953_s5 + $0x4] ss:$16 sps:$4 sm:$0xff]   ;;  %v11866_v56 = vld [vmem:[%s12953_s5 + $0xc] ss:$16 sps:$4 sm:$0xff]   ;;  %v11872_v60 = vld [vmem:[%s12953_s5] ss:$16 sps:$4 sm:$0xff]  }
 0x97c   :  { %v11878_v4 = vld [vmem:[%s12953_s5 + $0x8] ss:$16 sps:$4 sm:$0xff]  }
 0x97d   :  { %v5379_v2 = vadd.f32 %v5377_v35, %v13068_v59 }
 0x97f   :  { %v5380_v23 = vmul.f32 0.5, %v5379_v2  ;;  %v5385_v37 = vrot.slane %v5379_v2, 2  ;;  %v5391_v30 = vrot.slane %v5379_v2, 4  ;;  %v5394_v5 = vrot.slane %v5379_v2, 6 }
 0x981   :  { %8837 = vtanh.f32 %v5380_v23  ;;  %v5387_v50 = vmul.f32 0.5, %v5385_v37  ;;  %v5396_v25 = vmul.f32 0.5, %v5394_v5 }
 0x983   :  { %8839 = vtanh.f32 %v5387_v50 }
 0x984   :  { %8841 = vtanh.f32 %v5391_v30 }
 0x985   :  { %8843 = vtanh.f32 %v5396_v25 }
 0x98e   :  { %v8838_v54 = vpop.eup %8837 }
 0x98f   :  { %v5382_v58 = vadd.f32 1.0, %v8838_v54 }
 0x990   :  { %v8840_v38 = vpop.eup %8839 }
 0x991   :  { %v5383_v8 = vmul.f32 0.5, %v5382_v58  ;;  %v5389_v62 = vadd.f32 1.0, %v8840_v38  ;;  %v8842_v14 = vpop.eup %8841 }
 0x992   :  { %v8844_v43 = vpop.eup %8843 }
 0x993   :  { %v5390_v33 = vmul.f32 0.5, %v5389_v62  ;;  %v5401_v55 = vmul.f32 %v8842_v14, %v5383_v8  ;;  %v5398_v44 = vadd.f32 1.0, %v8844_v43  ;;  %v13069_v8 = vld [vmem:[#allocation31_spill] sm:$0xff]  ;;  %v13070_v62 = vld [vmem:[#allocation32_spill] sm:$0xff] }
 0x995   :  { %v5400_v52 = vmul.f32 %v5390_v33, %v11643_v26  ;;  %v5399_v1 = vmul.f32 0.5, %v5398_v44  ;;  %v11770_v26 = vld [vmem:[%s12953_s5 + $0x8c] ss:$16 sps:$4 sm:$0xff]   ;;  %v13071_v33 = vcombine.low %v13069_v8, %v13070_v62 }
 0x997   :  { %v11696_v7 = vadd.f32 %v5401_v55, %v5400_v52 }
 0x999   :  { %8845 = vtanh.f32 %v11696_v7 }
 0x9a6   :  { %v8846_v9 = vpop.eup %8845 }
 0x9a7   :  { %v5404_v22 = vmul.f32 %v8846_v9, %v5399_v1 }
 0x9a9   :  { %v5406_v51 = vpack.c.bf16 %v5404_v22, %v5404_v22 }
 0x9ab   :  { %5440 = vmatmul.mubr.bf16.vlgmr.msra.gmra.mxu0 %v5406_v51  ;;  %5481 = vmatmul.mubr.bf16.vlgmr.msra.gmra.mxu1 %v5406_v51 }
 0x9ac   :  { %5540 = vmatpush1.bf16.msra.mxu0 %v11702_v11  ;;  %5581 = vmatpush1.bf16.msra.mxu1 %v11708_v45 }
 0x9ad   :  { %5541 = vmatprep.subr.bf16.mxu0 %v11714_v24  ;;  %5582 = vmatprep.subr.bf16.mxu1 %v11720_v15 }
 0x9ae   :  { %5571 = vmatprep.mubr.bf16.mxu0 %v13018_v46  ;;  %5612 = vmatprep.mubr.bf16.mxu1 %v13018_v46 }
 0x9b0   :  { %5542 = vmatpush1.bf16.msra.mxu0 %v11728_v47  ;;  %5583 = vmatpush1.bf16.msra.mxu1 %v11734_v0 }
 0x9b1   :  { %5543 = vmatprep.subr.bf16.mxu0 %v11740_v16  ;;  %5584 = vmatprep.subr.bf16.mxu1 %v11746_v20 }
 0x9b4   :  { %5544 = vmatpush1.bf16.msra.mxu0 %v11752_v40  ;;  %5585 = vmatpush1.bf16.msra.mxu1 %v11758_v31 }
 0x9b5   :  { %5545 = vmatprep.subr.bf16.mxu0 %v11764_v6  ;;  %5586 = vmatprep.subr.bf16.mxu1 %v11770_v26 }
 0x9b8   :  { %5546 = vmatpush1.bf16.msra.mxu0 %v11776_v13  ;;  %5587 = vmatpush1.bf16.msra.mxu1 %v11782_v41 }
 0x9b9   :  { %5547 = vmatprep.subr.bf16.mxu0 %v11788_v27  ;;  %5588 = vmatprep.subr.bf16.mxu1 %v11794_v49 }
 0x9bc   :  { %5548 = vmatpush1.bf16.msra.mxu0 %v11800_v53  ;;  %5589 = vmatpush1.bf16.msra.mxu1 %v11806_v10 }
 0x9bd   :  { %5549 = vmatprep.subr.bf16.mxu0 %v11812_v61  ;;  %5590 = vmatprep.subr.bf16.mxu1 %v11818_v63 }
 0x9c0   :  { %5550 = vmatpush1.bf16.msra.mxu0 %v11824_v42  ;;  %5591 = vmatpush1.bf16.msra.mxu1 %v11830_v28 }
 0x9c1   :  { %5551 = vmatprep.subr.bf16.mxu0 %v11836_v39  ;;  %5592 = vmatprep.subr.bf16.mxu1 %v11842_v36 }
 0x9c4   :  { %5552 = vmatpush1.bf16.msra.mxu0 %v11848_v19  ;;  %5593 = vmatpush1.bf16.msra.mxu1 %v11854_v12 }
 0x9c5   :  { %5553 = vmatprep.subr.bf16.mxu0 %v11860_v3  ;;  %5594 = vmatprep.subr.bf16.mxu1 %v11866_v56 }
 0x9c8   :  { %5554 = vmatpush1.bf16.msra.mxu0 %v11872_v60  ;;  %5595 = vmatpush1.bf16.msra.mxu1 %v11878_v4 }
 0x9c9   :  { %5671 = vmatprep.subr.bf16.mxu0 %v11681_v21  ;;  %5712 = vmatprep.subr.bf16.mxu1 %v11687_v57 }
 0xa6b   :  { %v5441_v35 = vpop.f32.mrf.mxu0  ;;  %v5482_v18 = vpop.f32.mrf.mxu1 }
 0xa6d   :  { %v5443_v59 = vpop.f32.mrf.mxu0  ;;  %v5484_v2 = vpop.f32.mrf.mxu1 }
 0xa6e   :  { %v5493_v23 = vcombine.low %v5441_v35, %v5443_v59  ;;  %v5494_v37 = vcombine.low %v5482_v18, %v5484_v2 }
 0xa6f   :  { %v5445_v50 = vpop.f32.mrf.mxu0  ;;  %v5486_v30 = vpop.f32.mrf.mxu1 }
 0xa70   :  { %v5501_v5 = vrot.slane %v5493_v23, %v10186_v34  ;;  %v5508_v25 = vrot.slane %v5494_v37, %v10186_v34 }
 0xa71   :  { %v5446_v54 = vpop.f32.mrf.mxu0  ;;  %v5487_v58 = vpop.f32.mrf.mxu1 }
 0xa72   :  { %v5509_v38 = vcombine.low %v5501_v5, %v5508_v25 }
 0xa74   :  { %v5511_v14 = vadd.f32 %v5509_v38, %v13071_v33 }
 0xa76   :  { %v5512_v52 = vmul.f32 0.5, %v5511_v14  ;;  %v5517_v55 = vrot.slane %v5511_v14, 2  ;;  %v5523_v44 = vrot.slane %v5511_v14, 4  ;;  %v5526_v1 = vrot.slane %v5511_v14, 6 }
 0xa78   :  { %8847 = vtanh.f32 %v5512_v52  ;;  %v5519_v43 = vmul.f32 0.5, %v5517_v55  ;;  %v5528_v9 = vmul.f32 0.5, %v5526_v1 }
 0xa7a   :  { %8849 = vtanh.f32 %v5519_v43 }
 0xa7b   :  { %8851 = vtanh.f32 %v5523_v44 }
 0xa7c   :  { %8853 = vtanh.f32 %v5528_v9 }
 0xa85   :  { %v8848_v22 = vpop.eup %8847 }
 0xa86   :  { %v5514_v51 = vadd.f32 1.0, %v8848_v22 }
 0xa87   :  { %v8850_v35 = vpop.eup %8849 }
 0xa88   :  { %v5515_v18 = vmul.f32 0.5, %v5514_v51  ;;  %v5521_v59 = vadd.f32 1.0, %v8850_v35  ;;  %v8852_v23 = vpop.eup %8851 }
 0xa89   :  { %v8854_v5 = vpop.eup %8853 }
 0xa8a   :  { %v5522_v2 = vmul.f32 0.5, %v5521_v59  ;;  %v5533_v50 = vmul.f32 %v8852_v23, %v5515_v18  ;;  %v5530_v25 = vadd.f32 1.0, %v8854_v5  ;;  %v13072_v18 = vld [vmem:[#allocation33_spill] sm:$0xff]  ;;  %v13073_v59 = vld [vmem:[#allocation34_spill] sm:$0xff] }
 0xa8c   :  { %v5532_v37 = vmul.f32 %v5522_v2, %v11696_v7  ;;  %v5531_v54 = vmul.f32 0.5, %v5530_v25  ;;  %v13074_v2 = vcombine.low %v13072_v18, %v13073_v59 }
 0xa8e   :  { %v11889_v30 = vadd.f32 %v5533_v50, %v5532_v37 }
 0xa90   :  { %8855 = vtanh.f32 %v11889_v30 }
 0xa9d   :  { %v8856_v58 = vpop.eup %8855 }
 0xa9e   :  { %v5536_v38 = vmul.f32 %v8856_v58, %v5531_v54 }
 0xaa0   :  { %v5538_v8 = vpack.c.bf16 %v5536_v38, %v5536_v38 }
 0xaa2   :  { %5572 = vmatmul.mubr.bf16.vlgmr.msra.gmra.mxu0 %v5538_v8  ;;  %5613 = vmatmul.mubr.bf16.vlgmr.msra.gmra.mxu1 %v5538_v8 }
 0xaa3   :  { %5672 = vmatpush1.bf16.msra.mxu0 %v11702_v11  ;;  %5713 = vmatpush1.bf16.msra.mxu1 %v11708_v45 }
 0xaa4   :  { %5673 = vmatprep.subr.bf16.mxu0 %v11714_v24  ;;  %5714 = vmatprep.subr.bf16.mxu1 %v11720_v15 }
 0xaa5   :  { %5703 = vmatprep.mubr.bf16.mxu0 %v13018_v46  ;;  %5744 = vmatprep.mubr.bf16.mxu1 %v13018_v46 }
 0xaa7   :  { %5674 = vmatpush1.bf16.msra.mxu0 %v11728_v47  ;;  %5715 = vmatpush1.bf16.msra.mxu1 %v11734_v0 }
 0xaa8   :  { %5675 = vmatprep.subr.bf16.mxu0 %v11740_v16  ;;  %5716 = vmatprep.subr.bf16.mxu1 %v11746_v20 }
 0xaab   :  { %5676 = vmatpush1.bf16.msra.mxu0 %v11752_v40  ;;  %5717 = vmatpush1.bf16.msra.mxu1 %v11758_v31 }
 0xaac   :  { %5677 = vmatprep.subr.bf16.mxu0 %v11764_v6  ;;  %5718 = vmatprep.subr.bf16.mxu1 %v11770_v26 }
 0xaaf   :  { %5678 = vmatpush1.bf16.msra.mxu0 %v11776_v13  ;;  %5719 = vmatpush1.bf16.msra.mxu1 %v11782_v41 }
 0xab0   :  { %5679 = vmatprep.subr.bf16.mxu0 %v11788_v27  ;;  %5720 = vmatprep.subr.bf16.mxu1 %v11794_v49 }
 0xab3   :  { %5680 = vmatpush1.bf16.msra.mxu0 %v11800_v53  ;;  %5721 = vmatpush1.bf16.msra.mxu1 %v11806_v10 }
 0xab4   :  { %5681 = vmatprep.subr.bf16.mxu0 %v11812_v61  ;;  %5722 = vmatprep.subr.bf16.mxu1 %v11818_v63 }
 0xab7   :  { %5682 = vmatpush1.bf16.msra.mxu0 %v11824_v42  ;;  %5723 = vmatpush1.bf16.msra.mxu1 %v11830_v28 }
 0xab8   :  { %5683 = vmatprep.subr.bf16.mxu0 %v11836_v39  ;;  %5724 = vmatprep.subr.bf16.mxu1 %v11842_v36 }
 0xabb   :  { %5684 = vmatpush1.bf16.msra.mxu0 %v11848_v19  ;;  %5725 = vmatpush1.bf16.msra.mxu1 %v11854_v12 }
 0xabc   :  { %5685 = vmatprep.subr.bf16.mxu0 %v11860_v3  ;;  %5726 = vmatprep.subr.bf16.mxu1 %v11866_v56 }
 0xabf   :  { %5686 = vmatpush1.bf16.msra.mxu0 %v11872_v60  ;;  %5727 = vmatpush1.bf16.msra.mxu1 %v11878_v4 }
 0xac0   :  { %5803 = vmatprep.subr.bf16.mxu0 %v11681_v21  ;;  %5844 = vmatprep.subr.bf16.mxu1 %v11687_v57 }
 0xb62   :  { %v5573_v7 = vpop.f32.mrf.mxu0  ;;  %v5614_v62 = vpop.f32.mrf.mxu1 }
 0xb64   :  { %v5575_v33 = vpop.f32.mrf.mxu0  ;;  %v5616_v14 = vpop.f32.mrf.mxu1 }
 0xb65   :  { %v5625_v52 = vcombine.low %v5573_v7, %v5575_v33  ;;  %v5626_v55 = vcombine.low %v5614_v62, %v5616_v14 }
 0xb66   :  { %v5577_v43 = vpop.f32.mrf.mxu0  ;;  %v5618_v44 = vpop.f32.mrf.mxu1 }
 0xb67   :  { %v5633_v1 = vrot.slane %v5625_v52, %v10186_v34  ;;  %v5640_v9 = vrot.slane %v5626_v55, %v10186_v34 }
 0xb68   :  { %v5578_v22 = vpop.f32.mrf.mxu0  ;;  %v5619_v51 = vpop.f32.mrf.mxu1 }
 0xb69   :  { %v5641_v35 = vcombine.low %v5633_v1, %v5640_v9 }
 0xb6b   :  { %v5643_v23 = vadd.f32 %v5641_v35, %v13074_v2 }
 0xb6d   :  { %v5644_v37 = vmul.f32 0.5, %v5643_v23  ;;  %v5649_v50 = vrot.slane %v5643_v23, 2  ;;  %v5655_v25 = vrot.slane %v5643_v23, 4  ;;  %v5658_v54 = vrot.slane %v5643_v23, 6 }
 0xb6f   :  { %8857 = vtanh.f32 %v5644_v37  ;;  %v5651_v5 = vmul.f32 0.5, %v5649_v50  ;;  %v5660_v58 = vmul.f32 0.5, %v5658_v54 }
 0xb71   :  { %8859 = vtanh.f32 %v5651_v5 }
 0xb72   :  { %8861 = vtanh.f32 %v5655_v25 }
 0xb73   :  { %8863 = vtanh.f32 %v5660_v58 }
 0xb7c   :  { %v8858_v38 = vpop.eup %8857 }
 0xb7d   :  { %v5646_v8 = vadd.f32 1.0, %v8858_v38 }
 0xb7e   :  { %v8860_v7 = vpop.eup %8859 }
 0xb7f   :  { %v5647_v62 = vmul.f32 0.5, %v5646_v8  ;;  %v5653_v33 = vadd.f32 1.0, %v8860_v7  ;;  %v8862_v52 = vpop.eup %8861 }
 0xb80   :  { %v8864_v1 = vpop.eup %8863 }
 0xb81   :  { %v5654_v14 = vmul.f32 0.5, %v5653_v33  ;;  %v5665_v43 = vmul.f32 %v8862_v52, %v5647_v62  ;;  %v5662_v9 = vadd.f32 1.0, %v8864_v1  ;;  %v13075_v62 = vld [vmem:[#allocation35_spill] sm:$0xff]  ;;  %v13076_v33 = vld [vmem:[#allocation36_spill] sm:$0xff] }
 0xb83   :  { %v5664_v55 = vmul.f32 %v5654_v14, %v11889_v30  ;;  %v5663_v22 = vmul.f32 0.5, %v5662_v9  ;;  %v13077_v14 = vcombine.low %v13075_v62, %v13076_v33 }
 0xb85   :  { %v11932_v44 = vadd.f32 %v5665_v43, %v5664_v55 }
 0xb87   :  { %8865 = vtanh.f32 %v11932_v44 }
 0xb94   :  { %v8866_v51 = vpop.eup %8865 }
 0xb95   :  { %v5668_v35 = vmul.f32 %v8866_v51, %v5663_v22 }
 0xb97   :  { %v5670_v18 = vpack.c.bf16 %v5668_v35, %v5668_v35 }
 0xb99   :  { %5704 = vmatmul.mubr.bf16.vlgmr.msra.gmra.mxu0 %v5670_v18  ;;  %5745 = vmatmul.mubr.bf16.vlgmr.msra.gmra.mxu1 %v5670_v18 }
 0xb9a   :  { %5804 = vmatpush1.bf16.msra.mxu0 %v11702_v11  ;;  %5845 = vmatpush1.bf16.msra.mxu1 %v11708_v45 }
 0xb9b   :  { %5805 = vmatprep.subr.bf16.mxu0 %v11714_v24  ;;  %5846 = vmatprep.subr.bf16.mxu1 %v11720_v15 }
 0xb9c   :  { %5835 = vmatprep.mubr.bf16.mxu0 %v13018_v46  ;;  %5876 = vmatprep.mubr.bf16.mxu1 %v13018_v46 }
 0xb9e   :  { %5806 = vmatpush1.bf16.msra.mxu0 %v11728_v47  ;;  %5847 = vmatpush1.bf16.msra.mxu1 %v11734_v0 }
 0xb9f   :  { %5807 = vmatprep.subr.bf16.mxu0 %v11740_v16  ;;  %5848 = vmatprep.subr.bf16.mxu1 %v11746_v20 }
 0xba2   :  { %5808 = vmatpush1.bf16.msra.mxu0 %v11752_v40  ;;  %5849 = vmatpush1.bf16.msra.mxu1 %v11758_v31 }
 0xba3   :  { %5809 = vmatprep.subr.bf16.mxu0 %v11764_v6  ;;  %5850 = vmatprep.subr.bf16.mxu1 %v11770_v26 }
 0xba6   :  { %5810 = vmatpush1.bf16.msra.mxu0 %v11776_v13  ;;  %5851 = vmatpush1.bf16.msra.mxu1 %v11782_v41 }
 0xba7   :  { %5811 = vmatprep.subr.bf16.mxu0 %v11788_v27  ;;  %5852 = vmatprep.subr.bf16.mxu1 %v11794_v49 }
 0xbaa   :  { %5812 = vmatpush1.bf16.msra.mxu0 %v11800_v53  ;;  %5853 = vmatpush1.bf16.msra.mxu1 %v11806_v10 }
 0xbab   :  { %5813 = vmatprep.subr.bf16.mxu0 %v11812_v61  ;;  %5854 = vmatprep.subr.bf16.mxu1 %v11818_v63 }
 0xbae   :  { %5814 = vmatpush1.bf16.msra.mxu0 %v11824_v42  ;;  %5855 = vmatpush1.bf16.msra.mxu1 %v11830_v28 }
 0xbaf   :  { %5815 = vmatprep.subr.bf16.mxu0 %v11836_v39  ;;  %5856 = vmatprep.subr.bf16.mxu1 %v11842_v36 }
 0xbb2   :  { %5816 = vmatpush1.bf16.msra.mxu0 %v11848_v19  ;;  %5857 = vmatpush1.bf16.msra.mxu1 %v11854_v12 }
 0xbb3   :  { %5817 = vmatprep.subr.bf16.mxu0 %v11860_v3  ;;  %5858 = vmatprep.subr.bf16.mxu1 %v11866_v56 }
 0xbb6   :  { %5818 = vmatpush1.bf16.msra.mxu0 %v11872_v60  ;;  %5859 = vmatpush1.bf16.msra.mxu1 %v11878_v4 }
 0xbb7   :  { %5935 = vmatprep.subr.bf16.mxu0 %v11681_v21  ;;  %5976 = vmatprep.subr.bf16.mxu1 %v11687_v57 }
 0xc59   :  { %v5705_v30 = vpop.f32.mrf.mxu0  ;;  %v5746_v59 = vpop.f32.mrf.mxu1 }
 0xc5b   :  { %v5707_v2 = vpop.f32.mrf.mxu0  ;;  %v5748_v23 = vpop.f32.mrf.mxu1 }
 0xc5c   :  { %v5757_v37 = vcombine.low %v5705_v30, %v5707_v2  ;;  %v5758_v50 = vcombine.low %v5746_v59, %v5748_v23 }
 0xc5d   :  { %v5709_v5 = vpop.f32.mrf.mxu0  ;;  %v5750_v25 = vpop.f32.mrf.mxu1 }
 0xc5e   :  { %v5765_v54 = vrot.slane %v5757_v37, %v10186_v34  ;;  %v5772_v58 = vrot.slane %v5758_v50, %v10186_v34 }
 0xc5f   :  { %v5710_v38 = vpop.f32.mrf.mxu0  ;;  %v5751_v8 = vpop.f32.mrf.mxu1 }
 0xc60   :  { %v5773_v7 = vcombine.low %v5765_v54, %v5772_v58 }
 0xc62   :  { %v5775_v52 = vadd.f32 %v5773_v7, %v13077_v14 }
 0xc64   :  { %v5776_v55 = vmul.f32 0.5, %v5775_v52  ;;  %v5781_v43 = vrot.slane %v5775_v52, 2  ;;  %v5787_v9 = vrot.slane %v5775_v52, 4  ;;  %v5790_v22 = vrot.slane %v5775_v52, 6 }
 0xc66   :  { %8867 = vtanh.f32 %v5776_v55  ;;  %v5783_v1 = vmul.f32 0.5, %v5781_v43  ;;  %v5792_v51 = vmul.f32 0.5, %v5790_v22 }
 0xc68   :  { %8869 = vtanh.f32 %v5783_v1 }
 0xc69   :  { %8871 = vtanh.f32 %v5787_v9 }
 0xc6a   :  { %8873 = vtanh.f32 %v5792_v51 }
 0xc73   :  { %v8868_v35 = vpop.eup %8867 }
 0xc74   :  { %v5778_v18 = vadd.f32 1.0, %v8868_v35 }
 0xc75   :  { %v8870_v30 = vpop.eup %8869 }
 0xc76   :  { %v5779_v59 = vmul.f32 0.5, %v5778_v18  ;;  %v5785_v2 = vadd.f32 1.0, %v8870_v30  ;;  %v8872_v37 = vpop.eup %8871 }
 0xc77   :  { %v8874_v54 = vpop.eup %8873 }
 0xc78   :  { %v5786_v23 = vmul.f32 0.5, %v5785_v2  ;;  %v5797_v5 = vmul.f32 %v8872_v37, %v5779_v59  ;;  %v5794_v58 = vadd.f32 1.0, %v8874_v54  ;;  %v13078_v59 = vld [vmem:[#allocation37_spill] sm:$0xff]  ;;  %v13079_v2 = vld [vmem:[#allocation38_spill] sm:$0xff] }
 0xc7a   :  { %v5796_v50 = vmul.f32 %v5786_v23, %v11932_v44  ;;  %v5795_v38 = vmul.f32 0.5, %v5794_v58  ;;  %v13080_v23 = vcombine.low %v13078_v59, %v13079_v2 }
 0xc7c   :  { %v11975_v25 = vadd.f32 %v5797_v5, %v5796_v50 }
 0xc7e   :  { %8875 = vtanh.f32 %v11975_v25 }
 0xc8b   :  { %v8876_v8 = vpop.eup %8875 }
 0xc8c   :  { %v5800_v7 = vmul.f32 %v8876_v8, %v5795_v38 }
 0xc8e   :  { %v5802_v62 = vpack.c.bf16 %v5800_v7, %v5800_v7 }
 0xc90   :  { %5836 = vmatmul.mubr.bf16.vlgmr.msra.gmra.mxu0 %v5802_v62  ;;  %5877 = vmatmul.mubr.bf16.vlgmr.msra.gmra.mxu1 %v5802_v62 }
 0xc91   :  { %5936 = vmatpush1.bf16.msra.mxu0 %v11702_v11  ;;  %5977 = vmatpush1.bf16.msra.mxu1 %v11708_v45 }
 0xc92   :  { %5937 = vmatprep.subr.bf16.mxu0 %v11714_v24  ;;  %5978 = vmatprep.subr.bf16.mxu1 %v11720_v15 }
 0xc93   :  { %5967 = vmatprep.mubr.bf16.mxu0 %v13018_v46  ;;  %6008 = vmatprep.mubr.bf16.mxu1 %v13018_v46 }
 0xc95   :  { %5938 = vmatpush1.bf16.msra.mxu0 %v11728_v47  ;;  %5979 = vmatpush1.bf16.msra.mxu1 %v11734_v0 }
 0xc96   :  { %5939 = vmatprep.subr.bf16.mxu0 %v11740_v16  ;;  %5980 = vmatprep.subr.bf16.mxu1 %v11746_v20 }
 0xc99   :  { %5940 = vmatpush1.bf16.msra.mxu0 %v11752_v40  ;;  %5981 = vmatpush1.bf16.msra.mxu1 %v11758_v31 }
 0xc9a   :  { %5941 = vmatprep.subr.bf16.mxu0 %v11764_v6  ;;  %5982 = vmatprep.subr.bf16.mxu1 %v11770_v26 }
 0xc9d   :  { %5942 = vmatpush1.bf16.msra.mxu0 %v11776_v13  ;;  %5983 = vmatpush1.bf16.msra.mxu1 %v11782_v41 }
 0xc9e   :  { %5943 = vmatprep.subr.bf16.mxu0 %v11788_v27  ;;  %5984 = vmatprep.subr.bf16.mxu1 %v11794_v49 }
 0xca1   :  { %5944 = vmatpush1.bf16.msra.mxu0 %v11800_v53  ;;  %5985 = vmatpush1.bf16.msra.mxu1 %v11806_v10 }
 0xca2   :  { %5945 = vmatprep.subr.bf16.mxu0 %v11812_v61  ;;  %5986 = vmatprep.subr.bf16.mxu1 %v11818_v63 }
 0xca5   :  { %5946 = vmatpush1.bf16.msra.mxu0 %v11824_v42  ;;  %5987 = vmatpush1.bf16.msra.mxu1 %v11830_v28 }
 0xca6   :  { %5947 = vmatprep.subr.bf16.mxu0 %v11836_v39  ;;  %5988 = vmatprep.subr.bf16.mxu1 %v11842_v36 }
 0xca9   :  { %5948 = vmatpush1.bf16.msra.mxu0 %v11848_v19  ;;  %5989 = vmatpush1.bf16.msra.mxu1 %v11854_v12 }
 0xcaa   :  { %5949 = vmatprep.subr.bf16.mxu0 %v11860_v3  ;;  %5990 = vmatprep.subr.bf16.mxu1 %v11866_v56 }
 0xcad   :  { %5950 = vmatpush1.bf16.msra.mxu0 %v11872_v60  ;;  %5991 = vmatpush1.bf16.msra.mxu1 %v11878_v4 }
 0xcae   :  { %6067 = vmatprep.subr.bf16.mxu0 %v11681_v21  ;;  %6108 = vmatprep.subr.bf16.mxu1 %v11687_v57 }
 0xd50   :  { %v5837_v44 = vpop.f32.mrf.mxu0  ;;  %v5878_v33 = vpop.f32.mrf.mxu1 }
 0xd52   :  { %v5839_v14 = vpop.f32.mrf.mxu0  ;;  %v5880_v52 = vpop.f32.mrf.mxu1 }
 0xd53   :  { %v5889_v55 = vcombine.low %v5837_v44, %v5839_v14  ;;  %v5890_v43 = vcombine.low %v5878_v33, %v5880_v52 }
 0xd54   :  { %v5841_v1 = vpop.f32.mrf.mxu0  ;;  %v5882_v9 = vpop.f32.mrf.mxu1 }
 0xd55   :  { %v5897_v22 = vrot.slane %v5889_v55, %v10186_v34  ;;  %v5904_v51 = vrot.slane %v5890_v43, %v10186_v34 }
 0xd56   :  { %v5842_v35 = vpop.f32.mrf.mxu0  ;;  %v5883_v18 = vpop.f32.mrf.mxu1 }
 0xd57   :  { %v5905_v30 = vcombine.low %v5897_v22, %v5904_v51 }
 0xd59   :  { %v5907_v37 = vadd.f32 %v5905_v30, %v13080_v23 }
 0xd5b   :  { %v5908_v50 = vmul.f32 0.5, %v5907_v37  ;;  %v5913_v5 = vrot.slane %v5907_v37, 2  ;;  %v5919_v58 = vrot.slane %v5907_v37, 4  ;;  %v5922_v38 = vrot.slane %v5907_v37, 6 }
 0xd5d   :  { %8877 = vtanh.f32 %v5908_v50  ;;  %v5915_v54 = vmul.f32 0.5, %v5913_v5  ;;  %v5924_v8 = vmul.f32 0.5, %v5922_v38 }
 0xd5f   :  { %8879 = vtanh.f32 %v5915_v54 }
 0xd60   :  { %8881 = vtanh.f32 %v5919_v58 }
 0xd61   :  { %8883 = vtanh.f32 %v5924_v8 }
 0xd6a   :  { %v8878_v7 = vpop.eup %8877 }
 0xd6b   :  { %v5910_v62 = vadd.f32 1.0, %v8878_v7 }
 0xd6c   :  { %v8880_v44 = vpop.eup %8879 }
 0xd6d   :  { %v5911_v33 = vmul.f32 0.5, %v5910_v62  ;;  %v5917_v14 = vadd.f32 1.0, %v8880_v44  ;;  %v8882_v55 = vpop.eup %8881 }
 0xd6e   :  { %v8884_v22 = vpop.eup %8883 }
 0xd6f   :  { %v5918_v52 = vmul.f32 0.5, %v5917_v14  ;;  %v5929_v1 = vmul.f32 %v8882_v55, %v5911_v33  ;;  %v5926_v51 = vadd.f32 1.0, %v8884_v22  ;;  %v13081_v33 = vld [vmem:[#allocation22_spill] sm:$0xff]  ;;  %v13082_v14 = vld [vmem:[#allocation39_spill] sm:$0xff] }
 0xd71   :  { %v5928_v43 = vmul.f32 %v5918_v52, %v11975_v25  ;;  %v5927_v35 = vmul.f32 0.5, %v5926_v51  ;;  %v13083_v52 = vcombine.low %v13081_v33, %v13082_v14 }
 0xd73   :  { %v12018_v9 = vadd.f32 %v5929_v1, %v5928_v43 }
 0xd75   :  { %8885 = vtanh.f32 %v12018_v9 }
 0xd82   :  { %v8886_v18 = vpop.eup %8885 }
 0xd83   :  { %v5932_v30 = vmul.f32 %v8886_v18, %v5927_v35 }
 0xd85   :  { %v5934_v59 = vpack.c.bf16 %v5932_v30, %v5932_v30 }
 0xd87   :  { %5968 = vmatmul.mubr.bf16.vlgmr.msra.gmra.mxu0 %v5934_v59  ;;  %6009 = vmatmul.mubr.bf16.vlgmr.msra.gmra.mxu1 %v5934_v59 }
 0xd88   :  { %6068 = vmatpush1.bf16.msra.mxu0 %v11702_v11  ;;  %6109 = vmatpush1.bf16.msra.mxu1 %v11708_v45 }
 0xd89   :  { %6069 = vmatprep.subr.bf16.mxu0 %v11714_v24  ;;  %6110 = vmatprep.subr.bf16.mxu1 %v11720_v15 }
 0xd8a   :  { %6099 = vmatprep.mubr.bf16.mxu0 %v13018_v46  ;;  %6140 = vmatprep.mubr.bf16.mxu1 %v13018_v46 }
 0xd8c   :  { %6070 = vmatpush1.bf16.msra.mxu0 %v11728_v47  ;;  %6111 = vmatpush1.bf16.msra.mxu1 %v11734_v0 }
 0xd8d   :  { %6071 = vmatprep.subr.bf16.mxu0 %v11740_v16  ;;  %6112 = vmatprep.subr.bf16.mxu1 %v11746_v20 }
 0xd90   :  { %6072 = vmatpush1.bf16.msra.mxu0 %v11752_v40  ;;  %6113 = vmatpush1.bf16.msra.mxu1 %v11758_v31 }
 0xd91   :  { %6073 = vmatprep.subr.bf16.mxu0 %v11764_v6  ;;  %6114 = vmatprep.subr.bf16.mxu1 %v11770_v26 }
 0xd94   :  { %6074 = vmatpush1.bf16.msra.mxu0 %v11776_v13  ;;  %6115 = vmatpush1.bf16.msra.mxu1 %v11782_v41 }
 0xd95   :  { %6075 = vmatprep.subr.bf16.mxu0 %v11788_v27  ;;  %6116 = vmatprep.subr.bf16.mxu1 %v11794_v49 }
 0xd98   :  { %6076 = vmatpush1.bf16.msra.mxu0 %v11800_v53  ;;  %6117 = vmatpush1.bf16.msra.mxu1 %v11806_v10 }
 0xd99   :  { %6077 = vmatprep.subr.bf16.mxu0 %v11812_v61  ;;  %6118 = vmatprep.subr.bf16.mxu1 %v11818_v63 }
 0xd9c   :  { %6078 = vmatpush1.bf16.msra.mxu0 %v11824_v42  ;;  %6119 = vmatpush1.bf16.msra.mxu1 %v11830_v28 }
 0xd9d   :  { %6079 = vmatprep.subr.bf16.mxu0 %v11836_v39  ;;  %6120 = vmatprep.subr.bf16.mxu1 %v11842_v36 }
 0xda0   :  { %6080 = vmatpush1.bf16.msra.mxu0 %v11848_v19  ;;  %6121 = vmatpush1.bf16.msra.mxu1 %v11854_v12 }
 0xda1   :  { %6081 = vmatprep.subr.bf16.mxu0 %v11860_v3  ;;  %6122 = vmatprep.subr.bf16.mxu1 %v11866_v56 }
 0xda4   :  { %6082 = vmatpush1.bf16.msra.mxu0 %v11872_v60  ;;  %6123 = vmatpush1.bf16.msra.mxu1 %v11878_v4 }
 0xda5   :  { %6199 = vmatprep.subr.bf16.mxu0 %v11681_v21  ;;  %6240 = vmatprep.subr.bf16.mxu1 %v11687_v57 }
 0xe47   :  { %v5969_v25 = vpop.f32.mrf.mxu0  ;;  %v6010_v2 = vpop.f32.mrf.mxu1 }
 0xe49   :  { %v5971_v23 = vpop.f32.mrf.mxu0  ;;  %v6012_v37 = vpop.f32.mrf.mxu1 }
 0xe4a   :  { %v6021_v50 = vcombine.low %v5969_v25, %v5971_v23  ;;  %v6022_v5 = vcombine.low %v6010_v2, %v6012_v37 }
 0xe4b   :  { %v5973_v54 = vpop.f32.mrf.mxu0  ;;  %v6014_v58 = vpop.f32.mrf.mxu1 }
 0xe4c   :  { %v6029_v38 = vrot.slane %v6021_v50, %v10186_v34  ;;  %v6036_v8 = vrot.slane %v6022_v5, %v10186_v34 }
 0xe4d   :  { %v5974_v7 = vpop.f32.mrf.mxu0  ;;  %v6015_v62 = vpop.f32.mrf.mxu1 }
 0xe4e   :  { %v6037_v44 = vcombine.low %v6029_v38, %v6036_v8 }
 0xe50   :  { %v6039_v55 = vadd.f32 %v6037_v44, %v13083_v52 }
 0xe52   :  { %v6040_v43 = vmul.f32 0.5, %v6039_v55  ;;  %v6045_v1 = vrot.slane %v6039_v55, 2  ;;  %v6051_v51 = vrot.slane %v6039_v55, 4  ;;  %v6054_v35 = vrot.slane %v6039_v55, 6 }
 0xe54   :  { %8887 = vtanh.f32 %v6040_v43  ;;  %v6047_v22 = vmul.f32 0.5, %v6045_v1  ;;  %v6056_v18 = vmul.f32 0.5, %v6054_v35 }
 0xe56   :  { %8889 = vtanh.f32 %v6047_v22 }
 0xe57   :  { %8891 = vtanh.f32 %v6051_v51 }
 0xe58   :  { %8893 = vtanh.f32 %v6056_v18 }
 0xe61   :  { %v8888_v30 = vpop.eup %8887 }
 0xe62   :  { %v6042_v59 = vadd.f32 1.0, %v8888_v30 }
 0xe63   :  { %v8890_v25 = vpop.eup %8889 }
 0xe64   :  { %v6043_v2 = vmul.f32 0.5, %v6042_v59  ;;  %v6049_v23 = vadd.f32 1.0, %v8890_v25  ;;  %v8892_v50 = vpop.eup %8891 }
 0xe65   :  { %v8894_v38 = vpop.eup %8893 }
 0xe66   :  { %v6050_v37 = vmul.f32 0.5, %v6049_v23  ;;  %v6061_v54 = vmul.f32 %v8892_v50, %v6043_v2  ;;  %v6058_v8 = vadd.f32 1.0, %v8894_v38  ;;  %v13084_v2 = vld [vmem:[#allocation23_spill] sm:$0xff]  ;;  %v13085_v23 = vld [vmem:[#allocation40_spill] sm:$0xff] }
 0xe68   :  { %v6060_v5 = vmul.f32 %v6050_v37, %v12018_v9  ;;  %v6059_v7 = vmul.f32 0.5, %v6058_v8 }
 0xe6a   :  { %v12061_v58 = vadd.f32 %v6061_v54, %v6060_v5 }
 0xe6c   :  { %8895 = vtanh.f32 %v12061_v58 }
 0xe79   :  { %v8896_v62 = vpop.eup %8895 }
 0xe7a   :  { %v6064_v44 = vmul.f32 %v8896_v62, %v6059_v7 }
 0xe7c   :  { %v6066_v33 = vpack.c.bf16 %v6064_v44, %v6064_v44 }
 0xe7e   :  { %6100 = vmatmul.mubr.bf16.vlgmr.msra.gmra.mxu0 %v6066_v33  ;;  %6141 = vmatmul.mubr.bf16.vlgmr.msra.gmra.mxu1 %v6066_v33 }
 0xe7f   :  { %6200 = vmatpush1.bf16.msra.mxu0 %v11702_v11  ;;  %6241 = vmatpush1.bf16.msra.mxu1 %v11708_v45 }
 0xe80   :  { %6201 = vmatprep.subr.bf16.mxu0 %v11714_v24  ;;  %6242 = vmatprep.subr.bf16.mxu1 %v11720_v15 }
 0xe81   :  { %6231 = vmatprep.mubr.bf16.mxu0 %v13018_v46  ;;  %6272 = vmatprep.mubr.bf16.mxu1 %v13018_v46 }
 0xe83   :  { %6202 = vmatpush1.bf16.msra.mxu0 %v11728_v47  ;;  %6243 = vmatpush1.bf16.msra.mxu1 %v11734_v0 }
 0xe84   :  { %6203 = vmatprep.subr.bf16.mxu0 %v11740_v16  ;;  %6244 = vmatprep.subr.bf16.mxu1 %v11746_v20 }
 0xe87   :  { %6204 = vmatpush1.bf16.msra.mxu0 %v11752_v40  ;;  %6245 = vmatpush1.bf16.msra.mxu1 %v11758_v31 }
 0xe88   :  { %6205 = vmatprep.subr.bf16.mxu0 %v11764_v6  ;;  %6246 = vmatprep.subr.bf16.mxu1 %v11770_v26 }
 0xe8b   :  { %6206 = vmatpush1.bf16.msra.mxu0 %v11776_v13  ;;  %6247 = vmatpush1.bf16.msra.mxu1 %v11782_v41 }
 0xe8c   :  { %6207 = vmatprep.subr.bf16.mxu0 %v11788_v27  ;;  %6248 = vmatprep.subr.bf16.mxu1 %v11794_v49 }
 0xe8f   :  { %6208 = vmatpush1.bf16.msra.mxu0 %v11800_v53  ;;  %6249 = vmatpush1.bf16.msra.mxu1 %v11806_v10 }
 0xe90   :  { %6209 = vmatprep.subr.bf16.mxu0 %v11812_v61  ;;  %6250 = vmatprep.subr.bf16.mxu1 %v11818_v63 }
 0xe93   :  { %6210 = vmatpush1.bf16.msra.mxu0 %v11824_v42  ;;  %6251 = vmatpush1.bf16.msra.mxu1 %v11830_v28 }
 0xe94   :  { %6211 = vmatprep.subr.bf16.mxu0 %v11836_v39  ;;  %6252 = vmatprep.subr.bf16.mxu1 %v11842_v36 }
 0xe97   :  { %6212 = vmatpush1.bf16.msra.mxu0 %v11848_v19  ;;  %6253 = vmatpush1.bf16.msra.mxu1 %v11854_v12 }
 0xe98   :  { %6213 = vmatprep.subr.bf16.mxu0 %v11860_v3  ;;  %6254 = vmatprep.subr.bf16.mxu1 %v11866_v56 }
 0xe9b   :  { %6214 = vmatpush1.bf16.msra.mxu0 %v11872_v60  ;;  %6255 = vmatpush1.bf16.msra.mxu1 %v11878_v4 }
 0xe9c   :  { %6331 = vmatprep.subr.bf16.mxu0 %v11681_v21  ;;  %6372 = vmatprep.subr.bf16.mxu1 %v11687_v57  ;;  %v13086_v21 = vcombine.low %v13084_v2, %v13085_v23 }
 0xf3e   :  { %v6101_v9 = vpop.f32.mrf.mxu0  ;;  %v6142_v14 = vpop.f32.mrf.mxu1 }
 0xf40   :  { %v6103_v52 = vpop.f32.mrf.mxu0  ;;  %v6144_v55 = vpop.f32.mrf.mxu1 }
 0xf41   :  { %v6153_v43 = vcombine.low %v6101_v9, %v6103_v52  ;;  %v6154_v1 = vcombine.low %v6142_v14, %v6144_v55 }
 0xf42   :  { %v6105_v22 = vpop.f32.mrf.mxu0  ;;  %v6146_v51 = vpop.f32.mrf.mxu1 }
 0xf43   :  { %v6161_v35 = vrot.slane %v6153_v43, %v10186_v34  ;;  %v6168_v18 = vrot.slane %v6154_v1, %v10186_v34 }
 0xf44   :  { %v6106_v30 = vpop.f32.mrf.mxu0  ;;  %v6147_v59 = vpop.f32.mrf.mxu1 }
 0xf45   :  { %v6169_v25 = vcombine.low %v6161_v35, %v6168_v18 }
 0xf47   :  { %v6171_v37 = vadd.f32 %v6169_v25, %v13086_v21 }
 0xf49   :  { %v6172_v57 = vmul.f32 0.5, %v6171_v37  ;;  %v6177_v50 = vrot.slane %v6171_v37, 2  ;;  %v6183_v54 = vrot.slane %v6171_v37, 4  ;;  %v6186_v38 = vrot.slane %v6171_v37, 6 }
 0xf4b   :  { %8897 = vtanh.f32 %v6172_v57  ;;  %v6179_v5 = vmul.f32 0.5, %v6177_v50  ;;  %v6188_v8 = vmul.f32 0.5, %v6186_v38 }
 0xf4d   :  { %8899 = vtanh.f32 %v6179_v5 }
 0xf4e   :  { %8901 = vtanh.f32 %v6183_v54 }
 0xf4f   :  { %8903 = vtanh.f32 %v6188_v8  ;;  %v12163_v8 = vld [vmem:[%s12953_s5 + $0xe0] ss:$16 sps:$4 sm:$0xff]  }
 0xf58   :  { %v8898_v7 = vpop.eup %8897 }
 0xf59   :  { %v6174_v62 = vadd.f32 1.0, %v8898_v7  ;;  %v12169_v7 = vld [vmem:[%s12953_s5 + $0xe8] ss:$16 sps:$4 sm:$0xff]  }
 0xf5a   :  { %v8900_v44 = vpop.eup %8899 }
 0xf5b   :  { %v6175_v33 = vmul.f32 0.5, %v6174_v62  ;;  %v6181_v9 = vadd.f32 1.0, %v8900_v44  ;;  %v8902_v52 = vpop.eup %8901  ;;  %v12175_v62 = vld [vmem:[%s12953_s5 + $0xc4] ss:$16 sps:$4 sm:$0xff]   ;;  %v12181_v44 = vld [vmem:[%s12953_s5 + $0xcc] ss:$16 sps:$4 sm:$0xff]  }
 0xf5c   :  { %v8904_v22 = vpop.eup %8903 }
 0xf5d   :  { %v6182_v14 = vmul.f32 0.5, %v6181_v9  ;;  %v6193_v43 = vmul.f32 %v8902_v52, %v6175_v33  ;;  %v6190_v51 = vadd.f32 1.0, %v8904_v22  ;;  %v12189_v33 = vld [vmem:[%s12953_s5 + $0xc0] ss:$16 sps:$4 sm:$0xff]   ;;  %v12195_v9 = vld [vmem:[%s12953_s5 + $0xc8] ss:$16 sps:$4 sm:$0xff]  }
 0xf5e   :  { %v12207_v52 = vld [vmem:[%s12953_s5 + $0xac] ss:$16 sps:$4 sm:$0xff]  }
 0xf5f   :  { %v6192_v55 = vmul.f32 %v6182_v14, %v12061_v58  ;;  %v6191_v35 = vmul.f32 0.5, %v6190_v51  ;;  %v12201_v14 = vld [vmem:[%s12953_s5 + $0xa4] ss:$16 sps:$4 sm:$0xff]   ;;  %v12231_v22 = vld [vmem:[%s12953_s5 + $0x8c] ss:$16 sps:$4 sm:$0xff]  }
 0xf60   :  { %v12237_v51 = vld [vmem:[%s12953_s5 + $0x80] ss:$16 sps:$4 sm:$0xff]  }
 0xf61   :  { %v12104_v1 = vadd.f32 %v6193_v43, %v6192_v55  ;;  %v12213_v55 = vld [vmem:[%s12953_s5 + $0xa0] ss:$16 sps:$4 sm:$0xff]   ;;  %v12219_v43 = vld [vmem:[%s12953_s5 + $0xa8] ss:$16 sps:$4 sm:$0xff]  }
 0xf63   :  { %8905 = vtanh.f32 %v12104_v1 }
 0xf70   :  { %v8906_v18 = vpop.eup %8905 }
 0xf71   :  { %v6196_v30 = vmul.f32 %v8906_v18, %v6191_v35  ;;  %v12243_v35 = vld [vmem:[%s12953_s5 + $0x88] ss:$16 sps:$4 sm:$0xff]   ;;  %v12249_v18 = vld [vmem:[%s12953_s5 + $0x64] ss:$16 sps:$4 sm:$0xff]  }
 0xf73   :  { %v6198_v59 = vpack.c.bf16 %v6196_v30, %v6196_v30  ;;  %v12255_v30 = vld [vmem:[%s12953_s5 + $0x6c] ss:$16 sps:$4 sm:$0xff]  }
 0xf75   :  { %6232 = vmatmul.mubr.bf16.vlgmr.msra.gmra.mxu0 %v6198_v59  ;;  %6273 = vmatmul.mubr.bf16.vlgmr.msra.gmra.mxu1 %v6198_v59  ;;  %v12261_v59 = vld [vmem:[%s12953_s5 + $0x60] ss:$16 sps:$4 sm:$0xff]  }
 0xf76   :  { %6332 = vmatpush1.bf16.msra.mxu0 %v11702_v11  ;;  %6373 = vmatpush1.bf16.msra.mxu1 %v11708_v45  ;;  %v12142_v11 = vld [vmem:[%s12953_s5 + $0xe4] ss:$16 sps:$4 sm:$0xff]   ;;  %v12148_v45 = vld [vmem:[%s12953_s5 + $0xec] ss:$16 sps:$4 sm:$0xff]  }
 0xf77   :  { %6333 = vmatprep.subr.bf16.mxu0 %v11714_v24  ;;  %6374 = vmatprep.subr.bf16.mxu1 %v11720_v15 }
 0xf78   :  { %6363 = vmatprep.mubr.bf16.mxu0 %v13018_v46  ;;  %6404 = vmatprep.mubr.bf16.mxu1 %v13018_v46 }
 0xf7a   :  { %6334 = vmatpush1.bf16.msra.mxu0 %v11728_v47  ;;  %6375 = vmatpush1.bf16.msra.mxu1 %v11734_v0 }
 0xf7b   :  { %6335 = vmatprep.subr.bf16.mxu0 %v11740_v16  ;;  %6376 = vmatprep.subr.bf16.mxu1 %v11746_v20 }
 0xf7e   :  { %6336 = vmatpush1.bf16.msra.mxu0 %v11752_v40  ;;  %6377 = vmatpush1.bf16.msra.mxu1 %v11758_v31 }
 0xf7f   :  { %6337 = vmatprep.subr.bf16.mxu0 %v11764_v6  ;;  %6378 = vmatprep.subr.bf16.mxu1 %v11770_v26 }
 0xf82   :  { %6338 = vmatpush1.bf16.msra.mxu0 %v11776_v13  ;;  %6379 = vmatpush1.bf16.msra.mxu1 %v11782_v41 }
 0xf83   :  { %6339 = vmatprep.subr.bf16.mxu0 %v11788_v27  ;;  %6380 = vmatprep.subr.bf16.mxu1 %v11794_v49  ;;  %v13087_v49 = vld [vmem:[#allocation24_spill] sm:$0xff] }
 0xf86   :  { %6340 = vmatpush1.bf16.msra.mxu0 %v11800_v53  ;;  %6381 = vmatpush1.bf16.msra.mxu1 %v11806_v10  ;;  %v13088_v53 = vld [vmem:[#allocation41_spill] sm:$0xff] }
 0xf87   :  { %6341 = vmatprep.subr.bf16.mxu0 %v11812_v61  ;;  %6382 = vmatprep.subr.bf16.mxu1 %v11818_v63  ;;  %v13089_v10 = vcombine.low %v13087_v49, %v13088_v53 }
 0xf8a   :  { %6342 = vmatpush1.bf16.msra.mxu0 %v11824_v42  ;;  %6383 = vmatpush1.bf16.msra.mxu1 %v11830_v28 }
 0xf8b   :  { %6343 = vmatprep.subr.bf16.mxu0 %v11836_v39  ;;  %6384 = vmatprep.subr.bf16.mxu1 %v11842_v36 }
 0xf8e   :  { %6344 = vmatpush1.bf16.msra.mxu0 %v11848_v19  ;;  %6385 = vmatpush1.bf16.msra.mxu1 %v11854_v12 }
 0xf8f   :  { %6345 = vmatprep.subr.bf16.mxu0 %v11860_v3  ;;  %6386 = vmatprep.subr.bf16.mxu1 %v11866_v56 }
 0xf92   :  { %6346 = vmatpush1.bf16.msra.mxu0 %v11872_v60  ;;  %6387 = vmatpush1.bf16.msra.mxu1 %v11878_v4 }
 0xf93   :  { %6463 = vmatprep.subr.bf16.mxu0 %v12142_v11  ;;  %6504 = vmatprep.subr.bf16.mxu1 %v12148_v45 }
0x1035   :  { %v6233_v24 = vpop.f32.mrf.mxu0  ;;  %v6274_v15 = vpop.f32.mrf.mxu1 }
0x1037   :  { %v6235_v47 = vpop.f32.mrf.mxu0  ;;  %v6276_v0 = vpop.f32.mrf.mxu1 }
0x1038   :  { %v6285_v16 = vcombine.low %v6233_v24, %v6235_v47  ;;  %v6286_v20 = vcombine.low %v6274_v15, %v6276_v0  ;;  %v12267_v24 = vld [vmem:[%s12953_s5 + $0x68] ss:$16 sps:$4 sm:$0xff]   ;;  %v12273_v15 = vld [vmem:[%s12953_s5 + $0x44] ss:$16 sps:$4 sm:$0xff]   ;;  %v12279_v47 = vld [vmem:[%s12953_s5 + $0x4c] ss:$16 sps:$4 sm:$0xff]  }
0x1039   :  { %v6237_v40 = vpop.f32.mrf.mxu0  ;;  %v6278_v31 = vpop.f32.mrf.mxu1  ;;  %v12285_v0 = vld [vmem:[%s12953_s5 + $0x40] ss:$16 sps:$4 sm:$0xff]  }
0x103a   :  { %v6293_v6 = vrot.slane %v6285_v16, %v10186_v34  ;;  %v6300_v26 = vrot.slane %v6286_v20, %v10186_v34  ;;  %v12291_v16 = vld [vmem:[%s12953_s5 + $0x48] ss:$16 sps:$4 sm:$0xff]   ;;  %v12297_v20 = vld [vmem:[%s12953_s5 + $0x24] ss:$16 sps:$4 sm:$0xff]   ;;  %v12303_v40 = vld [vmem:[%s12953_s5 + $0x2c] ss:$16 sps:$4 sm:$0xff]  }
0x103b   :  { %v6238_v13 = vpop.f32.mrf.mxu0  ;;  %v6279_v41 = vpop.f32.mrf.mxu1  ;;  %v12309_v31 = vld [vmem:[%s12953_s5 + $0x20] ss:$16 sps:$4 sm:$0xff]  }
0x103c   :  { %v6301_v27 = vcombine.low %v6293_v6, %v6300_v26  ;;  %v12315_v6 = vld [vmem:[%s12953_s5 + $0x28] ss:$16 sps:$4 sm:$0xff]   ;;  %v12321_v26 = vld [vmem:[%s12953_s5 + $0x4] ss:$16 sps:$4 sm:$0xff]   ;;  %v12327_v13 = vld [vmem:[%s12953_s5 + $0xc] ss:$16 sps:$4 sm:$0xff]  }
0x103d   :  { %v12333_v41 = vld [vmem:[%s12953_s5] ss:$16 sps:$4 sm:$0xff]  }
0x103e   :  { %v6303_v61 = vadd.f32 %v6301_v27, %v13089_v10  ;;  %v12339_v27 = vld [vmem:[%s12953_s5 + $0x8] ss:$16 sps:$4 sm:$0xff]  }
0x1040   :  { %v6304_v63 = vmul.f32 0.5, %v6303_v61  ;;  %v6309_v42 = vrot.slane %v6303_v61, 2  ;;  %v6315_v39 = vrot.slane %v6303_v61, 4  ;;  %v6318_v36 = vrot.slane %v6303_v61, 6 }
0x1042   :  { %8907 = vtanh.f32 %v6304_v63  ;;  %v6311_v28 = vmul.f32 0.5, %v6309_v42  ;;  %v6320_v19 = vmul.f32 0.5, %v6318_v36 }
0x1044   :  { %8909 = vtanh.f32 %v6311_v28 }
0x1045   :  { %8911 = vtanh.f32 %v6315_v39 }
0x1046   :  { %8913 = vtanh.f32 %v6320_v19 }
0x104f   :  { %v8908_v12 = vpop.eup %8907 }
0x1050   :  { %v6306_v3 = vadd.f32 1.0, %v8908_v12 }
0x1051   :  { %v8910_v56 = vpop.eup %8909 }
0x1052   :  { %v6307_v60 = vmul.f32 0.5, %v6306_v3  ;;  %v6313_v4 = vadd.f32 1.0, %v8910_v56  ;;  %v8912_v25 = vpop.eup %8911 }
0x1053   :  { %v8914_v37 = vpop.eup %8913 }
0x1054   :  { %v6314_v58 = vmul.f32 0.5, %v6313_v4  ;;  %v6325_v23 = vmul.f32 %v8912_v25, %v6307_v60  ;;  %v6322_v57 = vadd.f32 1.0, %v8914_v37  ;;  %v13090_v60 = vld [vmem:[#allocation25_spill] sm:$0xff]  ;;  %v13091_v4 = vld [vmem:[#allocation42_spill] sm:$0xff] }
0x1056   :  { %v6324_v2 = vmul.f32 %v6314_v58, %v12104_v1  ;;  %v6323_v50 = vmul.f32 0.5, %v6322_v57  ;;  %v12225_v1 = vld [vmem:[%s12953_s5 + $0x84] ss:$16 sps:$4 sm:$0xff]   ;;  %v13092_v58 = vcombine.low %v13090_v60, %v13091_v4 }
0x1058   :  { %v12157_v21 = vadd.f32 %v6325_v23, %v6324_v2 }
0x105a   :  { %8915 = vtanh.f32 %v12157_v21 }
0x1067   :  { %v8916_v5 = vpop.eup %8915 }
0x1068   :  { %v6328_v54 = vmul.f32 %v8916_v5, %v6323_v50 }
0x106a   :  { %v6330_v38 = vpack.c.bf16 %v6328_v54, %v6328_v54 }
0x106c   :  { %6364 = vmatmul.mubr.bf16.vlgmr.msra.gmra.mxu0 %v6330_v38  ;;  %6405 = vmatmul.mubr.bf16.vlgmr.msra.gmra.mxu1 %v6330_v38 }
0x106d   :  { %6464 = vmatpush1.bf16.msra.mxu0 %v12163_v8  ;;  %6505 = vmatpush1.bf16.msra.mxu1 %v12169_v7 }
0x106e   :  { %6465 = vmatprep.subr.bf16.mxu0 %v12175_v62  ;;  %6506 = vmatprep.subr.bf16.mxu1 %v12181_v44 }
0x106f   :  { %6495 = vmatprep.mubr.bf16.mxu0 %v13018_v46  ;;  %6536 = vmatprep.mubr.bf16.mxu1 %v13018_v46 }
0x1071   :  { %6466 = vmatpush1.bf16.msra.mxu0 %v12189_v33  ;;  %6507 = vmatpush1.bf16.msra.mxu1 %v12195_v9 }
0x1072   :  { %6467 = vmatprep.subr.bf16.mxu0 %v12201_v14  ;;  %6508 = vmatprep.subr.bf16.mxu1 %v12207_v52 }
0x1075   :  { %6468 = vmatpush1.bf16.msra.mxu0 %v12213_v55  ;;  %6509 = vmatpush1.bf16.msra.mxu1 %v12219_v43 }
0x1076   :  { %6469 = vmatprep.subr.bf16.mxu0 %v12225_v1  ;;  %6510 = vmatprep.subr.bf16.mxu1 %v12231_v22 }
0x1079   :  { %6470 = vmatpush1.bf16.msra.mxu0 %v12237_v51  ;;  %6511 = vmatpush1.bf16.msra.mxu1 %v12243_v35 }
0x107a   :  { %6471 = vmatprep.subr.bf16.mxu0 %v12249_v18  ;;  %6512 = vmatprep.subr.bf16.mxu1 %v12255_v30 }
0x107d   :  { %6472 = vmatpush1.bf16.msra.mxu0 %v12261_v59  ;;  %6513 = vmatpush1.bf16.msra.mxu1 %v12267_v24 }
0x107e   :  { %6473 = vmatprep.subr.bf16.mxu0 %v12273_v15  ;;  %6514 = vmatprep.subr.bf16.mxu1 %v12279_v47 }
0x1081   :  { %6474 = vmatpush1.bf16.msra.mxu0 %v12285_v0  ;;  %6515 = vmatpush1.bf16.msra.mxu1 %v12291_v16 }
0x1082   :  { %6475 = vmatprep.subr.bf16.mxu0 %v12297_v20  ;;  %6516 = vmatprep.subr.bf16.mxu1 %v12303_v40 }
0x1085   :  { %6476 = vmatpush1.bf16.msra.mxu0 %v12309_v31  ;;  %6517 = vmatpush1.bf16.msra.mxu1 %v12315_v6 }
0x1086   :  { %6477 = vmatprep.subr.bf16.mxu0 %v12321_v26  ;;  %6518 = vmatprep.subr.bf16.mxu1 %v12327_v13 }
0x1089   :  { %6478 = vmatpush1.bf16.msra.mxu0 %v12333_v41  ;;  %6519 = vmatpush1.bf16.msra.mxu1 %v12339_v27 }
0x108a   :  { %6595 = vmatprep.subr.bf16.mxu0 %v12142_v11  ;;  %6636 = vmatprep.subr.bf16.mxu1 %v12148_v45 }
0x112c   :  { %v6365_v49 = vpop.f32.mrf.mxu0  ;;  %v6406_v53 = vpop.f32.mrf.mxu1 }
0x112e   :  { %v6367_v10 = vpop.f32.mrf.mxu0  ;;  %v6408_v61 = vpop.f32.mrf.mxu1 }
0x112f   :  { %v6417_v63 = vcombine.low %v6365_v49, %v6367_v10  ;;  %v6418_v42 = vcombine.low %v6406_v53, %v6408_v61 }
0x1130   :  { %v6369_v28 = vpop.f32.mrf.mxu0  ;;  %v6410_v39 = vpop.f32.mrf.mxu1 }
0x1131   :  { %v6425_v36 = vrot.slane %v6417_v63, %v10186_v34  ;;  %v6432_v19 = vrot.slane %v6418_v42, %v10186_v34 }
0x1132   :  { %v6370_v12 = vpop.f32.mrf.mxu0  ;;  %v6411_v3 = vpop.f32.mrf.mxu1 }
0x1133   :  { %v6433_v56 = vcombine.low %v6425_v36, %v6432_v19 }
0x1135   :  { %v6435_v25 = vadd.f32 %v6433_v56, %v13092_v58 }
0x1137   :  { %v6436_v2 = vmul.f32 0.5, %v6435_v25  ;;  %v6441_v23 = vrot.slane %v6435_v25, 2  ;;  %v6447_v57 = vrot.slane %v6435_v25, 4  ;;  %v6450_v50 = vrot.slane %v6435_v25, 6 }
0x1139   :  { %8917 = vtanh.f32 %v6436_v2  ;;  %v6443_v37 = vmul.f32 0.5, %v6441_v23  ;;  %v6452_v5 = vmul.f32 0.5, %v6450_v50 }
0x113b   :  { %8919 = vtanh.f32 %v6443_v37 }
0x113c   :  { %8921 = vtanh.f32 %v6447_v57 }
0x113d   :  { %8923 = vtanh.f32 %v6452_v5 }
0x1146   :  { %v8918_v54 = vpop.eup %8917 }
0x1147   :  { %v6438_v38 = vadd.f32 1.0, %v8918_v54 }
0x1148   :  { %v8920_v49 = vpop.eup %8919 }
0x1149   :  { %v6439_v53 = vmul.f32 0.5, %v6438_v38  ;;  %v6445_v10 = vadd.f32 1.0, %v8920_v49  ;;  %v8922_v63 = vpop.eup %8921 }
0x114a   :  { %v8924_v36 = vpop.eup %8923 }
0x114b   :  { %v6446_v61 = vmul.f32 0.5, %v6445_v10  ;;  %v6457_v28 = vmul.f32 %v8922_v63, %v6439_v53  ;;  %v6454_v19 = vadd.f32 1.0, %v8924_v36  ;;  %v13093_v53 = vld [vmem:[#allocation26_spill] sm:$0xff]  ;;  %v13094_v10 = vld [vmem:[#allocation43_spill] sm:$0xff] }
0x114d   :  { %v6456_v42 = vmul.f32 %v6446_v61, %v12157_v21  ;;  %v6455_v12 = vmul.f32 0.5, %v6454_v19  ;;  %v13095_v61 = vcombine.low %v13093_v53, %v13094_v10 }
0x114f   :  { %v12350_v39 = vadd.f32 %v6457_v28, %v6456_v42 }
0x1151   :  { %8925 = vtanh.f32 %v12350_v39 }
0x115e   :  { %v8926_v3 = vpop.eup %8925 }
0x115f   :  { %v6460_v56 = vmul.f32 %v8926_v3, %v6455_v12 }
0x1161   :  { %v6462_v60 = vpack.c.bf16 %v6460_v56, %v6460_v56 }
0x1163   :  { %6496 = vmatmul.mubr.bf16.vlgmr.msra.gmra.mxu0 %v6462_v60  ;;  %6537 = vmatmul.mubr.bf16.vlgmr.msra.gmra.mxu1 %v6462_v60 }
0x1164   :  { %6596 = vmatpush1.bf16.msra.mxu0 %v12163_v8  ;;  %6637 = vmatpush1.bf16.msra.mxu1 %v12169_v7 }
0x1165   :  { %6597 = vmatprep.subr.bf16.mxu0 %v12175_v62  ;;  %6638 = vmatprep.subr.bf16.mxu1 %v12181_v44 }
0x1166   :  { %6627 = vmatprep.mubr.bf16.mxu0 %v13018_v46  ;;  %6668 = vmatprep.mubr.bf16.mxu1 %v13018_v46 }
0x1168   :  { %6598 = vmatpush1.bf16.msra.mxu0 %v12189_v33  ;;  %6639 = vmatpush1.bf16.msra.mxu1 %v12195_v9 }
0x1169   :  { %6599 = vmatprep.subr.bf16.mxu0 %v12201_v14  ;;  %6640 = vmatprep.subr.bf16.mxu1 %v12207_v52 }
0x116c   :  { %6600 = vmatpush1.bf16.msra.mxu0 %v12213_v55  ;;  %6641 = vmatpush1.bf16.msra.mxu1 %v12219_v43 }
0x116d   :  { %6601 = vmatprep.subr.bf16.mxu0 %v12225_v1  ;;  %6642 = vmatprep.subr.bf16.mxu1 %v12231_v22 }
0x1170   :  { %6602 = vmatpush1.bf16.msra.mxu0 %v12237_v51  ;;  %6643 = vmatpush1.bf16.msra.mxu1 %v12243_v35 }
0x1171   :  { %6603 = vmatprep.subr.bf16.mxu0 %v12249_v18  ;;  %6644 = vmatprep.subr.bf16.mxu1 %v12255_v30 }
0x1174   :  { %6604 = vmatpush1.bf16.msra.mxu0 %v12261_v59  ;;  %6645 = vmatpush1.bf16.msra.mxu1 %v12267_v24 }
0x1175   :  { %6605 = vmatprep.subr.bf16.mxu0 %v12273_v15  ;;  %6646 = vmatprep.subr.bf16.mxu1 %v12279_v47 }
0x1178   :  { %6606 = vmatpush1.bf16.msra.mxu0 %v12285_v0  ;;  %6647 = vmatpush1.bf16.msra.mxu1 %v12291_v16 }
0x1179   :  { %6607 = vmatprep.subr.bf16.mxu0 %v12297_v20  ;;  %6648 = vmatprep.subr.bf16.mxu1 %v12303_v40 }
0x117c   :  { %6608 = vmatpush1.bf16.msra.mxu0 %v12309_v31  ;;  %6649 = vmatpush1.bf16.msra.mxu1 %v12315_v6 }
0x117d   :  { %6609 = vmatprep.subr.bf16.mxu0 %v12321_v26  ;;  %6650 = vmatprep.subr.bf16.mxu1 %v12327_v13 }
0x1180   :  { %6610 = vmatpush1.bf16.msra.mxu0 %v12333_v41  ;;  %6651 = vmatpush1.bf16.msra.mxu1 %v12339_v27 }
0x1181   :  { %6727 = vmatprep.subr.bf16.mxu0 %v12142_v11  ;;  %6768 = vmatprep.subr.bf16.mxu1 %v12148_v45 }
0x1223   :  { %v6497_v21 = vpop.f32.mrf.mxu0  ;;  %v6538_v4 = vpop.f32.mrf.mxu1 }
0x1225   :  { %v6499_v58 = vpop.f32.mrf.mxu0  ;;  %v6540_v25 = vpop.f32.mrf.mxu1 }
0x1226   :  { %v6549_v2 = vcombine.low %v6497_v21, %v6499_v58  ;;  %v6550_v23 = vcombine.low %v6538_v4, %v6540_v25 }
0x1227   :  { %v6501_v37 = vpop.f32.mrf.mxu0  ;;  %v6542_v57 = vpop.f32.mrf.mxu1 }
0x1228   :  { %v6557_v50 = vrot.slane %v6549_v2, %v10186_v34  ;;  %v6564_v5 = vrot.slane %v6550_v23, %v10186_v34 }
0x1229   :  { %v6502_v54 = vpop.f32.mrf.mxu0  ;;  %v6543_v38 = vpop.f32.mrf.mxu1 }
0x122a   :  { %v6565_v49 = vcombine.low %v6557_v50, %v6564_v5 }
0x122c   :  { %v6567_v63 = vadd.f32 %v6565_v49, %v13095_v61 }
0x122e   :  { %v6568_v42 = vmul.f32 0.5, %v6567_v63  ;;  %v6573_v28 = vrot.slane %v6567_v63, 2  ;;  %v6579_v19 = vrot.slane %v6567_v63, 4  ;;  %v6582_v12 = vrot.slane %v6567_v63, 6 }
0x1230   :  { %8927 = vtanh.f32 %v6568_v42  ;;  %v6575_v36 = vmul.f32 0.5, %v6573_v28  ;;  %v6584_v3 = vmul.f32 0.5, %v6582_v12 }
0x1232   :  { %8929 = vtanh.f32 %v6575_v36 }
0x1233   :  { %8931 = vtanh.f32 %v6579_v19 }
0x1234   :  { %8933 = vtanh.f32 %v6584_v3 }
0x123d   :  { %v8928_v56 = vpop.eup %8927 }
0x123e   :  { %v6570_v60 = vadd.f32 1.0, %v8928_v56 }
0x123f   :  { %v8930_v21 = vpop.eup %8929 }
0x1240   :  { %v6571_v4 = vmul.f32 0.5, %v6570_v60  ;;  %v6577_v58 = vadd.f32 1.0, %v8930_v21  ;;  %v8932_v2 = vpop.eup %8931 }
0x1241   :  { %v8934_v50 = vpop.eup %8933 }
0x1242   :  { %v6578_v25 = vmul.f32 0.5, %v6577_v58  ;;  %v6589_v37 = vmul.f32 %v8932_v2, %v6571_v4  ;;  %v6586_v5 = vadd.f32 1.0, %v8934_v50  ;;  %v13096_v4 = vld [vmem:[#allocation27_spill] sm:$0xff]  ;;  %v13097_v58 = vld [vmem:[#allocation44_spill] sm:$0xff] }
0x1244   :  { %v6588_v23 = vmul.f32 %v6578_v25, %v12350_v39  ;;  %v6587_v54 = vmul.f32 0.5, %v6586_v5  ;;  %v13098_v25 = vcombine.low %v13096_v4, %v13097_v58 }
0x1246   :  { %v12393_v57 = vadd.f32 %v6589_v37, %v6588_v23 }
0x1248   :  { %8935 = vtanh.f32 %v12393_v57 }
0x1255   :  { %v8936_v38 = vpop.eup %8935 }
0x1256   :  { %v6592_v49 = vmul.f32 %v8936_v38, %v6587_v54 }
0x1258   :  { %v6594_v53 = vpack.c.bf16 %v6592_v49, %v6592_v49 }
0x125a   :  { %6628 = vmatmul.mubr.bf16.vlgmr.msra.gmra.mxu0 %v6594_v53  ;;  %6669 = vmatmul.mubr.bf16.vlgmr.msra.gmra.mxu1 %v6594_v53 }
0x125b   :  { %6728 = vmatpush1.bf16.msra.mxu0 %v12163_v8  ;;  %6769 = vmatpush1.bf16.msra.mxu1 %v12169_v7 }
0x125c   :  { %6729 = vmatprep.subr.bf16.mxu0 %v12175_v62  ;;  %6770 = vmatprep.subr.bf16.mxu1 %v12181_v44 }
0x125d   :  { %6759 = vmatprep.mubr.bf16.mxu0 %v13018_v46  ;;  %6800 = vmatprep.mubr.bf16.mxu1 %v13018_v46 }
0x125f   :  { %6730 = vmatpush1.bf16.msra.mxu0 %v12189_v33  ;;  %6771 = vmatpush1.bf16.msra.mxu1 %v12195_v9 }
0x1260   :  { %6731 = vmatprep.subr.bf16.mxu0 %v12201_v14  ;;  %6772 = vmatprep.subr.bf16.mxu1 %v12207_v52 }
0x1263   :  { %6732 = vmatpush1.bf16.msra.mxu0 %v12213_v55  ;;  %6773 = vmatpush1.bf16.msra.mxu1 %v12219_v43 }
0x1264   :  { %6733 = vmatprep.subr.bf16.mxu0 %v12225_v1  ;;  %6774 = vmatprep.subr.bf16.mxu1 %v12231_v22 }
0x1267   :  { %6734 = vmatpush1.bf16.msra.mxu0 %v12237_v51  ;;  %6775 = vmatpush1.bf16.msra.mxu1 %v12243_v35 }
0x1268   :  { %6735 = vmatprep.subr.bf16.mxu0 %v12249_v18  ;;  %6776 = vmatprep.subr.bf16.mxu1 %v12255_v30 }
0x126b   :  { %6736 = vmatpush1.bf16.msra.mxu0 %v12261_v59  ;;  %6777 = vmatpush1.bf16.msra.mxu1 %v12267_v24 }
0x126c   :  { %6737 = vmatprep.subr.bf16.mxu0 %v12273_v15  ;;  %6778 = vmatprep.subr.bf16.mxu1 %v12279_v47 }
0x126f   :  { %6738 = vmatpush1.bf16.msra.mxu0 %v12285_v0  ;;  %6779 = vmatpush1.bf16.msra.mxu1 %v12291_v16 }
0x1270   :  { %6739 = vmatprep.subr.bf16.mxu0 %v12297_v20  ;;  %6780 = vmatprep.subr.bf16.mxu1 %v12303_v40 }
0x1273   :  { %6740 = vmatpush1.bf16.msra.mxu0 %v12309_v31  ;;  %6781 = vmatpush1.bf16.msra.mxu1 %v12315_v6 }
0x1274   :  { %6741 = vmatprep.subr.bf16.mxu0 %v12321_v26  ;;  %6782 = vmatprep.subr.bf16.mxu1 %v12327_v13 }
0x1277   :  { %6742 = vmatpush1.bf16.msra.mxu0 %v12333_v41  ;;  %6783 = vmatpush1.bf16.msra.mxu1 %v12339_v27 }
0x1278   :  { %6859 = vmatprep.subr.bf16.mxu0 %v12142_v11  ;;  %6900 = vmatprep.subr.bf16.mxu1 %v12148_v45 }
0x131a   :  { %v6629_v39 = vpop.f32.mrf.mxu0  ;;  %v6670_v10 = vpop.f32.mrf.mxu1 }
0x131c   :  { %v6631_v61 = vpop.f32.mrf.mxu0  ;;  %v6672_v63 = vpop.f32.mrf.mxu1 }
0x131d   :  { %v6681_v42 = vcombine.low %v6629_v39, %v6631_v61  ;;  %v6682_v28 = vcombine.low %v6670_v10, %v6672_v63 }
0x131e   :  { %v6633_v36 = vpop.f32.mrf.mxu0  ;;  %v6674_v19 = vpop.f32.mrf.mxu1 }
0x131f   :  { %v6689_v12 = vrot.slane %v6681_v42, %v10186_v34  ;;  %v6696_v3 = vrot.slane %v6682_v28, %v10186_v34 }
0x1320   :  { %v6634_v56 = vpop.f32.mrf.mxu0  ;;  %v6675_v60 = vpop.f32.mrf.mxu1 }
0x1321   :  { %v6697_v21 = vcombine.low %v6689_v12, %v6696_v3 }
0x1323   :  { %v6699_v2 = vadd.f32 %v6697_v21, %v13098_v25 }
0x1325   :  { %v6700_v23 = vmul.f32 0.5, %v6699_v2  ;;  %v6705_v37 = vrot.slane %v6699_v2, 2  ;;  %v6711_v5 = vrot.slane %v6699_v2, 4  ;;  %v6714_v54 = vrot.slane %v6699_v2, 6 }
0x1327   :  { %8937 = vtanh.f32 %v6700_v23  ;;  %v6707_v50 = vmul.f32 0.5, %v6705_v37  ;;  %v6716_v38 = vmul.f32 0.5, %v6714_v54 }
0x1329   :  { %8939 = vtanh.f32 %v6707_v50 }
0x132a   :  { %8941 = vtanh.f32 %v6711_v5 }
0x132b   :  { %8943 = vtanh.f32 %v6716_v38 }
0x1334   :  { %v8938_v49 = vpop.eup %8937 }
0x1335   :  { %v6702_v53 = vadd.f32 1.0, %v8938_v49 }
0x1336   :  { %v8940_v39 = vpop.eup %8939 }
0x1337   :  { %v6703_v10 = vmul.f32 0.5, %v6702_v53  ;;  %v6709_v61 = vadd.f32 1.0, %v8940_v39  ;;  %v8942_v42 = vpop.eup %8941 }
0x1338   :  { %v8944_v12 = vpop.eup %8943 }
0x1339   :  { %v6710_v63 = vmul.f32 0.5, %v6709_v61  ;;  %v6721_v36 = vmul.f32 %v8942_v42, %v6703_v10  ;;  %v6718_v3 = vadd.f32 1.0, %v8944_v12  ;;  %v13099_v10 = vld [vmem:[#allocation28_spill] sm:$0xff]  ;;  %v13100_v61 = vld [vmem:[#allocation45_spill] sm:$0xff] }
0x133b   :  { %v6720_v28 = vmul.f32 %v6710_v63, %v12393_v57  ;;  %v6719_v56 = vmul.f32 0.5, %v6718_v3  ;;  %v13101_v63 = vcombine.low %v13099_v10, %v13100_v61 }
0x133d   :  { %v12436_v19 = vadd.f32 %v6721_v36, %v6720_v28 }
0x133f   :  { %8945 = vtanh.f32 %v12436_v19 }
0x134c   :  { %v8946_v60 = vpop.eup %8945 }
0x134d   :  { %v6724_v21 = vmul.f32 %v8946_v60, %v6719_v56 }
0x134f   :  { %v6726_v4 = vpack.c.bf16 %v6724_v21, %v6724_v21 }
0x1351   :  { %6760 = vmatmul.mubr.bf16.vlgmr.msra.gmra.mxu0 %v6726_v4  ;;  %6801 = vmatmul.mubr.bf16.vlgmr.msra.gmra.mxu1 %v6726_v4 }
0x1352   :  { %6860 = vmatpush1.bf16.msra.mxu0 %v12163_v8  ;;  %6901 = vmatpush1.bf16.msra.mxu1 %v12169_v7 }
0x1353   :  { %6861 = vmatprep.subr.bf16.mxu0 %v12175_v62  ;;  %6902 = vmatprep.subr.bf16.mxu1 %v12181_v44 }
0x1354   :  { %6891 = vmatprep.mubr.bf16.mxu0 %v13018_v46  ;;  %6932 = vmatprep.mubr.bf16.mxu1 %v13018_v46 }
0x1356   :  { %6862 = vmatpush1.bf16.msra.mxu0 %v12189_v33  ;;  %6903 = vmatpush1.bf16.msra.mxu1 %v12195_v9 }
0x1357   :  { %6863 = vmatprep.subr.bf16.mxu0 %v12201_v14  ;;  %6904 = vmatprep.subr.bf16.mxu1 %v12207_v52 }
0x135a   :  { %6864 = vmatpush1.bf16.msra.mxu0 %v12213_v55  ;;  %6905 = vmatpush1.bf16.msra.mxu1 %v12219_v43 }
0x135b   :  { %6865 = vmatprep.subr.bf16.mxu0 %v12225_v1  ;;  %6906 = vmatprep.subr.bf16.mxu1 %v12231_v22 }
0x135e   :  { %6866 = vmatpush1.bf16.msra.mxu0 %v12237_v51  ;;  %6907 = vmatpush1.bf16.msra.mxu1 %v12243_v35 }
0x135f   :  { %6867 = vmatprep.subr.bf16.mxu0 %v12249_v18  ;;  %6908 = vmatprep.subr.bf16.mxu1 %v12255_v30 }
0x1362   :  { %6868 = vmatpush1.bf16.msra.mxu0 %v12261_v59  ;;  %6909 = vmatpush1.bf16.msra.mxu1 %v12267_v24 }
0x1363   :  { %6869 = vmatprep.subr.bf16.mxu0 %v12273_v15  ;;  %6910 = vmatprep.subr.bf16.mxu1 %v12279_v47 }
0x1366   :  { %6870 = vmatpush1.bf16.msra.mxu0 %v12285_v0  ;;  %6911 = vmatpush1.bf16.msra.mxu1 %v12291_v16 }
0x1367   :  { %6871 = vmatprep.subr.bf16.mxu0 %v12297_v20  ;;  %6912 = vmatprep.subr.bf16.mxu1 %v12303_v40 }
0x136a   :  { %6872 = vmatpush1.bf16.msra.mxu0 %v12309_v31  ;;  %6913 = vmatpush1.bf16.msra.mxu1 %v12315_v6 }
0x136b   :  { %6873 = vmatprep.subr.bf16.mxu0 %v12321_v26  ;;  %6914 = vmatprep.subr.bf16.mxu1 %v12327_v13 }
0x136e   :  { %6874 = vmatpush1.bf16.msra.mxu0 %v12333_v41  ;;  %6915 = vmatpush1.bf16.msra.mxu1 %v12339_v27 }
0x136f   :  { %6991 = vmatprep.subr.bf16.mxu0 %v12142_v11  ;;  %7032 = vmatprep.subr.bf16.mxu1 %v12148_v45 }
0x1411   :  { %v6761_v57 = vpop.f32.mrf.mxu0  ;;  %v6802_v58 = vpop.f32.mrf.mxu1 }
0x1413   :  { %v6763_v25 = vpop.f32.mrf.mxu0  ;;  %v6804_v2 = vpop.f32.mrf.mxu1 }
0x1414   :  { %v6813_v23 = vcombine.low %v6761_v57, %v6763_v25  ;;  %v6814_v37 = vcombine.low %v6802_v58, %v6804_v2 }
0x1415   :  { %v6765_v50 = vpop.f32.mrf.mxu0  ;;  %v6806_v5 = vpop.f32.mrf.mxu1 }
0x1416   :  { %v6821_v54 = vrot.slane %v6813_v23, %v10186_v34  ;;  %v6828_v38 = vrot.slane %v6814_v37, %v10186_v34 }
0x1417   :  { %v6766_v49 = vpop.f32.mrf.mxu0  ;;  %v6807_v53 = vpop.f32.mrf.mxu1 }
0x1418   :  { %v6829_v39 = vcombine.low %v6821_v54, %v6828_v38 }
0x141a   :  { %v6831_v42 = vadd.f32 %v6829_v39, %v13101_v63 }
0x141c   :  { %v6832_v28 = vmul.f32 0.5, %v6831_v42  ;;  %v6837_v36 = vrot.slane %v6831_v42, 2  ;;  %v6843_v3 = vrot.slane %v6831_v42, 4  ;;  %v6846_v56 = vrot.slane %v6831_v42, 6 }
0x141e   :  { %8947 = vtanh.f32 %v6832_v28  ;;  %v6839_v12 = vmul.f32 0.5, %v6837_v36  ;;  %v6848_v60 = vmul.f32 0.5, %v6846_v56 }
0x1420   :  { %8949 = vtanh.f32 %v6839_v12 }
0x1421   :  { %8951 = vtanh.f32 %v6843_v3 }
0x1422   :  { %8953 = vtanh.f32 %v6848_v60 }
0x142b   :  { %v8948_v21 = vpop.eup %8947 }
0x142c   :  { %v6834_v4 = vadd.f32 1.0, %v8948_v21 }
0x142d   :  { %v8950_v57 = vpop.eup %8949 }
0x142e   :  { %v6835_v58 = vmul.f32 0.5, %v6834_v4  ;;  %v6841_v25 = vadd.f32 1.0, %v8950_v57  ;;  %v8952_v23 = vpop.eup %8951 }
0x142f   :  { %v8954_v54 = vpop.eup %8953 }
0x1430   :  { %v6842_v2 = vmul.f32 0.5, %v6841_v25  ;;  %v6853_v50 = vmul.f32 %v8952_v23, %v6835_v58  ;;  %v6850_v38 = vadd.f32 1.0, %v8954_v54  ;;  %v13102_v58 = vld [vmem:[#allocation46_spill] sm:$0xff]  ;;  %v13103_v25 = vld [vmem:[#allocation47_spill] sm:$0xff] }
0x1432   :  { %v6852_v37 = vmul.f32 %v6842_v2, %v12436_v19  ;;  %v6851_v49 = vmul.f32 0.5, %v6850_v38  ;;  %v13104_v2 = vcombine.low %v13102_v58, %v13103_v25 }
0x1434   :  { %v12479_v5 = vadd.f32 %v6853_v50, %v6852_v37 }
0x1436   :  { %8955 = vtanh.f32 %v12479_v5 }
0x1443   :  { %v8956_v53 = vpop.eup %8955 }
0x1444   :  { %v6856_v39 = vmul.f32 %v8956_v53, %v6851_v49 }
0x1446   :  { %v6858_v10 = vpack.c.bf16 %v6856_v39, %v6856_v39 }
0x1448   :  { %6892 = vmatmul.mubr.bf16.vlgmr.msra.gmra.mxu0 %v6858_v10  ;;  %6933 = vmatmul.mubr.bf16.vlgmr.msra.gmra.mxu1 %v6858_v10 }
0x1449   :  { %6992 = vmatpush1.bf16.msra.mxu0 %v12163_v8  ;;  %7033 = vmatpush1.bf16.msra.mxu1 %v12169_v7 }
0x144a   :  { %6993 = vmatprep.subr.bf16.mxu0 %v12175_v62  ;;  %7034 = vmatprep.subr.bf16.mxu1 %v12181_v44 }
0x144b   :  { %7023 = vmatprep.mubr.bf16.mxu0 %v13018_v46  ;;  %7064 = vmatprep.mubr.bf16.mxu1 %v13018_v46 }
0x144d   :  { %6994 = vmatpush1.bf16.msra.mxu0 %v12189_v33  ;;  %7035 = vmatpush1.bf16.msra.mxu1 %v12195_v9 }
0x144e   :  { %6995 = vmatprep.subr.bf16.mxu0 %v12201_v14  ;;  %7036 = vmatprep.subr.bf16.mxu1 %v12207_v52 }
0x1451   :  { %6996 = vmatpush1.bf16.msra.mxu0 %v12213_v55  ;;  %7037 = vmatpush1.bf16.msra.mxu1 %v12219_v43 }
0x1452   :  { %6997 = vmatprep.subr.bf16.mxu0 %v12225_v1  ;;  %7038 = vmatprep.subr.bf16.mxu1 %v12231_v22 }
0x1455   :  { %6998 = vmatpush1.bf16.msra.mxu0 %v12237_v51  ;;  %7039 = vmatpush1.bf16.msra.mxu1 %v12243_v35 }
0x1456   :  { %6999 = vmatprep.subr.bf16.mxu0 %v12249_v18  ;;  %7040 = vmatprep.subr.bf16.mxu1 %v12255_v30 }
0x1459   :  { %7000 = vmatpush1.bf16.msra.mxu0 %v12261_v59  ;;  %7041 = vmatpush1.bf16.msra.mxu1 %v12267_v24 }
0x145a   :  { %7001 = vmatprep.subr.bf16.mxu0 %v12273_v15  ;;  %7042 = vmatprep.subr.bf16.mxu1 %v12279_v47 }
0x145d   :  { %7002 = vmatpush1.bf16.msra.mxu0 %v12285_v0  ;;  %7043 = vmatpush1.bf16.msra.mxu1 %v12291_v16 }
0x145e   :  { %7003 = vmatprep.subr.bf16.mxu0 %v12297_v20  ;;  %7044 = vmatprep.subr.bf16.mxu1 %v12303_v40 }
0x1461   :  { %7004 = vmatpush1.bf16.msra.mxu0 %v12309_v31  ;;  %7045 = vmatpush1.bf16.msra.mxu1 %v12315_v6 }
0x1462   :  { %7005 = vmatprep.subr.bf16.mxu0 %v12321_v26  ;;  %7046 = vmatprep.subr.bf16.mxu1 %v12327_v13 }
0x1465   :  { %7006 = vmatpush1.bf16.msra.mxu0 %v12333_v41  ;;  %7047 = vmatpush1.bf16.msra.mxu1 %v12339_v27 }
0x1466   :  { %7123 = vmatprep.subr.bf16.mxu0 %v12142_v11  ;;  %7164 = vmatprep.subr.bf16.mxu1 %v12148_v45 }
0x1508   :  { %v6893_v19 = vpop.f32.mrf.mxu0  ;;  %v6934_v61 = vpop.f32.mrf.mxu1 }
0x150a   :  { %v6895_v63 = vpop.f32.mrf.mxu0  ;;  %v6936_v42 = vpop.f32.mrf.mxu1 }
0x150b   :  { %v6945_v28 = vcombine.low %v6893_v19, %v6895_v63  ;;  %v6946_v36 = vcombine.low %v6934_v61, %v6936_v42 }
0x150c   :  { %v6897_v12 = vpop.f32.mrf.mxu0  ;;  %v6938_v3 = vpop.f32.mrf.mxu1 }
0x150d   :  { %v6953_v56 = vrot.slane %v6945_v28, %v10186_v34  ;;  %v6960_v60 = vrot.slane %v6946_v36, %v10186_v34 }
0x150e   :  { %v6898_v21 = vpop.f32.mrf.mxu0  ;;  %v6939_v4 = vpop.f32.mrf.mxu1 }
0x150f   :  { %v6961_v57 = vcombine.low %v6953_v56, %v6960_v60 }
0x1511   :  { %v6963_v23 = vadd.f32 %v6961_v57, %v13104_v2 }
0x1513   :  { %v6964_v37 = vmul.f32 0.5, %v6963_v23  ;;  %v6969_v50 = vrot.slane %v6963_v23, 2  ;;  %v6975_v38 = vrot.slane %v6963_v23, 4  ;;  %v6978_v49 = vrot.slane %v6963_v23, 6 }
0x1515   :  { %8957 = vtanh.f32 %v6964_v37  ;;  %v6971_v54 = vmul.f32 0.5, %v6969_v50  ;;  %v6980_v53 = vmul.f32 0.5, %v6978_v49 }
0x1517   :  { %8959 = vtanh.f32 %v6971_v54 }
0x1518   :  { %8961 = vtanh.f32 %v6975_v38 }
0x1519   :  { %8963 = vtanh.f32 %v6980_v53 }
0x1522   :  { %v8958_v39 = vpop.eup %8957 }
0x1523   :  { %v6966_v10 = vadd.f32 1.0, %v8958_v39 }
0x1524   :  { %v8960_v19 = vpop.eup %8959 }
0x1525   :  { %v6967_v61 = vmul.f32 0.5, %v6966_v10  ;;  %v6973_v63 = vadd.f32 1.0, %v8960_v19  ;;  %v8962_v28 = vpop.eup %8961 }
0x1526   :  { %v8964_v56 = vpop.eup %8963 }
0x1527   :  { %v6974_v42 = vmul.f32 0.5, %v6973_v63  ;;  %v6985_v12 = vmul.f32 %v8962_v28, %v6967_v61  ;;  %v6982_v60 = vadd.f32 1.0, %v8964_v56  ;;  %v13105_v61 = vld [vmem:[#allocation48_spill] sm:$0xff]  ;;  %v13106_v63 = vld [vmem:[#allocation49_spill] sm:$0xff] }
0x1529   :  { %v6984_v36 = vmul.f32 %v6974_v42, %v12479_v5  ;;  %v6983_v21 = vmul.f32 0.5, %v6982_v60 }
0x152b   :  { %v12522_v3 = vadd.f32 %v6985_v12, %v6984_v36 }
0x152d   :  { %8965 = vtanh.f32 %v12522_v3 }
0x153a   :  { %v8966_v4 = vpop.eup %8965 }
0x153b   :  { %v6988_v57 = vmul.f32 %v8966_v4, %v6983_v21 }
0x153d   :  { %v6990_v58 = vpack.c.bf16 %v6988_v57, %v6988_v57 }
0x153f   :  { %7024 = vmatmul.mubr.bf16.vlgmr.msra.gmra.mxu0 %v6990_v58  ;;  %7065 = vmatmul.mubr.bf16.vlgmr.msra.gmra.mxu1 %v6990_v58 }
0x1540   :  { %7124 = vmatpush1.bf16.msra.mxu0 %v12163_v8  ;;  %7165 = vmatpush1.bf16.msra.mxu1 %v12169_v7 }
0x1541   :  { %7125 = vmatprep.subr.bf16.mxu0 %v12175_v62  ;;  %7166 = vmatprep.subr.bf16.mxu1 %v12181_v44 }
0x1542   :  { %7155 = vmatprep.mubr.bf16.mxu0 %v13018_v46  ;;  %7196 = vmatprep.mubr.bf16.mxu1 %v13018_v46 }
0x1544   :  { %7126 = vmatpush1.bf16.msra.mxu0 %v12189_v33  ;;  %7167 = vmatpush1.bf16.msra.mxu1 %v12195_v9 }
0x1545   :  { %7127 = vmatprep.subr.bf16.mxu0 %v12201_v14  ;;  %7168 = vmatprep.subr.bf16.mxu1 %v12207_v52 }
0x1548   :  { %7128 = vmatpush1.bf16.msra.mxu0 %v12213_v55  ;;  %7169 = vmatpush1.bf16.msra.mxu1 %v12219_v43 }
0x1549   :  { %7129 = vmatprep.subr.bf16.mxu0 %v12225_v1  ;;  %7170 = vmatprep.subr.bf16.mxu1 %v12231_v22 }
0x154c   :  { %7130 = vmatpush1.bf16.msra.mxu0 %v12237_v51  ;;  %7171 = vmatpush1.bf16.msra.mxu1 %v12243_v35 }
0x154d   :  { %7131 = vmatprep.subr.bf16.mxu0 %v12249_v18  ;;  %7172 = vmatprep.subr.bf16.mxu1 %v12255_v30 }
0x1550   :  { %7132 = vmatpush1.bf16.msra.mxu0 %v12261_v59  ;;  %7173 = vmatpush1.bf16.msra.mxu1 %v12267_v24 }
0x1551   :  { %7133 = vmatprep.subr.bf16.mxu0 %v12273_v15  ;;  %7174 = vmatprep.subr.bf16.mxu1 %v12279_v47 }
0x1554   :  { %7134 = vmatpush1.bf16.msra.mxu0 %v12285_v0  ;;  %7175 = vmatpush1.bf16.msra.mxu1 %v12291_v16 }
0x1555   :  { %7135 = vmatprep.subr.bf16.mxu0 %v12297_v20  ;;  %7176 = vmatprep.subr.bf16.mxu1 %v12303_v40 }
0x1558   :  { %7136 = vmatpush1.bf16.msra.mxu0 %v12309_v31  ;;  %7177 = vmatpush1.bf16.msra.mxu1 %v12315_v6 }
0x1559   :  { %7137 = vmatprep.subr.bf16.mxu0 %v12321_v26  ;;  %7178 = vmatprep.subr.bf16.mxu1 %v12327_v13 }
0x155c   :  { %7138 = vmatpush1.bf16.msra.mxu0 %v12333_v41  ;;  %7179 = vmatpush1.bf16.msra.mxu1 %v12339_v27 }
0x155d   :  { %7255 = vmatprep.subr.bf16.mxu0 %v12142_v11  ;;  %7296 = vmatprep.subr.bf16.mxu1 %v12148_v45  ;;  %v13107_v11 = vcombine.low %v13105_v61, %v13106_v63 }
0x15ff   :  { %v7025_v5 = vpop.f32.mrf.mxu0  ;;  %v7066_v25 = vpop.f32.mrf.mxu1 }
0x1601   :  { %v7027_v2 = vpop.f32.mrf.mxu0  ;;  %v7068_v23 = vpop.f32.mrf.mxu1 }
0x1602   :  { %v7077_v37 = vcombine.low %v7025_v5, %v7027_v2  ;;  %v7078_v50 = vcombine.low %v7066_v25, %v7068_v23 }
0x1603   :  { %v7029_v54 = vpop.f32.mrf.mxu0  ;;  %v7070_v38 = vpop.f32.mrf.mxu1 }
0x1604   :  { %v7085_v49 = vrot.slane %v7077_v37, %v10186_v34  ;;  %v7092_v53 = vrot.slane %v7078_v50, %v10186_v34 }
0x1605   :  { %v7030_v39 = vpop.f32.mrf.mxu0  ;;  %v7071_v10 = vpop.f32.mrf.mxu1 }
0x1606   :  { %v7093_v19 = vcombine.low %v7085_v49, %v7092_v53 }
0x1608   :  { %v7095_v42 = vadd.f32 %v7093_v19, %v13107_v11 }
0x160a   :  { %v7096_v45 = vmul.f32 0.5, %v7095_v42  ;;  %v7101_v28 = vrot.slane %v7095_v42, 2  ;;  %v7107_v12 = vrot.slane %v7095_v42, 4  ;;  %v7110_v56 = vrot.slane %v7095_v42, 6 }
0x160c   :  { %8967 = vtanh.f32 %v7096_v45  ;;  %v7103_v36 = vmul.f32 0.5, %v7101_v28  ;;  %v7112_v60 = vmul.f32 0.5, %v7110_v56 }
0x160e   :  { %8969 = vtanh.f32 %v7103_v36 }
0x160f   :  { %8971 = vtanh.f32 %v7107_v12 }
0x1610   :  { %8973 = vtanh.f32 %v7112_v60  ;;  %v12624_v60 = vld [vmem:[%s12953_s5 + $0xe0] ss:$16 sps:$4 sm:$0xff]  }
0x1619   :  { %v8968_v21 = vpop.eup %8967 }
0x161a   :  { %v7098_v4 = vadd.f32 1.0, %v8968_v21  ;;  %v12630_v21 = vld [vmem:[%s12953_s5 + $0xe8] ss:$16 sps:$4 sm:$0xff]  }
0x161b   :  { %v8970_v57 = vpop.eup %8969 }
0x161c   :  { %v7099_v58 = vmul.f32 0.5, %v7098_v4  ;;  %v7105_v5 = vadd.f32 1.0, %v8970_v57  ;;  %v8972_v2 = vpop.eup %8971  ;;  %v12636_v4 = vld [vmem:[%s12953_s5 + $0xc4] ss:$16 sps:$4 sm:$0xff]   ;;  %v12642_v57 = vld [vmem:[%s12953_s5 + $0xcc] ss:$16 sps:$4 sm:$0xff]  }
0x161d   :  { %v8974_v54 = vpop.eup %8973 }
0x161e   :  { %v7106_v25 = vmul.f32 0.5, %v7105_v5  ;;  %v7117_v37 = vmul.f32 %v8972_v2, %v7099_v58  ;;  %v7114_v38 = vadd.f32 1.0, %v8974_v54  ;;  %v12650_v58 = vld [vmem:[%s12953_s5 + $0xc0] ss:$16 sps:$4 sm:$0xff]   ;;  %v12656_v5 = vld [vmem:[%s12953_s5 + $0xc8] ss:$16 sps:$4 sm:$0xff]  }
0x161f   :  { %v12668_v2 = vld [vmem:[%s12953_s5 + $0xac] ss:$16 sps:$4 sm:$0xff]  }
0x1620   :  { %v7116_v23 = vmul.f32 %v7106_v25, %v12522_v3  ;;  %v7115_v49 = vmul.f32 0.5, %v7114_v38  ;;  %v12662_v25 = vld [vmem:[%s12953_s5 + $0xa4] ss:$16 sps:$4 sm:$0xff]   ;;  %v12692_v54 = vld [vmem:[%s12953_s5 + $0x8c] ss:$16 sps:$4 sm:$0xff]  }
0x1621   :  { %v12698_v38 = vld [vmem:[%s12953_s5 + $0x80] ss:$16 sps:$4 sm:$0xff]  }
0x1622   :  { %v12565_v50 = vadd.f32 %v7117_v37, %v7116_v23  ;;  %v12674_v23 = vld [vmem:[%s12953_s5 + $0xa0] ss:$16 sps:$4 sm:$0xff]   ;;  %v12680_v37 = vld [vmem:[%s12953_s5 + $0xa8] ss:$16 sps:$4 sm:$0xff]  }
0x1624   :  { %8975 = vtanh.f32 %v12565_v50 }
0x1631   :  { %v8976_v53 = vpop.eup %8975 }
0x1632   :  { %v7120_v39 = vmul.f32 %v8976_v53, %v7115_v49  ;;  %v12704_v49 = vld [vmem:[%s12953_s5 + $0x88] ss:$16 sps:$4 sm:$0xff]   ;;  %v12710_v53 = vld [vmem:[%s12953_s5 + $0x64] ss:$16 sps:$4 sm:$0xff]  }
0x1634   :  { %v7122_v10 = vpack.c.bf16 %v7120_v39, %v7120_v39  ;;  %v12716_v39 = vld [vmem:[%s12953_s5 + $0x6c] ss:$16 sps:$4 sm:$0xff]  }
0x1636   :  { %7156 = vmatmul.mubr.bf16.vlgmr.msra.gmra.mxu0 %v7122_v10  ;;  %7197 = vmatmul.mubr.bf16.vlgmr.msra.gmra.mxu1 %v7122_v10  ;;  %v12722_v10 = vld [vmem:[%s12953_s5 + $0x60] ss:$16 sps:$4 sm:$0xff]  }
0x1637   :  { %7256 = vmatpush1.bf16.msra.mxu0 %v12163_v8  ;;  %7297 = vmatpush1.bf16.msra.mxu1 %v12169_v7  ;;  %v12603_v8 = vld [vmem:[%s12953_s5 + $0xe4] ss:$16 sps:$4 sm:$0xff]   ;;  %v12609_v7 = vld [vmem:[%s12953_s5 + $0xec] ss:$16 sps:$4 sm:$0xff]  }
0x1638   :  { %7257 = vmatprep.subr.bf16.mxu0 %v12175_v62  ;;  %7298 = vmatprep.subr.bf16.mxu1 %v12181_v44 }
0x1639   :  { %7287 = vmatprep.mubr.bf16.mxu0 %v13018_v46  ;;  %7328 = vmatprep.mubr.bf16.mxu1 %v13018_v46 }
0x163b   :  { %7258 = vmatpush1.bf16.msra.mxu0 %v12189_v33  ;;  %7299 = vmatpush1.bf16.msra.mxu1 %v12195_v9 }
0x163c   :  { %7259 = vmatprep.subr.bf16.mxu0 %v12201_v14  ;;  %7300 = vmatprep.subr.bf16.mxu1 %v12207_v52 }
0x163f   :  { %7260 = vmatpush1.bf16.msra.mxu0 %v12213_v55  ;;  %7301 = vmatpush1.bf16.msra.mxu1 %v12219_v43 }
0x1640   :  { %7261 = vmatprep.subr.bf16.mxu0 %v12225_v1  ;;  %7302 = vmatprep.subr.bf16.mxu1 %v12231_v22 }
0x1643   :  { %7262 = vmatpush1.bf16.msra.mxu0 %v12237_v51  ;;  %7303 = vmatpush1.bf16.msra.mxu1 %v12243_v35 }
0x1644   :  { %7263 = vmatprep.subr.bf16.mxu0 %v12249_v18  ;;  %7304 = vmatprep.subr.bf16.mxu1 %v12255_v30  ;;  %v13108_v30 = vld [vmem:[#allocation50_spill] sm:$0xff] }
0x1647   :  { %7264 = vmatpush1.bf16.msra.mxu0 %v12261_v59  ;;  %7305 = vmatpush1.bf16.msra.mxu1 %v12267_v24  ;;  %v13109_v59 = vld [vmem:[#allocation51_spill] sm:$0xff] }
0x1648   :  { %7265 = vmatprep.subr.bf16.mxu0 %v12273_v15  ;;  %7306 = vmatprep.subr.bf16.mxu1 %v12279_v47  ;;  %v13110_v24 = vcombine.low %v13108_v30, %v13109_v59 }
0x164b   :  { %7266 = vmatpush1.bf16.msra.mxu0 %v12285_v0  ;;  %7307 = vmatpush1.bf16.msra.mxu1 %v12291_v16 }
0x164c   :  { %7267 = vmatprep.subr.bf16.mxu0 %v12297_v20  ;;  %7308 = vmatprep.subr.bf16.mxu1 %v12303_v40 }
0x164f   :  { %7268 = vmatpush1.bf16.msra.mxu0 %v12309_v31  ;;  %7309 = vmatpush1.bf16.msra.mxu1 %v12315_v6 }
0x1650   :  { %7269 = vmatprep.subr.bf16.mxu0 %v12321_v26  ;;  %7310 = vmatprep.subr.bf16.mxu1 %v12327_v13 }
0x1653   :  { %7270 = vmatpush1.bf16.msra.mxu0 %v12333_v41  ;;  %7311 = vmatpush1.bf16.msra.mxu1 %v12339_v27 }
0x1654   :  { %7387 = vmatprep.subr.bf16.mxu0 %v12603_v8  ;;  %7428 = vmatprep.subr.bf16.mxu1 %v12609_v7 }
0x16f6   :  { %v7157_v62 = vpop.f32.mrf.mxu0  ;;  %v7198_v44 = vpop.f32.mrf.mxu1 }
0x16f8   :  { %v7159_v33 = vpop.f32.mrf.mxu0  ;;  %v7200_v9 = vpop.f32.mrf.mxu1 }
0x16f9   :  { %v7209_v14 = vcombine.low %v7157_v62, %v7159_v33  ;;  %v7210_v52 = vcombine.low %v7198_v44, %v7200_v9  ;;  %v12728_v62 = vld [vmem:[%s12953_s5 + $0x68] ss:$16 sps:$4 sm:$0xff]   ;;  %v12734_v44 = vld [vmem:[%s12953_s5 + $0x44] ss:$16 sps:$4 sm:$0xff]   ;;  %v12740_v33 = vld [vmem:[%s12953_s5 + $0x4c] ss:$16 sps:$4 sm:$0xff]  }
0x16fa   :  { %v7161_v55 = vpop.f32.mrf.mxu0  ;;  %v7202_v43 = vpop.f32.mrf.mxu1  ;;  %v12746_v9 = vld [vmem:[%s12953_s5 + $0x40] ss:$16 sps:$4 sm:$0xff]  }
0x16fb   :  { %v7217_v1 = vrot.slane %v7209_v14, %v10186_v34  ;;  %v7224_v22 = vrot.slane %v7210_v52, %v10186_v34  ;;  %v12752_v14 = vld [vmem:[%s12953_s5 + $0x48] ss:$16 sps:$4 sm:$0xff]   ;;  %v12758_v52 = vld [vmem:[%s12953_s5 + $0x24] ss:$16 sps:$4 sm:$0xff]   ;;  %v12764_v55 = vld [vmem:[%s12953_s5 + $0x2c] ss:$16 sps:$4 sm:$0xff]  }
0x16fc   :  { %v7162_v51 = vpop.f32.mrf.mxu0  ;;  %v7203_v35 = vpop.f32.mrf.mxu1  ;;  %v12770_v43 = vld [vmem:[%s12953_s5 + $0x20] ss:$16 sps:$4 sm:$0xff]  }
0x16fd   :  { %v7225_v18 = vcombine.low %v7217_v1, %v7224_v22  ;;  %v12776_v1 = vld [vmem:[%s12953_s5 + $0x28] ss:$16 sps:$4 sm:$0xff]   ;;  %v12782_v22 = vld [vmem:[%s12953_s5 + $0x4] ss:$16 sps:$4 sm:$0xff]   ;;  %v12788_v51 = vld [vmem:[%s12953_s5 + $0xc] ss:$16 sps:$4 sm:$0xff]  }
0x16fe   :  { %v12794_v35 = vld [vmem:[%s12953_s5] ss:$16 sps:$4 sm:$0xff]  }
0x16ff   :  { %v7227_v15 = vadd.f32 %v7225_v18, %v13110_v24  ;;  %v12800_v18 = vld [vmem:[%s12953_s5 + $0x8] ss:$16 sps:$4 sm:$0xff]  }
0x1701   :  { %v7228_v47 = vmul.f32 0.5, %v7227_v15  ;;  %v7233_v0 = vrot.slane %v7227_v15, 2  ;;  %v7239_v20 = vrot.slane %v7227_v15, 4  ;;  %v7242_v40 = vrot.slane %v7227_v15, 6 }
0x1703   :  { %8977 = vtanh.f32 %v7228_v47  ;;  %v7235_v16 = vmul.f32 0.5, %v7233_v0  ;;  %v7244_v31 = vmul.f32 0.5, %v7242_v40 }
0x1705   :  { %8979 = vtanh.f32 %v7235_v16 }
0x1706   :  { %8981 = vtanh.f32 %v7239_v20 }
0x1707   :  { %8983 = vtanh.f32 %v7244_v31 }
0x1710   :  { %v8978_v6 = vpop.eup %8977 }
0x1711   :  { %v7230_v26 = vadd.f32 1.0, %v8978_v6 }
0x1712   :  { %v8980_v13 = vpop.eup %8979 }
0x1713   :  { %v7231_v41 = vmul.f32 0.5, %v7230_v26  ;;  %v7237_v27 = vadd.f32 1.0, %v8980_v13  ;;  %v8982_v19 = vpop.eup %8981 }
0x1714   :  { %v8984_v42 = vpop.eup %8983 }
0x1715   :  { %v7238_v3 = vmul.f32 0.5, %v7237_v27  ;;  %v7249_v63 = vmul.f32 %v8982_v19, %v7231_v41  ;;  %v7246_v45 = vadd.f32 1.0, %v8984_v42  ;;  %v13111_v41 = vld [vmem:[#allocation52_spill] sm:$0xff]  ;;  %v13112_v27 = vld [vmem:[#allocation53_spill] sm:$0xff] }
0x1717   :  { %v7248_v61 = vmul.f32 %v7238_v3, %v12565_v50  ;;  %v7247_v28 = vmul.f32 0.5, %v7246_v45  ;;  %v12686_v50 = vld [vmem:[%s12953_s5 + $0x84] ss:$16 sps:$4 sm:$0xff]  }
0x1719   :  { %v12618_v11 = vadd.f32 %v7249_v63, %v7248_v61 }
0x171b   :  { %8985 = vtanh.f32 %v12618_v11 }
0x1728   :  { %v8986_v36 = vpop.eup %8985 }
0x1729   :  { %v7252_v12 = vmul.f32 %v8986_v36, %v7247_v28 }
0x172b   :  { %v7254_v56 = vpack.c.bf16 %v7252_v12, %v7252_v12 }
0x172d   :  { %7288 = vmatmul.mubr.bf16.vlgmr.msra.gmra.mxu0 %v7254_v56  ;;  %7329 = vmatmul.mubr.bf16.vlgmr.msra.gmra.mxu1 %v7254_v56 }
0x172e   :  { %7388 = vmatpush1.bf16.msra.mxu0 %v12624_v60  ;;  %7429 = vmatpush1.bf16.msra.mxu1 %v12630_v21 }
0x172f   :  { %7389 = vmatprep.subr.bf16.mxu0 %v12636_v4  ;;  %7430 = vmatprep.subr.bf16.mxu1 %v12642_v57 }
0x1730   :  { %7419 = vmatprep.mubr.bf16.mxu0 %v13018_v46  ;;  %7460 = vmatprep.mubr.bf16.mxu1 %v13018_v46 }
0x1732   :  { %7390 = vmatpush1.bf16.msra.mxu0 %v12650_v58  ;;  %7431 = vmatpush1.bf16.msra.mxu1 %v12656_v5 }
0x1733   :  { %7391 = vmatprep.subr.bf16.mxu0 %v12662_v25  ;;  %7432 = vmatprep.subr.bf16.mxu1 %v12668_v2 }
0x1736   :  { %7392 = vmatpush1.bf16.msra.mxu0 %v12674_v23  ;;  %7433 = vmatpush1.bf16.msra.mxu1 %v12680_v37 }
0x1737   :  { %7393 = vmatprep.subr.bf16.mxu0 %v12686_v50  ;;  %7434 = vmatprep.subr.bf16.mxu1 %v12692_v54 }
0x173a   :  { %7394 = vmatpush1.bf16.msra.mxu0 %v12698_v38  ;;  %7435 = vmatpush1.bf16.msra.mxu1 %v12704_v49 }
0x173b   :  { %7395 = vmatprep.subr.bf16.mxu0 %v12710_v53  ;;  %7436 = vmatprep.subr.bf16.mxu1 %v12716_v39 }
0x173e   :  { %7396 = vmatpush1.bf16.msra.mxu0 %v12722_v10  ;;  %7437 = vmatpush1.bf16.msra.mxu1 %v12728_v62 }
0x173f   :  { %7397 = vmatprep.subr.bf16.mxu0 %v12734_v44  ;;  %7438 = vmatprep.subr.bf16.mxu1 %v12740_v33 }
0x1742   :  { %7398 = vmatpush1.bf16.msra.mxu0 %v12746_v9  ;;  %7439 = vmatpush1.bf16.msra.mxu1 %v12752_v14 }
0x1743   :  { %7399 = vmatprep.subr.bf16.mxu0 %v12758_v52  ;;  %7440 = vmatprep.subr.bf16.mxu1 %v12764_v55 }
0x1746   :  { %7400 = vmatpush1.bf16.msra.mxu0 %v12770_v43  ;;  %7441 = vmatpush1.bf16.msra.mxu1 %v12776_v1 }
0x1747   :  { %7401 = vmatprep.subr.bf16.mxu0 %v12782_v22  ;;  %7442 = vmatprep.subr.bf16.mxu1 %v12788_v51 }
0x174a   :  { %7402 = vmatpush1.bf16.msra.mxu0 %v12794_v35  ;;  %7443 = vmatpush1.bf16.msra.mxu1 %v12800_v18 }
0x174b   :  { %7560 = vmatprep.subr.bf16.mxu1 %v12609_v7  ;;  %7519 = vmatprep.subr.bf16.mxu0 %v12603_v8  ;;  %v13113_v7 = vcombine.low %v13111_v41, %v13112_v27 }
0x17ed   :  { %v7289_v30 = vpop.f32.mrf.mxu0  ;;  %v7330_v59 = vpop.f32.mrf.mxu1 }
0x17ef   :  { %v7291_v24 = vpop.f32.mrf.mxu0  ;;  %v7332_v15 = vpop.f32.mrf.mxu1 }
0x17f0   :  { %v7341_v47 = vcombine.low %v7289_v30, %v7291_v24  ;;  %v7342_v0 = vcombine.low %v7330_v59, %v7332_v15 }
0x17f1   :  { %v7293_v16 = vpop.f32.mrf.mxu0  ;;  %v7334_v20 = vpop.f32.mrf.mxu1 }
0x17f2   :  { %v7349_v40 = vrot.slane %v7341_v47, %v10186_v34  ;;  %v7356_v31 = vrot.slane %v7342_v0, %v10186_v34 }
0x17f3   :  { %v7294_v6 = vpop.f32.mrf.mxu0  ;;  %v7335_v26 = vpop.f32.mrf.mxu1 }
0x17f4   :  { %v7357_v13 = vcombine.low %v7349_v40, %v7356_v31 }
0x17f6   :  { %v7359_v3 = vadd.f32 %v7357_v13, %v13113_v7  ;;  %v8779_v7 = vld [vmem:[%s12962_s14 + $0x18] sm:$0xff]  }
0x17f8   :  { %v7360_v8 = vmul.f32 0.5, %v7359_v3  ;;  %v7365_v19 = vrot.slane %v7359_v3, 2  ;;  %v7371_v63 = vrot.slane %v7359_v3, 4  ;;  %v7374_v42 = vrot.slane %v7359_v3, 6 }
0x17fa   :  { %8987 = vtanh.f32 %v7360_v8  ;;  %v7367_v61 = vmul.f32 0.5, %v7365_v19  ;;  %v7376_v45 = vmul.f32 0.5, %v7374_v42  ;;  %v8780_v8 = vld [vmem:[%s12962_s14 + $0x10] sm:$0xff]   ;;  %v8781_v19 = vld [vmem:[%s12962_s14 + $0x8] sm:$0xff]  }
0x17fc   :  { %8989 = vtanh.f32 %v7367_v61  ;;  %v8782_v61 = vld [vmem:[%s12962_s14] sm:$0xff]  }
0x17fd   :  { %8991 = vtanh.f32 %v7371_v63  ;;  %v13116_v63 = vld [vmem:[#allocation21_spill] sm:$0xff] }
0x17fe   :  { %8993 = vtanh.f32 %v7376_v45  ;;  %v623_v42 = vmax.f32 %v13116_v63, 0.0 }
0x1800   :  { %v7771_v45 = vpack.c.bf16 %v623_v42, %v623_v42  ;;  %v8795_v42 = vld [vmem:[%s12964_s16 + $0x8] sm:$0xff]  }
0x1807   :  { %v8988_v28 = vpop.eup %8987 }
0x1808   :  { %v7362_v36 = vadd.f32 1.0, %v8988_v28  ;;  %v8783_v28 = vld [vmem:[%s12959_s11 + $0x38] sm:$0xff]  }
0x1809   :  { %v8990_v12 = vpop.eup %8989 }
0x180a   :  { %v7363_v56 = vmul.f32 0.5, %v7362_v36  ;;  %v7369_v30 = vadd.f32 1.0, %v8990_v12  ;;  %v8992_v24 = vpop.eup %8991  ;;  %v8784_v36 = vld [vmem:[%s12959_s11 + $0x30] sm:$0xff]   ;;  %v8785_v12 = vld [vmem:[%s12959_s11 + $0x28] sm:$0xff]  }
0x180b   :  { %v8994_v16 = vpop.eup %8993 }
0x180c   :  { %v7370_v59 = vmul.f32 0.5, %v7369_v30  ;;  %v7381_v47 = vmul.f32 %v8992_v24, %v7363_v56  ;;  %v7378_v20 = vadd.f32 1.0, %v8994_v16  ;;  %v8786_v56 = vld [vmem:[%s12959_s11 + $0x20] sm:$0xff]   ;;  %v8787_v30 = vld [vmem:[%s12959_s11 + $0x18] sm:$0xff]   ;;  %v8789_v24 = vld [vmem:[%s12959_s11 + $0x8] sm:$0xff]  }
0x180e   :  { %v7380_v15 = vmul.f32 %v7370_v59, %v12618_v11  ;;  %v7379_v40 = vmul.f32 0.5, %v7378_v20  ;;  %v8788_v59 = vld [vmem:[%s12959_s11 + $0x10] sm:$0xff]  }
0x1810   :  { %v12811_v0 = vadd.f32 %v7381_v47, %v7380_v15  ;;  %v8790_v15 = vld [vmem:[%s12959_s11] sm:$0xff]  }
0x1812   :  { %8995 = vtanh.f32 %v12811_v0 }
0x181f   :  { %v8996_v31 = vpop.eup %8995 }
0x1820   :  { %v7384_v6 = vmul.f32 %v8996_v31, %v7379_v40 }
0x1822   :  { %v7386_v26 = vpack.c.bf16 %v7384_v6, %v7384_v6 }
0x1824   :  { %7420 = vmatmul.mubr.bf16.vlgmr.msra.gmra.mxu0 %v7386_v26  ;;  %7461 = vmatmul.mubr.bf16.vlgmr.msra.gmra.mxu1 %v7386_v26 }
0x1825   :  { %7561 = vmatpush1.bf16.msra.mxu1 %v12630_v21  ;;  %7520 = vmatpush1.bf16.msra.mxu0 %v12624_v60 }
0x1826   :  { %7562 = vmatprep.subr.bf16.mxu1 %v12642_v57  ;;  %7521 = vmatprep.subr.bf16.mxu0 %v12636_v4 }
0x1827   :  { %7551 = vmatprep.mubr.bf16.mxu0 %v13018_v46  ;;  %7592 = vmatprep.mubr.bf16.mxu1 %v13018_v46  ;;  %v13114_v46 = vmov 0.0  }
0x1829   :  { %7563 = vmatpush1.bf16.msra.mxu1 %v12656_v5  ;;  %7522 = vmatpush1.bf16.msra.mxu0 %v12650_v58 }
0x182a   :  { %7564 = vmatprep.subr.bf16.mxu1 %v12668_v2  ;;  %7523 = vmatprep.subr.bf16.mxu0 %v12662_v25 }
0x182d   :  { %7565 = vmatpush1.bf16.msra.mxu1 %v12680_v37  ;;  %7524 = vmatpush1.bf16.msra.mxu0 %v12674_v23 }
0x182e   :  { %7566 = vmatprep.subr.bf16.mxu1 %v12692_v54  ;;  %7525 = vmatprep.subr.bf16.mxu0 %v12686_v50 }
0x1831   :  { %7567 = vmatpush1.bf16.msra.mxu1 %v12704_v49  ;;  %7526 = vmatpush1.bf16.msra.mxu0 %v12698_v38  ;;  %v13115_v38 = vcombine.low %v11490_v29, %v11493_v48 }
0x1832   :  { %7568 = vmatprep.subr.bf16.mxu1 %v12716_v39  ;;  %7527 = vmatprep.subr.bf16.mxu0 %v12710_v53 }
0x1835   :  { %7569 = vmatpush1.bf16.msra.mxu1 %v12728_v62  ;;  %7528 = vmatpush1.bf16.msra.mxu0 %v12722_v10 }
0x1836   :  { %7570 = vmatprep.subr.bf16.mxu1 %v12740_v33  ;;  %7529 = vmatprep.subr.bf16.mxu0 %v12734_v44 }
0x1839   :  { %7571 = vmatpush1.bf16.msra.mxu1 %v12752_v14  ;;  %7530 = vmatpush1.bf16.msra.mxu0 %v12746_v9 }
0x183a   :  { %7572 = vmatprep.subr.bf16.mxu1 %v12764_v55  ;;  %7531 = vmatprep.subr.bf16.mxu0 %v12758_v52 }
0x183d   :  { %7573 = vmatpush1.bf16.msra.mxu1 %v12776_v1  ;;  %7532 = vmatpush1.bf16.msra.mxu0 %v12770_v43 }
0x183e   :  { %7574 = vmatprep.subr.bf16.mxu1 %v12788_v51  ;;  %7533 = vmatprep.subr.bf16.mxu0 %v12782_v22 }
0x1841   :  { %7575 = vmatpush1.bf16.msra.mxu1 %v12800_v18  ;;  %7534 = vmatpush1.bf16.msra.mxu0 %v12794_v35 }
0x1842   :  { %8398 = vmatprep.subr.bf16.mxu1 %v13114_v46  ;;  %8378 = vmatprep.subr.bf16.mxu0 %v13114_v46 }
0x18e4   :  { %v7421_v11 = vpop.f32.mrf.mxu0  ;;  %v7462_v60 = vpop.f32.mrf.mxu1 }
0x18e6   :  { %v7423_v21 = vpop.f32.mrf.mxu0  ;;  %v7464_v4 = vpop.f32.mrf.mxu1 }
0x18e7   :  { %v7473_v57 = vcombine.low %v7421_v11, %v7423_v21  ;;  %v7474_v58 = vcombine.low %v7462_v60, %v7464_v4 }
0x18e8   :  { %v7425_v5 = vpop.f32.mrf.mxu0  ;;  %v7466_v25 = vpop.f32.mrf.mxu1 }
0x18e9   :  { %v7481_v2 = vrot.slane %v7473_v57, %v10186_v34  ;;  %v7488_v23 = vrot.slane %v7474_v58, %v10186_v34  ;;  %v13117_v58 = vcombine.low %v11502_v32, %v11505_v17 }
0x18ea   :  { %v7426_v37 = vpop.f32.mrf.mxu0  ;;  %v7467_v50 = vpop.f32.mrf.mxu1 }
0x18eb   :  { %v7489_v54 = vcombine.low %v7481_v2, %v7488_v23 }
0x18ed   :  { %v7491_v49 = vadd.f32 %v7489_v54, %v13115_v38 }
0x18ef   :  { %v7492_v53 = vmul.f32 0.5, %v7491_v49  ;;  %v7497_v39 = vrot.slane %v7491_v49, 2  ;;  %v7503_v62 = vrot.slane %v7491_v49, 4  ;;  %v7506_v44 = vrot.slane %v7491_v49, 6 }
0x18f1   :  { %8997 = vtanh.f32 %v7492_v53  ;;  %v7499_v10 = vmul.f32 0.5, %v7497_v39  ;;  %v7508_v33 = vmul.f32 0.5, %v7506_v44 }
0x18f3   :  { %8999 = vtanh.f32 %v7499_v10 }
0x18f4   :  { %9001 = vtanh.f32 %v7503_v62 }
0x18f5   :  { %9003 = vtanh.f32 %v7508_v33 }
0x18fe   :  { %v8998_v9 = vpop.eup %8997 }
0x18ff   :  { %v7494_v14 = vadd.f32 1.0, %v8998_v9 }
0x1900   :  { %v9000_v52 = vpop.eup %8999 }
0x1901   :  { %v7495_v55 = vmul.f32 0.5, %v7494_v14  ;;  %v7501_v43 = vadd.f32 1.0, %v9000_v52  ;;  %v9002_v22 = vpop.eup %9001 }
0x1902   :  { %v9004_v35 = vpop.eup %9003 }
0x1903   :  { %v7502_v1 = vmul.f32 0.5, %v7501_v43  ;;  %v7513_v29 = vmul.f32 %v9002_v22, %v7495_v55  ;;  %v7510_v18 = vadd.f32 1.0, %v9004_v35 }
0x1905   :  { %v7512_v48 = vmul.f32 %v7502_v1, %v12811_v0  ;;  %v7511_v13 = vmul.f32 0.5, %v7510_v18  ;;  %v8792_v18 = vld [vmem:[%s12961_s13 + $0x10] sm:$0xff]  }
0x1907   :  { %v12854_v51 = vadd.f32 %v7513_v29, %v7512_v48  ;;  %v8791_v29 = vld [vmem:[%s12961_s13 + $0x18] sm:$0xff]  }
0x1909   :  { %9005 = vtanh.f32 %v12854_v51 }
0x1916   :  { %v9006_v41 = vpop.eup %9005 }
0x1917   :  { %v7516_v27 = vmul.f32 %v9006_v41, %v7511_v13  ;;  %v8794_v13 = vld [vmem:[%s12961_s13] sm:$0xff]   ;;  %v8267_v41 = vld [vmem:[#allocation11] ss:$0 sm:$0xff] }
0x1919   :  { %v7518_v3 = vpack.c.bf16 %v7516_v27, %v7516_v27 }
0x191b   :  { %7552 = vmatmul.mubr.bf16.vlgmr.msra.gmra.mxu0 %v7518_v3  ;;  %7593 = vmatmul.mubr.bf16.vlgmr.msra.gmra.mxu1 %v7518_v3 }
0x191c   :  { %8399 = vmatpush3.bf16.msra.mxu1 %v8779_v7  ;;  %8406 = vmatprep.mubr.msk.bf16.mxu1 %vm9361_vm0, %v13114_v46 }
0x191d   :  { %8400 = vmatprep.subr.bf16.mxu1 %v13114_v46  ;;  %8394 = vmatprep.mubr.msk.bf16.mxu0 %vm9361_vm0, %v13114_v46 }
0x191e   :  { %8379 = vmatpush3.bf16.msra.mxu0 %v8783_v28 }
0x191f   :  { %8380 = vmatprep.subr.bf16.mxu0 %v13114_v46 }
0x1920   :  { %8401 = vmatpush3.bf16.msra.mxu1 %v8780_v8 }
0x1921   :  { %8402 = vmatprep.subr.bf16.mxu1 %v13114_v46 }
0x1922   :  { %8381 = vmatpush3.bf16.msra.mxu0 %v8784_v36  ;;  %v8286_v36 = vld [vmem:[#allocation12] ss:$0 sm:$0xff] }
0x1923   :  { %8382 = vmatprep.subr.bf16.mxu0 %v13114_v46 }
0x1924   :  { %8403 = vmatpush3.bf16.msra.mxu1 %v8781_v19 }
0x1925   :  { %8404 = vmatprep.subr.bf16.mxu1 %v13114_v46 }
0x1926   :  { %8383 = vmatpush3.bf16.msra.mxu0 %v8785_v12 }
0x1927   :  { %8384 = vmatprep.subr.bf16.mxu0 %v13114_v46 }
0x1928   :  { %8405 = vmatpush3.bf16.msra.mxu1 %v8782_v61 }
0x1929   :  { %8422 = vmatprep.subr.bf16.mxu1 %v13114_v46 }
0x192a   :  { %8385 = vmatpush3.bf16.msra.mxu0 %v8786_v56 }
0x192b   :  { %8407 = vmatmul.mubr.msk.bf16.vlgmr.msra.gmra.mxu1 %vm7804_vm4, %v7771_v45  ;;  %8386 = vmatprep.subr.bf16.mxu0 %v13114_v46  ;;  %v8796_v45 = vld [vmem:[%s12964_s16] sm:$0xff]   ;;  %s9363_s16 = smov [#allocation15]  }
0x192c   :  { %8426 = vmatprep.mubr.msk.bf16.mxu1 %vm9361_vm0, %v13114_v46  ;;  %8423 = vmatpush3.bf16.msra.mxu1 %v8795_v42  ;;  %s8006_s26 = sshll.u32 %s9363_s16, 4  ;;  %s8007_s26 = int_to_ptr.vmem [resolvable:$true] %s8006_s26 }
0x192d   :  { %8424 = vmatprep.subr.bf16.mxu1 %v13114_v46  ;;  %s9320_s28 = scalar_lea.vmem %s8007_s26, 32  ;;  %p9325_p8 = scmp.lt.s32.totalorder %s8007_s26, %s8007_s26 }
0x192e   :  { %8387 = vmatpush3.bf16.msra.mxu0 %v8787_v30  ;;  %p9321_p7 = scmp.ne.s32.totalorder %s8007_s26, %s9320_s28  ;;  %p9326_p9 = scmp.lt.s32.totalorder %s9320_s28, %s9320_s28 }
0x192f   :  { %8388 = vmatprep.subr.bf16.mxu0 %v13114_v46 }
0x1930   :  { %8425 = vmatpush3.bf16.msra.mxu1 %v8796_v45  ;;  %p9327_p10 = por %p9326_p9, %p9325_p8 }
0x1932   :  { %8389 = vmatpush3.bf16.msra.mxu0 %v8788_v59  ;;  %p9328_p11 = pnand %p9327_p10, %p9321_p7 }
0x1933   :  { %8390 = vmatprep.subr.bf16.mxu0 %v13114_v46 }
0x1936   :  { %8391 = vmatpush3.bf16.msra.mxu0 %v8789_v24 }
0x1937   :  { %8392 = vmatprep.subr.bf16.mxu0 %v13114_v46 }
0x193a   :  { %8393 = vmatpush3.bf16.msra.mxu0 %v8790_v15 }
0x193b   :  { %8410 = vmatprep.subr.bf16.mxu0 %v13114_v46 }
0x19db   :  { %v7553_v47 = vpop.f32.mrf.mxu0  ;;  %v7594_v0 = vpop.f32.mrf.mxu1 }
0x19dd   :  { %v7555_v16 = vpop.f32.mrf.mxu0  ;;  %v7596_v20 = vpop.f32.mrf.mxu1 }
0x19de   :  { %v7605_v40 = vcombine.low %v7553_v47, %v7555_v16  ;;  %v7606_v31 = vcombine.low %v7594_v0, %v7596_v20  ;;  %v8287_v0 = vld [vmem:[#allocation14] ss:$0 sm:$0xff] }
0x19df   :  { %v7557_v6 = vpop.f32.mrf.mxu0  ;;  %v7598_v26 = vpop.f32.mrf.mxu1 }
0x19e0   :  { %v7613_v11 = vrot.slane %v7605_v40, %v10186_v34  ;;  %v7620_v60 = vrot.slane %v7606_v31, %v10186_v34  ;;  %v13118_v26 = vlaneseq }
0x19e1   :  { %v7558_v21 = vpop.f32.mrf.mxu0  ;;  %v7599_v4 = vpop.f32.mrf.mxu1 }
0x19e2   :  { %v7621_v57 = vcombine.low %v7613_v11, %v7620_v60  ;;  %v7993_v11 = vand.u32 127, %v13118_v26 }
0x19e4   :  { %v7623_v5 = vadd.f32 %v7621_v57, %v13117_v58  ;;  %vm7994_vm6 = vcmp.lt.s32.totalorder %v7993_v11, 2 }
0x19e6   :  { %v7624_v25 = vmul.f32 0.5, %v7623_v5  ;;  %v7629_v2 = vrot.slane %v7623_v5, 2  ;;  %v7635_v37 = vrot.slane %v7623_v5, 4  ;;  %v7638_v49 = vrot.slane %v7623_v5, 6 }
0x19e8   :  { %9007 = vtanh.f32 %v7624_v25  ;;  %v7631_v23 = vmul.f32 0.5, %v7629_v2  ;;  %v7640_v34 = vmul.f32 0.5, %v7638_v49 }
0x19ea   :  { %9009 = vtanh.f32 %v7631_v23 }
0x19eb   :  { %v7842_v50 = vpop.f32.mrf.mxu1  ;;  %9011 = vtanh.f32 %v7635_v37 }
0x19ec   :  { %9013 = vtanh.f32 %v7640_v34 }
0x19ed   :  { %v8408_v54 = vpop.f32.mrf.mxu1 }
0x19ef   :  { %v7845_v38 = vpop.f32.mrf.mxu1 }
0x19f1   :  { %v8409_v53 = vpop.f32.mrf.mxu1 }
0x19f5   :  { %v9008_v39 = vpop.eup %9007 }
0x19f6   :  { %v7626_v10 = vadd.f32 1.0, %v9008_v39 }
0x19f7   :  { %v9010_v62 = vpop.eup %9009 }
0x19f8   :  { %v7627_v44 = vmul.f32 0.5, %v7626_v10  ;;  %v7633_v33 = vadd.f32 1.0, %v9010_v62  ;;  %v9012_v32 = vpop.eup %9011 }
0x19f9   :  { %v9014_v55 = vpop.eup %9013 }
0x19fa   :  { %v7634_v17 = vmul.f32 0.5, %v7633_v33  ;;  %v7645_v14 = vmul.f32 %v9012_v32, %v7627_v44  ;;  %v7642_v43 = vadd.f32 1.0, %v9014_v55 }
0x19fc   :  { %v7644_v9 = vmul.f32 %v7634_v17, %v12854_v51  ;;  %v7643_v1 = vmul.f32 0.5, %v7642_v43  ;;  %v8793_v51 = vld [vmem:[%s12961_s13 + $0x8] sm:$0xff]  }
0x19fe   :  { %v7646_v52 = vadd.f32 %v7645_v14, %v7644_v9 }
0x1a00   :  { %9015 = vtanh.f32 %v7646_v52 }
0x1a0d   :  { %v9016_v22 = vpop.eup %9015 }
0x1a0e   :  { %v7648_v48 = vmul.f32 %v9016_v22, %v7643_v1 }
0x1a10   :  { %v7649_v35 = vpack.c.bf16 %v7648_v48, %v7648_v48 }
0x1a12   :  { %8395 = vmatmul.mubr.bf16.vlgmr.msra.gmra.mxu0 %v7649_v35 }
0x1a13   :  { %8411 = vmatpush3.bf16.msra.mxu0 %v8791_v29  ;;  %8418 = vmatprep.mubr.msk.bf16.mxu0 %vm9361_vm0, %v13114_v46 }
0x1a14   :  { %8412 = vmatprep.subr.bf16.mxu0 %v13114_v46 }
0x1a17   :  { %8413 = vmatpush3.bf16.msra.mxu0 %v8792_v18 }
0x1a18   :  { %8414 = vmatprep.subr.bf16.mxu0 %v13114_v46 }
0x1a1b   :  { %8415 = vmatpush3.bf16.msra.mxu0 %v8793_v51 }
0x1a1c   :  { %8416 = vmatprep.subr.bf16.mxu0 %v13114_v46 }
0x1a1f   :  { %8417 = vmatpush3.bf16.msra.mxu0 %v8794_v13 }
0x1ad2   :  { %v7755_v27 = vpop.f32.mrf.mxu0 }
0x1ad3   :  { %v7756_v7 = vadd.f32 %v8267_v41, %v7755_v27 }
0x1ad4   :  { %v8396_v3 = vpop.f32.mrf.mxu0 }
0x1ad5   :  { %v7761_v8 = vmax.f32 %v7756_v7, 0.0 }
0x1ad6   :  { %v7758_v19 = vpop.f32.mrf.mxu0 }
0x1ad7   :  { %v7762_v61 = vpack.c.bf16 %v7761_v8, %v7761_v8 }
0x1ad8   :  { %v8397_v63 = vpop.f32.mrf.mxu0 }
0x1ad9   :  { %8419 = vmatmul.mubr.msk.bf16.vlgmr.msra.gmra.mxu0 %vm7804_vm4, %v7762_v61 }
0x1b99   :  { %v7909_v28 = vpop.f32.mrf.mxu0 }
0x1b9a   :  { %v7910_v12 = vadd.f32 %v7909_v28, %v7842_v50 }
0x1b9b   :  { %v8420_v56 = vpop.f32.mrf.mxu0 }
0x1b9c   :  { %v7922_v30 = vadd.f32 %v8286_v36, %v7910_v12 }
0x1b9d   :  { %v7912_v59 = vpop.f32.mrf.mxu0 }
0x1b9e   :  { %v7923_v24 = vmax.f32 %v7922_v30, 0.0 }
0x1b9f   :  { %v8421_v15 = vpop.f32.mrf.mxu0 }
0x1ba0   :  { %v7924_v47 = vpack.c.bf16 %v7923_v24, %v7923_v24 }
0x1ba2   :  { %8427 = vmatmul.mubr.msk.bf16.vlgmr.msra.gmra.mxu1 %vm7948_vm5, %v7924_v47 }
0x1c62   :  { %v7986_v16 = vpop.f32.mrf.mxu1 }
0x1c63   :  { %v7987_v20 = vadd.f32 %v8287_v0, %v7986_v16 }
0x1c64   :  { %v8428_v46 = vpop.f32.mrf.mxu1 }
0x1c65   :  { %v7995_v40 = vmul.f32 1.442695, %v7987_v20 }
0x1c66   :  { %v7989_v31 = vpop.f32.mrf.mxu1 }
0x1c67   :  { %9017 = vpow2.f32 %v7995_v40 }
0x1c68   :  { %v8429_v6 = vpop.f32.mrf.mxu1 }
0x1c74   :  { %v9018_v60 = vpop.eup %9017 }
0x1c75   :  { %v7997_v21 = vsel %vm7994_vm6, %v9018_v60, %v7987_v20 }
0x1c76   :  { %7999 = vst.msk [vmem:[#allocation15] sm:$0x3] %vm7998_vm7, %v7997_v21 }
0x1c77   :  { %9331 = shalt.err (!%p9328_p11)
}
0x1c78   :  { %8009 = dma.vmem_to_hbm [thread:$0]  %s8007_s26, 32, %s12966_s18, [#allocation5]  }
0x1c79   :  { %9348 = dma.done.wait [#allocation5], 32  }
0x1c7a   :  { %9349 = vsyncadd [#allocation5], 4294967264 }
0x1c7b   :  { %8013 = vsyncpa [#allocation4], 1 }
0x1c7c   :  { %8014 = vsyncpa [#allocation7], 1 }
0x1c7d   :  { %8015 = vsyncpa [#allocation10], 1 }
0x1c7e   :  { %8016 = vsyncpa [#allocation13], 1 }
0x1c7f   :  { %8017 = vsyncpa [#allocation5], 1 }

</bundles_post_ra>
